<compile_context>
chip_gen: v5e
topology: v5e:2x2
jax: 0.10.0
libtpu: 0.0.40
codegen_flags: <defaults>
</compile_context>

<pallas_src>
import numpy as np
import jax
import jax.numpy as jnp
from jax import lax
from jax.experimental import pallas as pl


IN_SIZE = (4, 16, 16)      # (C, H, W)
CHANNELS = [8, 16]         # N = 2 conv layers
POOL_EVERY = 2             # P
HIDDEN_DIMS = [32]         # M = 1 hidden linear layer
OUT_CLASSES = 10
BATCH = 2

_PREC = lax.Precision.HIGHEST   # keep MXU passes in f32 for parity with reference


def _round_up(x, m):
    return -(-x // m) * m


def _conv_meta(in_size, channels, pool_every):
    """Static per-conv bookkeeping: (H, W, ci, co, pool_after)."""
    c0, h, w = in_size
    cp = _round_up(c0, 8)            # pad input channels -> aligned sublane concat
    meta = []
    for i, co in enumerate(channels):
        pool_after = (i + 1) % pool_every == 0
        meta.append((h, w, cp, co, pool_after))
        cp = co
        if pool_after:
            h, w = h // 2, w // 2
    return meta, (h, w, cp)


def _tap_masks(batch, h, w):
    """(9, B*H*W) {0,1} masks: tap t reads an in-bounds pixel at flat position f."""
    n = batch * h * w
    f = np.arange(n)
    hh = (f // w) % h
    ww = f % w
    m = np.zeros((9, n), np.float32)
    for t in range(9):
        ky, kx = divmod(t, 3)
        oy, ox = ky - 1, kx - 1
        ok = (hh + oy >= 0) & (hh + oy < h) & (ww + ox >= 0) & (ww + ox < w)
        m[t] = ok.astype(np.float32)
    return m


def _pool_select(batch, h, w):
    """(B*H*W, B*(H/2)*(W/2)) 0/1 matrix gathering the stride-2 grid points."""
    ph, pw = h // 2, w // 2
    s = np.zeros((batch * h * w, batch * ph * pw), np.float32)
    for b in range(batch):
        for h2 in range(ph):
            for w2 in range(pw):
                src = b * h * w + (2 * h2) * w + 2 * w2
                dst = b * ph * pw + h2 * pw + w2
                s[src, dst] = 1.0
    return s


# --------------------------------------------------------------------------
# Fused forward kernel (builder)
# --------------------------------------------------------------------------

def _build_kernel(batch, conv_meta, final_hwc, n_fc):
    n_conv = len(conv_meta)
    n_pool = sum(1 for m in conv_meta if m[4])
    hf, wf, cf = final_hwc
    hw_f = hf * wf

    def kernel(*refs):
        i = 0
        x_ref = refs[i]; i += 1
        conv_refs = refs[i:i + 3 * n_conv]; i += 3 * n_conv
        sel_refs = refs[i:i + n_pool]; i += n_pool
        fc_refs = refs[i:i + 2 * n_fc]; i += 2 * n_fc
        out_ref = refs[i]

        # channel-major, lane-dense activation: (C, B*H*W)
        a = x_ref[...]
        pool_i = 0
        for li, (h, w, ci, co, pool_after) in enumerate(conv_meta):
            n = batch * h * w
            p = w + 1
            w_ref, b_ref, m_ref = conv_refs[3 * li:3 * li + 3]
            masks = m_ref[...]                                   # (9, n)

            # ---- 3x3 conv as ONE im2col matmul (K = 9*ci), no padded slab ----
            zpad = jnp.zeros((ci, p), jnp.float32)
            apad = jnp.concatenate([zpad, a, zpad], axis=1)      # (ci, n + 2p)
            taps = []
            for t in range(9):
                ky, kx = divmod(t, 3)
                d = (ky - 1) * w + (kx - 1)
                tap = apad[:, p + d:p + d + n]                   # (ci, n)
                if ky == 1 and kx == 1:                          # center: mask == 1
                    taps.append(tap)
                else:
                    taps.append(tap * masks[t:t + 1, :])
            cols = jnp.concatenate(taps, axis=0)                 # (9*ci, n)
            y = jnp.dot(w_ref[...], cols,
                        preferred_element_type=jnp.float32,
                        precision=_PREC)                         # (co, n), lane-dense
            a = jnp.maximum(y + b_ref[...], 0.0)

            # ----------------- vectorized 2x2 / stride-2 max pool -------------
            if pool_after:
                ztail = jnp.zeros((co, w + 1), jnp.float32)
                ap = jnp.concatenate([a, ztail], axis=1)         # (co, n + w + 1)
                m2 = jnp.maximum(jnp.maximum(a, ap[:, 1:1 + n]),
                                 jnp.maximum(ap[:, w:w + n],
                                             ap[:, w + 1:w + 1 + n]))
                # compress stride-2 grid; columns come out ordered (b, h2, w2)
                a = jnp.dot(m2, sel_refs[pool_i][...],
                            preferred_element_type=jnp.float32,
                            precision=_PREC)                     # (co, n // 4)
                pool_i += 1

        # ------ flatten (c_last, B*hf*wf) -> (B, c*h*w) entirely in registers ------
        rows = []
        for b in range(batch):
            pieces = [a[c:c + 1, b * hw_f:(b + 1) * hw_f] for c in range(cf)]
            rows.append(jnp.concatenate(pieces, axis=1))         # (1, cf*hw_f)
        z = jnp.concatenate(rows, axis=0)                        # (B, feat_dim)

        # ---------------- classifier: (Linear -> ReLU)*M -> Linear ----------------
        for j in range(n_fc):
            wj = fc_refs[2 * j][...]
            bj = fc_refs[2 * j + 1][...]
            z = jnp.dot(z, wj, preferred_element_type=jnp.float32,
                        precision=_PREC) + bj
            if j < n_fc - 1:
                z = jnp.maximum(z, 0.0)
        out_ref[...] = z.astype(out_ref.dtype)

    return kernel


def make_fused_forward(params, *, in_size, channels, pool_every, hidden_dims,
                       out_classes, batch):
    assert len(channels) % pool_every == 0, "module structure requires P | N"
    c0, h0, w0 = in_size
    conv_meta, final_hwc = _conv_meta(in_size, channels, pool_every)
    hf, wf, cf = final_hwc
    n_fc = len(hidden_dims) + 1
    feat_dim = cf * hf * wf
    c0_pad = conv_meta[0][2]

    # ---- one-time parameter prep (all layout work hoisted off the hot path) ----
    flat_params = []
    for (h, w, ci, co, _pool), (wgt, b) in zip(conv_meta, params["convs"]):
        ci_model = int(wgt.shape[1])
        if ci > ci_model:                     # zero-pad input channels to ci
            wgt = jnp.pad(wgt, ((0, 0), (0, ci - ci_model), (0, 0), (0, 0)))
        # OIHW -> (co, 9*ci), columns ordered (tap, ci): matches in-kernel cols
        w2d = jnp.transpose(wgt, (0, 2, 3, 1)).reshape(co, 9 * ci)
        flat_params += [w2d, b.reshape(co, 1),
                        jnp.asarray(_tap_masks(batch, h, w))]

    flat_params += [jnp.asarray(_pool_select(batch, h, w))
                    for (h, w, _ci, _co, pool) in conv_meta if pool]

    # pooled features come out in PyTorch's (c, h, w) flatten order -> FC weights as-is
    for (wgt, b) in params["fcs"]:
        flat_params += [wgt, b.reshape(1, -1)]

    kernel = _build_kernel(batch, conv_meta, final_hwc, n_fc)

    # advisory cost hint for the XLA scheduler (not for roofline reasoning)
    flops = 0
    for (h, w, ci, co, pool) in conv_meta:
        n = batch * h * w
        flops += 2 * n * 9 * ci * co
        if pool:
            flops += 2 * co * n * (n // 4)
    dims = [feat_dim] + list(hidden_dims) + [out_classes]
    for d_in, d_out in zip(dims[:-1], dims[1:]):
        flops += 2 * batch * d_in * d_out
    n_in_elems = c0_pad * batch * h0 * w0 + sum(int(np.prod(q.shape))
                                                for q in flat_params)
    bytes_accessed = 4 * (n_in_elems + batch * out_classes)

    fused = pl.pallas_call(
        kernel,
        out_shape=jax.ShapeDtypeStruct((batch, out_classes), jnp.float32),
        cost_estimate=pl.CostEstimate(flops=flops, transcendentals=0,
                                      bytes_accessed=bytes_accessed),
    )

    @jax.jit
    def forward(x_nchw):
        # only glue on the hot path: NCHW -> channel-major (C, B*H*W) + pad C to 8
        x_cm = jnp.transpose(x_nchw, (1, 0, 2, 3)).reshape(c0, batch * h0 * w0)
        if c0_pad > c0:
            x_cm = jnp.pad(x_cm, ((0, c0_pad - c0), (0, 0)))
        return fused(x_cm, *flat_params)

    return forward


# ----------------------- pure-JAX reference (check) -------------------------

def reference_forward(x_nchw, params, pool_every):
    x = x_nchw
    for i, (w, b) in enumerate(params["convs"]):
        x = lax.conv_general_dilated(
            x, w, (1, 1), ((1, 1), (1, 1)),
            dimension_numbers=("NCHW", "OIHW", "NCHW"), precision=_PREC)
        x = jnp.maximum(x + b.reshape(1, -1, 1, 1), 0.0)
        if (i + 1) % pool_every == 0:
            x = lax.reduce_window(x, -jnp.inf, lax.max,
                                  (1, 1, 2, 2), (1, 1, 2, 2), "VALID")
    x = x.reshape(x.shape[0], -1)
    for (w, b) in params["fcs"][:-1]:
        x = jnp.maximum(jnp.dot(x, w, precision=_PREC) + b, 0.0)
    w, b = params["fcs"][-1]
    return jnp.dot(x, w, precision=_PREC) + b


# ---------------------------------- setup ------------------------------------

def make_params(key, in_size, channels, pool_every, hidden_dims, out_classes):
    c_in, h, w = in_size
    keys = jax.random.split(key, 2 * (len(channels) + len(hidden_dims) + 1))
    ki = iter(keys)
    convs = []
    prev_c = c_in
    for c_out in channels:
        wk, bk = next(ki), next(ki)
        convs.append((
            0.1 * jax.random.normal(wk, (c_out, prev_c, 3, 3), jnp.float32),
            0.1 * jax.random.normal(bk, (c_out,), jnp.float32),
        ))
        prev_c = c_out

    n_pools = len(channels) // pool_every
    flat_dim = channels[-1] * (h // (2 ** n_pools)) * (w // (2 ** n_pools))
    fcs = []
    prev_d = flat_dim
    for hd in list(hidden_dims) + [out_classes]:
        wk, bk = next(ki), next(ki)
        fcs.append((
            0.1 * jax.random.normal(wk, (prev_d, hd), jnp.float32),
            0.1 * jax.random.normal(bk, (hd,), jnp.float32),
        ))
        prev_d = hd
    return {"convs": convs, "fcs": fcs}


if __name__ == "__main__":
    key = jax.random.PRNGKey(0)
    pkey, xkey = jax.random.split(key)
    params = make_params(pkey, IN_SIZE, CHANNELS, POOL_EVERY, HIDDEN_DIMS,
                         OUT_CLASSES)
    x = jax.random.normal(xkey, (BATCH,) + IN_SIZE, jnp.float32)   # NCHW

    forward = make_fused_forward(params, in_size=IN_SIZE, channels=CHANNELS,
                                 pool_every=POOL_EVERY,
                                 hidden_dims=HIDDEN_DIMS,
                                 out_classes=OUT_CLASSES, batch=BATCH)

    out = jax.block_until_ready(forward(x))
    ref = jax.block_until_ready(reference_forward(x, params, POOL_EVERY))

    assert out.shape == (BATCH, OUT_CLASSES)
    np.testing.assert_allclose(np.asarray(out), np.asarray(ref),
                               rtol=2e-3, atol=2e-3)
    print("KERNEL_OK")
</pallas_src>

<mosaic_0001>
module attributes {stable_mosaic.version = 11 : i64} {
  func.func @kernel(%arg0: memref<8x512xf32, #tpu.memory_space<vmem>>, %arg1: memref<8x72xf32, #tpu.memory_space<vmem>>, %arg2: memref<8x1xf32, #tpu.memory_space<vmem>>, %arg3: memref<9x512xf32, #tpu.memory_space<vmem>>, %arg4: memref<16x72xf32, #tpu.memory_space<vmem>>, %arg5: memref<16x1xf32, #tpu.memory_space<vmem>>, %arg6: memref<9x512xf32, #tpu.memory_space<vmem>>, %arg7: memref<512x128xf32, #tpu.memory_space<vmem>>, %arg8: memref<1024x32xf32, #tpu.memory_space<vmem>>, %arg9: memref<1x32xf32, #tpu.memory_space<vmem>>, %arg10: memref<32x10xf32, #tpu.memory_space<vmem>>, %arg11: memref<1x10xf32, #tpu.memory_space<vmem>>, %arg12: memref<2x10xf32, #tpu.memory_space<vmem>>) attributes {dimension_semantics = [], scalar_prefetch = 0 : i64, scratch_operands = 0 : i64, tpu.core_type = #tpu.core_type<tc>} {
    %c0 = arith.constant 0 : index
    %c0_0 = arith.constant 0 : index
    %0 = vector.load %arg0[%c0, %c0_0] : memref<8x512xf32, #tpu.memory_space<vmem>>, vector<8x512xf32>
    %c0_1 = arith.constant 0 : index
    %c0_2 = arith.constant 0 : index
    %1 = vector.load %arg3[%c0_1, %c0_2] : memref<9x512xf32, #tpu.memory_space<vmem>>, vector<9x512xf32>
    %cst = arith.constant 0.000000e+00 : f32
    %2 = vector.broadcast %cst : f32 to vector<8x17xf32>
    %3 = tpu.concatenate %2, %0, %2 in 1 : vector<8x17xf32>, vector<8x512xf32>, vector<8x17xf32> -> vector<8x546xf32>
    %4 = vector.extract_strided_slice %3 {offsets = [0, 0], sizes = [8, 512], strides = [1, 1]} : vector<8x546xf32> to vector<8x512xf32>
    %5 = vector.extract_strided_slice %1 {offsets = [0, 0], sizes = [1, 512], strides = [1, 1]} : vector<9x512xf32> to vector<1x512xf32>
    %6 = vector.broadcast %5 : vector<1x512xf32> to vector<8x512xf32>
    %7 = arith.mulf %4, %6 : vector<8x512xf32>
    %8 = vector.extract_strided_slice %3 {offsets = [0, 1], sizes = [8, 512], strides = [1, 1]} : vector<8x546xf32> to vector<8x512xf32>
    %9 = vector.extract_strided_slice %1 {offsets = [1, 0], sizes = [1, 512], strides = [1, 1]} : vector<9x512xf32> to vector<1x512xf32>
    %10 = vector.broadcast %9 : vector<1x512xf32> to vector<8x512xf32>
    %11 = arith.mulf %8, %10 : vector<8x512xf32>
    %12 = vector.extract_strided_slice %3 {offsets = [0, 2], sizes = [8, 512], strides = [1, 1]} : vector<8x546xf32> to vector<8x512xf32>
    %13 = vector.extract_strided_slice %1 {offsets = [2, 0], sizes = [1, 512], strides = [1, 1]} : vector<9x512xf32> to vector<1x512xf32>
    %14 = vector.broadcast %13 : vector<1x512xf32> to vector<8x512xf32>
    %15 = arith.mulf %12, %14 : vector<8x512xf32>
    %16 = vector.extract_strided_slice %3 {offsets = [0, 16], sizes = [8, 512], strides = [1, 1]} : vector<8x546xf32> to vector<8x512xf32>
    %17 = vector.extract_strided_slice %1 {offsets = [3, 0], sizes = [1, 512], strides = [1, 1]} : vector<9x512xf32> to vector<1x512xf32>
    %18 = vector.broadcast %17 : vector<1x512xf32> to vector<8x512xf32>
    %19 = arith.mulf %16, %18 : vector<8x512xf32>
    %20 = vector.extract_strided_slice %3 {offsets = [0, 17], sizes = [8, 512], strides = [1, 1]} : vector<8x546xf32> to vector<8x512xf32>
    %21 = vector.extract_strided_slice %3 {offsets = [0, 18], sizes = [8, 512], strides = [1, 1]} : vector<8x546xf32> to vector<8x512xf32>
    %22 = vector.extract_strided_slice %1 {offsets = [5, 0], sizes = [1, 512], strides = [1, 1]} : vector<9x512xf32> to vector<1x512xf32>
    %23 = vector.broadcast %22 : vector<1x512xf32> to vector<8x512xf32>
    %24 = arith.mulf %21, %23 : vector<8x512xf32>
    %25 = vector.extract_strided_slice %3 {offsets = [0, 32], sizes = [8, 512], strides = [1, 1]} : vector<8x546xf32> to vector<8x512xf32>
    %26 = vector.extract_strided_slice %1 {offsets = [6, 0], sizes = [1, 512], strides = [1, 1]} : vector<9x512xf32> to vector<1x512xf32>
    %27 = vector.broadcast %26 : vector<1x512xf32> to vector<8x512xf32>
    %28 = arith.mulf %25, %27 : vector<8x512xf32>
    %29 = vector.extract_strided_slice %3 {offsets = [0, 33], sizes = [8, 512], strides = [1, 1]} : vector<8x546xf32> to vector<8x512xf32>
    %30 = vector.extract_strided_slice %1 {offsets = [7, 0], sizes = [1, 512], strides = [1, 1]} : vector<9x512xf32> to vector<1x512xf32>
    %31 = vector.broadcast %30 : vector<1x512xf32> to vector<8x512xf32>
    %32 = arith.mulf %29, %31 : vector<8x512xf32>
    %33 = vector.extract_strided_slice %3 {offsets = [0, 34], sizes = [8, 512], strides = [1, 1]} : vector<8x546xf32> to vector<8x512xf32>
    %34 = vector.extract_strided_slice %1 {offsets = [8, 0], sizes = [1, 512], strides = [1, 1]} : vector<9x512xf32> to vector<1x512xf32>
    %35 = vector.broadcast %34 : vector<1x512xf32> to vector<8x512xf32>
    %36 = arith.mulf %33, %35 : vector<8x512xf32>
    %37 = tpu.concatenate %7, %11, %15, %19, %20, %24, %28, %32, %36 in 0 : vector<8x512xf32>, vector<8x512xf32>, vector<8x512xf32>, vector<8x512xf32>, vector<8x512xf32>, vector<8x512xf32>, vector<8x512xf32>, vector<8x512xf32>, vector<8x512xf32> -> vector<72x512xf32>
    %c0_3 = arith.constant 0 : index
    %c0_4 = arith.constant 0 : index
    %38 = vector.load %arg1[%c0_3, %c0_4] : memref<8x72xf32, #tpu.memory_space<vmem>>, vector<8x72xf32>
    %cst_5 = arith.constant dense<0.000000e+00> : vector<8x512xf32>
    %39 = tpu.matmul %38, %37, %cst_5 {dimension_numbers = #tpu.dot_dimension_numbers<[1], [0], [0], [1], [0, 0, 1, 1], [], []>, precision = #tpu.contract_precision<fp32>} : vector<8x72xf32>, vector<72x512xf32>, vector<8x512xf32> -> vector<8x512xf32>
    %c0_6 = arith.constant 0 : index
    %c0_7 = arith.constant 0 : index
    %40 = vector.load %arg2[%c0_6, %c0_7] : memref<8x1xf32, #tpu.memory_space<vmem>>, vector<8x1xf32>
    %41 = vector.broadcast %40 : vector<8x1xf32> to vector<8x512xf32>
    %42 = arith.addf %39, %41 : vector<8x512xf32>
    %cst_8 = arith.constant 0.000000e+00 : f32
    %43 = vector.broadcast %cst_8 : f32 to vector<8x512xf32>
    %44 = arith.maximumf %42, %43 : vector<8x512xf32>
    %c0_9 = arith.constant 0 : index
    %c0_10 = arith.constant 0 : index
    %45 = vector.load %arg6[%c0_9, %c0_10] : memref<9x512xf32, #tpu.memory_space<vmem>>, vector<9x512xf32>
    %cst_11 = arith.constant 0.000000e+00 : f32
    %46 = vector.broadcast %cst_11 : f32 to vector<8x17xf32>
    %47 = tpu.concatenate %46, %44, %46 in 1 : vector<8x17xf32>, vector<8x512xf32>, vector<8x17xf32> -> vector<8x546xf32>
    %48 = vector.extract_strided_slice %47 {offsets = [0, 0], sizes = [8, 512], strides = [1, 1]} : vector<8x546xf32> to vector<8x512xf32>
    %49 = vector.extract_strided_slice %45 {offsets = [0, 0], sizes = [1, 512], strides = [1, 1]} : vector<9x512xf32> to vector<1x512xf32>
    %50 = vector.broadcast %49 : vector<1x512xf32> to vector<8x512xf32>
    %51 = arith.mulf %48, %50 : vector<8x512xf32>
    %52 = vector.extract_strided_slice %47 {offsets = [0, 1], sizes = [8, 512], strides = [1, 1]} : vector<8x546xf32> to vector<8x512xf32>
    %53 = vector.extract_strided_slice %45 {offsets = [1, 0], sizes = [1, 512], strides = [1, 1]} : vector<9x512xf32> to vector<1x512xf32>
    %54 = vector.broadcast %53 : vector<1x512xf32> to vector<8x512xf32>
    %55 = arith.mulf %52, %54 : vector<8x512xf32>
    %56 = vector.extract_strided_slice %47 {offsets = [0, 2], sizes = [8, 512], strides = [1, 1]} : vector<8x546xf32> to vector<8x512xf32>
    %57 = vector.extract_strided_slice %45 {offsets = [2, 0], sizes = [1, 512], strides = [1, 1]} : vector<9x512xf32> to vector<1x512xf32>
    %58 = vector.broadcast %57 : vector<1x512xf32> to vector<8x512xf32>
    %59 = arith.mulf %56, %58 : vector<8x512xf32>
    %60 = vector.extract_strided_slice %47 {offsets = [0, 16], sizes = [8, 512], strides = [1, 1]} : vector<8x546xf32> to vector<8x512xf32>
    %61 = vector.extract_strided_slice %45 {offsets = [3, 0], sizes = [1, 512], strides = [1, 1]} : vector<9x512xf32> to vector<1x512xf32>
    %62 = vector.broadcast %61 : vector<1x512xf32> to vector<8x512xf32>
    %63 = arith.mulf %60, %62 : vector<8x512xf32>
    %64 = vector.extract_strided_slice %47 {offsets = [0, 17], sizes = [8, 512], strides = [1, 1]} : vector<8x546xf32> to vector<8x512xf32>
    %65 = vector.extract_strided_slice %47 {offsets = [0, 18], sizes = [8, 512], strides = [1, 1]} : vector<8x546xf32> to vector<8x512xf32>
    %66 = vector.extract_strided_slice %45 {offsets = [5, 0], sizes = [1, 512], strides = [1, 1]} : vector<9x512xf32> to vector<1x512xf32>
    %67 = vector.broadcast %66 : vector<1x512xf32> to vector<8x512xf32>
    %68 = arith.mulf %65, %67 : vector<8x512xf32>
    %69 = vector.extract_strided_slice %47 {offsets = [0, 32], sizes = [8, 512], strides = [1, 1]} : vector<8x546xf32> to vector<8x512xf32>
    %70 = vector.extract_strided_slice %45 {offsets = [6, 0], sizes = [1, 512], strides = [1, 1]} : vector<9x512xf32> to vector<1x512xf32>
    %71 = vector.broadcast %70 : vector<1x512xf32> to vector<8x512xf32>
    %72 = arith.mulf %69, %71 : vector<8x512xf32>
    %73 = vector.extract_strided_slice %47 {offsets = [0, 33], sizes = [8, 512], strides = [1, 1]} : vector<8x546xf32> to vector<8x512xf32>
    %74 = vector.extract_strided_slice %45 {offsets = [7, 0], sizes = [1, 512], strides = [1, 1]} : vector<9x512xf32> to vector<1x512xf32>
    %75 = vector.broadcast %74 : vector<1x512xf32> to vector<8x512xf32>
    %76 = arith.mulf %73, %75 : vector<8x512xf32>
    %77 = vector.extract_strided_slice %47 {offsets = [0, 34], sizes = [8, 512], strides = [1, 1]} : vector<8x546xf32> to vector<8x512xf32>
    %78 = vector.extract_strided_slice %45 {offsets = [8, 0], sizes = [1, 512], strides = [1, 1]} : vector<9x512xf32> to vector<1x512xf32>
    %79 = vector.broadcast %78 : vector<1x512xf32> to vector<8x512xf32>
    %80 = arith.mulf %77, %79 : vector<8x512xf32>
    %81 = tpu.concatenate %51, %55, %59, %63, %64, %68, %72, %76, %80 in 0 : vector<8x512xf32>, vector<8x512xf32>, vector<8x512xf32>, vector<8x512xf32>, vector<8x512xf32>, vector<8x512xf32>, vector<8x512xf32>, vector<8x512xf32>, vector<8x512xf32> -> vector<72x512xf32>
    %c0_12 = arith.constant 0 : index
    %c0_13 = arith.constant 0 : index
    %82 = vector.load %arg4[%c0_12, %c0_13] : memref<16x72xf32, #tpu.memory_space<vmem>>, vector<16x72xf32>
    %cst_14 = arith.constant dense<0.000000e+00> : vector<16x512xf32>
    %83 = tpu.matmul %82, %81, %cst_14 {dimension_numbers = #tpu.dot_dimension_numbers<[1], [0], [0], [1], [0, 0, 1, 1], [], []>, precision = #tpu.contract_precision<fp32>} : vector<16x72xf32>, vector<72x512xf32>, vector<16x512xf32> -> vector<16x512xf32>
    %c0_15 = arith.constant 0 : index
    %c0_16 = arith.constant 0 : index
    %84 = vector.load %arg5[%c0_15, %c0_16] : memref<16x1xf32, #tpu.memory_space<vmem>>, vector<16x1xf32>
    %85 = vector.broadcast %84 : vector<16x1xf32> to vector<16x512xf32>
    %86 = arith.addf %83, %85 : vector<16x512xf32>
    %cst_17 = arith.constant 0.000000e+00 : f32
    %87 = vector.broadcast %cst_17 : f32 to vector<16x512xf32>
    %88 = arith.maximumf %86, %87 : vector<16x512xf32>
    %cst_18 = arith.constant 0.000000e+00 : f32
    %89 = vector.broadcast %cst_18 : f32 to vector<16x17xf32>
    %90 = tpu.concatenate %88, %89 in 1 : vector<16x512xf32>, vector<16x17xf32> -> vector<16x529xf32>
    %91 = vector.extract_strided_slice %90 {offsets = [0, 1], sizes = [16, 512], strides = [1, 1]} : vector<16x529xf32> to vector<16x512xf32>
    %92 = arith.maximumf %88, %91 : vector<16x512xf32>
    %93 = vector.extract_strided_slice %90 {offsets = [0, 16], sizes = [16, 512], strides = [1, 1]} : vector<16x529xf32> to vector<16x512xf32>
    %94 = vector.extract_strided_slice %90 {offsets = [0, 17], sizes = [16, 512], strides = [1, 1]} : vector<16x529xf32> to vector<16x512xf32>
    %95 = arith.maximumf %93, %94 : vector<16x512xf32>
    %96 = arith.maximumf %92, %95 : vector<16x512xf32>
    %c0_19 = arith.constant 0 : index
    %c0_20 = arith.constant 0 : index
    %97 = vector.load %arg7[%c0_19, %c0_20] : memref<512x128xf32, #tpu.memory_space<vmem>>, vector<512x128xf32>
    %cst_21 = arith.constant dense<0.000000e+00> : vector<16x128xf32>
    %98 = tpu.matmul %96, %97, %cst_21 {dimension_numbers = #tpu.dot_dimension_numbers<[1], [0], [0], [1], [0, 0, 1, 1], [], []>, precision = #tpu.contract_precision<fp32>} : vector<16x512xf32>, vector<512x128xf32>, vector<16x128xf32> -> vector<16x128xf32>
    %99 = vector.extract_strided_slice %98 {offsets = [0, 0], sizes = [1, 64], strides = [1, 1]} : vector<16x128xf32> to vector<1x64xf32>
    %100 = vector.extract_strided_slice %98 {offsets = [1, 0], sizes = [1, 64], strides = [1, 1]} : vector<16x128xf32> to vector<1x64xf32>
    %101 = vector.extract_strided_slice %98 {offsets = [2, 0], sizes = [1, 64], strides = [1, 1]} : vector<16x128xf32> to vector<1x64xf32>
    %102 = vector.extract_strided_slice %98 {offsets = [3, 0], sizes = [1, 64], strides = [1, 1]} : vector<16x128xf32> to vector<1x64xf32>
    %103 = vector.extract_strided_slice %98 {offsets = [4, 0], sizes = [1, 64], strides = [1, 1]} : vector<16x128xf32> to vector<1x64xf32>
    %104 = vector.extract_strided_slice %98 {offsets = [5, 0], sizes = [1, 64], strides = [1, 1]} : vector<16x128xf32> to vector<1x64xf32>
    %105 = vector.extract_strided_slice %98 {offsets = [6, 0], sizes = [1, 64], strides = [1, 1]} : vector<16x128xf32> to vector<1x64xf32>
    %106 = vector.extract_strided_slice %98 {offsets = [7, 0], sizes = [1, 64], strides = [1, 1]} : vector<16x128xf32> to vector<1x64xf32>
    %107 = vector.extract_strided_slice %98 {offsets = [8, 0], sizes = [1, 64], strides = [1, 1]} : vector<16x128xf32> to vector<1x64xf32>
    %108 = vector.extract_strided_slice %98 {offsets = [9, 0], sizes = [1, 64], strides = [1, 1]} : vector<16x128xf32> to vector<1x64xf32>
    %109 = vector.extract_strided_slice %98 {offsets = [10, 0], sizes = [1, 64], strides = [1, 1]} : vector<16x128xf32> to vector<1x64xf32>
    %110 = vector.extract_strided_slice %98 {offsets = [11, 0], sizes = [1, 64], strides = [1, 1]} : vector<16x128xf32> to vector<1x64xf32>
    %111 = vector.extract_strided_slice %98 {offsets = [12, 0], sizes = [1, 64], strides = [1, 1]} : vector<16x128xf32> to vector<1x64xf32>
    %112 = vector.extract_strided_slice %98 {offsets = [13, 0], sizes = [1, 64], strides = [1, 1]} : vector<16x128xf32> to vector<1x64xf32>
    %113 = vector.extract_strided_slice %98 {offsets = [14, 0], sizes = [1, 64], strides = [1, 1]} : vector<16x128xf32> to vector<1x64xf32>
    %114 = vector.extract_strided_slice %98 {offsets = [15, 0], sizes = [1, 64], strides = [1, 1]} : vector<16x128xf32> to vector<1x64xf32>
    %115 = tpu.concatenate %99, %100, %101, %102, %103, %104, %105, %106, %107, %108, %109, %110, %111, %112, %113, %114 in 1 : vector<1x64xf32>, vector<1x64xf32>, vector<1x64xf32>, vector<1x64xf32>, vector<1x64xf32>, vector<1x64xf32>, vector<1x64xf32>, vector<1x64xf32>, vector<1x64xf32>, vector<1x64xf32>, vector<1x64xf32>, vector<1x64xf32>, vector<1x64xf32>, vector<1x64xf32>, vector<1x64xf32>, vector<1x64xf32> -> vector<1x1024xf32>
    %116 = vector.extract_strided_slice %98 {offsets = [0, 64], sizes = [1, 64], strides = [1, 1]} : vector<16x128xf32> to vector<1x64xf32>
    %117 = vector.extract_strided_slice %98 {offsets = [1, 64], sizes = [1, 64], strides = [1, 1]} : vector<16x128xf32> to vector<1x64xf32>
    %118 = vector.extract_strided_slice %98 {offsets = [2, 64], sizes = [1, 64], strides = [1, 1]} : vector<16x128xf32> to vector<1x64xf32>
    %119 = vector.extract_strided_slice %98 {offsets = [3, 64], sizes = [1, 64], strides = [1, 1]} : vector<16x128xf32> to vector<1x64xf32>
    %120 = vector.extract_strided_slice %98 {offsets = [4, 64], sizes = [1, 64], strides = [1, 1]} : vector<16x128xf32> to vector<1x64xf32>
    %121 = vector.extract_strided_slice %98 {offsets = [5, 64], sizes = [1, 64], strides = [1, 1]} : vector<16x128xf32> to vector<1x64xf32>
    %122 = vector.extract_strided_slice %98 {offsets = [6, 64], sizes = [1, 64], strides = [1, 1]} : vector<16x128xf32> to vector<1x64xf32>
    %123 = vector.extract_strided_slice %98 {offsets = [7, 64], sizes = [1, 64], strides = [1, 1]} : vector<16x128xf32> to vector<1x64xf32>
    %124 = vector.extract_strided_slice %98 {offsets = [8, 64], sizes = [1, 64], strides = [1, 1]} : vector<16x128xf32> to vector<1x64xf32>
    %125 = vector.extract_strided_slice %98 {offsets = [9, 64], sizes = [1, 64], strides = [1, 1]} : vector<16x128xf32> to vector<1x64xf32>
    %126 = vector.extract_strided_slice %98 {offsets = [10, 64], sizes = [1, 64], strides = [1, 1]} : vector<16x128xf32> to vector<1x64xf32>
    %127 = vector.extract_strided_slice %98 {offsets = [11, 64], sizes = [1, 64], strides = [1, 1]} : vector<16x128xf32> to vector<1x64xf32>
    %128 = vector.extract_strided_slice %98 {offsets = [12, 64], sizes = [1, 64], strides = [1, 1]} : vector<16x128xf32> to vector<1x64xf32>
    %129 = vector.extract_strided_slice %98 {offsets = [13, 64], sizes = [1, 64], strides = [1, 1]} : vector<16x128xf32> to vector<1x64xf32>
    %130 = vector.extract_strided_slice %98 {offsets = [14, 64], sizes = [1, 64], strides = [1, 1]} : vector<16x128xf32> to vector<1x64xf32>
    %131 = vector.extract_strided_slice %98 {offsets = [15, 64], sizes = [1, 64], strides = [1, 1]} : vector<16x128xf32> to vector<1x64xf32>
    %132 = tpu.concatenate %116, %117, %118, %119, %120, %121, %122, %123, %124, %125, %126, %127, %128, %129, %130, %131 in 1 : vector<1x64xf32>, vector<1x64xf32>, vector<1x64xf32>, vector<1x64xf32>, vector<1x64xf32>, vector<1x64xf32>, vector<1x64xf32>, vector<1x64xf32>, vector<1x64xf32>, vector<1x64xf32>, vector<1x64xf32>, vector<1x64xf32>, vector<1x64xf32>, vector<1x64xf32>, vector<1x64xf32>, vector<1x64xf32> -> vector<1x1024xf32>
    %133 = tpu.concatenate %115, %132 in 0 : vector<1x1024xf32>, vector<1x1024xf32> -> vector<2x1024xf32>
    %c0_22 = arith.constant 0 : index
    %c0_23 = arith.constant 0 : index
    %134 = vector.load %arg8[%c0_22, %c0_23] : memref<1024x32xf32, #tpu.memory_space<vmem>>, vector<1024x32xf32>
    %c0_24 = arith.constant 0 : index
    %c0_25 = arith.constant 0 : index
    %135 = vector.load %arg9[%c0_24, %c0_25] : memref<1x32xf32, #tpu.memory_space<vmem>>, vector<1x32xf32>
    %cst_26 = arith.constant dense<0.000000e+00> : vector<2x32xf32>
    %136 = tpu.matmul %133, %134, %cst_26 {dimension_numbers = #tpu.dot_dimension_numbers<[1], [0], [0], [1], [0, 0, 1, 1], [], []>, precision = #tpu.contract_precision<fp32>} : vector<2x1024xf32>, vector<1024x32xf32>, vector<2x32xf32> -> vector<2x32xf32>
    %137 = vector.broadcast %135 : vector<1x32xf32> to vector<2x32xf32>
    %138 = arith.addf %136, %137 : vector<2x32xf32>
    %cst_27 = arith.constant 0.000000e+00 : f32
    %139 = vector.broadcast %cst_27 : f32 to vector<2x32xf32>
    %140 = arith.maximumf %138, %139 : vector<2x32xf32>
    %c0_28 = arith.constant 0 : index
    %c0_29 = arith.constant 0 : index
    %141 = vector.load %arg10[%c0_28, %c0_29] : memref<32x10xf32, #tpu.memory_space<vmem>>, vector<32x10xf32>
    %c0_30 = arith.constant 0 : index
    %c0_31 = arith.constant 0 : index
    %142 = vector.load %arg11[%c0_30, %c0_31] : memref<1x10xf32, #tpu.memory_space<vmem>>, vector<1x10xf32>
    %cst_32 = arith.constant dense<0.000000e+00> : vector<2x10xf32>
    %143 = tpu.matmul %140, %141, %cst_32 {dimension_numbers = #tpu.dot_dimension_numbers<[1], [0], [0], [1], [0, 0, 1, 1], [], []>, precision = #tpu.contract_precision<fp32>} : vector<2x32xf32>, vector<32x10xf32>, vector<2x10xf32> -> vector<2x10xf32>
    %144 = vector.broadcast %142 : vector<1x10xf32> to vector<2x10xf32>
    %145 = arith.addf %143, %144 : vector<2x10xf32>
    %c0_33 = arith.constant 0 : index
    %c0_34 = arith.constant 0 : index
    %146 = vector.load %arg12[%c0_33, %c0_34] : memref<2x10xf32, #tpu.memory_space<vmem>>, vector<2x10xf32>
    tpu.vector_store %arg12[%c0_33, %c0_34], %145 {strides = array<i32>} : memref<2x10xf32, #tpu.memory_space<vmem>>, vector<2x10xf32>,
    return
  }
}

</mosaic_0001>

<bundles_post_ra>
// kernel: forward.1
= control target key start
LH: loop header
LB: loop body
LE: loop exit
PB: predicated region body
PF: predicated region fallthrough
CT: control target
= control target key end

     0   :  { %17 = vsyncpa [#allocation3], 0  ;;  %s13481_s0 = inlined_call_operand.vmem [shape: f32[8,512], index: 0, kind: input, shape index: {}]   ;;  %s13482_s1 = inlined_call_operand.vmem [shape: f32[8,72], index: 1, kind: input, shape index: {}]   ;;  %s13483_s2 = inlined_call_operand.vmem [shape: f32[8,1], index: 2, kind: input, shape index: {}]   ;;  %s13484_s3 = inlined_call_operand.vmem [shape: f32[9,512], index: 3, kind: input, shape index: {}, may-alias: {3,6}]   ;;  %s13485_s4 = inlined_call_operand.vmem [shape: f32[16,72], index: 4, kind: input, shape index: {}]   ;;  %s13486_s5 = inlined_call_operand.vmem [shape: f32[16,1], index: 5, kind: input, shape index: {}]   ;;  %s13487_s6 = inlined_call_operand.vmem [shape: f32[9,512], index: 6, kind: input, shape index: {}, may-alias: {3,6}]   ;;  %s13488_s7 = inlined_call_operand.hbm [shape: f32[512,128], index: 7, kind: input, shape index: {}]   ;;  %s13489_s8 = inlined_call_operand.hbm [shape: f32[1024,32], index: 8, kind: input, shape index: {}]   ;;  %s13490_s9 = inlined_call_operand.vmem [shape: f32[1,32], index: 9, kind: input, shape index: {}]   ;;  %s13491_s10 = inlined_call_operand.vmem [shape: f32[32,10], index: 10, kind: input, shape index: {}]   ;;  %s13492_s11 = inlined_call_operand.vmem [shape: f32[1,10], index: 11, kind: input, shape index: {}]   ;;  %s13493_s12 = inlined_call_operand.hbm [shape: f32[2,10], index: 12, kind: output, shape index: {}]  }
   0x1   :  { %18 = vsyncpa [#allocation6], 0 }
   0x2   :  { %19 = vsyncpa [#allocation4], 0  ;;  %s38_s23 = sshll.u32 %s13488_s7, 4  ;;  %s8083_s24 = smov [#allocation2]   ;;  %s39_s23 = int_to_ptr.hbm [resolvable:$true] %s38_s23 }
   0x3   :  { %s40_s25 = sshll.u32 %s8083_s24, 4  ;;  %s51_s28 = sshll.u32 %s13489_s8, 4  ;;  %s41_s25 = int_to_ptr.vmem [resolvable:$true] %s40_s25  ;;  %s52_s28 = int_to_ptr.hbm [resolvable:$true] %s51_s28 }
   0x4   :  { %s8084_s29 = smov 128   ;;  %s8085_s30 = smov 8  }
   0x5   :  { %46 = dma.hbm_to_vmem [thread:$0]  %s39_s23, 8192, %s41_s25, [#allocation3], %s8084_s29, %s8084_s29, %s8085_s30  }
   0x6   :  { %s8086_s13 = smov [#allocation5]  }
   0x7   :  { %s53_s14 = sshll.u32 %s8086_s13, 4  ;;  %s54_s14 = int_to_ptr.vmem [resolvable:$true] %s53_s14 }
   0x8   :  { %59 = dma.hbm_to_vmem [thread:$0]  %s52_s28, 16384, %s54_s14, [#allocation6], %s8084_s29, %s8084_s29, %s8085_s30  }
   0x9   :  { %8077 = dma.done.wait [#allocation3], 8192  }
   0xa   :  { %8078 = vsyncadd [#allocation3], 4294959104 }
   0xb   :  { %8079 = dma.done.wait [#allocation6], 16384  }
   0xc   :  { %8080 = vsyncadd [#allocation6], 4294950912  ;;  %v74_v0 = vld [vmem:[%s13481_s0] sm:$0xff]  ;;  %s8087_s8 = smov 17   ;;  %s8088_s20 = smov 34   ;;  %v75_v4 = vld [vmem:[%s13481_s0 + $0x8] sm:$0xff] }
   0xd   :  { %v7992_v1 = vld [vmem:[%s13484_s3 + $0x20] ss:$0 sm:$0xff]  ;;  %90 = vrot.lane.b32.xlu0 %v74_v0, %s8087_s8  ;;  %s8089_s21 = smov 33   ;;  %v8199_v5 = vld [vmem:[%s13484_s3 + $0x8] sm:$0xff]  ;;  %s8090_s28 = smov 32   ;;  %v76_v12 = vld [vmem:[%s13481_s0 + $0x10] sm:$0xff] }
   0xe   :  { %v8188_v2 = vld [vmem:[%s13484_s3] sm:$0xff]  ;;  %305 = vrot.lane.b32.xlu1 %v7992_v1, %s8088_s20  ;;  %v7993_v6 = vld [vmem:[%s13484_s3 + $0x28] ss:$0 sm:$0xff]  ;;  %v268_v7 = vperm.slane %v8199_v5, 7  ;;  %v238_v9 = vperm.slane %v8199_v5, 6  ;;  %s8091_s29 = smov 18  }
   0xf   :  { %v267_v3 = vperm.slane %v8188_v2, 7  ;;  %v237_v8 = vperm.slane %v8188_v2, 6  ;;  %v207_v10 = vperm.slane %v8188_v2, 5  ;;  %v208_v11 = vperm.slane %v8199_v5, 5  ;;  %v7994_v13 = vld [vmem:[%s13484_s3 + $0x30] ss:$0 sm:$0xff] }
  0x10   :  { %v177_v14 = vperm.slane %v8188_v2, 3  ;;  %v8228_v15 = vld [vmem:[%s13484_s3 + $0x10] sm:$0xff]  ;;  %v178_v16 = vperm.slane %v8199_v5, 3  ;;  %s8092_s17 = smov 16   ;;  %v147_v18 = vperm.slane %v8188_v2, 2  ;;  %v148_v19 = vperm.slane %v8199_v5, 2 }
  0x11   :  { %275 = vrot.lane.b32.xlu2 %v267_v3, %s8089_s21  ;;  %v269_v17 = vperm.slane %v8228_v15, 7  ;;  %v239_v20 = vperm.slane %v8228_v15, 6  ;;  %s8093_s18 = smov 2   ;;  %v117_v21 = vperm.slane %v8188_v2, 1  ;;  %v118_v22 = vperm.slane %v8199_v5, 1  ;;  %s8094_s19 = smov 1  }
  0x12   :  { %v209_v23 = vperm.slane %v8228_v15, 5  ;;  %v179_v24 = vperm.slane %v8228_v15, 3  ;;  %v149_v25 = vperm.slane %v8228_v15, 2  ;;  %v119_v26 = vperm.slane %v8228_v15, 1  ;;  %v77_v27 = vld [vmem:[%s13481_s0 + $0x18] sm:$0xff]  ;;  %s8095_s0 = smov 111  }
  0x13   :  { %v7995_v28 = vld [vmem:[%s13484_s3 + $0x38] ss:$0 sm:$0xff]  ;;  %vm98_vm0 = vcmask 138240   ;;  %s8096_s30 = smov 95   ;;  %s8097_s13 = smov 94   ;;  %vm313_vm1 = vcmask 277504  }
  0x14   :  { %v81_v29 = vld [vmem:[%s13484_s3 + $0x18] sm:$0xff]  ;;  %s8098_s14 = smov 96   ;;  %vm283_vm2 = vcmask 269312   ;;  %s8099_s7 = smov 110   ;;  %vm223_vm3 = vcmask 146432   ;;  %vm193_vm4 = vcmask 130048  }
  0x15   :  { %92 = vrot.lane.b32.xlu0 %v75_v4, %s8087_s8  ;;  %v270_v30 = vperm.slane %v81_v29, 7  ;;  %v240_v31 = vperm.slane %v81_v29, 6  ;;  %v210_v32 = vperm.slane %v81_v29, 5  ;;  %v180_v33 = vperm.slane %v81_v29, 3  ;;  %s8100_s15 = smov 112   ;;  %s8101_s16 = smov 126  }
  0x16   :  { %307 = vrot.lane.b32.xlu1 %v7993_v6, %s8088_s20  ;;  %v150_v34 = vperm.slane %v81_v29, 2  ;;  %v120_v35 = vperm.slane %v81_v29, 1  ;;  %vm163_vm5 = vcmask 15360   ;;  %vm253_vm6 = vcmask 261120   ;;  %s8102_s22 = smov 127  }
  0x17   :  { %vm13494_vm7 = vcmask 7168   ;;  %vm483_vm8 = vcmask 777216   ;;  %vm507_vm9 = vcmask 769024   ;;  %vm435_vm10 = vcmask 900096  }
  0x18   :  { %vm411_vm11 = vcmask 908288   ;;  %vm390_vm12 = vcmask 916480   ;;  %vm366_vm13 = vcmask 1031168   ;;  %vm459_vm14 = vcmask 785408  }
  0x19   :  { %277 = vrot.lane.b32.xlu2 %v268_v7, %s8089_s21  ;;  %vm523_vm15 = vcmask 588800  }
  0x1d   :  { %245 = vrot.lane.b32.xlu0 %v237_v8, %s8090_s28 }
  0x1e   :  { %247 = vrot.lane.b32.xlu1 %v238_v9, %s8090_s28 }
  0x21   :  { %215 = vrot.lane.b32.xlu2 %v207_v10, %s8091_s29 }
  0x25   :  { %217 = vrot.lane.b32.xlu0 %v208_v11, %s8091_s29 }
  0x26   :  { %94 = vrot.lane.b32.xlu1 %v76_v12, %s8087_s8 }
  0x29   :  { %309 = vrot.lane.b32.xlu2 %v7994_v13, %s8088_s20 }
  0x2d   :  { %185 = vrot.lane.b32.xlu0 %v177_v14, %s8092_s17 }
  0x2e   :  { %187 = vrot.lane.b32.xlu1 %v178_v16, %s8092_s17 }
  0x31   :  { %279 = vrot.lane.b32.xlu2 %v269_v17, %s8089_s21 }
  0x35   :  { %155 = vrot.lane.b32.xlu0 %v147_v18, %s8093_s18 }
  0x36   :  { %157 = vrot.lane.b32.xlu1 %v148_v19, %s8093_s18 }
  0x39   :  { %249 = vrot.lane.b32.xlu2 %v239_v20, %s8090_s28 }
  0x3d   :  { %125 = vrot.lane.b32.xlu0 %v117_v21, %s8094_s19 }
  0x3e   :  { %127 = vrot.lane.b32.xlu1 %v118_v22, %s8094_s19 }
  0x41   :  { %219 = vrot.lane.b32.xlu2 %v209_v23, %s8091_s29 }
  0x45   :  { %189 = vrot.lane.b32.xlu0 %v179_v24, %s8092_s17 }
  0x46   :  { %159 = vrot.lane.b32.xlu1 %v149_v25, %s8093_s18 }
  0x49   :  { %129 = vrot.lane.b32.xlu2 %v119_v26, %s8094_s19 }
  0x4d   :  { %96 = vrot.lane.b32.xlu0 %v77_v27, %s8087_s8 }
  0x4e   :  { %311 = vrot.lane.b32.xlu1 %v7995_v28, %s8088_s20 }
  0x51   :  { %281 = vrot.lane.b32.xlu2 %v270_v30, %s8089_s21 }
  0x55   :  { %251 = vrot.lane.b32.xlu0 %v240_v31, %s8090_s28 }
  0x56   :  { %221 = vrot.lane.b32.xlu1 %v210_v32, %s8091_s29 }
  0x59   :  { %191 = vrot.lane.b32.xlu2 %v180_v33, %s8092_s17 }
  0x5d   :  { %161 = vrot.lane.b32.xlu0 %v150_v34, %s8093_s18 }
  0x5e   :  { %131 = vrot.lane.b32.xlu1 %v120_v35, %s8094_s19 }
  0x6b   :  { %v276_v36 = vpop.permute.xlu2 %275 }
  0x73   :  { %v278_v40 = vpop.permute.xlu2 %277 }
  0x74   :  { %v284_v56 = vsel %vm283_vm2, %v276_v36, %v278_v40 }
  0x7b   :  { %v216_v45 = vpop.permute.xlu2 %215 }
  0x7f   :  { %v91_v37 = vpop.permute.xlu0 %90 }
  0x80   :  { %v8271_v38 = vsel %vm98_vm0, 0.0, %v91_v37  ;;  %v306_v39 = vpop.permute.xlu1 %305 }
  0x81   :  { %401 = vrot.lane.b32.xlu1 %v8271_v38, %s8095_s0  ;;  %v292_v42 = vmul.f32 %v276_v36, %v8271_v38  ;;  %v322_v46 = vmul.f32 %v306_v39, %v8271_v38  ;;  %v232_v52 = vmul.f32 %v216_v45, %v8271_v38 }
  0x83   :  { %v8290_v53 = vpop.permute.xlu2 %309 }
  0x87   :  { %v93_v41 = vpop.permute.xlu0 %92 }
  0x88   :  { %v8277_v43 = vsel %vm98_vm0, %v91_v37, %v93_v41  ;;  %v308_v44 = vpop.permute.xlu1 %307 }
  0x89   :  { %473 = vrot.lane.b32.xlu1 %v292_v42, %s8096_s30  ;;  %403 = vrot.lane.b32.xlu2 %v8277_v43, %s8095_s0  ;;  %v314_v50 = vsel %vm313_vm1, %v306_v39, %v308_v44  ;;  %v293_v59 = vmul.f32 %v284_v56, %v8277_v43  ;;  %v315_v1 = vsel %vm313_vm1, %v308_v44, %v8290_v53 }
  0x8a   :  { %v323_v55 = vmul.f32 %v314_v50, %v8277_v43 }
  0x8b   :  { %v8304_v63 = vpop.permute.xlu2 %279 }
  0x8c   :  { %v285_v12 = vsel %vm283_vm2, %v278_v40, %v8304_v63 }
  0x8f   :  { %v246_v47 = vpop.permute.xlu0 %245 }
  0x90   :  { %v262_v48 = vmul.f32 %v246_v47, %v8271_v38  ;;  %v248_v49 = vpop.permute.xlu1 %247 }
  0x91   :  { %497 = vrot.lane.b32.xlu2 %v322_v46, %s8097_s13  ;;  %v254_v13 = vsel %vm253_vm6, %v246_v47, %v248_v49 }
  0x92   :  { %449 = vrot.lane.b32.xlu0 %v262_v48, %s8098_s14  ;;  %v263_v19 = vmul.f32 %v254_v13, %v8277_v43 }
  0x93   :  { %v250_v10 = vpop.permute.xlu2 %249 }
  0x94   :  { %v255_v21 = vsel %vm253_vm6, %v248_v49, %v250_v10 }
  0x97   :  { %v8287_v51 = vpop.permute.xlu0 %217 }
  0x98   :  { %v8292_v54 = vpop.permute.xlu1 %94  ;;  %v224_v57 = vsel %vm223_vm3, %v216_v45, %v8287_v51 }
  0x99   :  { %425 = vrot.lane.b32.xlu2 %v232_v52, %s8099_s7  ;;  %v233_v62 = vmul.f32 %v224_v57, %v8277_v43  ;;  %v8313_v3 = vsel %vm98_vm0, %v93_v41, %v8292_v54 }
  0x9a   :  { %499 = vrot.lane.b32.xlu0 %v323_v55, %s8097_s13  ;;  %v324_v9 = vmul.f32 %v315_v1, %v8313_v3  ;;  %v294_v18 = vmul.f32 %v285_v12, %v8313_v3  ;;  %v264_v27 = vmul.f32 %v255_v21, %v8313_v3 }
  0x9b   :  { %v220_v22 = vpop.permute.xlu2 %219 }
  0x9c   :  { %v225_v29 = vsel %vm223_vm3, %v8287_v51, %v220_v22 }
  0x9d   :  { %v234_v34 = vmul.f32 %v225_v29, %v8313_v3 }
  0x9f   :  { %v186_v58 = vpop.permute.xlu0 %185 }
  0xa0   :  { %v202_v60 = vmul.f32 %v186_v58, %v8271_v38  ;;  %v188_v61 = vpop.permute.xlu1 %187 }
  0xa1   :  { %475 = vrot.lane.b32.xlu2 %v293_v59, %s8096_s30  ;;  %v194_v0 = vsel %vm193_vm4, %v186_v58, %v188_v61 }
  0xa2   :  { %427 = vrot.lane.b32.xlu0 %v233_v62, %s8099_s7  ;;  %380 = vrot.lane.b32.xlu1 %v202_v60, %s8100_s15  ;;  %v203_v6 = vmul.f32 %v194_v0, %v8277_v43 }
  0xa3   :  { %v130_v30 = vpop.permute.xlu2 %129 }
  0xa7   :  { %v156_v4 = vpop.permute.xlu0 %155 }
  0xa8   :  { %v172_v7 = vmul.f32 %v156_v4, %v8271_v38  ;;  %v158_v8 = vpop.permute.xlu1 %157 }
  0xa9   :  { %382 = vrot.lane.b32.xlu2 %v203_v6, %s8100_s15  ;;  %v164_v11 = vsel %vm163_vm5, %v156_v4, %v158_v8 }
  0xaa   :  { %501 = vrot.lane.b32.xlu0 %v324_v9, %s8097_s13  ;;  %356 = vrot.lane.b32.xlu1 %v172_v7, %s8101_s16  ;;  %v173_v16 = vmul.f32 %v164_v11, %v8277_v43 }
  0xab   :  { %v282_v42 = vpop.permute.xlu2 %281 }
  0xac   :  { %v286_v48 = vsel %vm283_vm2, %v8304_v63, %v282_v42 }
  0xaf   :  { %v126_v14 = vpop.permute.xlu0 %125 }
  0xb0   :  { %v128_v17 = vpop.permute.xlu1 %127  ;;  %v142_v25 = vmul.f32 %v126_v14, %v8271_v38 }
  0xb1   :  { %358 = vrot.lane.b32.xlu2 %v173_v16, %s8101_s16  ;;  %v134_v20 = vsel %vm13494_vm7, %v126_v14, %v128_v17  ;;  %v135_v37 = vsel %vm13494_vm7, %v128_v17, %v130_v30 }
  0xb2   :  { %477 = vrot.lane.b32.xlu0 %v294_v18, %s8096_s30  ;;  %451 = vrot.lane.b32.xlu1 %v263_v19, %s8098_s14  ;;  %v143_v24 = vmul.f32 %v134_v20, %v8277_v43  ;;  %v144_v45 = vmul.f32 %v135_v37, %v8313_v3 }
  0xb7   :  { %v190_v23 = vpop.permute.xlu0 %189 }
  0xb8   :  { %v160_v26 = vpop.permute.xlu1 %159  ;;  %v195_v28 = vsel %vm193_vm4, %v188_v61, %v190_v23 }
  0xb9   :  { %334 = vrot.lane.b32.xlu2 %v143_v24, %s8102_s22  ;;  %v204_v32 = vmul.f32 %v195_v28, %v8313_v3  ;;  %v165_v39 = vsel %vm163_vm5, %v158_v8, %v160_v26 }
  0xba   :  { %453 = vrot.lane.b32.xlu0 %v264_v27, %s8098_s14  ;;  %332 = vrot.lane.b32.xlu1 %v142_v25, %s8102_s22  ;;  %v174_v44 = vmul.f32 %v165_v39, %v8313_v3 }
  0xbf   :  { %v97_v31 = vpop.permute.xlu0 %96 }
  0xc0   :  { %v312_v33 = vpop.permute.xlu1 %311  ;;  %v8350_v35 = vsel %vm98_vm0, %v8292_v54, %v97_v31  ;;  %v192_v54 = vpop.permute.xlu2 %191  ;;  %v108_v60 = vsel %vm98_vm0, %v97_v31, 0.0 }
  0xc1   :  { %384 = vrot.lane.b32.xlu2 %v204_v32, %s8100_s15  ;;  %v316_v36 = vsel %vm313_vm1, %v8290_v53, %v312_v33  ;;  %v295_v51 = vmul.f32 %v286_v48, %v8350_v35  ;;  %v196_v56 = vsel %vm193_vm4, %v190_v23, %v192_v54  ;;  %v296_v62 = vmul.f32 %v282_v42, %v108_v60 }
  0xc2   :  { %429 = vrot.lane.b32.xlu0 %v234_v34, %s8099_s7  ;;  %405 = vrot.lane.b32.xlu1 %v8313_v3, %s8095_s0  ;;  %v325_v41 = vmul.f32 %v316_v36, %v8350_v35  ;;  %v205_v58 = vmul.f32 %v196_v56, %v8350_v35  ;;  %v326_v63 = vmul.f32 %v312_v33, %v108_v60 }
  0xc7   :  { %v252_v40 = vpop.permute.xlu0 %251 }
  0xc8   :  { %v222_v46 = vpop.permute.xlu1 %221  ;;  %v256_v49 = vsel %vm253_vm6, %v250_v10, %v252_v40  ;;  %v266_v4 = vmul.f32 %v252_v40, %v108_v60  ;;  %v206_v10 = vmul.f32 %v192_v54, %v108_v60 }
  0xc9   :  { %503 = vrot.lane.b32.xlu2 %v325_v41, %s8097_s13  ;;  %v226_v47 = vsel %vm223_vm3, %v220_v22, %v222_v46  ;;  %v265_v52 = vmul.f32 %v256_v49, %v8350_v35  ;;  %v236_v6 = vmul.f32 %v222_v46, %v108_v60  ;;  %v109_v41 = vperm.slane %v8188_v2, 0 }
  0xca   :  { %360 = vrot.lane.b32.xlu0 %v174_v44, %s8101_s16  ;;  %336 = vrot.lane.b32.xlu1 %v144_v45, %s8102_s22  ;;  %v235_v50 = vmul.f32 %v226_v47, %v8350_v35 }
  0xcf   :  { %v162_v53 = vpop.permute.xlu0 %161 }
  0xd0   :  { %v166_v55 = vsel %vm163_vm5, %v160_v26, %v162_v53  ;;  %v132_v59 = vpop.permute.xlu1 %131  ;;  %v176_v8 = vmul.f32 %v162_v53, %v108_v60 }
  0xd1   :  { %431 = vrot.lane.b32.xlu2 %v235_v50, %s8099_s7  ;;  %v175_v57 = vmul.f32 %v166_v55, %v8350_v35  ;;  %v136_v61 = vsel %vm13494_vm7, %v130_v30, %v132_v59  ;;  %v146_v7 = vmul.f32 %v132_v59, %v108_v60  ;;  %v516_v55 = vld [vmem:[%s13482_s1] sm:$0xff]  ;;  %vm13501_vm7 = vcmask 1039360   ;;  %s8106_s1 = smov [#allocation7]  }
  0xd2   :  { %479 = vrot.lane.b32.xlu0 %v295_v51, %s8096_s30  ;;  %455 = vrot.lane.b32.xlu1 %v265_v52, %s8098_s14  ;;  %v145_v0 = vmul.f32 %v136_v61, %v8350_v35  ;;  %v113_v51 = vmul.f32 %v109_v41, %v8271_v38  ;;  %s7953_s25 = sshll.u32 %s8106_s1, 4  ;;  %s7954_s25 = int_to_ptr.vmem [resolvable:$true] %s7953_s25 }
  0xd9   :  { %362 = vrot.lane.b32.xlu2 %v175_v57, %s8101_s16 }
  0xda   :  { %407 = vrot.lane.b32.xlu0 %v8350_v35, %s8095_s0  ;;  %386 = vrot.lane.b32.xlu1 %v205_v58, %s8100_s15 }
  0xe1   :  { %481 = vrot.lane.b32.xlu2 %v296_v62, %s8096_s30  ;;  %v525_v62 = vsel %vm523_vm15, %v516_v55, 0 }
  0xe2   :  { %338 = vrot.lane.b32.xlu0 %v145_v0, %s8102_s22  ;;  %505 = vrot.lane.b32.xlu1 %v326_v63, %s8097_s13  ;;  %v8483_v0 = vand.u32 4294901760, %v113_v51 }
  0xe3   :  { %v8386_v1 = vpop.permute.xlu2 %403 }
  0xe9   :  { %409 = vrot.lane.b32.xlu2 %v108_v60, %s8095_s0 }
  0xea   :  { %457 = vrot.lane.b32.xlu0 %v266_v4, %s8098_s14  ;;  %433 = vrot.lane.b32.xlu1 %v236_v6, %s8099_s7 }
  0xeb   :  { %v498_v9 = vpop.permute.xlu2 %497 }
  0xf1   :  { %340 = vrot.lane.b32.xlu2 %v146_v7, %s8102_s22 }
  0xf2   :  { %388 = vrot.lane.b32.xlu0 %v206_v10, %s8100_s15  ;;  %364 = vrot.lane.b32.xlu1 %v176_v8, %s8101_s16 }
  0xf3   :  { %v402_v11 = vpop.permute.xlu1 %401  ;;  %v426_v12 = vpop.permute.xlu2 %425 }
  0xf4   :  { %v412_v39 = vsel %vm411_vm11, %v402_v11, %v8386_v1 }
  0xf5   :  { %v8437_v44 = vand.u32 4294901760, %v412_v39 }
  0xf7   :  { %v8462_v56 = vsub.f32 %v412_v39, %v8437_v44 }
  0xf9   :  { %v594_v6 = vand.u32 4294901760, %v8462_v56 }
  0xfb   :  { %v474_v13 = vpop.permute.xlu1 %473  ;;  %v476_v14 = vpop.permute.xlu2 %475 }
  0xfc   :  { %v484_v17 = vsel %vm483_vm8, %v474_v13, %v476_v14 }
  0xfd   :  { %v8395_v18 = vand.u32 4294901760, %v484_v17 }
  0xff   :  { %v8398_v19 = vsub.f32 %v484_v17, %v8395_v18 }
 0x101   :  { %v576_v25 = vand.u32 4294901760, %v8398_v19 }
 0x103   :  { %v8403_v23 = vpop.permute.xlu2 %382  ;;  %v577_v30 = vsub.f32 %v8398_v19, %v576_v25 }
 0x104   :  { %v450_v16 = vpop.permute.xlu0 %449 }
 0x105   :  { %v578_v32 = vand.u32 4294901760, %v577_v30 }
 0x10b   :  { %v8424_v33 = vpop.permute.xlu2 %358 }
 0x10c   :  { %v500_v20 = vpop.permute.xlu0 %499 }
 0x10d   :  { %v508_v21 = vsel %vm507_vm9, %v498_v9, %v500_v20  ;;  %v8496_v9 = vand.u32 4294901760, %v525_v62 }
 0x10e   :  { %v8401_v22 = vand.u32 4294901760, %v508_v21 }
 0x10f   :  { %v8533_v39 = vsub.f32 %v525_v62, %v8496_v9 }
 0x110   :  { %v8406_v24 = vsub.f32 %v508_v21, %v8401_v22  ;;  %535 = vmatpush.msra.mxu0 %v8401_v22  ;;  %675 = vmatpush.msra.mxu3 %v8401_v22  ;;  %v8516_v21 = vsub.f32 %v113_v51, %v8483_v0 }
 0x112   :  { %537 = vmatpush.msra.mxu0 %v8395_v18  ;;  %636 = vmatpush.msra.mxu2 %v8406_v24  ;;  %v570_v26 = vand.u32 4294901760, %v8406_v24  ;;  %v618_v62 = vand.u32 4294901760, %v8516_v21 }
 0x113   :  { %677 = vmatpush.msra.mxu3 %v8395_v18  ;;  %v8441_v46 = vpop.permute.xlu2 %334 }
 0x114   :  { %v381_v27 = vpop.permute.xlu1 %380  ;;  %639 = vmatpush.msra.mxu2 %v8398_v19  ;;  %v8416_v28 = vpop.permute.xlu0 %427  ;;  %v571_v29 = vsub.f32 %v8406_v24, %v570_v26 }
 0x115   :  { %v436_v37 = vsel %vm435_vm10, %v426_v12, %v8416_v28  ;;  %v391_v45 = vsel %vm390_vm12, %v381_v27, %v8403_v23 }
 0x116   :  { %v572_v31 = vand.u32 4294901760, %v571_v29  ;;  %v8432_v40 = vand.u32 4294901760, %v436_v37  ;;  %v8453_v52 = vand.u32 4294901760, %v391_v45 }
 0x118   :  { %573 = vmatpush.msra.mxu1 %v572_v31  ;;  %v8444_v47 = vsub.f32 %v436_v37, %v8432_v40  ;;  %v8481_v63 = vsub.f32 %v391_v45, %v8453_v52 }
 0x11a   :  { %579 = vmatpush.msra.mxu1 %v578_v32  ;;  %v588_v61 = vand.u32 4294901760, %v8444_v47  ;;  %v595_v32 = vsub.f32 %v8462_v56, %v594_v6 }
 0x11b   :  { %v8518_v27 = vpop.permute.xlu2 %384 }
 0x11c   :  { %v357_v34 = vpop.permute.xlu1 %356  ;;  %v8426_v36 = vpop.permute.xlu0 %501  ;;  %v589_v13 = vsub.f32 %v8444_v47, %v588_v61 }
 0x11d   :  { %v509_v42 = vsel %vm507_vm9, %v500_v20, %v8426_v36  ;;  %v367_v48 = vsel %vm366_vm13, %v357_v34, %v8424_v33  ;;  %v13500_v20 = vand.u32 4294901760, %v8481_v63 }
 0x11e   :  { %v8448_v49 = vand.u32 4294901760, %v509_v42  ;;  %v8466_v58 = vand.u32 4294901760, %v367_v48  ;;  %v590_v45 = vand.u32 4294901760, %v589_v13 }
 0x11f   :  { %v601_v51 = vsub.f32 %v8481_v63, %v13500_v20 }
 0x120   :  { %v8471_v59 = vsub.f32 %v509_v42, %v8448_v49  ;;  %v8490_v7 = vsub.f32 %v367_v48, %v8466_v58 }
 0x122   :  { %v13498_v37 = vand.u32 4294901760, %v8490_v7 }
 0x124   :  { %v452_v2 = vpop.permute.xlu1 %451  ;;  %v8450_v50 = vpop.permute.xlu0 %477 }
 0x125   :  { %v460_v53 = vsel %vm459_vm14, %v450_v16, %v452_v2  ;;  %v485_v54 = vsel %vm483_vm8, %v476_v14, %v8450_v50  ;;  %v13496_v14 = vand.u32 4294901760, %v8471_v59 }
 0x126   :  { %v8464_v57 = vand.u32 4294901760, %v460_v53  ;;  %v8468_v38 = vand.u32 4294901760, %v485_v54 }
 0x127   :  { %v821_v48 = vsub.f32 %v8471_v59, %v13496_v14  ;;  %v602_v14 = vand.u32 4294901760, %v601_v51 }
 0x128   :  { %v8474_v60 = vsub.f32 %v460_v53, %v8464_v57  ;;  %539 = vmatpush.msra.mxu0 %v8464_v57  ;;  %679 = vmatpush.msra.mxu3 %v8464_v57  ;;  %v8493_v8 = vsub.f32 %v485_v54, %v8468_v38  ;;  %v596_v53 = vand.u32 4294901760, %v595_v32 }
 0x12a   :  { %541 = vmatpush.msra.mxu0 %v8432_v40  ;;  %642 = vmatpush.msra.mxu2 %v8474_v60  ;;  %v582_v4 = vand.u32 4294901760, %v8474_v60  ;;  %v13495_v34 = vand.u32 4294901760, %v8493_v8 }
 0x12b   :  { %681 = vmatpush.msra.mxu3 %v8432_v40 }
 0x12c   :  { %v333_v10 = vpop.permute.xlu1 %332  ;;  %543 = vmatpush.msra.mxu0 %v8437_v44  ;;  %645 = vmatpush.msra.mxu2 %v8444_v47  ;;  %v8500_v11 = vpop.permute.xlu0 %453  ;;  %v583_v12 = vsub.f32 %v8474_v60, %v582_v4 }
 0x12d   :  { %v343_v16 = vsel %vm13501_vm7, %v333_v10, %v8441_v46  ;;  %683 = vmatpush.msra.mxu3 %v8437_v44  ;;  %v461_v17 = vsel %vm459_vm14, %v452_v2, %v8500_v11  ;;  %v392_v2 = vsel %vm390_vm12, %v8403_v23, %v8518_v27  ;;  %v827_v23 = vsub.f32 %v8493_v8, %v13495_v34 }
 0x12e   :  { %v8520_v29 = vand.u32 4294901760, %v343_v16  ;;  %v8522_v30 = vand.u32 4294901760, %v461_v17  ;;  %545 = vmatpush.msra.mxu0 %v8453_v52  ;;  %648 = vmatpush.msra.mxu2 %v8462_v56  ;;  %v584_v31 = vand.u32 4294901760, %v583_v12  ;;  %v607_v10 = vsub.f32 %v8490_v7, %v13498_v37 }
 0x12f   :  { %685 = vmatpush.msra.mxu3 %v8453_v52  ;;  %v8566_v12 = vand.u32 4294901760, %v8533_v39  ;;  %v8568_v13 = vand.u32 4294901760, %v392_v2 }
 0x130   :  { %v8536_v41 = vsub.f32 %v343_v16, %v8520_v29  ;;  %v8539_v42 = vsub.f32 %v461_v17, %v8522_v30  ;;  %547 = vmatpush.msra.mxu0 %v8466_v58  ;;  %585 = vmatpush.msra.mxu1 %v584_v31  ;;  %v822_v31 = vand.u32 4294901760, %v821_v48  ;;  %v608_v51 = vand.u32 4294901760, %v607_v10 }
 0x131   :  { %651 = vmatpush.msra.mxu2 %v8481_v63  ;;  %687 = vmatpush.msra.mxu3 %v8466_v58  ;;  %v8603_v20 = vsub.f32 %v392_v2, %v8568_v13 }
 0x132   :  { %549 = vmatpush.msra.mxu0 %v8520_v29  ;;  %591 = vmatpush.msra.mxu1 %v590_v45  ;;  %v13497_v54 = vand.u32 4294901760, %v8539_v42  ;;  %v13499_v55 = vand.u32 4294901760, %v8536_v41  ;;  %v110_v45 = vperm.slane %v8199_v5, 0 }
 0x133   :  { %654 = vmatpush.msra.mxu2 %v8490_v7  ;;  %689 = vmatpush.msra.mxu3 %v8520_v29  ;;  %v850_v10 = vand.u32 4294901760, %v8603_v20 }
 0x134   :  { %v8570_v16 = vpop.permute.xlu1 %405  ;;  %551 = vmatpush.msra.mxu0 %v8483_v0  ;;  %597 = vmatpush.msra.mxu1 %v596_v53  ;;  %v8573_v17 = vpop.permute.xlu0 %429  ;;  %v833_v32 = vsub.f32 %v8539_v42, %v13497_v54  ;;  %v613_v48 = vsub.f32 %v8536_v41, %v13499_v55  ;;  %v555_v55 = vsub.f32 %v8533_v39, %v8566_v12 }
 0x135   :  { %v413_v34 = vsel %vm411_vm11, %v8386_v1, %v8570_v16  ;;  %657 = vmatpush.msra.mxu2 %v8536_v41  ;;  %691 = vmatpush.msra.mxu3 %v8483_v0  ;;  %v437_v53 = vsel %vm435_vm10, %v8416_v28, %v8573_v17  ;;  %v619_v1 = vsub.f32 %v8516_v21, %v618_v62  ;;  %v828_v28 = vand.u32 4294901760, %v827_v23 }
 0x136   :  { %v8590_v54 = vand.u32 4294901760, %v413_v34  ;;  %v8592_v5 = vand.u32 4294901760, %v437_v53  ;;  %709 = vmatpush.msrb.mxu0 %v570_v26  ;;  %603 = vmatpush.msra.mxu1 %v602_v14  ;;  %v834_v37 = vand.u32 4294901760, %v833_v32  ;;  %v614_v14 = vand.u32 4294901760, %v613_v48 }
 0x137   :  { %823 = vmatpush.msrb.mxu3 %v822_v31  ;;  %660 = vmatpush.msra.mxu2 %v8516_v21  ;;  %v114_v23 = vmul.f32 %v110_v45, %v8277_v43  ;;  %v620_v19 = vand.u32 4294901760, %v619_v1  ;;  %v13659_v48 = vand.u32 4294901760, %v8490_v7  ;;  %v8675_v1 = vpop.permute.xlu2 %503 }
 0x138   :  { %v8606_v24 = vsub.f32 %v413_v34, %v8590_v54  ;;  %v8609_v26 = vsub.f32 %v437_v53, %v8592_v5  ;;  %713 = vmatpush.msrb.mxu0 %v576_v25  ;;  %609 = vmatpush.msra.mxu1 %v608_v51  ;;  %v8620_v25 = vand.u32 4294901760, %v555_v55  ;;  %v13658_v53 = vand.u32 4294901760, %v8481_v63 }
 0x139   :  { %785 = vmatpush.msrb.mxu2 %v8448_v49  ;;  %829 = vmatpush.msrb.mxu3 %v828_v28  ;;  %v8643_v55 = vand.u32 4294901760, %v114_v23  ;;  %v13660_v28 = vand.u32 4294901760, %v8536_v41 }
 0x13a   :  { %717 = vmatpush.msrb.mxu0 %v582_v4  ;;  %v838_v34 = vand.u32 4294901760, %v8609_v26  ;;  %v844_v2 = vand.u32 4294901760, %v8606_v24  ;;  %615 = vmatpush.msra.mxu1 %v614_v14 }
 0x13b   :  { %787 = vmatpush.msrb.mxu2 %v8468_v38  ;;  %835 = vmatpush.msrb.mxu3 %v834_v37 }
 0x13c   :  { %721 = vmatpush.msrb.mxu0 %v588_v61  ;;  %v8625_v43 = vpop.permute.xlu1 %336  ;;  %v8627_v60 = vpop.permute.xlu0 %360  ;;  %v839_v4 = vsub.f32 %v8609_v26, %v838_v34  ;;  %621 = vmatpush.msra.mxu1 %v620_v19  ;;  %v845_v61 = vsub.f32 %v8606_v24, %v844_v2 }
 0x13d   :  { %789 = vmatpush.msrb.mxu2 %v8522_v30  ;;  %v344_v37 = vsel %vm13501_vm7, %v8441_v46, %v8625_v43  ;;  %v368_v47 = vsel %vm366_vm13, %v8424_v33, %v8627_v60  ;;  %557 = vmatmul.f32.vlgmr.msra.gmra.mxu0 %v8620_v25 }
 0x13e   :  { %663 = vmatmul.f32.vlgmr.msra.gmra.mxu2 %v8533_v39  ;;  %v8645_v31 = vand.u32 4294901760, %v344_v37  ;;  %v8647_v32 = vand.u32 4294901760, %v368_v47  ;;  %725 = vmatpush.msrb.mxu0 %v594_v6  ;;  %v840_v46 = vand.u32 4294901760, %v839_v4  ;;  %v846_v56 = vand.u32 4294901760, %v845_v61 }
 0x13f   :  { %755 = vmatpush.msrb.mxu1 %v8401_v22  ;;  %791 = vmatpush.msrb.mxu2 %v8592_v5  ;;  %v851_v22 = vsub.f32 %v8603_v20, %v850_v10  ;;  %v8668_v6 = vsub.f32 %v114_v23, %v8643_v55  ;;  %v8710_v19 = vpop.permute.xlu2 %431 }
 0x140   :  { %v8655_v33 = vsub.f32 %v344_v37, %v8645_v31  ;;  %v8658_v45 = vsub.f32 %v368_v47, %v8647_v32  ;;  %729 = vmatpush.msrb.mxu0 %v13658_v53  ;;  %841 = vmatpush.msrb.mxu3 %v840_v46  ;;  %v8103_v37 = vmov 0  }
 0x141   :  { %757 = vmatpush.msrb.mxu1 %v8395_v18  ;;  %793 = vmatpush.msrb.mxu2 %v8590_v54  ;;  %v852_v51 = vand.u32 4294901760, %v851_v22 }
 0x142   :  { %733 = vmatpush.msrb.mxu0 %v13659_v48  ;;  %v856_v63 = vand.u32 4294901760, %v8658_v45  ;;  %v862_v18 = vand.u32 4294901760, %v8655_v33  ;;  %847 = vmatpush.msrb.mxu3 %v846_v56 }
 0x143   :  { %759 = vmatpush.msrb.mxu1 %v8464_v57  ;;  %795 = vmatpush.msrb.mxu2 %v8568_v13  ;;  %v868_v57 = vand.u32 4294901760, %v8668_v6 }
 0x144   :  { %737 = vmatpush.msrb.mxu0 %v13660_v28  ;;  %v857_v7 = vsub.f32 %v8658_v45, %v856_v63  ;;  %695 = vmatmul.f32.vlgmr.msra.gmra.mxu3 %v8566_v12  ;;  %v8687_v14 = vpop.permute.xlu0 %479  ;;  %v8696_v23 = vpop.permute.xlu1 %455 }
 0x145   :  { %761 = vmatpush.msrb.mxu1 %v8432_v40  ;;  %797 = vmatpush.msrb.mxu2 %v8647_v32  ;;  %v863_v40 = vsub.f32 %v8655_v33, %v862_v18  ;;  %v869_v21 = vsub.f32 %v8668_v6, %v868_v57 }
 0x146   :  { %853 = vmatpush.msrb.mxu3 %v852_v51  ;;  %741 = vmatpush.msrb.mxu0 %v618_v62  ;;  %v858_v41 = vand.u32 4294901760, %v857_v7  ;;  %v13661_v62 = vand.u32 4294901760, %v8471_v59 }
 0x147   :  { %763 = vmatpush.msrb.mxu1 %v8437_v44  ;;  %799 = vmatpush.msrb.mxu2 %v8645_v31  ;;  %v864_v44 = vand.u32 4294901760, %v863_v40  ;;  %v870_v4 = vand.u32 4294901760, %v869_v21 }
 0x148   :  { %623 = vmatmul.f32.vlgmr.msra.gmra.mxu1 %v8496_v9  ;;  %886 = vmatpush.msra.mxu0 %v8471_v59  ;;  %v13663_v59 = vand.u32 4294901760, %v8539_v42 }
 0x149   :  { %765 = vmatpush.msrb.mxu1 %v8453_v52  ;;  %801 = vmatpush.msrb.mxu2 %v8643_v55  ;;  %v13662_v52 = vand.u32 4294901760, %v8493_v8 }
 0x14a   :  { %807 = vmatmul.f32.vlgmr.msrb.gmra.mxu2 %v8620_v25  ;;  %859 = vmatpush.msrb.mxu3 %v858_v41 }
 0x14b   :  { %889 = vmatpush.msra.mxu0 %v8493_v8  ;;  %959 = vmatpush.msra.mxu2 %v13661_v62  ;;  %v517_v8 = vld [vmem:[%s13483_s2] sm:$0xff] }
 0x14c   :  { %767 = vmatpush.msrb.mxu1 %v8466_v58  ;;  %865 = vmatpush.msrb.mxu3 %v864_v44  ;;  %v8720_v58 = vpop.permute.xlu0 %407 }
 0x14d   :  { %892 = vmatpush.msra.mxu0 %v8539_v42  ;;  %963 = vmatpush.msra.mxu2 %v13662_v52  ;;  %v510_v42 = vsel %vm507_vm9, %v8426_v36, %v8675_v1  ;;  %v8749_v36 = vpop.permute.xlu2 %362 }
 0x14e   :  { %769 = vmatpush.msrb.mxu1 %v8520_v29  ;;  %743 = vmatmul.f32.vlgmr.msrb.gmra.mxu0 %v8496_v9  ;;  %v8728_v29 = vpop.permute.xlu1 %386  ;;  %v8744_v47 = vand.u32 4294901760, %v510_v42 }
 0x14f   :  { %871 = vmatpush.msrb.mxu3 %v870_v4  ;;  %895 = vmatpush.msra.mxu0 %v8609_v26 }
 0x150   :  { %967 = vmatpush.msra.mxu2 %v13663_v59  ;;  %771 = vmatpush.msrb.mxu1 %v8483_v0  ;;  %v486_v0 = vsel %vm483_vm8, %v8450_v50, %v8687_v14 }
 0x151   :  { %873 = vmatmul.f32.vlgmr.msrb.gmra.mxu3 %v8496_v9  ;;  %7990 = vset.pattern.permute.xlu0 %v8103_v37  ;;  %v8756_v50 = vand.u32 4294901760, %v486_v0 }
 0x152   :  { %1005 = vmatpush.msra.mxu3 %v8448_v49  ;;  %773 = vmatmul.f32.vlgmr.msrb.gmra.mxu1 %v8496_v9 }
 0x153   :  { %898 = vmatpush.msra.mxu0 %v8606_v24  ;;  %925 = vmatpush.msra.mxu1 %v8448_v49  ;;  %v462_v49 = vsel %vm459_vm14, %v8500_v11, %v8696_v23  ;;  %v8767_v11 = vsub.f32 %v510_v42, %v8744_v47  ;;  %v8784_v26 = vsub.f32 %v486_v0, %v8756_v50 }
 0x154   :  { %971 = vmatpush.msra.mxu2 %v838_v34  ;;  %520 = vperm.xlu0 %7990, %v517_v8   ;;  %v8769_v24 = vand.u32 4294901760, %v462_v49 }
 0x155   :  { %1007 = vmatpush.msra.mxu3 %v8468_v38  ;;  %901 = vmatpush.msra.mxu0 %v8603_v20  ;;  %v8774_v20 = vpop.permute.xlu0 %338 }
 0x156   :  { %927 = vmatpush.msra.mxu1 %v8468_v38  ;;  %975 = vmatpush.msra.mxu2 %v844_v2  ;;  %v438_v38 = vsel %vm435_vm10, %v8573_v17, %v8710_v19  ;;  %v506_v34 = vpop.permute.xlu1 %505  ;;  %v1070_v2 = vand.u32 4294901760, %v8767_v11  ;;  %v345_v53 = vsel %vm13501_vm7, %v8625_v43, %v8774_v20 }
 0x157   :  { %1009 = vmatpush.msra.mxu3 %v8522_v30  ;;  %904 = vmatpush.msra.mxu0 %v8658_v45  ;;  %v8781_v17 = vand.u32 4294901760, %v438_v38  ;;  %v8845_v48 = vand.u32 4294901760, %v345_v53 }
 0x158   :  { %929 = vmatpush.msra.mxu1 %v8522_v30  ;;  %979 = vmatpush.msra.mxu2 %v850_v10  ;;  %v414_v30 = vsel %vm411_vm11, %v8570_v16, %v8720_v58  ;;  %v111_v16 = vperm.slane %v8228_v15, 0  ;;  %v8797_v10 = vsub.f32 %v462_v49, %v8769_v24  ;;  %v369_v15 = vsel %vm366_vm13, %v8627_v60, %v8749_v36 }
 0x159   :  { %1011 = vmatpush.msra.mxu3 %v8592_v5  ;;  %907 = vmatpush.msra.mxu0 %v8655_v33  ;;  %v8799_v61 = vand.u32 4294901760, %v414_v30  ;;  %v1071_v45 = vsub.f32 %v8767_v11, %v1070_v2  ;;  %v8832_v22 = vand.u32 4294901760, %v369_v15  ;;  %v8874_v62 = vsub.f32 %v345_v53, %v8845_v48 }
 0x15a   :  { %931 = vmatpush.msra.mxu1 %v8592_v5  ;;  %983 = vmatpush.msra.mxu2 %v856_v63  ;;  %v393_v5 = vsel %vm390_vm12, %v8518_v27, %v8728_v29  ;;  %v8807_v27 = vsub.f32 %v438_v38, %v8781_v17  ;;  %v115_v33 = vmul.f32 %v111_v16, %v8313_v3 }
 0x15b   :  { %1013 = vmatpush.msra.mxu3 %v8590_v54  ;;  %910 = vmatpush.msra.mxu0 %v8668_v6  ;;  %v8812_v46 = vand.u32 4294901760, %v393_v5  ;;  %v8824_v60 = vsub.f32 %v414_v30, %v8799_v61  ;;  %v511_v63 = vsel %vm507_vm9, %v8675_v1, %v506_v34  ;;  %v1072_v28 = vand.u32 4294901760, %v1071_v45 }
 0x15c   :  { %933 = vmatpush.msra.mxu1 %v8590_v54  ;;  %987 = vmatpush.msra.mxu2 %v862_v18  ;;  %v482_v54 = vpop.permute.xlu2 %481  ;;  %v1088_v6 = vand.u32 4294901760, %v8807_v27  ;;  %v8871_v44 = vand.u32 4294901760, %v511_v63 }
 0x15d   :  { %913 = vmatmul.f32.vlgmr.msra.gmra.mxu0 %v8533_v39  ;;  %1015 = vmatpush.msra.mxu3 %v8568_v13  ;;  %v8837_v3 = vsub.f32 %v393_v5, %v8812_v46  ;;  %v458_v56 = vpop.permute.xlu0 %457  ;;  %v1094_v7 = vand.u32 4294901760, %v8824_v60 }
 0x15e   :  { %1035 = vmatpush.msrb.mxu0 %v8744_v47  ;;  %935 = vmatpush.msra.mxu1 %v8568_v13  ;;  %v1076_v13 = vand.u32 4294901760, %v8784_v26  ;;  %v434_v18 = vpop.permute.xlu1 %433  ;;  %v1089_v41 = vsub.f32 %v8807_v27, %v1088_v6  ;;  %v8901_v30 = vsub.f32 %v511_v63, %v8871_v44 }
 0x15f   :  { %991 = vmatpush.msra.mxu2 %v868_v57  ;;  %1017 = vmatpush.msra.mxu3 %v8647_v32  ;;  %v8860_v57 = vsub.f32 %v369_v15, %v8832_v22  ;;  %v1100_v40 = vand.u32 4294901760, %v8837_v3  ;;  %v1095_v4 = vsub.f32 %v8824_v60, %v1094_v7 }
 0x160   :  { %1037 = vmatpush.msrb.mxu0 %v8756_v50  ;;  %937 = vmatpush.msra.mxu1 %v8647_v32  ;;  %v1082_v32 = vand.u32 4294901760, %v8797_v10  ;;  %v1077_v43 = vsub.f32 %v8784_v26, %v1076_v13  ;;  %v1090_v0 = vand.u32 4294901760, %v1089_v41 }
 0x161   :  { %1136 = vmatpush.msrb.mxu2 %v8767_v11  ;;  %1019 = vmatpush.msra.mxu3 %v8645_v31  ;;  %v1106_v42 = vand.u32 4294901760, %v8860_v57  ;;  %v1101_v49 = vsub.f32 %v8837_v3, %v1100_v40  ;;  %v1096_v16 = vand.u32 4294901760, %v1095_v4 }
 0x162   :  { %993 = vmatmul.f32.vlgmr.msra.gmra.mxu2 %v8496_v9  ;;  %1039 = vmatpush.msrb.mxu0 %v8769_v24  ;;  %v1083_v51 = vsub.f32 %v8797_v10, %v1082_v32  ;;  %v1078_v1 = vand.u32 4294901760, %v1077_v43  ;;  %v1320_v43 = vand.u32 4294901760, %v8901_v30 }
 0x163   :  { %1139 = vmatpush.msrb.mxu2 %v8784_v26  ;;  %939 = vmatpush.msra.mxu1 %v8645_v31  ;;  %v8849_v31 = vand.u32 4294901760, %v115_v33 }
 0x164   :  { %1021 = vmatpush.msra.mxu3 %v8643_v55  ;;  %1041 = vmatpush.msrb.mxu0 %v8781_v17  ;;  %v410_v21 = vpop.permute.xlu2 %409  ;;  %v1084_v52 = vand.u32 4294901760, %v1083_v51  ;;  %v1321_v4 = vsub.f32 %v8901_v30, %v1320_v43 }
 0x165   :  { %1142 = vmatpush.msrb.mxu2 %v8797_v10  ;;  %941 = vmatpush.msra.mxu1 %v8643_v55  ;;  %v487_v55 = vsel %vm483_vm8, %v8687_v14, %v482_v54  ;;  %v463_v14 = vsel %vm459_vm14, %v8696_v23, %v458_v56  ;;  %v8885_v59 = vsub.f32 %v115_v33, %v8849_v31  ;;  %v389_v5 = vpop.permute.xlu0 %388  ;;  %v1102_v56 = vand.u32 4294901760, %v1101_v49 }
 0x166   :  { %1023 = vmatmul.f32.vlgmr.msra.gmra.mxu3 %v8496_v9  ;;  %945 = vmatmul.f32.vlgmr.msra.gmra.mxu1 %v8566_v12  ;;  %v8887_v8 = vand.u32 4294901760, %v487_v55  ;;  %v439_v23 = vsel %vm435_vm10, %v8710_v19, %v434_v18  ;;  %v415_v38 = vsel %vm411_vm11, %v8720_v58, %v410_v21  ;;  %v8903_v34 = vand.u32 4294901760, %v463_v14  ;;  %v365_v53 = vpop.permute.xlu1 %364 }
 0x167   :  { %1175 = vmatpush.msrb.mxu3 %v8744_v47  ;;  %1043 = vmatpush.msrb.mxu0 %v8799_v61  ;;  %v1112_v19 = vand.u32 4294901760, %v8874_v62  ;;  %v1118_v54 = vand.u32 4294901760, %v8885_v59  ;;  %v8913_v15 = vand.u32 4294901760, %v439_v23  ;;  %v1107_v33 = vsub.f32 %v8860_v57, %v1106_v42 }
 0x168   :  { %1073 = vmatpush.msrb.mxu1 %v1072_v28  ;;  %1145 = vmatpush.msrb.mxu2 %v8807_v27  ;;  %v8911_v58 = vsub.f32 %v487_v55, %v8887_v8  ;;  %v8920_v45 = vand.u32 4294901760, %v415_v38  ;;  %v8925_v63 = vsub.f32 %v463_v14, %v8903_v34  ;;  %v394_v18 = vsel %vm390_vm12, %v8728_v29, %v389_v5  ;;  %v8002_v29 = vld [vmem:[%s13484_s3 + $0x18] sm:$0xff] }
 0x169   :  { %1177 = vmatpush.msrb.mxu3 %v8756_v50  ;;  %1045 = vmatpush.msrb.mxu0 %v8812_v46  ;;  %v1113_v28 = vsub.f32 %v8874_v62, %v1112_v19  ;;  %v1119_v51 = vsub.f32 %v8885_v59, %v1118_v54  ;;  %v112_v55 = vperm.slane %v8002_v29, 0  ;;  %v8943_v41 = vsub.f32 %v439_v23, %v8913_v15 }
 0x16a   :  { %1079 = vmatpush.msrb.mxu1 %v1078_v1  ;;  %1148 = vmatpush.msrb.mxu2 %v8824_v60  ;;  %v370_v21 = vsel %vm366_vm13, %v8749_v36, %v365_v53  ;;  %v1108_v11 = vand.u32 4294901760, %v1107_v33  ;;  %v1326_v14 = vand.u32 4294901760, %v8911_v58  ;;  %v8961_v36 = vsub.f32 %v415_v38, %v8920_v45  ;;  %v9020_v60 = vld [vmem:[%s13487_s6 + $0x8] sm:$0xff] }
 0x16b   :  { %1179 = vmatpush.msrb.mxu3 %v8769_v24  ;;  %1047 = vmatpush.msrb.mxu0 %v8832_v22  ;;  %v1114_v23 = vand.u32 4294901760, %v1113_v28  ;;  %v8970_v26 = vand.u32 4294901760, %v370_v21  ;;  %v1120_v38 = vand.u32 4294901760, %v1119_v51 }
 0x16c   :  { %1085 = vmatpush.msrb.mxu1 %v1084_v52  ;;  %1151 = vmatpush.msrb.mxu2 %v8837_v3  ;;  %v341_v1 = vpop.permute.xlu2 %340  ;;  %v8955_v52 = vand.u32 4294901760, %v394_v18  ;;  %v1327_v5 = vsub.f32 %v8911_v58, %v1326_v14 }
 0x16d   :  { %1181 = vmatpush.msrb.mxu3 %v8781_v17  ;;  %1049 = vmatpush.msrb.mxu0 %v8845_v48  ;;  %v346_v49 = vsel %vm13501_vm7, %v8774_v20, %v341_v1  ;;  %v116_v20 = vmul.f32 %v112_v55, %v8350_v35  ;;  %v1344_v35 = vand.u32 4294901760, %v8961_v36  ;;  %vm13664_vm7 = vcmask 7168  }
 0x16e   :  { %1091 = vmatpush.msrb.mxu1 %v1090_v0  ;;  %1154 = vmatpush.msrb.mxu2 %v8860_v57  ;;  %v1332_v0 = vand.u32 4294901760, %v8925_v63  ;;  %v8983_v33 = vsub.f32 %v394_v18, %v8955_v52  ;;  %v8988_v10 = vand.u32 4294901760, %v346_v49  ;;  %v1328_v27 = vand.u32 4294901760, %v1327_v5 }
 0x16f   :  { %1183 = vmatpush.msrb.mxu3 %v8799_v61  ;;  %1051 = vmatpush.msrb.mxu0 %v8849_v31  ;;  %v9004_v18 = vand.u32 4294901760, %v116_v20  ;;  %v1345_v55 = vsub.f32 %v8961_v36, %v1344_v35 }
 0x170   :  { %1097 = vmatpush.msrb.mxu1 %v1096_v16  ;;  %1157 = vmatpush.msrb.mxu2 %v8874_v62  ;;  %v1338_v16 = vand.u32 4294901760, %v8943_v41  ;;  %v1333_v53 = vsub.f32 %v8925_v63, %v1332_v0  ;;  %v1350_v28 = vand.u32 4294901760, %v8983_v33  ;;  %v9011_v51 = vsub.f32 %v346_v49, %v8988_v10 }
 0x171   :  { %1057 = vmatmul.f32.vlgmr.msrb.gmra.mxu0 %v8620_v25  ;;  %1185 = vmatpush.msrb.mxu3 %v8812_v46  ;;  %v9028_v1 = vsub.f32 %v116_v20, %v9004_v18  ;;  %v1346_v3 = vand.u32 4294901760, %v1345_v55 }
 0x172   :  { %1209 = vmatpush.msra.mxu0 %v1070_v2  ;;  %1103 = vmatpush.msrb.mxu1 %v1102_v56  ;;  %v8952_v2 = vld [vmem:[%s13487_s6] sm:$0xff]  ;;  %v8996_v56 = vsub.f32 %v370_v21, %v8970_v26  ;;  %v1334_v29 = vand.u32 4294901760, %v1333_v53  ;;  %v1686_v21 = vperm.slane %v9020_v60, 6 }
 0x173   :  { %1160 = vmatpush.msrb.mxu2 %v8885_v59  ;;  %1187 = vmatpush.msrb.mxu3 %v8832_v22  ;;  %v1368_v57 = vand.u32 4294901760, %v9028_v1  ;;  %v1627_v59 = vperm.slane %v8952_v2, 3 }
 0x174   :  { %1213 = vmatpush.msra.mxu0 %v1076_v13  ;;  %1109 = vmatpush.msrb.mxu1 %v1108_v11  ;;  %v1714_v13 = vperm.slane %v8952_v2, 7 }
 0x175   :  { %1285 = vmatpush.msra.mxu2 %v8871_v44  ;;  %1189 = vmatpush.msrb.mxu3 %v8845_v48 }
 0x176   :  { %1163 = vmatmul.f32.vlgmr.msrb.gmra.mxu2 %v8533_v39  ;;  %1217 = vmatpush.msra.mxu0 %v1082_v32  ;;  %v1322_v32 = vand.u32 4294901760, %v1321_v4 }
 0x177   :  { %1287 = vmatpush.msra.mxu2 %v8887_v8  ;;  %1115 = vmatpush.msrb.mxu1 %v1114_v23 }
 0x178   :  { %1191 = vmatpush.msrb.mxu3 %v8849_v31  ;;  %1221 = vmatpush.msra.mxu0 %v1088_v6  ;;  %v1339_v6 = vsub.f32 %v8943_v41, %v1338_v16 }
 0x179   :  { %1289 = vmatpush.msra.mxu2 %v8903_v34  ;;  %1121 = vmatpush.msrb.mxu1 %v1120_v38 }
 0x17a   :  { %1195 = vmatmul.f32.vlgmr.msrb.gmra.mxu3 %v8566_v12  ;;  %1722 = vrot.lane.b32.xlu0 %v1714_v13, %s8089_s21 }
 0x17b   :  { %1323 = vmatpush.msra.mxu3 %v1322_v32  ;;  %1123 = vmatmul.f32.vlgmr.msrb.gmra.mxu1 %v8496_v9 }
 0x17c   :  { %1225 = vmatpush.msra.mxu0 %v1094_v7  ;;  %1255 = vmatpush.msra.mxu1 %v8744_v47  ;;  %v1356_v47 = vand.u32 4294901760, %v8996_v56  ;;  %v1340_v7 = vand.u32 4294901760, %v1339_v6 }
 0x17d   :  { %1291 = vmatpush.msra.mxu2 %v8913_v15  ;;  %1329 = vmatpush.msra.mxu3 %v1328_v27 }
 0x17e   :  { %1229 = vmatpush.msra.mxu0 %v1100_v40  ;;  %1257 = vmatpush.msra.mxu1 %v8756_v50  ;;  %v1351_v50 = vsub.f32 %v8983_v33, %v1350_v28  ;;  %v1362_v40 = vand.u32 4294901760, %v9011_v51 }
 0x17f   :  { %1293 = vmatpush.msra.mxu2 %v8920_v45  ;;  %1335 = vmatpush.msra.mxu3 %v1334_v29 }
 0x180   :  { %1233 = vmatpush.msra.mxu0 %v1106_v42  ;;  %1259 = vmatpush.msra.mxu1 %v8769_v24  ;;  %v1357_v24 = vsub.f32 %v8996_v56, %v1356_v47  ;;  %v1352_v42 = vand.u32 4294901760, %v1351_v50 }
 0x181   :  { %1295 = vmatpush.msra.mxu2 %v8955_v52  ;;  %1341 = vmatpush.msra.mxu3 %v1340_v7 }
 0x182   :  { %1237 = vmatpush.msra.mxu0 %v1112_v19  ;;  %1261 = vmatpush.msra.mxu1 %v8781_v17  ;;  %v1363_v17 = vsub.f32 %v9011_v51, %v1362_v40  ;;  %v1358_v62 = vand.u32 4294901760, %v1357_v24  ;;  %v1369_v19 = vsub.f32 %v9028_v1, %v1368_v57 }
 0x183   :  { %1297 = vmatpush.msra.mxu2 %v8970_v26  ;;  %1347 = vmatpush.msra.mxu3 %v1346_v3 }
 0x184   :  { %1695 = vrot.lane.b32.xlu0 %v1686_v21, %s8090_s28  ;;  %1241 = vmatpush.msra.mxu0 %v1118_v54 }
 0x185   :  { %1263 = vmatpush.msra.mxu1 %v8799_v61  ;;  %1299 = vmatpush.msra.mxu2 %v8988_v10  ;;  %v1364_v61 = vand.u32 4294901760, %v1363_v17 }
 0x186   :  { %1243 = vmatmul.f32.vlgmr.msra.gmra.mxu0 %v8496_v9  ;;  %1353 = vmatpush.msra.mxu3 %v1352_v42 }
 0x187   :  { %1386 = vmatpush.msrb.mxu0 %v8901_v30  ;;  %1265 = vmatpush.msra.mxu1 %v8812_v46  ;;  %v1370_v46 = vand.u32 4294901760, %v1369_v19  ;;  %v1656_v30 = vperm.slane %v8952_v2, 5 }
 0x188   :  { %1301 = vmatpush.msra.mxu2 %v9004_v18  ;;  %1359 = vmatpush.msra.mxu3 %v1358_v62 }
 0x189   :  { %1307 = vmatmul.f32.vlgmr.msra.gmra.mxu2 %v8620_v25  ;;  %1389 = vmatpush.msrb.mxu0 %v8911_v58  ;;  %v1599_v25 = vperm.slane %v9020_v60, 2  ;;  %v1628_v58 = vperm.slane %v9020_v60, 3 }
 0x18a   :  { %1459 = vmatpush.msrb.mxu2 %v1320_v43  ;;  %1267 = vmatpush.msra.mxu1 %v8832_v22  ;;  %v7996_v22 = vld [vmem:[%s13487_s6 + $0x20] ss:$0 sm:$0xff]  ;;  %v9152_v43 = vld [vmem:[%s13487_s6 + $0x18] sm:$0xff] }
 0x18b   :  { %1365 = vmatpush.msra.mxu3 %v1364_v61  ;;  %1392 = vmatpush.msrb.mxu0 %v8925_v63  ;;  %v1717_v63 = vperm.slane %v9152_v43, 7  ;;  %v1659_v20 = vperm.slane %v9152_v43, 5 }
 0x18c   :  { %1463 = vmatpush.msrb.mxu2 %v1326_v14  ;;  %1269 = vmatpush.msra.mxu1 %v8845_v48  ;;  %v7997_v48 = vld [vmem:[%s13487_s6 + $0x28] ss:$0 sm:$0xff] }
 0x18d   :  { %1371 = vmatpush.msra.mxu3 %v1370_v46  ;;  %1395 = vmatpush.msrb.mxu0 %v8943_v41 }
 0x18e   :  { %1467 = vmatpush.msrb.mxu2 %v1332_v0  ;;  %1635 = vrot.lane.b32.xlu0 %v1627_v59, %s8092_s17 }
 0x18f   :  { %1271 = vmatpush.msra.mxu1 %v8849_v31  ;;  %1373 = vmatmul.f32.vlgmr.msra.gmra.mxu3 %v8496_v9  ;;  %v1570_v31 = vperm.slane %v9020_v60, 1 }
 0x190   :  { %1505 = vmatpush.msrb.mxu3 %v8871_v44  ;;  %1273 = vmatmul.f32.vlgmr.msra.gmra.mxu1 %v8496_v9 }
 0x191   :  { %1398 = vmatpush.msrb.mxu0 %v8961_v36  ;;  %1425 = vmatpush.msrb.mxu1 %v8871_v44  ;;  %v1715_v44 = vperm.slane %v9020_v60, 7 }
 0x192   :  { %1471 = vmatpush.msrb.mxu2 %v1338_v16  ;;  %1507 = vmatpush.msrb.mxu3 %v8887_v8 }
 0x193   :  { %1401 = vmatpush.msrb.mxu0 %v8983_v33  ;;  %1427 = vmatpush.msrb.mxu1 %v8887_v8  ;;  %v1533_v8 = vld [vmem:[%s13487_s6 + $0x10] sm:$0xff] }
 0x194   :  { %1475 = vmatpush.msrb.mxu2 %v1344_v35  ;;  %1509 = vmatpush.msrb.mxu3 %v8903_v34  ;;  %v1600_v54 = vperm.slane %v1533_v8, 2  ;;  %v1658_v41 = vperm.slane %v1533_v8, 5  ;;  %v1716_v11 = vperm.slane %v1533_v8, 7  ;;  %v1571_v4 = vperm.slane %v1533_v8, 1 }
 0x195   :  { %1404 = vmatpush.msrb.mxu0 %v8996_v56  ;;  %1429 = vmatpush.msrb.mxu1 %v8903_v34  ;;  %v1657_v34 = vperm.slane %v9020_v60, 5 }
 0x196   :  { %1479 = vmatpush.msrb.mxu2 %v1350_v28  ;;  %1511 = vmatpush.msrb.mxu3 %v8913_v15 }
 0x197   :  { %1407 = vmatpush.msrb.mxu0 %v9011_v51  ;;  %1431 = vmatpush.msrb.mxu1 %v8913_v15  ;;  %v7999_v15 = vld [vmem:[%s13487_s6 + $0x30] ss:$0 sm:$0xff] }
 0x198   :  { %1483 = vmatpush.msrb.mxu2 %v1356_v47  ;;  %1608 = vrot.lane.b32.xlu0 %v1599_v25, %s8093_s18 }
 0x199   :  { %1751 = vrot.lane.b32.xlu1 %v7996_v22, %s8088_s20  ;;  %1513 = vmatpush.msrb.mxu3 %v8920_v45 }
 0x19a   :  { %1410 = vmatpush.msrb.mxu0 %v9028_v1  ;;  %1433 = vmatpush.msrb.mxu1 %v8920_v45  ;;  %v1569_v45 = vperm.slane %v8952_v2, 1 }
 0x19b   :  { %1487 = vmatpush.msrb.mxu2 %v1362_v40  ;;  %1413 = vmatmul.f32.vlgmr.msrb.gmra.mxu0 %v8533_v39  ;;  %v1685_v39 = vperm.slane %v8952_v2, 6 }
 0x19c   :  { %1515 = vmatpush.msrb.mxu3 %v8955_v52  ;;  %1435 = vmatpush.msrb.mxu1 %v8955_v52  ;;  %v1688_v52 = vperm.slane %v9152_v43, 6 }
 0x19d   :  { %1491 = vmatpush.msrb.mxu2 %v1368_v57  ;;  %1753 = vrot.lane.b32.xlu2 %v7997_v48, %s8088_s20 }
 0x19e   :  { %1517 = vmatpush.msrb.mxu3 %v8970_v26  ;;  %1437 = vmatpush.msrb.mxu1 %v8970_v26  ;;  %v1629_v26 = vperm.slane %v1533_v8, 3 }
 0x19f   :  { %1493 = vmatmul.f32.vlgmr.msrb.gmra.mxu2 %v8496_v9  ;;  %7991 = vset.pattern.permute.xlu2 %v8103_v37  ;;  %v1687_v37 = vperm.slane %v1533_v8, 6 }
 0x1a0   :  { %1519 = vmatpush.msrb.mxu3 %v8988_v10  ;;  %1439 = vmatpush.msrb.mxu1 %v8988_v10 }
 0x1a1   :  { %1579 = vrot.lane.b32.xlu0 %v1570_v31, %s8094_s19  ;;  %1724 = vrot.lane.b32.xlu1 %v1715_v44, %s8089_s21 }
 0x1a2   :  { %1521 = vmatpush.msrb.mxu3 %v9004_v18  ;;  %1441 = vmatpush.msrb.mxu1 %v9004_v18 }
 0x1a3   :  { %1523 = vmatmul.f32.vlgmr.msrb.gmra.mxu3 %v8496_v9  ;;  %1445 = vmatmul.f32.vlgmr.msrb.gmra.mxu1 %v8566_v12  ;;  %v1598_v9 = vperm.slane %v8952_v2, 2  ;;  %v7998_v12 = vld [vmem:[%s13487_s6 + $0x38] ss:$0 sm:$0xff] }
 0x1a5   :  { %1693 = vrot.lane.b32.xlu2 %v1685_v39, %s8090_s28 }
 0x1a9   :  { %1697 = vrot.lane.b32.xlu0 %v1687_v37, %s8090_s28  ;;  %1664 = vrot.lane.b32.xlu1 %v1656_v30, %s8091_s29 }
 0x1ad   :  { %1666 = vrot.lane.b32.xlu2 %v1657_v34, %s8091_s29 }
 0x1b1   :  { %1610 = vrot.lane.b32.xlu0 %v1600_v54, %s8093_s18  ;;  %1637 = vrot.lane.b32.xlu1 %v1628_v58, %s8092_s17 }
 0x1b5   :  { %1606 = vrot.lane.b32.xlu2 %v1598_v9, %s8093_s18 }
 0x1b9   :  { %1757 = vrot.lane.b32.xlu0 %v7998_v12, %s8088_s20  ;;  %1755 = vrot.lane.b32.xlu1 %v7999_v15, %s8088_s20 }
 0x1ba   :  { %v558_v14 = vpop.f32.mrf.mxu0 }
 0x1bd   :  { %1577 = vrot.lane.b32.xlu2 %v1569_v45, %s8094_s19 }
 0x1c1   :  { %1728 = vrot.lane.b32.xlu0 %v1717_v63, %s8089_s21  ;;  %1668 = vrot.lane.b32.xlu1 %v1658_v41, %s8091_s29  ;;  %v664_v13 = vpop.f32.mrf.mxu2 }
 0x1c5   :  { %1726 = vrot.lane.b32.xlu2 %v1716_v11, %s8089_s21  ;;  %v624_v36 = vpop.f32.mrf.mxu1 }
 0x1c6   :  { %v521_v23 = vpop.permute.xlu0 %520 }
 0x1c7   :  { %v559_v0 = vadd.f32 %v558_v14, %v521_v23  ;;  %v696_v38 = vpop.f32.mrf.mxu3 }
 0x1c9   :  { %1699 = vrot.lane.b32.xlu0 %v1688_v52, %s8090_s28  ;;  %v625_v49 = vadd.f32 %v624_v36, %v559_v0  ;;  %1581 = vrot.lane.b32.xlu1 %v1571_v4, %s8094_s19 }
 0x1cb   :  { %v665_v5 = vadd.f32 %v664_v13, %v625_v49  ;;  %v744_v16 = vpop.f32.mrf.mxu0 }
 0x1cd   :  { %v697_v33 = vadd.f32 %v696_v38, %v665_v5  ;;  %1639 = vrot.lane.b32.xlu2 %v1629_v26, %s8092_s17  ;;  %v808_v56 = vpop.f32.mrf.mxu2 }
 0x1ce   :  { %v809_v6 = vadd.f32 %v808_v56, %v521_v23 }
 0x1cf   :  { %v745_v10 = vadd.f32 %v744_v16, %v697_v33  ;;  %v774_v32 = vpop.f32.mrf.mxu1 }
 0x1d1   :  { %1670 = vrot.lane.b32.xlu0 %v1659_v20, %s8091_s29  ;;  %v775_v53 = vadd.f32 %v774_v32, %v745_v10 }
 0x1d3   :  { %v1527_v35 = vmax.f32 %v775_v53, 0.0 }
 0x1d4   :  { %v874_v27 = vpop.f32.mrf.mxu3 }
 0x1d5   :  { %1543 = vrot.lane.b32.xlu1 %v1527_v35, %s8087_s8  ;;  %v875_v28 = vadd.f32 %v874_v27, %v809_v6 }
 0x1da   :  { %v914_v18 = vpop.f32.mrf.mxu0 }
 0x1db   :  { %v915_v51 = vadd.f32 %v914_v18, %v875_v28 }
 0x1e3   :  { %v946_v29 = vpop.f32.mrf.mxu1 }
 0x1e4   :  { %v947_v55 = vadd.f32 %v946_v29, %v915_v51 }
 0x1e5   :  { %v994_v47 = vpop.f32.mrf.mxu2 }
 0x1e6   :  { %v995_v7 = vadd.f32 %v994_v47, %v947_v55  ;;  %v1601_v47 = vperm.slane %v9152_v43, 2 }
 0x1e9   :  { %v1024_v1 = vpop.f32.mrf.mxu3 }
 0x1ea   :  { %v1025_v21 = vadd.f32 %v1024_v1, %v995_v7 }
 0x1ec   :  { %v1528_v50 = vmax.f32 %v1025_v21, 0.0  ;;  %v1723_v16 = vpop.permute.xlu0 %1722 }
 0x1ee   :  { %1545 = vrot.lane.b32.xlu2 %v1528_v50, %s8087_s8  ;;  %v1058_v40 = vpop.f32.mrf.mxu0 }
 0x1ef   :  { %v1059_v42 = vadd.f32 %v1058_v40, %v521_v23  ;;  %v1630_v40 = vperm.slane %v9152_v43, 3 }
 0x1f6   :  { %v1696_v33 = vpop.permute.xlu0 %1695 }
 0x1f7   :  { %v9167_v3 = vpop.permute.xlu2 %1753 }
 0x1f8   :  { %v1124_v24 = vpop.f32.mrf.mxu1 }
 0x1f9   :  { %v1125_v17 = vadd.f32 %v1124_v24, %v1059_v42  ;;  %v1164_v62 = vpop.f32.mrf.mxu2 }
 0x1fb   :  { %v1165_v19 = vadd.f32 %v1164_v62, %v1125_v17 }
 0x1fd   :  { %v1196_v61 = vpop.f32.mrf.mxu3 }
 0x1fe   :  { %v1197_v25 = vadd.f32 %v1196_v61, %v1165_v19  ;;  %v1572_v61 = vperm.slane %v9152_v43, 1 }
 0x1ff   :  { %v9169_v57 = vpop.permute.xlu2 %1693 }
 0x200   :  { %v1636_v27 = vpop.permute.xlu0 %1635 }
 0x203   :  { %v1244_v46 = vpop.f32.mrf.mxu0 }
 0x204   :  { %v1245_v48 = vadd.f32 %v1244_v46, %v1197_v25 }
 0x207   :  { %v9171_v59 = vpop.permute.xlu2 %1666 }
 0x20a   :  { %v1609_v29 = vpop.permute.xlu0 %1608 }
 0x20b   :  { %v1752_v22 = vpop.permute.xlu1 %1751 }
 0x20c   :  { %v1308_v34 = vpop.f32.mrf.mxu2  ;;  %v1759_v7 = vsel %vm313_vm1, %v1752_v22, %v9167_v3 }
 0x20d   :  { %v1274_v31 = vpop.f32.mrf.mxu1  ;;  %v1309_v58 = vadd.f32 %v1308_v34, %v521_v23 }
 0x20e   :  { %v1275_v44 = vadd.f32 %v1274_v31, %v1245_v48 }
 0x20f   :  { %v9173_v39 = vpop.permute.xlu2 %1606 }
 0x210   :  { %v1529_v8 = vmax.f32 %v1275_v44, 0.0  ;;  %v1614_v31 = vsel %vm163_vm5, %v9173_v39, %v1609_v29 }
 0x212   :  { %1547 = vrot.lane.b32.xlu1 %v1529_v8, %s8087_s8  ;;  %v1374_v54 = vpop.f32.mrf.mxu3 }
 0x213   :  { %v1725_v37 = vpop.permute.xlu1 %1724  ;;  %v1375_v15 = vadd.f32 %v1374_v54, %v1309_v58  ;;  %v1580_v21 = vpop.permute.xlu0 %1579 }
 0x214   :  { %v1730_v24 = vsel %vm283_vm2, %v1723_v16, %v1725_v37 }
 0x217   :  { %v9176_v30 = vpop.permute.xlu2 %1577 }
 0x218   :  { %v1414_v12 = vpop.f32.mrf.mxu0  ;;  %v1585_v8 = vsel %vm13664_vm7, %v9176_v30, %v1580_v21 }
 0x219   :  { %v1415_v45 = vadd.f32 %v1414_v12, %v1375_v15 }
 0x21b   :  { %v1665_v9 = vpop.permute.xlu1 %1664  ;;  %v1698_v62 = vpop.permute.xlu0 %1697 }
 0x21c   :  { %v1672_v17 = vsel %vm223_vm3, %v1665_v9, %v9171_v59  ;;  %v1702_v34 = vsel %vm253_vm6, %v1696_v33, %v1698_v62 }
 0x21f   :  { %v9178_v63 = vpop.permute.xlu2 %1726 }
 0x220   :  { %v1446_v41 = vpop.f32.mrf.mxu1  ;;  %v9182_v11 = vsel %vm283_vm2, %v1725_v37, %v9178_v63 }
 0x221   :  { %v1447_v14 = vadd.f32 %v1446_v41, %v1415_v45 }
 0x222   :  { %v1494_v52 = vpop.f32.mrf.mxu2 }
 0x223   :  { %v1495_v36 = vadd.f32 %v1494_v52, %v1447_v14  ;;  %v9184_v4 = vpop.permute.xlu1 %1637 }
 0x224   :  { %v1643_v46 = vsel %vm193_vm4, %v1636_v27, %v9184_v4 }
 0x226   :  { %v1524_v0 = vpop.f32.mrf.mxu3 }
 0x227   :  { %v1525_v49 = vadd.f32 %v1524_v0, %v1495_v36  ;;  %v9206_v53 = vpop.permute.xlu2 %1639 }
 0x229   :  { %v1530_v26 = vmax.f32 %v1525_v49, 0.0 }
 0x22b   :  { %1549 = vrot.lane.b32.xlu2 %v1530_v26, %s8087_s8  ;;  %v9187_v23 = vpop.permute.xlu1 %1755  ;;  %s7955_s8 = sshll.u32 %s13493_s12, 4  ;;  %s7956_s8 = int_to_ptr.hbm [resolvable:$true] %s7955_s8 }
 0x22c   :  { %v9192_v13 = vsel %vm313_vm1, %v9167_v3, %v9187_v23 }
 0x233   :  { %v9194_v38 = vpop.permute.xlu1 %1668 }
 0x234   :  { %v9199_v5 = vsel %vm223_vm3, %v9171_v59, %v9194_v38  ;;  %v1701_v59 = vsel %vm253_vm6, %v9169_v57, %v1696_v33 }
 0x23b   :  { %v9201_v20 = vpop.permute.xlu1 %1581 }
 0x23c   :  { %v1586_v36 = vsel %vm13664_vm7, %v1580_v21, %v9201_v20 }
 0x247   :  { %v1544_v10 = vpop.permute.xlu1 %1543 }
 0x248   :  { %v9204_v32 = vsel %vm98_vm0, 0.0, %v1544_v10  ;;  %v1546_v18 = vpop.permute.xlu2 %1545 }
 0x249   :  { %1843 = vrot.lane.b32.xlu1 %v9204_v32, %s8095_s0  ;;  %v1767_v35 = vmul.f32 %v1752_v22, %v9204_v32  ;;  %v1709_v56 = vmul.f32 %v9169_v57, %v9204_v32  ;;  %v1738_v6 = vmul.f32 %v1723_v16, %v9204_v32  ;;  %v1593_v28 = vmul.f32 %v9176_v30, %v9204_v32  ;;  %v1611_v22 = vpop.permute.xlu0 %1610 }
 0x24a   :  { %v9220_v51 = vsel %vm98_vm0, %v1544_v10, %v1546_v18  ;;  %v1680_v55 = vmul.f32 %v1665_v9, %v9204_v32  ;;  %v1651_v50 = vmul.f32 %v1636_v27, %v9204_v32  ;;  %v1622_v3 = vmul.f32 %v9173_v39, %v9204_v32 }
 0x24b   :  { %1935 = vrot.lane.b32.xlu2 %v1767_v35, %s8097_s13  ;;  %1889 = vrot.lane.b32.xlu0 %v1709_v56, %s8098_s14  ;;  %v1768_v1 = vmul.f32 %v1759_v7, %v9220_v51  ;;  %v1739_v42 = vmul.f32 %v1730_v24, %v9220_v51  ;;  %v1681_v19 = vmul.f32 %v1672_v17, %v9220_v51 }
 0x24c   :  { %v1652_v25 = vmul.f32 %v1643_v46, %v9220_v51  ;;  %v1710_v48 = vmul.f32 %v1701_v59, %v9220_v51  ;;  %v1623_v43 = vmul.f32 %v1614_v31, %v9220_v51  ;;  %v1594_v37 = vmul.f32 %v1585_v8, %v9220_v51 }
 0x24d   :  { %v1644_v30 = vsel %vm193_vm4, %v9184_v4, %v9206_v53 }
 0x251   :  { %1912 = vrot.lane.b32.xlu1 %v1738_v6, %s8096_s30  ;;  %v9261_v44 = vpop.permute.xlu0 %1757 }
 0x252   :  { %v1761_v4 = vsel %vm313_vm1, %v9187_v23, %v9261_v44  ;;  %vm13666_vm1 = vcmask 1039360  }
 0x253   :  { %1777 = vrot.lane.b32.xlu0 %v1593_v28, %s8102_s22  ;;  %1845 = vrot.lane.b32.xlu2 %v9220_v51, %s8095_s0 }
 0x259   :  { %1866 = vrot.lane.b32.xlu1 %v1680_v55, %s8099_s7  ;;  %v1729_v9 = vpop.permute.xlu0 %1728 }
 0x25a   :  { %v1732_v10 = vsel %vm283_vm2, %v9178_v63, %v1729_v9  ;;  %vm13667_vm2 = vmmov %vm13666_vm1 }
 0x25b   :  { %1612 = vrot.lane.b32.xlu2 %v1601_v47, %s8093_s18  ;;  %1937 = vrot.lane.b32.xlu0 %v1768_v1, %s8097_s13 }
 0x261   :  { %1823 = vrot.lane.b32.xlu1 %v1651_v50, %s8100_s15  ;;  %v9288_v41 = vpop.permute.xlu0 %1699 }
 0x263   :  { %1641 = vrot.lane.b32.xlu0 %v1630_v40, %s8092_s17  ;;  %1914 = vrot.lane.b32.xlu2 %v1739_v42, %s8096_s30 }
 0x269   :  { %1800 = vrot.lane.b32.xlu1 %v1622_v3, %s8101_s16 }
 0x26b   :  { %1868 = vrot.lane.b32.xlu2 %v1681_v19, %s8099_s7 }
 0x271   :  { %1583 = vrot.lane.b32.xlu1 %v1572_v61, %s8094_s19 }
 0x273   :  { %1825 = vrot.lane.b32.xlu2 %v1652_v25, %s8100_s15 }
 0x279   :  { %1891 = vrot.lane.b32.xlu1 %v1710_v48, %s8098_s14 }
 0x27b   :  { %1802 = vrot.lane.b32.xlu2 %v1623_v43, %s8101_s16 }
 0x281   :  { %1779 = vrot.lane.b32.xlu1 %v1594_v37, %s8102_s22 }
 0x284   :  { %v1548_v57 = vpop.permute.xlu1 %1547 }
 0x285   :  { %v9269_v39 = vsel %vm98_vm0, %v1546_v18, %v1548_v57  ;;  %v1550_v14 = vpop.permute.xlu2 %1549 }
 0x286   :  { %v1711_v54 = vmul.f32 %v1702_v34, %v9269_v39  ;;  %v1769_v58 = vmul.f32 %v9192_v13, %v9269_v39  ;;  %v1740_v12 = vmul.f32 %v9182_v11, %v9269_v39  ;;  %v1682_v15 = vmul.f32 %v9199_v5, %v9269_v39  ;;  %v9308_v5 = vpop.permute.xlu0 %1670 }
 0x287   :  { %v1653_v45 = vmul.f32 %v1644_v30, %v9269_v39  ;;  %v1615_v11 = vsel %vm163_vm5, %v1609_v29, %v1611_v22  ;;  %v9293_v52 = vsel %vm98_vm0, %v1548_v57, %v1550_v14  ;;  %v1595_v0 = vmul.f32 %v1586_v36, %v9269_v39 }
 0x288   :  { %1893 = vrot.lane.b32.xlu0 %v1711_v54, %s8098_s14  ;;  %1939 = vrot.lane.b32.xlu2 %v1769_v58, %s8097_s13  ;;  %v1624_v49 = vmul.f32 %v1615_v11, %v9269_v39  ;;  %v1770_v26 = vmul.f32 %v1761_v4, %v9293_v52  ;;  %v1703_v13 = vsel %vm253_vm6, %v1698_v62, %v9288_v41  ;;  %v9332_v29 = vsel %vm98_vm0, %v1550_v14, 0.0  ;;  %vm13665_vm0 = vmmov %vm13664_vm7 }
 0x289   :  { %1916 = vrot.lane.b32.xlu1 %v1740_v12, %s8096_s30  ;;  %v1674_v23 = vsel %vm223_vm3, %v9194_v38, %v9308_v5  ;;  %v1712_v16 = vmul.f32 %v1703_v13, %v9293_v52  ;;  %v1741_v56 = vmul.f32 %v1732_v10, %v9293_v52  ;;  %v1742_v47 = vmul.f32 %v1729_v9, %v9332_v29  ;;  %vm13669_vm3 = vmmov %vm13666_vm1 }
 0x28a   :  { %v1683_v33 = vmul.f32 %v1674_v23, %v9293_v52  ;;  %v1771_v58 = vmul.f32 %v9261_v44, %v9332_v29  ;;  %v1561_v23 = vperm.slane %v8952_v2, 0  ;;  %vm4880_vm7 = vcmask 1040384  }
 0x290   :  { %1847 = vrot.lane.b32.xlu0 %v9269_v39, %s8095_s0  ;;  %1870 = vrot.lane.b32.xlu2 %v1682_v15, %s8099_s7 }
 0x291   :  { %1827 = vrot.lane.b32.xlu1 %v1653_v45, %s8100_s15 }
 0x298   :  { %1781 = vrot.lane.b32.xlu0 %v1595_v0, %s8102_s22  ;;  %1804 = vrot.lane.b32.xlu2 %v1624_v49, %s8101_s16 }
 0x299   :  { %1941 = vrot.lane.b32.xlu1 %v1770_v26, %s8097_s13 }
 0x2a0   :  { %1895 = vrot.lane.b32.xlu0 %v1712_v16, %s8098_s14  ;;  %1849 = vrot.lane.b32.xlu2 %v9293_v52, %s8095_s0 }
 0x2a1   :  { %1872 = vrot.lane.b32.xlu1 %v1683_v33, %s8099_s7 }
 0x2a5   :  { %v1936_v35 = vpop.permute.xlu2 %1935 }
 0x2a8   :  { %1918 = vrot.lane.b32.xlu2 %v1741_v56, %s8096_s30 }
 0x2ad   :  { %v9323_v38 = vpop.permute.xlu2 %1845 }
 0x2b5   :  { %v9325_v27 = vpop.permute.xlu2 %1612 }
 0x2b6   :  { %v1616_v6 = vsel %vm163_vm5, %v1611_v22, %v9325_v27  ;;  %vm13671_vm5 = vmmov %vm13666_vm1 }
 0x2b7   :  { %v1625_v18 = vmul.f32 %v1616_v6, %v9293_v52 }
 0x2b9   :  { %1806 = vrot.lane.b32.xlu1 %v1625_v18, %s8101_s16 }
 0x2bb   :  { %v1844_v28 = vpop.permute.xlu1 %1843 }
 0x2bc   :  { %v1853_v44 = vsel %vm411_vm11, %v1844_v28, %v9323_v38 }
 0x2bd   :  { %v9334_v63 = vpop.permute.xlu0 %1889  ;;  %v9336_v55 = vpop.permute.xlu2 %1914  ;;  %v9407_v4 = vand.u32 4294901760, %v1853_v44 }
 0x2bf   :  { %v9433_v56 = vsub.f32 %v1853_v44, %v9407_v4 }
 0x2c1   :  { %1920 = vrot.lane.b32.xlu1 %v1742_v47, %s8096_s30 }
 0x2c3   :  { %v1913_v7 = vpop.permute.xlu1 %1912 }
 0x2c4   :  { %v1922_v21 = vsel %vm483_vm8, %v1913_v7, %v9336_v55  ;;  %v1626_v7 = vmul.f32 %v9325_v27, %v9332_v29  ;;  %v2048_v27 = vand.u32 4294901760, %v9433_v56 }
 0x2c5   :  { %v9340_v1 = vpop.permute.xlu0 %1777  ;;  %v9344_v50 = vpop.permute.xlu2 %1868  ;;  %v9346_v40 = vand.u32 4294901760, %v1922_v21 }
 0x2c7   :  { %v9351_v42 = vsub.f32 %v1922_v21, %v9346_v40 }
 0x2c9   :  { %1851 = vrot.lane.b32.xlu1 %v9332_v29, %s8095_s0  ;;  %v2030_v61 = vand.u32 4294901760, %v9351_v42 }
 0x2cb   :  { %v1867_v24 = vpop.permute.xlu1 %1866  ;;  %v2031_v31 = vsub.f32 %v9351_v42, %v2030_v61 }
 0x2cc   :  { %v1876_v15 = vsel %vm435_vm10, %v1867_v24, %v9344_v50 }
 0x2cd   :  { %v1938_v3 = vpop.permute.xlu0 %1937  ;;  %v9362_v46 = vpop.permute.xlu2 %1825  ;;  %v2032_v57 = vand.u32 4294901760, %v2031_v31  ;;  %v9405_v36 = vand.u32 4294901760, %v1876_v15 }
 0x2ce   :  { %v1945_v17 = vsel %vm507_vm9, %v1936_v35, %v1938_v3  ;;  %v1713_v35 = vmul.f32 %v9288_v41, %v9332_v29  ;;  %v1565_v41 = vmul.f32 %v1561_v23, %v9204_v32 }
 0x2cf   :  { %v9354_v62 = vand.u32 4294901760, %v1945_v17  ;;  %v9423_v16 = vsub.f32 %v1876_v15, %v9405_v36 }
 0x2d1   :  { %v9357_v19 = vsub.f32 %v1945_v17, %v9354_v62  ;;  %1981 = vmatpush.msra.mxu0 %v9354_v62  ;;  %2138 = vmatpush.msra.mxu3 %v9354_v62 }
 0x2d3   :  { %v2024_v25 = vand.u32 4294901760, %v9357_v19  ;;  %v1824_v22 = vpop.permute.xlu1 %1823  ;;  %1983 = vmatpush.msra.mxu0 %v9346_v40  ;;  %2094 = vmatpush.msra.mxu2 %v9357_v19 }
 0x2d4   :  { %2140 = vmatpush.msra.mxu3 %v9346_v40  ;;  %v1833_v26 = vsel %vm390_vm12, %v1824_v22, %v9362_v46 }
 0x2d5   :  { %v2025_v59 = vsub.f32 %v9357_v19, %v2024_v25  ;;  %2097 = vmatpush.msra.mxu2 %v9351_v42  ;;  %v9372_v48 = vpop.permute.xlu0 %1641  ;;  %v9382_v54 = vpop.permute.xlu2 %1802  ;;  %v9435_v2 = vand.u32 4294901760, %v1833_v26 }
 0x2d6   :  { %v1645_v43 = vsel %vm193_vm4, %v9206_v53, %v9372_v48  ;;  %v1953_v53 = vld [vmem:[%s13485_s4] sm:$0xff]  ;;  %v1655_v44 = vmul.f32 %v9372_v48, %v9332_v29  ;;  %vm13670_vm4 = vmmov %vm13666_vm1 }
 0x2d7   :  { %v1654_v8 = vmul.f32 %v1645_v43, %v9293_v52  ;;  %v2026_v37 = vand.u32 4294901760, %v2025_v59  ;;  %v1968_v14 = vsel %vm523_vm15, %v1953_v53, 0  ;;  %v9461_v17 = vsub.f32 %v1833_v26, %v9435_v2 }
 0x2d8   :  { %v9412_v49 = vand.u32 4294901760, %v1968_v14 }
 0x2d9   :  { %2027 = vmatpush.msra.mxu1 %v2026_v37  ;;  %1829 = vrot.lane.b32.xlu0 %v1654_v8, %s8100_s15  ;;  %v9481_v8 = vand.u32 4294901760, %v1565_v41 }
 0x2da   :  { %v9442_v28 = vsub.f32 %v1968_v14, %v9412_v49 }
 0x2db   :  { %v1801_v34 = vpop.permute.xlu1 %1800  ;;  %2033 = vmatpush.msra.mxu1 %v2032_v57 }
 0x2dc   :  { %v1810_v6 = vsel %vm366_vm13, %v1801_v34, %v9382_v54  ;;  %v9472_v59 = vand.u32 4294901760, %v9442_v28 }
 0x2dd   :  { %v9453_v21 = vand.u32 4294901760, %v1810_v6 }
 0x2df   :  { %v9484_v37 = vsub.f32 %v1810_v6, %v9453_v21 }
 0x2e1   :  { %1943 = vrot.lane.b32.xlu0 %v1771_v58, %s8097_s13  ;;  %v2060_v48 = vand.u32 4294901760, %v9484_v37 }
 0x2e2   :  { %v9398_v11 = vpop.permute.xlu2 %1939 }
 0x2e3   :  { %v1584_v9 = vpop.permute.xlu1 %1583  ;;  %v1946_v0 = vsel %vm507_vm9, %v1938_v3, %v9398_v11  ;;  %v2042_v3 = vand.u32 4294901760, %v9423_v16 }
 0x2e4   :  { %v1587_v12 = vsel %vm13665_vm0, %v9201_v20, %v1584_v9  ;;  %v1597_v30 = vmul.f32 %v1584_v9, %v9332_v29  ;;  %v1684_v20 = vmul.f32 %v9308_v5, %v9332_v29  ;;  %v1954_v5 = vld [vmem:[%s13485_s4 + $0x8] sm:$0xff]  ;;  %v9425_v33 = vand.u32 4294901760, %v1946_v0 }
 0x2e5   :  { %v1596_v45 = vmul.f32 %v1587_v12, %v9293_v52  ;;  %v1971_v47 = vsel %vm523_vm15, %v1954_v5, 0  ;;  %v2043_v58 = vsub.f32 %v9423_v16, %v2042_v3  ;;  %v1956_v29 = vld [vmem:[%s13486_s5 + $0x8] sm:$0xff]  ;;  %vm13683_vm15 = vmmov %vm13666_vm1 }
 0x2e6   :  { %1785 = vrot.lane.b32.xlu1 %v1597_v30, %s8102_s22  ;;  %v9456_v24 = vsub.f32 %v1946_v0, %v9425_v33  ;;  %v9467_v22 = vand.u32 4294901760, %v1971_v47  ;;  %v2049_v30 = vsub.f32 %v9433_v56, %v2048_v27 }
 0x2e7   :  { %1783 = vrot.lane.b32.xlu2 %v1596_v45, %s8102_s22  ;;  %v2001_v45 = vsub.f32 %v9442_v28, %v9472_v59  ;;  %v2044_v26 = vand.u32 4294901760, %v2043_v58 }
 0x2e8   :  { %v13502_v57 = vand.u32 4294901760, %v9456_v24  ;;  %v9505_v15 = vsub.f32 %v1971_v47, %v9467_v22  ;;  %v2050_v23 = vand.u32 4294901760, %v2049_v30 }
 0x2e9   :  { %1874 = vrot.lane.b32.xlu0 %v1684_v20, %s8099_s7  ;;  %v9517_v20 = vsub.f32 %v1565_v41, %v9481_v8  ;;  %v9539_v6 = vand.u32 4294901760, %v2001_v45 }
 0x2ea   :  { %v9494_v9 = vpop.permute.xlu2 %1870  ;;  %v2306_v0 = vsub.f32 %v9456_v24, %v13502_v57  ;;  %v9543_v41 = vand.u32 4294901760, %v9505_v15 }
 0x2eb   :  { %v9416_v13 = vpop.permute.xlu1 %1891 }
 0x2ec   :  { %v1899_v10 = vsel %vm459_vm14, %v9334_v63, %v9416_v13 }
 0x2ed   :  { %v9439_v18 = vand.u32 4294901760, %v1899_v10 }
 0x2ef   :  { %v9446_v63 = vsub.f32 %v1899_v10, %v9439_v18  ;;  %1897 = vrot.lane.b32.xlu2 %v1713_v35, %s8098_s14  ;;  %1985 = vmatpush.msra.mxu0 %v9439_v18  ;;  %v1877_v10 = vsel %vm435_vm10, %v9344_v50, %v9494_v9 }
 0x2f0   :  { %2142 = vmatpush.msra.mxu3 %v9439_v18  ;;  %v9561_v30 = vand.u32 4294901760, %v1877_v10 }
 0x2f1   :  { %1987 = vmatpush.msra.mxu0 %v9405_v36  ;;  %2100 = vmatpush.msra.mxu2 %v9446_v63  ;;  %v2036_v32 = vand.u32 4294901760, %v9446_v63 }
 0x2f2   :  { %2144 = vmatpush.msra.mxu3 %v9405_v36  ;;  %1808 = vrot.lane.b32.xlu0 %v1626_v7, %s8101_s16  ;;  %v9589_v57 = vsub.f32 %v1877_v10, %v9561_v30  ;;  %v1562_v10 = vperm.slane %v9020_v60, 0 }
 0x2f3   :  { %v9474_v31 = vpop.permute.xlu1 %1779  ;;  %1989 = vmatpush.msra.mxu0 %v9407_v4  ;;  %2103 = vmatpush.msra.mxu2 %v9423_v16  ;;  %v2037_v43 = vsub.f32 %v9446_v63, %v2036_v32 }
 0x2f4   :  { %v1787_v34 = vsel %vm13666_vm1, %v9340_v1, %v9474_v31  ;;  %2146 = vmatpush.msra.mxu3 %v9407_v4  ;;  %v2054_v1 = vand.u32 4294901760, %v9461_v17 }
 0x2f5   :  { %v9496_v53 = vand.u32 4294901760, %v1787_v34  ;;  %1991 = vmatpush.msra.mxu0 %v9435_v2  ;;  %2106 = vmatpush.msra.mxu2 %v9433_v56  ;;  %v2038_v12 = vand.u32 4294901760, %v2037_v43  ;;  %v2072_v43 = vand.u32 4294901760, %v9517_v20 }
 0x2f6   :  { %2148 = vmatpush.msra.mxu3 %v9435_v2  ;;  %v2055_v5 = vsub.f32 %v9461_v17, %v2054_v1 }
 0x2f7   :  { %v9513_v14 = vsub.f32 %v1787_v34, %v9496_v53  ;;  %1993 = vmatpush.msra.mxu0 %v9453_v21  ;;  %2039 = vmatpush.msra.mxu1 %v2038_v12  ;;  %v2307_v12 = vand.u32 4294901760, %v2306_v0  ;;  %v2009_v0 = vsub.f32 %v9505_v15, %v9543_v41 }
 0x2f8   :  { %2109 = vmatpush.msra.mxu2 %v9461_v17  ;;  %2150 = vmatpush.msra.mxu3 %v9453_v21 }
 0x2f9   :  { %1831 = vrot.lane.b32.xlu2 %v1655_v44, %s8100_s15  ;;  %1995 = vmatpush.msra.mxu0 %v9496_v53  ;;  %v2066_v47 = vand.u32 4294901760, %v9513_v14  ;;  %v2056_v44 = vand.u32 4294901760, %v2055_v5 }
 0x2fa   :  { %v9536_v35 = vpop.permute.xlu0 %1893  ;;  %2045 = vmatpush.msra.mxu1 %v2044_v26  ;;  %2112 = vmatpush.msra.mxu2 %v9484_v37  ;;  %v9573_v26 = vpop.permute.xlu2 %1804 }
 0x2fb   :  { %v1900_v7 = vsel %vm459_vm14, %v9416_v13, %v9536_v35  ;;  %2152 = vmatpush.msra.mxu3 %v9496_v53  ;;  %1964 = vperm.xlu0 %7990, %v1956_v29   ;;  %v9549_v50 = vpop.permute.xlu1 %1916  ;;  %v2061_v13 = vsub.f32 %v9484_v37, %v2060_v48 }
 0x2fc   :  { %v9552_v34 = vand.u32 4294901760, %v1900_v7  ;;  %v1923_v58 = vsel %vm483_vm8, %v9336_v55, %v9549_v50  ;;  %1997 = vmatpush.msra.mxu0 %v9481_v8  ;;  %2051 = vmatpush.msra.mxu1 %v2050_v23  ;;  %v2067_v55 = vsub.f32 %v9513_v14, %v2066_v47 }
 0x2fd   :  { %v9563_v45 = vand.u32 4294901760, %v1923_v58  ;;  %2115 = vmatpush.msra.mxu2 %v9513_v14  ;;  %2154 = vmatpush.msra.mxu3 %v9481_v8  ;;  %v2062_v5 = vand.u32 4294901760, %v2061_v13  ;;  %v9601_v13 = vand.u32 4294901760, %v2009_v0 }
 0x2fe   :  { %2003 = vmatmul.f32.vlgmr.msra.gmra.mxu0 %v9539_v6  ;;  %v9576_v29 = vsub.f32 %v1900_v7, %v9552_v34  ;;  %2057 = vmatpush.msra.mxu1 %v2056_v44 }
 0x2ff   :  { %2308 = vmatpush.msrb.mxu3 %v2307_v12  ;;  %v9579_v23 = vsub.f32 %v1923_v58, %v9563_v45  ;;  %2178 = vmatpush.msrb.mxu0 %v2024_v25  ;;  %v2073_v12 = vsub.f32 %v9517_v20, %v2072_v43  ;;  %v1811_v25 = vsel %vm366_vm13, %v9382_v54, %v9573_v26  ;;  %v2068_v58 = vand.u32 4294901760, %v2067_v55 }
 0x300   :  { %2118 = vmatpush.msra.mxu2 %v9517_v20  ;;  %2158 = vmatmul.f32.vlgmr.msra.gmra.mxu3 %v9472_v59  ;;  %v2317_v54 = vand.u32 4294901760, %v9576_v29  ;;  %v9618_v0 = vand.u32 4294901760, %v1811_v25 }
 0x301   :  { %2182 = vmatpush.msrb.mxu0 %v2030_v61  ;;  %v2311_v19 = vand.u32 4294901760, %v9579_v23  ;;  %2063 = vmatpush.msra.mxu1 %v2062_v5  ;;  %v2074_v55 = vand.u32 4294901760, %v2073_v12 }
 0x302   :  { %2262 = vmatpush.msrb.mxu2 %v9425_v33  ;;  %v9598_v7 = vpop.permute.xlu0 %1847  ;;  %v2318_v12 = vsub.f32 %v9576_v29, %v2317_v54 }
 0x303   :  { %2121 = vmatmul.f32.vlgmr.msra.gmra.mxu2 %v9442_v28  ;;  %v1854_v42 = vsel %vm411_vm11, %v9323_v38, %v9598_v7  ;;  %2186 = vmatpush.msrb.mxu0 %v2036_v32  ;;  %v9610_v61 = vpop.permute.xlu1 %1827  ;;  %v2312_v63 = vsub.f32 %v9579_v23, %v2311_v19  ;;  %v2323_v32 = vand.u32 4294901760, %v9589_v57 }
 0x304   :  { %2264 = vmatpush.msrb.mxu2 %v9563_v45  ;;  %v9613_v44 = vand.u32 4294901760, %v1854_v42  ;;  %2069 = vmatpush.msra.mxu1 %v2068_v58  ;;  %v1834_v60 = vsel %vm390_vm12, %v9362_v46, %v9610_v61  ;;  %v1566_v46 = vmul.f32 %v1562_v10, %v9220_v51  ;;  %v9647_v51 = vsub.f32 %v1811_v25, %v9618_v0 }
 0x305   :  { %2190 = vmatpush.msrb.mxu0 %v2042_v3  ;;  %v9623_v38 = vand.u32 4294901760, %v1834_v60  ;;  %v2313_v3 = vand.u32 4294901760, %v2312_v63  ;;  %v2324_v56 = vsub.f32 %v9589_v57, %v2323_v32  ;;  %v9700_v63 = vpop.permute.xlu2 %1849 }
 0x306   :  { %2266 = vmatpush.msrb.mxu2 %v9552_v34  ;;  %v9630_v5 = vsub.f32 %v1854_v42, %v9613_v44  ;;  %2075 = vmatpush.msra.mxu1 %v2074_v55 }
 0x307   :  { %2011 = vmatmul.f32.gmra.mxu0 %v9601_v13  ;;  %v9635_v16 = vsub.f32 %v1834_v60, %v9623_v38  ;;  %2077 = vmatmul.f32.vlgmr.msra.gmra.mxu1 %v9412_v49  ;;  %v2325_v37 = vand.u32 4294901760, %v2324_v56 }
 0x308   :  { %2194 = vmatpush.msrb.mxu0 %v2048_v27  ;;  %2228 = vmatpush.msrb.mxu1 %v9354_v62  ;;  %v2329_v58 = vand.u32 4294901760, %v9630_v5  ;;  %v9659_v62 = vand.u32 4294901760, %v1566_v46 }
 0x309   :  { %2268 = vmatpush.msrb.mxu2 %v9561_v30  ;;  %2314 = vmatpush.msrb.mxu3 %v2313_v3  ;;  %v2335_v27 = vand.u32 4294901760, %v9635_v16 }
 0x30a   :  { %2198 = vmatpush.msrb.mxu0 %v2054_v1  ;;  %v9655_v10 = vpop.permute.xlu0 %1781  ;;  %2230 = vmatpush.msrb.mxu1 %v9346_v40  ;;  %v2319_v1 = vand.u32 4294901760, %v2318_v12  ;;  %v2330_v40 = vsub.f32 %v9630_v5, %v2329_v58 }
 0x30b   :  { %2270 = vmatpush.msrb.mxu2 %v9613_v44  ;;  %v1788_v17 = vsel %vm13667_vm2, %v9474_v31, %v9655_v10  ;;  %v2336_v31 = vsub.f32 %v9635_v16, %v2335_v27  ;;  %2164 = vmatmul.f32.gmra.mxu3 %v9543_v41 }
 0x30c   :  { %2126 = vmatmul.f32.gmra.mxu2 %v9505_v15  ;;  %2202 = vmatpush.msrb.mxu0 %v2060_v48  ;;  %v9667_v25 = vand.u32 4294901760, %v1788_v17  ;;  %v2341_v48 = vand.u32 4294901760, %v9647_v51  ;;  %v2331_v14 = vand.u32 4294901760, %v2330_v40 }
 0x30d   :  { %2232 = vmatpush.msrb.mxu1 %v9439_v18  ;;  %2272 = vmatpush.msrb.mxu2 %v9623_v38  ;;  %v9686_v18 = vsub.f32 %v1566_v46, %v9659_v62  ;;  %v9716_v46 = vpop.permute.xlu1 %1941 }
 0x30e   :  { %2320 = vmatpush.msrb.mxu3 %v2319_v1  ;;  %2206 = vmatpush.msrb.mxu0 %v2066_v47  ;;  %v9681_v42 = vsub.f32 %v1788_v17, %v9667_v25  ;;  %v2337_v47 = vand.u32 4294901760, %v2336_v31  ;;  %v1955_v1 = vld [vmem:[%s13486_s5] sm:$0xff] }
 0x30f   :  { %2234 = vmatpush.msrb.mxu1 %v9405_v36  ;;  %2274 = vmatpush.msrb.mxu2 %v9618_v0  ;;  %v2342_v36 = vsub.f32 %v9647_v51, %v2341_v48  ;;  %v2353_v55 = vand.u32 4294901760, %v9686_v18 }
 0x310   :  { %2326 = vmatpush.msrb.mxu3 %v2325_v37  ;;  %2081 = vmatmul.f32.gmra.mxu1 %v9467_v22  ;;  %v2347_v60 = vand.u32 4294901760, %v9681_v42 }
 0x311   :  { %2210 = vmatpush.msrb.mxu0 %v2072_v43  ;;  %2236 = vmatpush.msrb.mxu1 %v9407_v4  ;;  %v2343_v20 = vand.u32 4294901760, %v2342_v36  ;;  %v13668_v43 = vand.u32 4294901760, %v9456_v24 }
 0x312   :  { %2276 = vmatpush.msrb.mxu2 %v9667_v25  ;;  %2212 = vmatmul.f32.vlgmr.msrb.gmra.mxu0 %v9412_v49  ;;  %v2348_v4 = vsub.f32 %v9681_v42, %v2347_v60 }
 0x313   :  { %2332 = vmatpush.msrb.mxu3 %v2331_v14  ;;  %2375 = vmatpush.msra.mxu0 %v9456_v24  ;;  %v9729_v24 = vpop.permute.xlu2 %1918 }
 0x314   :  { %2238 = vmatpush.msrb.mxu1 %v9435_v2  ;;  %2278 = vmatpush.msrb.mxu2 %v9659_v62  ;;  %v2354_v2 = vsub.f32 %v9686_v18, %v2353_v55  ;;  %v2349_v3 = vand.u32 4294901760, %v2348_v4 }
 0x315   :  { %2338 = vmatpush.msrb.mxu3 %v2337_v47  ;;  %2284 = vmatmul.f32.vlgmr.msrb.gmra.mxu2 %v9539_v6 }
 0x316   :  { %2378 = vmatpush.msra.mxu0 %v9579_v23  ;;  %2459 = vmatpush.msra.mxu2 %v13668_v43 }
 0x317   :  { %2240 = vmatpush.msrb.mxu1 %v9453_v21  ;;  %2344 = vmatpush.msrb.mxu3 %v2343_v20  ;;  %v2355_v21 = vand.u32 4294901760, %v2354_v2 }
 0x318   :  { %2381 = vmatpush.msra.mxu0 %v9576_v29  ;;  %2463 = vmatpush.msra.mxu2 %v2311_v19  ;;  %v1924_v29 = vsel %vm483_vm8, %v9549_v50, %v9729_v24 }
 0x319   :  { %2242 = vmatpush.msrb.mxu1 %v9496_v53  ;;  %2350 = vmatpush.msrb.mxu3 %v2349_v3  ;;  %v1947_v53 = vsel %vm507_vm9, %v9398_v11, %v9716_v46  ;;  %v9761_v50 = vand.u32 4294901760, %v1924_v29 }
 0x31a   :  { %2384 = vmatpush.msra.mxu0 %v9589_v57  ;;  %2467 = vmatpush.msra.mxu2 %v2317_v54  ;;  %v9749_v11 = vand.u32 4294901760, %v1947_v53  ;;  %v9751_v57 = vpop.permute.xlu1 %1872 }
 0x31b   :  { %2244 = vmatpush.msrb.mxu1 %v9481_v8  ;;  %2216 = vmatmul.f32.gmra.mxu0 %v9467_v22  ;;  %v9739_v8 = vpop.permute.xlu0 %1895 }
 0x31c   :  { %2246 = vmatmul.f32.vlgmr.msrb.gmra.mxu1 %v9412_v49  ;;  %2356 = vmatpush.msrb.mxu3 %v2355_v21  ;;  %v9774_v23 = vsub.f32 %v1947_v53, %v9749_v11 }
 0x31d   :  { %2387 = vmatpush.msra.mxu0 %v9630_v5  ;;  %2419 = vmatpush.msra.mxu1 %v9425_v33 }
 0x31e   :  { %2471 = vmatpush.msra.mxu2 %v2323_v32  ;;  %2358 = vmatmul.f32.vlgmr.msrb.gmra.mxu3 %v9412_v49  ;;  %v2586_v54 = vand.u32 4294901760, %v9774_v23 }
 0x31f   :  { %2292 = vmatmul.f32.gmra.mxu2 %v9601_v13  ;;  %2509 = vmatpush.msra.mxu3 %v9425_v33  ;;  %v1901_v33 = vsel %vm459_vm14, %v9536_v35, %v9739_v8 }
 0x320   :  { %2390 = vmatpush.msra.mxu0 %v9635_v16  ;;  %2421 = vmatpush.msra.mxu1 %v9563_v45  ;;  %v9771_v35 = vand.u32 4294901760, %v1901_v33 }
 0x321   :  { %2475 = vmatpush.msra.mxu2 %v2329_v58  ;;  %2511 = vmatpush.msra.mxu3 %v9563_v45  ;;  %v1878_v45 = vsel %vm435_vm10, %v9494_v9, %v9751_v57  ;;  %v9784_v9 = vsub.f32 %v1924_v29, %v9761_v50 }
 0x322   :  { %2393 = vmatpush.msra.mxu0 %v9647_v51  ;;  %2423 = vmatpush.msra.mxu1 %v9552_v34  ;;  %v9786_v19 = vand.u32 4294901760, %v1878_v45 }
 0x323   :  { %2479 = vmatpush.msra.mxu2 %v2335_v27  ;;  %2513 = vmatpush.msra.mxu3 %v9552_v34  ;;  %v1855_v34 = vsel %vm411_vm11, %v9598_v7, %v9700_v63  ;;  %v9796_v7 = vsub.f32 %v1901_v33, %v9771_v35 }
 0x324   :  { %2396 = vmatpush.msra.mxu0 %v9681_v42  ;;  %2425 = vmatpush.msra.mxu1 %v9561_v30  ;;  %v9805_v32 = vsub.f32 %v1878_v45, %v9786_v19  ;;  %v8003_v42 = vld [vmem:[%s13487_s6 + $0x10] sm:$0xff] }
 0x325   :  { %2483 = vmatpush.msra.mxu2 %v2341_v48  ;;  %2515 = vmatpush.msra.mxu3 %v9561_v30  ;;  %v9793_v30 = vand.u32 4294901760, %v1855_v34  ;;  %v2598_v16 = vand.u32 4294901760, %v9796_v7 }
 0x326   :  { %2250 = vmatmul.f32.gmra.mxu1 %v9467_v22  ;;  %2399 = vmatpush.msra.mxu0 %v9686_v18  ;;  %v2604_v58 = vand.u32 4294901760, %v9805_v32  ;;  %v1563_v18 = vperm.slane %v8003_v42, 0 }
 0x327   :  { %2427 = vmatpush.msra.mxu1 %v9613_v44  ;;  %2487 = vmatpush.msra.mxu2 %v2347_v60  ;;  %v9813_v5 = vsub.f32 %v1855_v34, %v9793_v30  ;;  %v2599_v51 = vsub.f32 %v9796_v7, %v2598_v16 }
 0x328   :  { %2362 = vmatmul.f32.gmra.mxu3 %v9467_v22  ;;  %2402 = vmatmul.f32.vlgmr.msra.gmra.mxu0 %v9442_v28  ;;  %v2605_v17 = vsub.f32 %v9805_v32, %v2604_v58  ;;  %v1567_v36 = vmul.f32 %v1563_v18, %v9269_v39 }
 0x329   :  { %2517 = vmatpush.msra.mxu3 %v9613_v44  ;;  %2543 = vmatpush.msrb.mxu0 %v9749_v11  ;;  %v2592_v44 = vand.u32 4294901760, %v9784_v9  ;;  %v2610_v56 = vand.u32 4294901760, %v9813_v5 }
 0x32a   :  { %2429 = vmatpush.msra.mxu1 %v9623_v38  ;;  %2491 = vmatpush.msra.mxu2 %v2353_v55  ;;  %v2606_v40 = vand.u32 4294901760, %v2605_v17 }
 0x32b   :  { %2519 = vmatpush.msra.mxu3 %v9623_v38  ;;  %2545 = vmatpush.msrb.mxu0 %v9761_v50  ;;  %v2587_v38 = vsub.f32 %v9774_v23, %v2586_v54  ;;  %v2593_v12 = vsub.f32 %v9784_v9, %v2592_v44  ;;  %v9859_v37 = vpop.permute.xlu1 %1806 }
 0x32c   :  { %2656 = vmatpush.msrb.mxu2 %v9774_v23  ;;  %2431 = vmatpush.msra.mxu1 %v9618_v0  ;;  %v1812_v14 = vsel %vm366_vm13, %v9573_v26, %v9859_v37  ;;  %v9882_v26 = vand.u32 4294901760, %v1567_v36 }
 0x32d   :  { %2493 = vmatmul.f32.vlgmr.msra.gmra.mxu2 %v9412_v49  ;;  %2521 = vmatpush.msra.mxu3 %v9618_v0  ;;  %v2588_v0 = vand.u32 4294901760, %v2587_v38  ;;  %v2594_v27 = vand.u32 4294901760, %v2593_v12  ;;  %v9872_v60 = vand.u32 4294901760, %v1812_v14 }
 0x32e   :  { %2547 = vmatpush.msrb.mxu0 %v9771_v35  ;;  %2659 = vmatpush.msrb.mxu2 %v9784_v9  ;;  %v9899_v29 = vsub.f32 %v1567_v36, %v9882_v26 }
 0x32f   :  { %2433 = vmatpush.msra.mxu1 %v9667_v25  ;;  %2523 = vmatpush.msra.mxu3 %v9667_v25  ;;  %v2611_v25 = vsub.f32 %v9813_v5, %v2610_v56  ;;  %v9878_v2 = vsub.f32 %v1812_v14, %v9872_v60 }
 0x330   :  { %2549 = vmatpush.msrb.mxu0 %v9786_v19  ;;  %2662 = vmatpush.msrb.mxu2 %v9796_v7  ;;  %v2634_v17 = vand.u32 4294901760, %v9899_v29 }
 0x331   :  { %2435 = vmatpush.msra.mxu1 %v9659_v62  ;;  %2407 = vmatmul.f32.gmra.mxu0 %v9505_v15  ;;  %v2612_v31 = vand.u32 4294901760, %v2611_v25  ;;  %v2622_v33 = vand.u32 4294901760, %v9878_v2 }
 0x332   :  { %2439 = vmatmul.f32.vlgmr.msra.gmra.mxu1 %v9472_v59  ;;  %2525 = vmatpush.msra.mxu3 %v9659_v62  ;;  %v2600_v62 = vand.u32 4294901760, %v2599_v51 }
 0x333   :  { %2551 = vmatpush.msrb.mxu0 %v9793_v30  ;;  %2589 = vmatpush.msrb.mxu1 %v2588_v0  ;;  %v1921_v55 = vpop.permute.xlu1 %1920 }
 0x334   :  { %2665 = vmatpush.msrb.mxu2 %v9805_v32  ;;  %2527 = vmatmul.f32.vlgmr.msra.gmra.mxu3 %v9412_v49 }
 0x335   :  { %2497 = vmatmul.f32.gmra.mxu2 %v9467_v22  ;;  %2700 = vmatpush.msrb.mxu3 %v9749_v11 }
 0x336   :  { %2595 = vmatpush.msrb.mxu1 %v2594_v27  ;;  %2668 = vmatpush.msrb.mxu2 %v9813_v5  ;;  %v2623_v27 = vsub.f32 %v9878_v2, %v2622_v33 }
 0x337   :  { %1959 = vperm.xlu2 %7991, %v1955_v1   ;;  %2702 = vmatpush.msrb.mxu3 %v9761_v50 }
 0x338   :  { %2601 = vmatpush.msrb.mxu1 %v2600_v62  ;;  %v2624_v14 = vand.u32 4294901760, %v2623_v27 }
 0x339   :  { %2704 = vmatpush.msrb.mxu3 %v9771_v35 }
 0x33a   :  { %2607 = vmatpush.msrb.mxu1 %v2606_v40 }
 0x33b   :  { %2445 = vmatmul.f32.gmra.mxu1 %v9543_v41  ;;  %2706 = vmatpush.msrb.mxu3 %v9786_v19  ;;  %v1852_v38 = vpop.permute.xlu1 %1851 }
 0x33c   :  { %2613 = vmatpush.msrb.mxu1 %v2612_v31  ;;  %2531 = vmatmul.f32.gmra.mxu3 %v9467_v22 }
 0x33d   :  { %2708 = vmatpush.msrb.mxu3 %v9793_v30 }
 0x341   :  { %v9861_v48 = vpop.permute.xlu2 %1783 }
 0x342   :  { %v1789_v47 = vsel %vm13669_vm3, %v9655_v10, %v9861_v48  ;;  %v1925_v10 = vsel %vm483_vm8, %v9729_v24, %v1921_v55  ;;  %vm13672_vm8 = vmmov %vm13666_vm1 }
 0x343   :  { %v9875_v4 = vand.u32 4294901760, %v1789_v47  ;;  %v9902_v45 = vand.u32 4294901760, %v1925_v10 }
 0x345   :  { %v9889_v39 = vsub.f32 %v1789_v47, %v9875_v4  ;;  %v9924_v1 = vsub.f32 %v1925_v10, %v9902_v45  ;;  %v2635_v47 = vsub.f32 %v9899_v29, %v2634_v17 }
 0x347   :  { %v2628_v34 = vand.u32 4294901760, %v9889_v39  ;;  %v2873_v23 = vand.u32 4294901760, %v9924_v1  ;;  %v2636_v10 = vand.u32 4294901760, %v2635_v47 }
 0x349   :  { %v1898_v20 = vpop.permute.xlu2 %1897  ;;  %v2629_v31 = vsub.f32 %v9889_v39, %v2628_v34 }
 0x34b   :  { %v1830_v43 = vpop.permute.xlu0 %1829 }
 0x34c   :  { %v1835_v3 = vsel %vm390_vm12, %v9610_v61, %v1830_v43  ;;  %v1902_v61 = vsel %vm459_vm14, %v9739_v8, %v1898_v20  ;;  %vm13680_vm14 = vmmov %vm13666_vm1 }
 0x34d   :  { %v9884_v21 = vand.u32 4294901760, %v1835_v3  ;;  %v9909_v12 = vand.u32 4294901760, %v1902_v61 }
 0x34f   :  { %v9892_v53 = vsub.f32 %v1835_v3, %v9884_v21  ;;  %2553 = vmatpush.msrb.mxu0 %v9884_v21  ;;  %2710 = vmatpush.msrb.mxu3 %v9884_v21  ;;  %v9938_v42 = vsub.f32 %v1902_v61, %v9909_v12  ;;  %v8004_v61 = vld [vmem:[%s13487_s6 + $0x18] sm:$0xff]  ;;  %s8105_s6 = smov 64  }
 0x351   :  { %2555 = vmatpush.msrb.mxu0 %v9872_v60  ;;  %2671 = vmatpush.msrb.mxu2 %v9892_v53  ;;  %v2616_v24 = vand.u32 4294901760, %v9892_v53 }
 0x352   :  { %2712 = vmatpush.msrb.mxu3 %v9872_v60 }
 0x353   :  { %2557 = vmatpush.msrb.mxu0 %v9875_v4  ;;  %2674 = vmatpush.msrb.mxu2 %v9878_v2  ;;  %v1944_v8 = vpop.permute.xlu0 %1943  ;;  %v2617_v0 = vsub.f32 %v9892_v53, %v2616_v24  ;;  %v1832_v62 = vpop.permute.xlu2 %1831 }
 0x354   :  { %2714 = vmatpush.msrb.mxu3 %v9875_v4  ;;  %v1948_v51 = vsel %vm507_vm9, %v9716_v46, %v1944_v8  ;;  %v1856_v46 = vsel %vm411_vm11, %v9700_v63, %v1852_v38  ;;  %v1836_v63 = vsel %vm390_vm12, %v1830_v43, %v1832_v62  ;;  %v1564_v38 = vperm.slane %v8004_v61, 0  ;;  %vm13674_vm9 = vmmov %vm13666_vm1 }
 0x355   :  { %v9926_v25 = vand.u32 4294901760, %v1948_v51  ;;  %2559 = vmatpush.msrb.mxu0 %v9882_v26  ;;  %2677 = vmatpush.msrb.mxu2 %v9889_v39  ;;  %v2618_v40 = vand.u32 4294901760, %v2617_v0  ;;  %v9951_v36 = vand.u32 4294901760, %v1856_v46  ;;  %v9959_v20 = vand.u32 4294901760, %v1836_v63  ;;  %vm13677_vm11 = vmmov %vm13666_vm1 }
 0x356   :  { %2716 = vmatpush.msrb.mxu3 %v9882_v26  ;;  %2565 = vmatmul.f32.vlgmr.msrb.gmra.mxu0 %v9539_v6 }
 0x357   :  { %v9941_v18 = vsub.f32 %v1948_v51, %v9926_v25  ;;  %2740 = vmatpush.msra.mxu0 %v2586_v54  ;;  %2619 = vmatpush.msrb.mxu1 %v2618_v40  ;;  %v2630_v54 = vand.u32 4294901760, %v2629_v31  ;;  %v9974_v8 = vsub.f32 %v1856_v46, %v9951_v36  ;;  %v9986_v51 = vsub.f32 %v1836_v63, %v9959_v20 }
 0x358   :  { %2680 = vmatpush.msrb.mxu2 %v9899_v29  ;;  %2720 = vmatmul.f32.vlgmr.msrb.gmra.mxu3 %v9472_v59  ;;  %v1786_v7 = vpop.permute.xlu1 %1785 }
 0x359   :  { %v2867_v55 = vand.u32 4294901760, %v9941_v18  ;;  %2744 = vmatpush.msra.mxu0 %v2592_v44  ;;  %2625 = vmatpush.msrb.mxu1 %v2624_v14  ;;  %v2879_v44 = vand.u32 4294901760, %v9938_v42  ;;  %v2891_v5 = vand.u32 4294901760, %v9974_v8 }
 0x35a   :  { %2824 = vmatpush.msra.mxu2 %v9926_v25 }
 0x35b   :  { %2683 = vmatmul.f32.vlgmr.msrb.gmra.mxu2 %v9442_v28  ;;  %v2868_v43 = vsub.f32 %v9941_v18, %v2867_v55  ;;  %2748 = vmatpush.msra.mxu0 %v2598_v16  ;;  %v1875_v9 = vpop.permute.xlu0 %1874  ;;  %v2880_v32 = vsub.f32 %v9938_v42, %v2879_v44  ;;  %v2892_v31 = vsub.f32 %v9974_v8, %v2891_v5 }
 0x35c   :  { %2826 = vmatpush.msra.mxu2 %v9902_v45  ;;  %2631 = vmatpush.msrb.mxu1 %v2630_v54  ;;  %v1879_v3 = vsel %vm435_vm10, %v9751_v57, %v1875_v9  ;;  %v2874_v57 = vsub.f32 %v9924_v1, %v2873_v23  ;;  %vm13675_vm10 = vmmov %vm13666_vm1 }
 0x35d   :  { %v9976_v16 = vand.u32 4294901760, %v1879_v3  ;;  %2752 = vmatpush.msra.mxu0 %v2604_v58  ;;  %v2869_v0 = vand.u32 4294901760, %v2868_v43  ;;  %v1790_v58 = vsel %vm13670_vm4, %v9861_v48, %v1786_v7  ;;  %v2893_v39 = vand.u32 4294901760, %v2892_v31 }
 0x35e   :  { %2828 = vmatpush.msra.mxu2 %v9909_v12  ;;  %2637 = vmatpush.msrb.mxu1 %v2636_v10  ;;  %v2875_v62 = vand.u32 4294901760, %v2874_v57  ;;  %v10008_v48 = vand.u32 4294901760, %v1790_v58 }
 0x35f   :  { %2573 = vmatmul.f32.gmra.mxu0 %v9601_v13  ;;  %v9989_v27 = vsub.f32 %v1879_v3, %v9976_v16  ;;  %2639 = vmatmul.f32.vlgmr.msrb.gmra.mxu1 %v9412_v49 }
 0x360   :  { %2756 = vmatpush.msra.mxu0 %v2610_v56  ;;  %2790 = vmatpush.msra.mxu1 %v9749_v11  ;;  %v1568_v56 = vmul.f32 %v1564_v38, %v9293_v52  ;;  %v2881_v11 = vand.u32 4294901760, %v2880_v32 }
 0x361   :  { %2830 = vmatpush.msra.mxu2 %v9976_v16  ;;  %2870 = vmatpush.msra.mxu3 %v2869_v0  ;;  %v2885_v40 = vand.u32 4294901760, %v9989_v27 }
 0x362   :  { %2760 = vmatpush.msra.mxu0 %v2616_v24  ;;  %2792 = vmatpush.msra.mxu1 %v9761_v50  ;;  %v2897_v24 = vand.u32 4294901760, %v9986_v51  ;;  %v10024_v63 = vand.u32 4294901760, %v1568_v56 }
 0x363   :  { %2832 = vmatpush.msra.mxu2 %v9951_v36  ;;  %2876 = vmatpush.msra.mxu3 %v2875_v62  ;;  %v2886_v53 = vsub.f32 %v9989_v27, %v2885_v40 }
 0x364   :  { %2688 = vmatmul.f32.gmra.mxu2 %v9505_v15  ;;  %2764 = vmatpush.msra.mxu0 %v2622_v33  ;;  %v1809_v52 = vpop.permute.xlu0 %1808  ;;  %v2914_v33 = vsub.f32 %v1568_v56, %v10024_v63 }
 0x365   :  { %2794 = vmatpush.msra.mxu1 %v9771_v35  ;;  %2834 = vmatpush.msra.mxu2 %v9959_v20  ;;  %v1813_v50 = vsel %vm366_vm13, %v9859_v37, %v1809_v52  ;;  %v2887_v46 = vand.u32 4294901760, %v2886_v53  ;;  %v10032_v35 = vsub.f32 %v1790_v58, %v10008_v48  ;;  %v2898_v37 = vsub.f32 %v9986_v51, %v2897_v24  ;;  %vm13679_vm13 = vmmov %vm13666_vm1 }
 0x366   :  { %2882 = vmatpush.msra.mxu3 %v2881_v11  ;;  %v10026_v14 = vand.u32 4294901760, %v1813_v50  ;;  %2768 = vmatpush.msra.mxu0 %v2628_v34  ;;  %v2915_v29 = vand.u32 4294901760, %v2914_v33 }
 0x367   :  { %2726 = vmatmul.f32.gmra.mxu3 %v9543_v41  ;;  %2796 = vmatpush.msra.mxu1 %v9786_v19  ;;  %v2899_v34 = vand.u32 4294901760, %v2898_v37  ;;  %v2909_v47 = vand.u32 4294901760, %v10032_v35 }
 0x368   :  { %2888 = vmatpush.msra.mxu3 %v2887_v46  ;;  %v2902_v2 = vsub.f32 %v1813_v50, %v10026_v14  ;;  %2643 = vmatmul.f32.gmra.mxu1 %v9467_v22 }
 0x369   :  { %2772 = vmatpush.msra.mxu0 %v2634_v17  ;;  %2798 = vmatpush.msra.mxu1 %v9793_v30  ;;  %v2910_v17 = vsub.f32 %v10032_v35, %v2909_v47 }
 0x36a   :  { %2774 = vmatmul.f32.vlgmr.msra.gmra.mxu0 %v9412_v49  ;;  %2836 = vmatpush.msra.mxu2 %v10026_v14  ;;  %v2903_v19 = vand.u32 4294901760, %v2902_v2 }
 0x36b   :  { %2937 = vmatpush.msrb.mxu0 %v9941_v18  ;;  %2800 = vmatpush.msra.mxu1 %v9884_v21 }
 0x36c   :  { %2894 = vmatpush.msra.mxu3 %v2893_v39  ;;  %2838 = vmatpush.msra.mxu2 %v10008_v48  ;;  %v2904_v30 = vsub.f32 %v2902_v2, %v2903_v19 }
 0x36d   :  { %2940 = vmatpush.msrb.mxu0 %v9924_v1  ;;  %2802 = vmatpush.msra.mxu1 %v9872_v60  ;;  %v2916_v60 = vsub.f32 %v2914_v33, %v2915_v29 }
 0x36e   :  { %2900 = vmatpush.msra.mxu3 %v2899_v34  ;;  %2840 = vmatpush.msra.mxu2 %v10024_v63  ;;  %v2905_v21 = vand.u32 4294901760, %v2904_v30 }
 0x36f   :  { %2943 = vmatpush.msrb.mxu0 %v9938_v42  ;;  %2804 = vmatpush.msra.mxu1 %v9875_v4  ;;  %v2917_v4 = vand.u32 4294901760, %v2916_v60 }
 0x370   :  { %2846 = vmatmul.f32.vlgmr.msra.gmra.mxu2 %v9539_v6  ;;  %2906 = vmatpush.msra.mxu3 %v2905_v21  ;;  %v2911_v6 = vand.u32 4294901760, %v2910_v17 }
 0x371   :  { %3021 = vmatpush.msrb.mxu2 %v2867_v55  ;;  %2946 = vmatpush.msrb.mxu0 %v9989_v27 }
 0x372   :  { %2806 = vmatpush.msra.mxu1 %v9882_v26  ;;  %2778 = vmatmul.f32.gmra.mxu0 %v9467_v22 }
 0x373   :  { %3025 = vmatpush.msrb.mxu2 %v2873_v23  ;;  %2808 = vmatmul.f32.vlgmr.msra.gmra.mxu1 %v9412_v49 }
 0x374   :  { %2949 = vmatpush.msrb.mxu0 %v9974_v8  ;;  %2981 = vmatpush.msrb.mxu1 %v9926_v25 }
 0x375   :  { %3029 = vmatpush.msrb.mxu2 %v2879_v44  ;;  %2912 = vmatpush.msra.mxu3 %v2911_v6 }
 0x376   :  { %2952 = vmatpush.msrb.mxu0 %v9986_v51  ;;  %2983 = vmatpush.msrb.mxu1 %v9902_v45 }
 0x377   :  { %3033 = vmatpush.msrb.mxu2 %v2885_v40  ;;  %2918 = vmatpush.msra.mxu3 %v2917_v4 }
 0x378   :  { %2955 = vmatpush.msrb.mxu0 %v2902_v2  ;;  %2985 = vmatpush.msrb.mxu1 %v9909_v12 }
 0x379   :  { %2854 = vmatmul.f32.gmra.mxu2 %v9601_v13  ;;  %2920 = vmatmul.f32.vlgmr.msra.gmra.mxu3 %v9412_v49 }
 0x37a   :  { %3037 = vmatpush.msrb.mxu2 %v2891_v5  ;;  %3071 = vmatpush.msrb.mxu3 %v9926_v25 }
 0x37b   :  { %2958 = vmatpush.msrb.mxu0 %v10032_v35  ;;  %2987 = vmatpush.msrb.mxu1 %v9976_v16  ;;  %v2004_v13 = vpop.f32.mrf.mxu0 }
 0x37c   :  { %3041 = vmatpush.msrb.mxu2 %v2897_v24  ;;  %3073 = vmatpush.msrb.mxu3 %v9902_v45 }
 0x37d   :  { %2812 = vmatmul.f32.gmra.mxu1 %v9467_v22  ;;  %2961 = vmatpush.msrb.mxu0 %v2914_v33 }
 0x37e   :  { %2989 = vmatpush.msrb.mxu1 %v9951_v36  ;;  %3045 = vmatpush.msrb.mxu2 %v2903_v19 }
 0x37f   :  { %3075 = vmatpush.msrb.mxu3 %v9909_v12  ;;  %2964 = vmatmul.f32.vlgmr.msrb.gmra.mxu0 %v9442_v28 }
 0x380   :  { %2991 = vmatpush.msrb.mxu1 %v9959_v20  ;;  %3049 = vmatpush.msrb.mxu2 %v2909_v47 }
 0x381   :  { %3077 = vmatpush.msrb.mxu3 %v9976_v16 }
 0x382   :  { %2993 = vmatpush.msrb.mxu1 %v10026_v14  ;;  %2924 = vmatmul.f32.gmra.mxu3 %v9467_v22 }
 0x383   :  { %3053 = vmatpush.msrb.mxu2 %v2915_v29  ;;  %3079 = vmatpush.msrb.mxu3 %v9951_v36 }
 0x384   :  { %2995 = vmatpush.msrb.mxu1 %v10008_v48  ;;  %3055 = vmatmul.f32.vlgmr.msrb.gmra.mxu2 %v9412_v49  ;;  %v2078_v26 = vpop.f32.mrf.mxu1  ;;  %v2012_v28 = vpop.f32.mrf.mxu0 }
 0x385   :  { %3081 = vmatpush.msrb.mxu3 %v9959_v20 }
 0x386   :  { %2997 = vmatpush.msrb.mxu1 %v10024_v63  ;;  %v2122_v45 = vpop.f32.mrf.mxu2 }
 0x387   :  { %3001 = vmatmul.f32.vlgmr.msrb.gmra.mxu1 %v9472_v59  ;;  %3083 = vmatpush.msrb.mxu3 %v10026_v14  ;;  %v2159_v59 = vpop.f32.mrf.mxu3 }
 0x388   :  { %2969 = vmatmul.f32.gmra.mxu0 %v9505_v15  ;;  %v10109_v15 = vpop.permute.xlu0 %1964 }
 0x389   :  { %3085 = vmatpush.msrb.mxu3 %v10008_v48  ;;  %v2013_v36 = vadd.f32 %v2012_v28, %v10109_v15 }
 0x38b   :  { %3087 = vmatpush.msrb.mxu3 %v10024_v63 }
 0x38c   :  { %3059 = vmatmul.f32.gmra.mxu2 %v9467_v22  ;;  %3089 = vmatmul.f32.vlgmr.msrb.gmra.mxu3 %v9412_v49 }
 0x38d   :  { %v2082_v12 = vpop.f32.mrf.mxu1 }
 0x38e   :  { %v2083_v54 = vadd.f32 %v2082_v12, %v2013_v36 }
 0x38f   :  { %3007 = vmatmul.f32.gmra.mxu1 %v9543_v41  ;;  %v2213_v18 = vpop.f32.mrf.mxu0  ;;  %v2127_v55 = vpop.f32.mrf.mxu2 }
 0x390   :  { %v2128_v43 = vadd.f32 %v2127_v55, %v2083_v54  ;;  %v2165_v9 = vpop.f32.mrf.mxu3 }
 0x391   :  { %v10105_v1 = vpop.permute.xlu2 %1959 }
 0x392   :  { %v2005_v25 = vadd.f32 %v2004_v13, %v10105_v1  ;;  %v2166_v61 = vadd.f32 %v2165_v9, %v2128_v43 }
 0x394   :  { %v2079_v42 = vadd.f32 %v2078_v26, %v2005_v25  ;;  %3093 = vmatmul.f32.gmra.mxu3 %v9467_v22 }
 0x396   :  { %v2123_v23 = vadd.f32 %v2122_v45, %v2079_v42 }
 0x398   :  { %v2160_v49 = vadd.f32 %v2159_v59, %v2123_v23  ;;  %v2217_v10 = vpop.f32.mrf.mxu0  ;;  %v2285_v22 = vpop.f32.mrf.mxu2 }
 0x399   :  { %v2247_v20 = vpop.f32.mrf.mxu1  ;;  %v2218_v38 = vadd.f32 %v2217_v10, %v2166_v61  ;;  %v2286_v0 = vadd.f32 %v2285_v22, %v10105_v1 }
 0x39a   :  { %v2214_v41 = vadd.f32 %v2213_v18, %v2160_v49 }
 0x39c   :  { %v10112_v44 = vadd.f32 %v2247_v20, %v2214_v41 }
 0x39e   :  { %v3097_v3 = vmax.f32 %v10112_v44, 0.0  ;;  %v8104_v44 = vmov 0.0  }
 0x3a0   :  { %3114 = vrot.lane.b32.xlu1 %v3097_v3, %s8102_s22 }
 0x3a1   :  { %v2359_v7 = vpop.f32.mrf.mxu3 }
 0x3a2   :  { %v2360_v51 = vadd.f32 %v2359_v7, %v2286_v0  ;;  %v2293_v27 = vpop.f32.mrf.mxu2 }
 0x3a3   :  { %v2251_v8 = vpop.f32.mrf.mxu1  ;;  %v2294_v48 = vadd.f32 %v2293_v27, %v10109_v15 }
 0x3a4   :  { %v10118_v16 = vadd.f32 %v2251_v8, %v2218_v38 }
 0x3a5   :  { %v2403_v32 = vpop.f32.mrf.mxu0 }
 0x3a6   :  { %v3101_v57 = vmax.f32 %v10118_v16, 0.0  ;;  %v2404_v58 = vadd.f32 %v2403_v32, %v2360_v51 }
 0x3a8   :  { %3124 = vrot.lane.b32.xlu1 %v3101_v57, %s8102_s22 }
 0x3ab   :  { %v2363_v62 = vpop.f32.mrf.mxu3 }
 0x3ac   :  { %v2364_v11 = vadd.f32 %v2363_v62, %v2294_v48 }
 0x3ae   :  { %v2408_v24 = vpop.f32.mrf.mxu0 }
 0x3af   :  { %v2440_v40 = vpop.f32.mrf.mxu1  ;;  %v2409_v46 = vadd.f32 %v2408_v24, %v2364_v11 }
 0x3b0   :  { %v2441_v5 = vadd.f32 %v2440_v40, %v2404_v58  ;;  %v2494_v56 = vpop.f32.mrf.mxu2 }
 0x3b2   :  { %v2495_v53 = vadd.f32 %v2494_v56, %v2441_v5 }
 0x3b7   :  { %v2528_v52 = vpop.f32.mrf.mxu3 }
 0x3b8   :  { %v2446_v50 = vpop.f32.mrf.mxu1  ;;  %v10126_v31 = vadd.f32 %v2528_v52, %v2495_v53  ;;  %v2498_v35 = vpop.f32.mrf.mxu2 }
 0x3b9   :  { %v2447_v14 = vadd.f32 %v2446_v50, %v2409_v46 }
 0x3ba   :  { %v3098_v63 = vmax.f32 %v10126_v31, 0.0 }
 0x3bb   :  { %v2499_v37 = vadd.f32 %v2498_v35, %v2447_v14 }
 0x3bc   :  { %3116 = vrot.lane.b32.xlu2 %v3098_v63, %s8102_s22 }
 0x3bf   :  { %v2532_v2 = vpop.f32.mrf.mxu3 }
 0x3c0   :  { %v10132_v39 = vadd.f32 %v2532_v2, %v2499_v37 }
 0x3c2   :  { %v3102_v33 = vmax.f32 %v10132_v39, 0.0 }
 0x3c4   :  { %3126 = vrot.lane.b32.xlu2 %v3102_v33, %s8102_s22 }
 0x3d3   :  { %v2566_v19 = vpop.f32.mrf.mxu0 }
 0x3d4   :  { %v2567_v47 = vadd.f32 %v2566_v19, %v10105_v1 }
 0x3db   :  { %v2721_v6 = vpop.f32.mrf.mxu3 }
 0x3dc   :  { %v2640_v34 = vpop.f32.mrf.mxu1  ;;  %v2574_v30 = vpop.f32.mrf.mxu0 }
 0x3dd   :  { %v2641_v21 = vadd.f32 %v2640_v34, %v2567_v47  ;;  %v2575_v13 = vadd.f32 %v2574_v30, %v10109_v15 }
 0x3de   :  { %v2684_v29 = vpop.f32.mrf.mxu2 }
 0x3df   :  { %v2685_v60 = vadd.f32 %v2684_v29, %v2641_v21 }
 0x3e1   :  { %v2722_v26 = vadd.f32 %v2721_v6, %v2685_v60  ;;  %v3224_v60 = vld [vmem:[#allocation2 + $0x78] sm:$0xff]  ;;  %v3223_v6 = vld [vmem:[#allocation2 + $0x70] sm:$0xff] }
 0x3e2   :  { %v10200_v31 = vand.u32 4294901760, %v3224_v60 }
 0x3e4   :  { %3487 = vmatpush.msra.mxu3 %v10200_v31  ;;  %3274 = vmatpush.msra.mxu0 %v10200_v31 }
 0x3e5   :  { %v2644_v17 = vpop.f32.mrf.mxu1 }
 0x3e6   :  { %v2645_v45 = vadd.f32 %v2644_v17, %v2575_v13 }
 0x3e7   :  { %v2775_v4 = vpop.f32.mrf.mxu0  ;;  %v2689_v28 = vpop.f32.mrf.mxu2 }
 0x3e8   :  { %v2776_v12 = vadd.f32 %v2775_v4, %v2722_v26  ;;  %v2690_v42 = vadd.f32 %v2689_v28, %v2645_v45  ;;  %v3222_v4 = vld [vmem:[#allocation2 + $0x68] sm:$0xff]  ;;  %v3221_v28 = vld [vmem:[#allocation2 + $0x60] sm:$0xff]  ;;  %v3220_v45 = vld [vmem:[#allocation2 + $0x58] sm:$0xff] }
 0x3e9   :  { %v10204_v26 = vand.u32 4294901760, %v3222_v4 }
 0x3ea   :  { %v2727_v36 = vpop.f32.mrf.mxu3 }
 0x3eb   :  { %v2728_v54 = vadd.f32 %v2727_v36, %v2690_v42  ;;  %v3218_v36 = vld [vmem:[#allocation2 + $0x48] sm:$0xff] }
 0x3ef   :  { %v2779_v23 = vpop.f32.mrf.mxu0 }
 0x3f0   :  { %v2809_v59 = vpop.f32.mrf.mxu1  ;;  %v2780_v49 = vadd.f32 %v2779_v23, %v2728_v54  ;;  %v10219_v54 = vsub.f32 %v3224_v60, %v10200_v31 }
 0x3f1   :  { %v10140_v25 = vadd.f32 %v2809_v59, %v2776_v12  ;;  %v3219_v12 = vld [vmem:[#allocation2 + $0x50] sm:$0xff]  ;;  %v10210_v59 = vand.u32 4294901760, %v3220_v45 }
 0x3f2   :  { %v10212_v42 = vand.u32 4294901760, %v3219_v12  ;;  %3429 = vmatpush.msra.mxu2 %v10219_v54 }
 0x3f3   :  { %v3099_v18 = vmax.f32 %v10140_v25, 0.0  ;;  %v2847_v55 = vpop.f32.mrf.mxu2 }
 0x3f4   :  { %v2848_v61 = vadd.f32 %v2847_v55, %v10105_v1  ;;  %v3217_v55 = vld [vmem:[#allocation2 + $0x40] sm:$0xff] }
 0x3f5   :  { %3118 = vrot.lane.b32.xlu0 %v3099_v18, %s8102_s22 }
 0x3fa   :  { %v2813_v20 = vpop.f32.mrf.mxu1 }
 0x3fb   :  { %v10146_v41 = vadd.f32 %v2813_v20, %v2780_v49  ;;  %v10225_v20 = vsub.f32 %v3222_v4, %v10204_v26 }
 0x3fc   :  { %v2921_v9 = vpop.f32.mrf.mxu3  ;;  %v2855_v10 = vpop.f32.mrf.mxu2 }
 0x3fd   :  { %v3103_v43 = vmax.f32 %v10146_v41, 0.0  ;;  %v2965_v22 = vpop.f32.mrf.mxu0  ;;  %v2922_v38 = vadd.f32 %v2921_v9, %v2848_v61  ;;  %v2856_v27 = vadd.f32 %v2855_v10, %v10109_v15  ;;  %v10233_v41 = vsub.f32 %v3220_v45, %v10210_v59 }
 0x3fe   :  { %v10238_v10 = vand.u32 4294901760, %v3218_v36  ;;  %v13514_v61 = vand.u32 4294901760, %v10219_v54 }
 0x3ff   :  { %3128 = vrot.lane.b32.xlu0 %v3103_v43, %s8102_s22  ;;  %v2966_v0 = vadd.f32 %v2965_v22, %v2922_v38  ;;  %v13511_v38 = vand.u32 4294901760, %v10225_v20 }
 0x404   :  { %v3002_v8 = vpop.f32.mrf.mxu1 }
 0x405   :  { %v2925_v7 = vpop.f32.mrf.mxu3  ;;  %v3003_v32 = vadd.f32 %v3002_v8, %v2966_v0  ;;  %v2970_v62 = vpop.f32.mrf.mxu0  ;;  %v10246_v8 = vand.u32 4294901760, %v3217_v55  ;;  %v3325_v0 = vsub.f32 %v10219_v54, %v13514_v61 }
 0x406   :  { %v2926_v58 = vadd.f32 %v2925_v7, %v2856_v27  ;;  %v3337_v27 = vsub.f32 %v10225_v20, %v13511_v38 }
 0x407   :  { %v3056_v51 = vpop.f32.mrf.mxu2 }
 0x408   :  { %v3057_v40 = vadd.f32 %v3056_v51, %v3003_v32  ;;  %v2971_v48 = vadd.f32 %v2970_v62, %v2926_v58  ;;  %v13508_v32 = vand.u32 4294901760, %v10233_v41  ;;  %v10266_v62 = vsub.f32 %v3218_v36, %v10238_v10 }
 0x40c   :  { %v3008_v5 = vpop.f32.mrf.mxu1 }
 0x40d   :  { %v3009_v53 = vadd.f32 %v3008_v5, %v2971_v48  ;;  %v3326_v5 = vand.u32 4294901760, %v3325_v0 }
 0x40f   :  { %v3090_v56 = vpop.f32.mrf.mxu3  ;;  %v3060_v24 = vpop.f32.mrf.mxu2  ;;  %3327 = vmatpush.msra.mxu1 %v3326_v5 }
 0x410   :  { %v10154_v11 = vadd.f32 %v3090_v56, %v3057_v40  ;;  %v3061_v50 = vadd.f32 %v3060_v24, %v3009_v53  ;;  %v10275_v53 = vsub.f32 %v3217_v55, %v10246_v8  ;;  %v3216_v24 = vld [vmem:[#allocation2 + $0x38] sm:$0xff] }
 0x412   :  { %v3100_v1 = vmax.f32 %v10154_v11, 0.0  ;;  %v3115_v52 = vpop.permute.xlu1 %3114 }
 0x414   :  { %3120 = vrot.lane.b32.xlu1 %v3100_v1, %s8102_s22 }
 0x416   :  { %v3117_v15 = vpop.permute.xlu2 %3116 }
 0x417   :  { %v3094_v46 = vpop.f32.mrf.mxu3  ;;  %v3132_v14 = vsel %vm13671_vm5, %v3115_v52, %v3117_v15  ;;  %v3215_v52 = vld [vmem:[#allocation2 + $0x30] sm:$0xff] }
 0x418   :  { %v10161_v35 = vadd.f32 %v3094_v46, %v3061_v50  ;;  %v10165_v37 = vmax.f32 %v3097_v3, %v3132_v14  ;;  %v3214_v50 = vld [vmem:[#allocation2 + $0x28] sm:$0xff]  ;;  %v3338_v46 = vand.u32 4294901760, %v3337_v27  ;;  %v3349_v14 = vsub.f32 %v10233_v41, %v13508_v32 }
 0x41a   :  { %v3104_v2 = vmax.f32 %v10161_v35, 0.0  ;;  %3167 = vrot.lane.b32.xlu0 %v10165_v37, %s8100_s15  ;;  %v3125_v19 = vpop.permute.xlu1 %3124  ;;  %v3350_v36 = vand.u32 4294901760, %v3349_v14 }
 0x41c   :  { %3130 = vrot.lane.b32.xlu2 %v3104_v2, %s8102_s22 }
 0x41e   :  { %v3127_v34 = vpop.permute.xlu2 %3126 }
 0x41f   :  { %v3136_v47 = vsel %vm13672_vm8, %v3125_v19, %v3127_v34  ;;  %v3213_v19 = vld [vmem:[#allocation2 + $0x20] sm:$0xff] }
 0x420   :  { %v10176_v30 = vmax.f32 %v3101_v57, %v3136_v47  ;;  %v10287_v47 = vand.u32 4294901760, %v3216_v24  ;;  %v10306_v45 = vand.u32 4294901760, %v3213_v19 }
 0x422   :  { %13673 = vst [vmem:[#allocation11_spill] sm:$0xff] %v10176_v30  ;;  %3177 = vrot.lane.b32.xlu0 %v10176_v30, %s8100_s15  ;;  %v10301_v4 = vsub.f32 %v3216_v24, %v10287_v47  ;;  %v10335_v14 = vsub.f32 %v3213_v19, %v10306_v45  ;;  %v3239_v19 = vld [vmem:[#allocation2 + $0xf0] sm:$0xff] }
 0x423   :  { %v3231_v30 = vld [vmem:[#allocation2 + $0xb0] sm:$0xff] }
 0x424   :  { %3122 = vrot.lane.b32.xlu2 %v8104_v44, %s8102_s22  ;;  %v10289_v44 = vand.u32 4294901760, %v3215_v52  ;;  %v13507_v27 = vand.u32 4294901760, %v10301_v4 }
 0x426   :  { %v3373_v25 = vsub.f32 %v10301_v4, %v13507_v27  ;;  %v3237_v27 = vld [vmem:[#allocation2 + $0xe0] sm:$0xff] }
 0x427   :  { %v10405_v38 = vand.u32 4294901760, %v3237_v27 }
 0x428   :  { %v3374_v32 = vand.u32 4294901760, %v3373_v25 }
 0x429   :  { %v10436_v35 = vsub.f32 %v3237_v27, %v10405_v38 }
 0x42b   :  { %13688 = vst [vmem:[#allocation20_spill] sm:$0xff] %v10436_v35 }
 0x467   :  { %v10181_v3 = vpop.permute.xlu0 %3118 }
 0x468   :  { %v3133_v29 = vsel %vm13674_vm9, %v3117_v15, %v10181_v3 }
 0x469   :  { %v10187_v21 = vmax.f32 %v3098_v63, %v3133_v29  ;;  %v10202_v63 = vand.u32 4294901760, %v3223_v6  ;;  %v10291_v29 = vand.u32 4294901760, %v3214_v50 }
 0x46b   :  { %3169 = vrot.lane.b32.xlu1 %v10187_v21, %s8100_s15  ;;  %v10222_v49 = vsub.f32 %v3223_v6, %v10202_v63  ;;  %3489 = vmatpush.msra.mxu3 %v10202_v63  ;;  %v13503_v6 = vand.u32 4294901760, %v10275_v53  ;;  %v10310_v55 = vsub.f32 %v3214_v50, %v10291_v29 }
 0x46c   :  { %3276 = vmatpush.msra.mxu0 %v10202_v63 }
 0x46d   :  { %v13512_v22 = vand.u32 4294901760, %v10222_v49  ;;  %3432 = vmatpush.msra.mxu2 %v10222_v49  ;;  %3491 = vmatpush.msra.mxu3 %v10204_v26 }
 0x46e   :  { %3278 = vmatpush.msra.mxu0 %v10204_v26 }
 0x46f   :  { %v3331_v51 = vsub.f32 %v10222_v49, %v13512_v22  ;;  %3435 = vmatpush.msra.mxu2 %v10225_v20 }
 0x471   :  { %v3129_v16 = vpop.permute.xlu0 %3128  ;;  %v3332_v56 = vand.u32 4294901760, %v3331_v51 }
 0x472   :  { %v3137_v57 = vsel %vm13675_vm10, %v3127_v34, %v3129_v16  ;;  %v13504_v34 = vand.u32 4294901760, %v10266_v62 }
 0x473   :  { %v10194_v17 = vmax.f32 %v3102_v33, %v3137_v57  ;;  %v10208_v33 = vand.u32 4294901760, %v3221_v28  ;;  %3333 = vmatpush.msra.mxu1 %v3332_v56 }
 0x474   :  { %v3361_v51 = vsub.f32 %v10266_v62, %v13504_v34  ;;  %v3240_v34 = vld [vmem:[#allocation2 + $0xf8] sm:$0xff] }
 0x475   :  { %13676 = vst [vmem:[#allocation12_spill] sm:$0xff] %v10194_v17  ;;  %3179 = vrot.lane.b32.xlu1 %v10194_v17, %s8100_s15  ;;  %v10229_v9 = vsub.f32 %v3221_v28, %v10208_v33  ;;  %3493 = vmatpush.msra.mxu3 %v10208_v33  ;;  %v10304_v28 = vsub.f32 %v3215_v52, %v10289_v44 }
 0x476   :  { %v10198_v13 = vpop.permute.xlu2 %3130  ;;  %3280 = vmatpush.msra.mxu0 %v10208_v33  ;;  %3339 = vmatpush.msra.mxu1 %v3338_v46 }
 0x477   :  { %v3138_v39 = vsel %vm13677_vm11, %v3129_v16, %v10198_v13  ;;  %v13510_v7 = vand.u32 4294901760, %v10229_v9  ;;  %3438 = vmatpush.msra.mxu2 %v10229_v9  ;;  %3495 = vmatpush.msra.mxu3 %v10210_v59  ;;  %v3212_v16 = vld [vmem:[#allocation2 + $0x18] sm:$0xff]  ;;  %v13506_v46 = vand.u32 4294901760, %v10304_v28 }
 0x478   :  { %v10216_v23 = vmax.f32 %v3103_v43, %v3138_v39  ;;  %v10236_v43 = vsub.f32 %v3219_v12, %v10212_v42  ;;  %3282 = vmatpush.msra.mxu0 %v10210_v59  ;;  %v3211_v12 = vld [vmem:[#allocation2 + $0x10] sm:$0xff]  ;;  %v3210_v39 = vld [vmem:[#allocation2 + $0x8] sm:$0xff]  ;;  %v10312_v0 = vand.u32 4294901760, %v3212_v16 }
 0x479   :  { %v3343_v48 = vsub.f32 %v10229_v9, %v13510_v7  ;;  %3441 = vmatpush.msra.mxu2 %v10233_v41  ;;  %3497 = vmatpush.msra.mxu3 %v10212_v42  ;;  %v10324_v24 = vand.u32 4294901760, %v3211_v12  ;;  %v10326_v52 = vand.u32 4294901760, %v3210_v39  ;;  %v3236_v7 = vld [vmem:[#allocation2 + $0xd8] sm:$0xff] }
 0x47a   :  { %13678 = vst [vmem:[#allocation13_spill] sm:$0xff] %v10216_v23  ;;  %3181 = vrot.lane.b32.xlu0 %v10216_v23, %s8100_s15  ;;  %v13505_v58 = vand.u32 4294901760, %v10236_v43  ;;  %3284 = vmatpush.msra.mxu0 %v10212_v42 }
 0x47b   :  { %v3344_v57 = vand.u32 4294901760, %v3343_v48  ;;  %3444 = vmatpush.msra.mxu2 %v10236_v43  ;;  %3499 = vmatpush.msra.mxu3 %v10238_v10  ;;  %v3367_v48 = vsub.f32 %v10275_v53, %v13503_v6  ;;  %v10360_v11 = vsub.f32 %v3211_v12, %v10324_v24 }
 0x47c   :  { %v3355_v60 = vsub.f32 %v10236_v43, %v13505_v58  ;;  %3286 = vmatpush.msra.mxu0 %v10238_v10  ;;  %v3362_v58 = vand.u32 4294901760, %v3361_v51  ;;  %v13513_v51 = vand.u32 4294901760, %v10335_v14 }
 0x47d   :  { %3345 = vmatpush.msra.mxu1 %v3344_v57  ;;  %3447 = vmatpush.msra.mxu2 %v10266_v62  ;;  %v3209_v57 = vld [vmem:[#allocation2] sm:$0xff] }
 0x47e   :  { %v10268_v40 = vpop.permute.xlu2 %3122  ;;  %v3356_v56 = vand.u32 4294901760, %v3355_v60  ;;  %3501 = vmatpush.msra.mxu3 %v10246_v8  ;;  %3288 = vmatpush.msra.mxu0 %v10246_v8 }
 0x47f   :  { %v3157_v15 = vmax.f32 %v10268_v40, 0.0  ;;  %3351 = vmatpush.msra.mxu1 %v3350_v36  ;;  %3450 = vmatpush.msra.mxu2 %v10275_v53  ;;  %v3379_v36 = vsub.f32 %v10304_v28, %v13506_v46  ;;  %v3139_v12 = vsel %vm13683_vm15, %v10198_v13, %v10268_v40  ;;  %v10383_v46 = vsub.f32 %v3210_v39, %v10326_v52 }
 0x480   :  { %3503 = vmatpush.msra.mxu3 %v10287_v47  ;;  %3290 = vmatpush.msra.mxu0 %v10287_v47  ;;  %v13516_v39 = vand.u32 4294901760, %v10360_v11  ;;  %v10409_v22 = vmax.f32 %v3104_v2, %v3139_v12 }
 0x481   :  { %3357 = vmatpush.msra.mxu1 %v3356_v56  ;;  %3453 = vmatpush.msra.mxu2 %v10301_v4  ;;  %v3380_v25 = vand.u32 4294901760, %v3379_v36  ;;  %v3235_v36 = vld [vmem:[#allocation2 + $0xd0] sm:$0xff] }
 0x482   :  { %3175 = vrot.lane.b32.xlu0 %v3157_v15, %s8100_s15  ;;  %3505 = vmatpush.msra.mxu3 %v10289_v44  ;;  %13686 = vst [vmem:[#allocation18_spill] sm:$0xff] %v10409_v22  ;;  %v3403_v12 = vsub.f32 %v10360_v11, %v13516_v39  ;;  %v13689_v39 = vand.u32 4294901760, %v10383_v46 }
 0x483   :  { %3363 = vmatpush.msra.mxu1 %v3362_v58  ;;  %3456 = vmatpush.msra.mxu2 %v10304_v28 }
 0x484   :  { %3292 = vmatpush.msra.mxu0 %v10289_v44  ;;  %3507 = vmatpush.msra.mxu3 %v10291_v29 }
 0x485   :  { %3459 = vmatpush.msra.mxu2 %v10310_v55 }
 0x486   :  { %v3121_v5 = vpop.permute.xlu1 %3120  ;;  %3294 = vmatpush.msra.mxu0 %v10291_v29  ;;  %3509 = vmatpush.msra.mxu3 %v10306_v45 }
 0x487   :  { %v3134_v50 = vsel %vm13679_vm13, %v10181_v3, %v3121_v5  ;;  %v3135_v15 = vsel %vm13680_vm14, %v3121_v5, %v10268_v40  ;;  %v13509_v3 = vand.u32 4294901760, %v10310_v55  ;;  %v10348_v5 = vsub.f32 %v3212_v16, %v10312_v0  ;;  %v3238_v16 = vld [vmem:[#allocation2 + $0xe8] sm:$0xff]  ;;  %3462 = vmatpush.msra.mxu2 %v10335_v14 }
 0x488   :  { %v10339_v60 = vmax.f32 %v3099_v18, %v3134_v50  ;;  %v10343_v6 = vmax.f32 %v3100_v1, %v3135_v15  ;;  %v3368_v18 = vand.u32 4294901760, %v3367_v48  ;;  %v10362_v1 = vand.u32 4294901760, %v3209_v57  ;;  %3511 = vmatpush.msra.mxu3 %v10312_v0  ;;  %3296 = vmatpush.msra.mxu0 %v10306_v45 }
 0x489   :  { %v10369_v50 = vand.u32 4294901760, %v3240_v34  ;;  %v10371_v15 = vand.u32 4294901760, %v3239_v19  ;;  %v3385_v56 = vsub.f32 %v10310_v55, %v13509_v3  ;;  %v13515_v48 = vand.u32 4294901760, %v10348_v5  ;;  %3465 = vmatpush.msra.mxu2 %v10348_v5 }
 0x48a   :  { %13681 = vst [vmem:[#allocation14_spill] sm:$0xff] %v10339_v60  ;;  %3171 = vrot.lane.b32.xlu2 %v10339_v60, %s8100_s15  ;;  %3173 = vrot.lane.b32.xlu1 %v10343_v6, %s8100_s15  ;;  %v10389_v40 = vand.u32 4294901760, %v3238_v16  ;;  %v10398_v58 = vsub.f32 %v3209_v57, %v10362_v1  ;;  %v10438_v57 = vand.u32 4294901760, %v3235_v36 }
 0x48b   :  { %13682 = vst [vmem:[#allocation15_spill] sm:$0xff] %v10343_v6  ;;  %v10387_v13 = vsub.f32 %v3240_v34, %v10369_v50  ;;  %v10392_v3 = vsub.f32 %v3239_v19, %v10371_v15  ;;  %3369 = vmatpush.msra.mxu1 %v3368_v18  ;;  %v3391_v34 = vsub.f32 %v10335_v14, %v13513_v51  ;;  %v10414_v18 = vand.u32 4294901760, %v3236_v7 }
 0x48c   :  { %v3386_v51 = vand.u32 4294901760, %v3385_v56  ;;  %v3397_v61 = vsub.f32 %v10348_v5, %v13515_v48  ;;  %v10422_v2 = vsub.f32 %v3238_v16, %v10389_v40  ;;  %v3234_v56 = vld [vmem:[#allocation2 + $0xc8] sm:$0xff]  ;;  %3468 = vmatpush.msra.mxu2 %v10360_v11  ;;  %v13691_v60 = vand.u32 4294901760, %v10398_v58  ;;  %3513 = vmatpush.msra.mxu3 %v10324_v24 }
 0x48d   :  { %13684 = vst [vmem:[#allocation16_spill] sm:$0xff] %v10387_v13  ;;  %v13518_v19 = vand.u32 4294901760, %v10387_v13  ;;  %3375 = vmatpush.msra.mxu1 %v3374_v32  ;;  %v3392_v48 = vand.u32 4294901760, %v3391_v34  ;;  %v3233_v34 = vld [vmem:[#allocation2 + $0xc0] sm:$0xff]  ;;  %v13690_v27 = vand.u32 4294901760, %v10392_v3  ;;  %v10453_v23 = vand.u32 4294901760, %v3234_v56  ;;  %3298 = vmatpush.msra.mxu0 %v10312_v0 }
 0x48e   :  { %13685 = vst [vmem:[#allocation17_spill] sm:$0xff] %v10392_v3  ;;  %v3398_v32 = vand.u32 4294901760, %v3397_v61  ;;  %v3415_v17 = vsub.f32 %v10398_v58, %v13691_v60  ;;  %v3232_v61 = vld [vmem:[#allocation2 + $0xb8] sm:$0xff]  ;;  %3471 = vmatpush.msra.mxu2 %v10383_v46  ;;  %v10465_v6 = vand.u32 4294901760, %v3233_v34  ;;  %3515 = vmatpush.msra.mxu3 %v10326_v52  ;;  %v3230_v60 = vld [vmem:[#allocation2 + $0xa8] sm:$0xff] }
 0x48f   :  { %13687 = vst [vmem:[#allocation19_spill] sm:$0xff] %v10422_v2  ;;  %3381 = vmatpush.msra.mxu1 %v3380_v25  ;;  %v3697_v16 = vsub.f32 %v10387_v13, %v13518_v19  ;;  %v10446_v25 = vsub.f32 %v3236_v7, %v10414_v18  ;;  %v3703_v19 = vsub.f32 %v10392_v3, %v13690_v27  ;;  %v10477_v3 = vand.u32 4294901760, %v3232_v61 }
 0x490   :  { %v10463_v27 = vsub.f32 %v3235_v36, %v10438_v57  ;;  %3300 = vmatpush.msra.mxu0 %v10324_v24  ;;  %3474 = vmatpush.msra.mxu2 %v10398_v58  ;;  %v10475_v36 = vsub.f32 %v3234_v56, %v10453_v23  ;;  %v10488_v56 = vand.u32 4294901760, %v3231_v30 }
 0x491   :  { %3387 = vmatpush.msra.mxu1 %v3386_v51  ;;  %v3698_v7 = vand.u32 4294901760, %v3697_v16  ;;  %v13692_v16 = vand.u32 4294901760, %v10422_v2  ;;  %3517 = vmatpush.msra.mxu3 %v10362_v1  ;;  %v10497_v13 = vsub.f32 %v3232_v61, %v10477_v3 }
 0x492   :  { %3183 = vrot.lane.b32.xlu2 %v10409_v22, %s8100_s15  ;;  %v3409_v22 = vsub.f32 %v10383_v46, %v13689_v39  ;;  %v3404_v39 = vand.u32 4294901760, %v3403_v12  ;;  %3646 = vmatpush.msrb.mxu2 %v10369_v50  ;;  %v10510_v61 = vsub.f32 %v3231_v30, %v10488_v56  ;;  %v13698_v30 = vand.u32 4294901760, %v10225_v20 }
 0x493   :  { %3393 = vmatpush.msra.mxu1 %v3392_v48  ;;  %v3704_v48 = vand.u32 4294901760, %v3703_v19  ;;  %v3709_v51 = vsub.f32 %v10422_v2, %v13692_v16  ;;  %3699 = vmatpush.msrb.mxu3 %v3698_v7  ;;  %v10486_v16 = vsub.f32 %v3233_v34, %v10465_v6  ;;  %v10499_v34 = vand.u32 4294901760, %v3230_v60 }
 0x494   :  { %v3410_v12 = vand.u32 4294901760, %v3409_v22  ;;  %v3416_v22 = vand.u32 4294901760, %v3415_v17  ;;  %3648 = vmatpush.msrb.mxu2 %v10371_v15  ;;  %3302 = vmatpush.msra.mxu0 %v10326_v52  ;;  %v13694_v17 = vand.u32 4294901760, %v10446_v25 }
 0x495   :  { %3399 = vmatpush.msra.mxu1 %v3398_v32  ;;  %v13693_v32 = vand.u32 4294901760, %v10436_v35  ;;  %3705 = vmatpush.msrb.mxu3 %v3704_v48  ;;  %v3710_v7 = vand.u32 4294901760, %v3709_v51  ;;  %v3738_v48 = vand.u32 4294901760, %v10486_v16 }
 0x496   :  { %3650 = vmatpush.msrb.mxu2 %v10389_v40  ;;  %3304 = vmatpush.msra.mxu0 %v10362_v1 }
 0x497   :  { %3405 = vmatpush.msra.mxu1 %v3404_v39  ;;  %v3715_v19 = vsub.f32 %v10436_v35, %v13693_v32  ;;  %v3721_v39 = vsub.f32 %v10446_v25, %v13694_v17  ;;  %v3732_v32 = vand.u32 4294901760, %v10475_v36  ;;  %v13695_v35 = vand.u32 4294901760, %v10219_v54  ;;  %3711 = vmatpush.msrb.mxu3 %v3710_v7 }
 0x498   :  { %3652 = vmatpush.msrb.mxu2 %v10405_v38  ;;  %v10521_v17 = vsub.f32 %v3230_v60, %v10499_v34 }
 0x499   :  { %3411 = vmatpush.msra.mxu1 %v3410_v12  ;;  %3534 = vmatpush.msrb.mxu0 %v13695_v35  ;;  %v3716_v2 = vand.u32 4294901760, %v3715_v19  ;;  %v13696_v12 = vand.u32 4294901760, %v10463_v27  ;;  %v3722_v54 = vand.u32 4294901760, %v3721_v39  ;;  %v3733_v35 = vsub.f32 %v10475_v36, %v3732_v32 }
 0x49a   :  { %v3744_v19 = vand.u32 4294901760, %v10497_v13  ;;  %3654 = vmatpush.msrb.mxu2 %v10414_v18  ;;  %v3750_v39 = vand.u32 4294901760, %v10510_v61 }
 0x49b   :  { %3417 = vmatpush.msra.mxu1 %v3416_v22  ;;  %v3727_v51 = vsub.f32 %v10463_v27, %v13696_v12  ;;  %v13697_v22 = vand.u32 4294901760, %v10222_v49  ;;  %3717 = vmatpush.msrb.mxu3 %v3716_v2  ;;  %v3739_v49 = vsub.f32 %v10486_v16, %v3738_v48  ;;  %v3734_v60 = vand.u32 4294901760, %v3733_v35  ;;  %v3225_v35 = vld [vmem:[#allocation2 + $0x80] sm:$0xff] }
 0x49c   :  { %3656 = vmatpush.msrb.mxu2 %v10438_v57  ;;  %v3745_v20 = vsub.f32 %v10497_v13, %v3744_v19  ;;  %v3756_v2 = vand.u32 4294901760, %v10521_v17  ;;  %v13701_v12 = vand.u32 4294901760, %v10236_v43  ;;  %v13703_v43 = vand.u32 4294901760, %v10275_v53 }
 0x49d   :  { %3605 = vmatpush.msrb.mxu1 %v10200_v31  ;;  %3538 = vmatpush.msrb.mxu0 %v13697_v22  ;;  %v3728_v31 = vand.u32 4294901760, %v3727_v51  ;;  %v3740_v7 = vand.u32 4294901760, %v3739_v49  ;;  %v3229_v22 = vld [vmem:[#allocation2 + $0xa0] sm:$0xff]  ;;  %v13707_v53 = vand.u32 4294901760, %v10335_v14 }
 0x49e   :  { %3723 = vmatpush.msrb.mxu3 %v3722_v54  ;;  %3658 = vmatpush.msrb.mxu2 %v10453_v23  ;;  %v3757_v51 = vsub.f32 %v10521_v17, %v3756_v2 }
 0x49f   :  { %3607 = vmatpush.msrb.mxu1 %v10202_v63  ;;  %3542 = vmatpush.msrb.mxu0 %v13698_v30  ;;  %v13699_v63 = vand.u32 4294901760, %v10229_v9  ;;  %v3751_v9 = vsub.f32 %v10510_v61, %v3750_v39 }
 0x4a0   :  { %3729 = vmatpush.msrb.mxu3 %v3728_v31  ;;  %3660 = vmatpush.msrb.mxu2 %v10465_v6  ;;  %v3758_v54 = vand.u32 4294901760, %v3757_v51 }
 0x4a1   :  { %3609 = vmatpush.msrb.mxu1 %v10204_v26  ;;  %3546 = vmatpush.msrb.mxu0 %v13699_v63  ;;  %v13700_v26 = vand.u32 4294901760, %v10233_v41  ;;  %v13702_v41 = vand.u32 4294901760, %v10266_v62  ;;  %v13704_v62 = vand.u32 4294901760, %v10301_v4  ;;  %v13709_v4 = vand.u32 4294901760, %v10360_v11 }
 0x4a2   :  { %3735 = vmatpush.msrb.mxu3 %v3734_v60  ;;  %3662 = vmatpush.msrb.mxu2 %v10477_v3  ;;  %v10617_v63 = vand.u32 4294901760, %v3225_v35 }
 0x4a3   :  { %3611 = vmatpush.msrb.mxu1 %v10208_v33  ;;  %3550 = vmatpush.msrb.mxu0 %v13700_v26  ;;  %v3746_v33 = vand.u32 4294901760, %v3745_v20 }
 0x4a4   :  { %3741 = vmatpush.msrb.mxu3 %v3740_v7  ;;  %3664 = vmatpush.msrb.mxu2 %v10488_v56  ;;  %v10627_v7 = vsub.f32 %v3225_v35, %v10617_v63 }
 0x4a5   :  { %3613 = vmatpush.msrb.mxu1 %v10210_v59  ;;  %3554 = vmatpush.msrb.mxu0 %v13701_v12  ;;  %v3752_v59 = vand.u32 4294901760, %v3751_v9 }
 0x4a6   :  { %3747 = vmatpush.msrb.mxu3 %v3746_v33  ;;  %3666 = vmatpush.msrb.mxu2 %v10499_v34  ;;  %v3786_v33 = vand.u32 4294901760, %v10627_v7 }
 0x4a7   :  { %3615 = vmatpush.msrb.mxu1 %v10212_v42  ;;  %3558 = vmatpush.msrb.mxu0 %v13702_v41  ;;  %v10563_v42 = vand.u32 4294901760, %v3229_v22 }
 0x4a8   :  { %3753 = vmatpush.msrb.mxu3 %v3752_v59  ;;  %v3787_v41 = vsub.f32 %v10627_v7, %v3786_v33 }
 0x4a9   :  { %3617 = vmatpush.msrb.mxu1 %v10238_v10  ;;  %3562 = vmatpush.msrb.mxu0 %v13703_v43  ;;  %v13705_v10 = vand.u32 4294901760, %v10304_v28  ;;  %v3228_v28 = vld [vmem:[#allocation2 + $0x98] sm:$0xff]  ;;  %v3168_v43 = vpop.permute.xlu0 %3167 }
 0x4aa   :  { %3668 = vmatpush.msrb.mxu2 %v10563_v42  ;;  %3759 = vmatpush.msrb.mxu3 %v3758_v54 }
 0x4ab   :  { %3619 = vmatpush.msrb.mxu1 %v10246_v8  ;;  %3566 = vmatpush.msrb.mxu0 %v13704_v62  ;;  %v13706_v8 = vand.u32 4294901760, %v10310_v55  ;;  %v10593_v55 = vsub.f32 %v3229_v22, %v10563_v42  ;;  %v3788_v22 = vand.u32 4294901760, %v3787_v41  ;;  %v13717_v41 = vld [vmem:[#allocation19_spill] sm:$0xff] }
 0x4ad   :  { %3621 = vmatpush.msrb.mxu1 %v10287_v47  ;;  %3570 = vmatpush.msrb.mxu0 %v13705_v10  ;;  %v13708_v47 = vand.u32 4294901760, %v10348_v5 }
 0x4af   :  { %3623 = vmatpush.msrb.mxu1 %v10289_v44  ;;  %3574 = vmatpush.msrb.mxu0 %v13706_v8  ;;  %v13710_v44 = vand.u32 4294901760, %v10383_v46  ;;  %v3226_v46 = vld [vmem:[#allocation2 + $0x88] sm:$0xff] }
 0x4b1   :  { %3625 = vmatpush.msrb.mxu1 %v10291_v29  ;;  %3578 = vmatpush.msrb.mxu0 %v13707_v53  ;;  %v13711_v29 = vand.u32 4294901760, %v10398_v58 }
 0x4b3   :  { %3627 = vmatpush.msrb.mxu1 %v10306_v45  ;;  %3582 = vmatpush.msrb.mxu0 %v13708_v47  ;;  %v10590_v45 = vand.u32 4294901760, %v3228_v28  ;;  %v3178_v47 = vpop.permute.xlu0 %3177 }
 0x4b5   :  { %3629 = vmatpush.msrb.mxu1 %v10312_v0  ;;  %3586 = vmatpush.msrb.mxu0 %v13709_v4  ;;  %v3227_v0 = vld [vmem:[#allocation2 + $0x90] sm:$0xff] }
 0x4b6   :  { %v10595_v14 = vand.u32 4294901760, %v3227_v0  ;;  %3670 = vmatpush.msrb.mxu2 %v10590_v45 }
 0x4b7   :  { %3631 = vmatpush.msrb.mxu1 %v10324_v24  ;;  %3590 = vmatpush.msrb.mxu0 %v13710_v44  ;;  %v3762_v24 = vand.u32 4294901760, %v10593_v55 }
 0x4b8   :  { %3672 = vmatpush.msrb.mxu2 %v10595_v14  ;;  %v10610_v58 = vsub.f32 %v3227_v0, %v10595_v14 }
 0x4b9   :  { %3633 = vmatpush.msrb.mxu1 %v10326_v52  ;;  %3594 = vmatpush.msrb.mxu0 %v13711_v29  ;;  %v10600_v52 = vsub.f32 %v3228_v28, %v10590_v45  ;;  %v3763_v5 = vsub.f32 %v10593_v55, %v3762_v24 }
 0x4ba   :  { %v3774_v49 = vand.u32 4294901760, %v10610_v58 }
 0x4bb   :  { %3635 = vmatpush.msrb.mxu1 %v10362_v1  ;;  %v3768_v11 = vand.u32 4294901760, %v10600_v52  ;;  %v10607_v1 = vand.u32 4294901760, %v3226_v46  ;;  %v3764_v30 = vand.u32 4294901760, %v3763_v5 }
 0x4bc   :  { %v3775_v26 = vsub.f32 %v10610_v58, %v3774_v49 }
 0x4bd   :  { %v3769_v31 = vsub.f32 %v10600_v52, %v3768_v11  ;;  %3674 = vmatpush.msrb.mxu2 %v10607_v1  ;;  %v10620_v60 = vsub.f32 %v3226_v46, %v10607_v1  ;;  %3765 = vmatpush.msrb.mxu3 %v3764_v30 }
 0x4be   :  { %v3776_v12 = vand.u32 4294901760, %v3775_v26  ;;  %v13716_v26 = vld [vmem:[#allocation11_spill] sm:$0xff] }
 0x4bf   :  { %v3770_v20 = vand.u32 4294901760, %v3769_v31  ;;  %3676 = vmatpush.msrb.mxu2 %v10617_v63  ;;  %v3780_v9 = vand.u32 4294901760, %v10620_v60  ;;  %v13714_v31 = vld [vmem:[#allocation17_spill] sm:$0xff] }
 0x4c1   :  { %3771 = vmatpush.msrb.mxu3 %v3770_v20  ;;  %v3781_v51 = vsub.f32 %v10620_v60, %v3780_v9  ;;  %v13715_v20 = vand.u32 4294901760, %v13714_v31 }
 0x4c3   :  { %3777 = vmatpush.msrb.mxu3 %v3776_v12  ;;  %v3782_v59 = vand.u32 4294901760, %v3781_v51 }
 0x4c5   :  { %3783 = vmatpush.msrb.mxu3 %v3782_v59  ;;  %v13718_v59 = vand.u32 4294901760, %v13717_v41 }
 0x4c7   :  { %3789 = vmatpush.msrb.mxu3 %v3788_v22 }
 0x4dd   :  { %v3170_v54 = vpop.permute.xlu1 %3169 }
 0x4de   :  { %v3185_v62 = vsel %vm390_vm12, %v3168_v43, %v3170_v54 }
 0x4df   :  { %v3201_v10 = vmax.f32 %v10165_v37, %v3185_v62  ;;  %v13712_v37 = vld [vmem:[#allocation16_spill] sm:$0xff] }
 0x4e0   :  { %v13713_v0 = vand.u32 4294901760, %v13712_v37 }
 0x4e1   :  { %v10639_v8 = vand.u32 4294901760, %v3201_v10 }
 0x4e3   :  { %v3306_v53 = vsub.f32 %v3201_v10, %v10639_v8  ;;  %3419 = vmatmul.f32.vlgmr.msra.gmra.mxu1 %v10639_v8 }
 0x4e4   :  { %v10643_v4 = vpop.permute.xlu2 %3171  ;;  %3859 = vmatpush.msra.mxu1 %v10369_v50 }
 0x4e5   :  { %v3186_v44 = vsel %vm390_vm12, %v3170_v54, %v10643_v4  ;;  %3477 = vmatmul.f32.vlgmr.msra.gmra.mxu2 %v3306_v53  ;;  %v3307_v29 = vand.u32 4294901760, %v3306_v53  ;;  %v13719_v54 = vld [vmem:[#allocation20_spill] sm:$0xff] }
 0x4e6   :  { %v3202_v28 = vmax.f32 %v10187_v21, %v3186_v44  ;;  %3861 = vmatpush.msra.mxu1 %v10371_v15  ;;  %3906 = vmatpush.msra.mxu2 %v13713_v0  ;;  %v13720_v62 = vand.u32 4294901760, %v13719_v54 }
 0x4e7   :  { %v3180_v46 = vpop.permute.xlu1 %3179  ;;  %3521 = vmatmul.f32.vlgmr.msra.gmra.mxu3 %v3307_v29  ;;  %v3308_v5 = vsub.f32 %v3306_v53, %v3307_v29 }
 0x4e8   :  { %v10652_v35 = vand.u32 4294901760, %v3202_v28  ;;  %v3189_v30 = vsel %vm390_vm12, %v3178_v47, %v3180_v46  ;;  %3863 = vmatpush.msra.mxu1 %v10389_v40  ;;  %3910 = vmatpush.msra.mxu2 %v13715_v20  ;;  %v3254_v20 = vld [vmem:[#allocation2 + $0x168] sm:$0xff] }
 0x4e9   :  { %v3205_v12 = vmax.f32 %v13716_v26, %v3189_v30  ;;  %3977 = vmatpush.msra.mxu3 %v10369_v50  ;;  %v3309_v21 = vand.u32 4294901760, %v3308_v5 }
 0x4ea   :  { %v10661_v51 = vsub.f32 %v3202_v28, %v10652_v35  ;;  %3865 = vmatpush.msra.mxu1 %v10405_v38  ;;  %3914 = vmatpush.msra.mxu2 %v13718_v59  ;;  %v13722_v28 = vand.u32 4294901760, %v10446_v25  ;;  %v3249_v59 = vld [vmem:[#allocation2 + $0x140] sm:$0xff] }
 0x4eb   :  { %v10666_v22 = vand.u32 4294901760, %v3205_v12  ;;  %3979 = vmatpush.msra.mxu3 %v10371_v15  ;;  %3310 = vmatmul.f32.vlgmr.msra.gmra.mxu0 %v3309_v21  ;;  %v13721_v15 = vld [vmem:[#allocation12_spill] sm:$0xff] }
 0x4ec   :  { %v10669_v43 = vpop.permute.xlu0 %3181  ;;  %3801 = vmatpush.msra.mxu0 %v13712_v37  ;;  %3867 = vmatpush.msra.mxu1 %v10414_v18  ;;  %v3679_v53 = vand.u32 4294901760, %v10661_v51  ;;  %v3251_v21 = vld [vmem:[#allocation2 + $0x150] sm:$0xff] }
 0x4ed   :  { %v3190_v50 = vsel %vm390_vm12, %v3180_v46, %v10669_v43  ;;  %3423 = vmatmul.f32.gmra.mxu1 %v10666_v22  ;;  %3918 = vmatpush.msra.mxu2 %v13720_v62  ;;  %v3314_v10 = vsub.f32 %v3205_v12, %v10666_v22  ;;  %v3256_v46 = vld [vmem:[#allocation2 + $0x178] sm:$0xff]  ;;  %v10796_v62 = vand.u32 4294901760, %v3249_v59 }
 0x4ee   :  { %v3206_v47 = vmax.f32 %v13721_v15, %v3190_v50  ;;  %3981 = vmatpush.msra.mxu3 %v10389_v40  ;;  %3804 = vmatpush.msra.mxu0 %v13714_v31  ;;  %v13723_v40 = vand.u32 4294901760, %v10463_v27  ;;  %v3680_v0 = vsub.f32 %v10661_v51, %v3679_v53  ;;  %v10705_v30 = vand.u32 4294901760, %v3256_v46  ;;  %v3255_v31 = vld [vmem:[#allocation2 + $0x170] sm:$0xff] }
 0x4ef   :  { %3482 = vmatmul.f32.gmra.mxu2 %v3314_v10  ;;  %3869 = vmatpush.msra.mxu1 %v10438_v57  ;;  %v3315_v44 = vand.u32 4294901760, %v3314_v10  ;;  %v3247_v15 = vld [vmem:[#allocation2 + $0x130] sm:$0xff] }
 0x4f0   :  { %v10684_v29 = vand.u32 4294901760, %v3206_v47  ;;  %3922 = vmatpush.msra.mxu2 %v13722_v28  ;;  %3983 = vmatpush.msra.mxu3 %v10405_v38  ;;  %v10821_v28 = vsub.f32 %v3249_v59, %v10796_v62 }
 0x4f1   :  { %3527 = vmatmul.f32.gmra.mxu3 %v3315_v44  ;;  %3807 = vmatpush.msra.mxu0 %v13717_v41  ;;  %v3316_v37 = vsub.f32 %v3314_v10, %v3315_v44  ;;  %v3248_v10 = vld [vmem:[#allocation2 + $0x138] sm:$0xff] }
 0x4f2   :  { %3871 = vmatpush.msra.mxu1 %v10453_v23  ;;  %3926 = vmatpush.msra.mxu2 %v13723_v40  ;;  %v10699_v38 = vsub.f32 %v3206_v47, %v10684_v29  ;;  %v10811_v47 = vand.u32 4294901760, %v3248_v10 }
 0x4f3   :  { %3985 = vmatpush.msra.mxu3 %v10414_v18  ;;  %3810 = vmatpush.msra.mxu0 %v13719_v54  ;;  %v3317_v5 = vand.u32 4294901760, %v3316_v37  ;;  %v3681_v18 = vand.u32 4294901760, %v3680_v0  ;;  %v3245_v37 = vld [vmem:[#allocation2 + $0x120] sm:$0xff] }
 0x4f4   :  { %3873 = vmatpush.msra.mxu1 %v10465_v6  ;;  %3930 = vmatpush.msra.mxu2 %v3732_v32  ;;  %v3687_v32 = vand.u32 4294901760, %v10699_v38  ;;  %v10832_v40 = vsub.f32 %v3248_v10, %v10811_v47 }
 0x4f5   :  { %3987 = vmatpush.msra.mxu3 %v10438_v57  ;;  %3318 = vmatmul.f32.gmra.mxu0 %v3317_v5  ;;  %v10714_v57 = vand.u32 4294901760, %v3255_v31  ;;  %v3244_v5 = vld [vmem:[#allocation2 + $0x118] sm:$0xff] }
 0x4f6   :  { %3637 = vmatmul.f32.vlgmr.msrb.gmra.mxu1 %v10639_v8  ;;  %3813 = vmatpush.msra.mxu0 %v10446_v25  ;;  %v10719_v25 = vsub.f32 %v3256_v46, %v10705_v30  ;;  %v13540_v46 = vand.u32 4294901760, %v10821_v28 }
 0x4f7   :  { %3875 = vmatpush.msra.mxu1 %v10477_v3  ;;  %3934 = vmatpush.msra.mxu2 %v3738_v48  ;;  %v3253_v48 = vld [vmem:[#allocation2 + $0x160] sm:$0xff] }
 0x4f8   :  { %3989 = vmatpush.msra.mxu3 %v10453_v23  ;;  %3682 = vmatmul.f32.vlgmr.msrb.gmra.mxu2 %v3681_v18  ;;  %v10726_v23 = vand.u32 4294901760, %v3254_v20  ;;  %v10740_v26 = vand.u32 4294901760, %v3253_v48 }
 0x4f9   :  { %3816 = vmatpush.msra.mxu0 %v10463_v27  ;;  %3877 = vmatpush.msra.mxu1 %v10488_v56  ;;  %v3688_v27 = vsub.f32 %v10699_v38, %v3687_v32 }
 0x4fa   :  { %3938 = vmatpush.msra.mxu2 %v3744_v19  ;;  %3991 = vmatpush.msra.mxu3 %v10465_v6  ;;  %v10735_v19 = vsub.f32 %v3255_v31, %v10714_v57  ;;  %v3252_v6 = vld [vmem:[#allocation2 + $0x158] sm:$0xff]  ;;  %v10846_v31 = vand.u32 4294901760, %v3245_v37 }
 0x4fb   :  { %3791 = vmatmul.f32.vlgmr.msrb.gmra.mxu3 %v10652_v35  ;;  %3819 = vmatpush.msra.mxu0 %v10475_v36  ;;  %v13549_v36 = vand.u32 4294901760, %v10719_v25  ;;  %v10750_v12 = vand.u32 4294901760, %v3252_v6 }
 0x4fc   :  { %3879 = vmatpush.msra.mxu1 %v10499_v34  ;;  %3942 = vmatpush.msra.mxu2 %v3750_v39  ;;  %v10748_v39 = vsub.f32 %v3254_v20, %v10726_v23  ;;  %v3243_v20 = vld [vmem:[#allocation2 + $0x110] sm:$0xff] }
 0x4fd   :  { %3993 = vmatpush.msra.mxu3 %v10477_v3  ;;  %3822 = vmatpush.msra.mxu0 %v10486_v16  ;;  %v3689_v3 = vand.u32 4294901760, %v3688_v27  ;;  %v13548_v16 = vand.u32 4294901760, %v10735_v19  ;;  %v10769_v41 = vsub.f32 %v3252_v6, %v10750_v12  ;;  %v10858_v27 = vand.u32 4294901760, %v3244_v5 }
 0x4fe   :  { %3881 = vmatpush.msra.mxu1 %v10563_v42  ;;  %3946 = vmatpush.msra.mxu2 %v3756_v2  ;;  %v10762_v2 = vsub.f32 %v3253_v48, %v10740_v26  ;;  %v13539_v48 = vand.u32 4294901760, %v10832_v40  ;;  %v4111_v6 = vsub.f32 %v10821_v28, %v13540_v46 }
 0x4ff   :  { %3995 = vmatpush.msra.mxu3 %v10488_v56  ;;  %3596 = vmatmul.f32.vlgmr.msrb.gmra.mxu0 %v10639_v8  ;;  %v4069_v56 = vsub.f32 %v10719_v25, %v13549_v36  ;;  %v13547_v8 = vand.u32 4294901760, %v10748_v39 }
 0x500   :  { %3641 = vmatmul.f32.gmra.mxu1 %v10666_v22  ;;  %3825 = vmatpush.msra.mxu0 %v10497_v13  ;;  %v3250_v13 = vld [vmem:[#allocation2 + $0x148] sm:$0xff]  ;;  %v13545_v50 = vand.u32 4294901760, %v10762_v2  ;;  %v4117_v59 = vsub.f32 %v10832_v40, %v13539_v48 }
 0x501   :  { %3883 = vmatpush.msra.mxu1 %v10590_v45  ;;  %3950 = vmatpush.msra.mxu2 %v3762_v24  ;;  %v10771_v24 = vand.u32 4294901760, %v3251_v21  ;;  %v10782_v54 = vand.u32 4294901760, %v3250_v13 }
 0x502   :  { %3997 = vmatpush.msra.mxu3 %v10499_v34  ;;  %3690 = vmatmul.f32.gmra.mxu2 %v3689_v3  ;;  %v4075_v34 = vsub.f32 %v10735_v19, %v13548_v16  ;;  %v3242_v3 = vld [vmem:[#allocation2 + $0x108] sm:$0xff] }
 0x503   :  { %3828 = vmatpush.msra.mxu0 %v10510_v61  ;;  %3885 = vmatpush.msra.mxu1 %v10595_v14  ;;  %v4070_v61 = vand.u32 4294901760, %v4069_v56  ;;  %v10868_v56 = vsub.f32 %v3245_v37, %v10846_v31  ;;  %v10884_v10 = vand.u32 4294901760, %v3242_v3  ;;  %v10910_v37 = vpop.permute.xlu1 %3173 }
 0x504   :  { %3954 = vmatpush.msra.mxu2 %v3768_v11  ;;  %3999 = vmatpush.msra.mxu3 %v10563_v42  ;;  %v4081_v42 = vsub.f32 %v10748_v39, %v13547_v8  ;;  %v10794_v11 = vsub.f32 %v3251_v21, %v10771_v24  ;;  %v3264_v8 = vld [vmem:[#allocation2 + $0x1b8] sm:$0xff] }
 0x505   :  { %3795 = vmatmul.f32.gmra.mxu3 %v10684_v29  ;;  %3831 = vmatpush.msra.mxu0 %v10521_v17  ;;  %v13544_v17 = vand.u32 4294901760, %v10769_v41 }
 0x506   :  { %3887 = vmatpush.msra.mxu1 %v10607_v1  ;;  %3958 = vmatpush.msra.mxu2 %v3774_v49  ;;  %v10806_v49 = vsub.f32 %v3250_v13, %v10782_v54  ;;  %v13543_v44 = vand.u32 4294901760, %v10794_v11  ;;  %v10870_v13 = vand.u32 4294901760, %v3243_v20 }
 0x507   :  { %4001 = vmatpush.msra.mxu3 %v10590_v45  ;;  %3834 = vmatpush.msra.mxu0 %v10593_v55  ;;  %v4076_v45 = vand.u32 4294901760, %v4075_v34  ;;  %v4087_v55 = vsub.f32 %v10762_v2, %v13545_v50  ;;  %v3241_v34 = vld [vmem:[#allocation2 + $0x100] sm:$0xff]  ;;  %v3263_v50 = vld [vmem:[#allocation2 + $0x1b0] sm:$0xff] }
 0x508   :  { %3889 = vmatpush.msra.mxu1 %v10617_v63  ;;  %3962 = vmatpush.msra.mxu2 %v3780_v9  ;;  %v4093_v9 = vsub.f32 %v10769_v41, %v13544_v17 }
 0x509   :  { %4003 = vmatpush.msra.mxu3 %v10595_v14  ;;  %3600 = vmatmul.f32.gmra.mxu0 %v10666_v22  ;;  %v4082_v14 = vand.u32 4294901760, %v4081_v42  ;;  %v3246_v22 = vld [vmem:[#allocation2 + $0x128] sm:$0xff]  ;;  %v10882_v42 = vsub.f32 %v3244_v5, %v10858_v27 }
 0x50a   :  { %4071 = vmatpush.msrb.mxu1 %v4070_v61  ;;  %3837 = vmatpush.msra.mxu0 %v10600_v52  ;;  %v4088_v52 = vand.u32 4294901760, %v4087_v55  ;;  %v10834_v0 = vand.u32 4294901760, %v3246_v22  ;;  %v10894_v55 = vsub.f32 %v3243_v20, %v10870_v13 }
 0x50b   :  { %3893 = vmatmul.f32.vlgmr.msra.gmra.mxu1 %v3679_v53  ;;  %3966 = vmatpush.msra.mxu2 %v3786_v33  ;;  %v10824_v53 = vand.u32 4294901760, %v3247_v15  ;;  %v13542_v33 = vand.u32 4294901760, %v10806_v49 }
 0x50c   :  { %4005 = vmatpush.msra.mxu3 %v10607_v1  ;;  %4077 = vmatpush.msrb.mxu1 %v4076_v45  ;;  %v4094_v1 = vand.u32 4294901760, %v4093_v9  ;;  %v13536_v45 = vand.u32 4294901760, %v10868_v56  ;;  %v13532_v5 = vand.u32 4294901760, %v10894_v55 }
 0x50d   :  { %4173 = vmatpush.msrb.mxu2 %v10719_v25  ;;  %3840 = vmatpush.msra.mxu0 %v10610_v58  ;;  %v4099_v58 = vsub.f32 %v10794_v11, %v13543_v44  ;;  %v4105_v18 = vsub.f32 %v10806_v49, %v13542_v33  ;;  %v3265_v33 = vld [vmem:[#allocation2 + $0x1c0] sm:$0xff] }
 0x50e   :  { %3968 = vmatmul.f32.vlgmr.msra.gmra.mxu2 %v10652_v35  ;;  %4007 = vmatpush.msra.mxu3 %v10617_v63  ;;  %v10844_v63 = vsub.f32 %v3247_v15, %v10824_v53  ;;  %v10896_v15 = vand.u32 4294901760, %v3241_v34 }
 0x50f   :  { %4083 = vmatpush.msrb.mxu1 %v4082_v14  ;;  %4176 = vmatpush.msrb.mxu2 %v10735_v19  ;;  %v4118_v14 = vand.u32 4294901760, %v4117_v59  ;;  %v4147_v59 = vsub.f32 %v10894_v55, %v13532_v5  ;;  %v3270_v5 = vld [vmem:[#allocation2 + $0x1e8] sm:$0xff] }
 0x510   :  { %4231 = vmatpush.msrb.mxu3 %v10705_v30  ;;  %3843 = vmatpush.msra.mxu0 %v10620_v60  ;;  %v10856_v60 = vsub.f32 %v3246_v22, %v10834_v0  ;;  %v13538_v21 = vand.u32 4294901760, %v10844_v63  ;;  %v13533_v22 = vand.u32 4294901760, %v10882_v42 }
 0x511   :  { %4009 = vmatmul.f32.vlgmr.msra.gmra.mxu3 %v10652_v35  ;;  %4089 = vmatpush.msrb.mxu1 %v4088_v52  ;;  %v4100_v35 = vand.u32 4294901760, %v4099_v58  ;;  %v10906_v52 = vsub.f32 %v3242_v3, %v10884_v10  ;;  %v4135_v58 = vsub.f32 %v10868_v56, %v13536_v45  ;;  %v3187_v3 = vsel %vm390_vm12, %v10643_v4, %v10910_v37  ;;  %v10941_v4 = vpop.permute.xlu2 %3183 }
 0x512   :  { %4179 = vmatpush.msrb.mxu2 %v10748_v39  ;;  %4233 = vmatpush.msrb.mxu3 %v10714_v57  ;;  %v13537_v61 = vand.u32 4294901760, %v10856_v60 }
 0x513   :  { %3846 = vmatpush.msra.mxu0 %v10627_v7  ;;  %4095 = vmatpush.msrb.mxu1 %v4094_v1  ;;  %v4106_v7 = vand.u32 4294901760, %v4105_v18  ;;  %13724 = vst [vmem:[#allocation16_spill] sm:$0xff] %v10906_v52  ;;  %v10918_v18 = vsub.f32 %v3241_v34, %v10896_v15  ;;  %v4136_v34 = vand.u32 4294901760, %v4135_v58 }
 0x514   :  { %4182 = vmatpush.msrb.mxu2 %v10762_v2  ;;  %4235 = vmatpush.msrb.mxu3 %v10726_v23  ;;  %v4129_v9 = vsub.f32 %v10856_v60, %v13537_v61 }
 0x515   :  { %4018 = vmatpush.msrb.mxu0 %v10705_v30  ;;  %3899 = vmatmul.f32.gmra.mxu1 %v3687_v32  ;;  %v4123_v32 = vsub.f32 %v10844_v63, %v13538_v21  ;;  %13725 = vst [vmem:[#allocation17_spill] sm:$0xff] %v10918_v18 }
 0x516   :  { %3849 = vmatmul.f32.vlgmr.msra.gmra.mxu0 %v10661_v51  ;;  %4101 = vmatpush.msrb.mxu1 %v4100_v35  ;;  %v4112_v51 = vand.u32 4294901760, %v4111_v6  ;;  %v4130_v20 = vand.u32 4294901760, %v4129_v9  ;;  %v4141_v35 = vsub.f32 %v10882_v42, %v13533_v22  ;;  %v13534_v6 = vand.u32 4294901760, %v10906_v52 }
 0x517   :  { %4020 = vmatpush.msrb.mxu0 %v10714_v57  ;;  %4185 = vmatpush.msrb.mxu2 %v10769_v41  ;;  %v4124_v1 = vand.u32 4294901760, %v4123_v32  ;;  %v4148_v22 = vand.u32 4294901760, %v4147_v59  ;;  %v10967_v59 = vand.u32 4294901760, %v3270_v5 }
 0x518   :  { %4237 = vmatpush.msrb.mxu3 %v10740_v26  ;;  %3972 = vmatmul.f32.gmra.mxu2 %v10684_v29  ;;  %v4142_v9 = vand.u32 4294901760, %v4141_v35 }
 0x519   :  { %4022 = vmatpush.msrb.mxu0 %v10726_v23  ;;  %4107 = vmatpush.msrb.mxu1 %v4106_v7  ;;  %v3271_v7 = vld [vmem:[#allocation2 + $0x1f0] sm:$0xff] }
 0x51a   :  { %4188 = vmatpush.msrb.mxu2 %v10794_v11  ;;  %4239 = vmatpush.msrb.mxu3 %v10750_v12  ;;  %v10948_v58 = vand.u32 4294901760, %v3271_v7 }
 0x51b   :  { %4013 = vmatmul.f32.gmra.mxu3 %v10684_v29  ;;  %4024 = vmatpush.msrb.mxu0 %v10740_v26  ;;  %v3272_v29 = vld [vmem:[#allocation2 + $0x1f8] sm:$0xff] }
 0x51c   :  { %4113 = vmatpush.msrb.mxu1 %v4112_v51  ;;  %4191 = vmatpush.msrb.mxu2 %v10806_v49  ;;  %v13535_v51 = vand.u32 4294901760, %v10918_v18  ;;  %v10937_v32 = vand.u32 4294901760, %v3272_v29 }
 0x51d   :  { %4241 = vmatpush.msrb.mxu3 %v10771_v24  ;;  %4026 = vmatpush.msrb.mxu0 %v10750_v12 }
 0x51e   :  { %4119 = vmatpush.msrb.mxu1 %v4118_v14  ;;  %4194 = vmatpush.msrb.mxu2 %v10821_v28  ;;  %v10957_v35 = vsub.f32 %v3272_v29, %v10937_v32  ;;  %v10970_v29 = vsub.f32 %v3271_v7, %v10948_v58  ;;  %v3267_v7 = vld [vmem:[#allocation2 + $0x1d0] sm:$0xff] }
 0x51f   :  { %4243 = vmatpush.msrb.mxu3 %v10782_v54  ;;  %3854 = vmatmul.f32.gmra.mxu0 %v10699_v38  ;;  %v13726_v38 = vld [vmem:[#allocation14_spill] sm:$0xff] }
 0x520   :  { %4028 = vmatpush.msrb.mxu0 %v10771_v24  ;;  %4125 = vmatpush.msrb.mxu1 %v4124_v1  ;;  %v3203_v14 = vmax.f32 %v13726_v38, %v3187_v3  ;;  %v4153_v1 = vsub.f32 %v10906_v52, %v13534_v6  ;;  %v3191_v3 = vsel %vm390_vm12, %v10669_v43, %v10941_v4  ;;  %v3269_v38 = vld [vmem:[#allocation2 + $0x1e0] sm:$0xff]  ;;  %v3268_v43 = vld [vmem:[#allocation2 + $0x1d8] sm:$0xff]  ;;  %v13541_v45 = vand.u32 4294901760, %v10957_v35 }
 0x521   :  { %4197 = vmatpush.msrb.mxu2 %v10832_v40  ;;  %4245 = vmatpush.msrb.mxu3 %v10796_v62  ;;  %v10976_v61 = vand.u32 4294901760, %v3269_v38  ;;  %v13546_v48 = vand.u32 4294901760, %v10970_v29 }
 0x522   :  { %4030 = vmatpush.msrb.mxu0 %v10782_v54  ;;  %4131 = vmatpush.msrb.mxu1 %v4130_v20  ;;  %v4159_v20 = vsub.f32 %v10918_v18, %v13535_v51  ;;  %v10964_v6 = vand.u32 4294901760, %v3203_v14 }
 0x523   :  { %4200 = vmatpush.msrb.mxu2 %v10844_v63  ;;  %4247 = vmatpush.msrb.mxu3 %v10811_v47 }
 0x524   :  { %4032 = vmatpush.msrb.mxu0 %v10796_v62  ;;  %4137 = vmatpush.msrb.mxu1 %v4136_v34  ;;  %v4154_v34 = vand.u32 4294901760, %v4153_v1  ;;  %v4160_v51 = vand.u32 4294901760, %v4159_v20  ;;  %v4050_v21 = vsub.f32 %v3203_v14, %v10964_v6  ;;  %v10987_v20 = vand.u32 4294901760, %v3268_v43 }
 0x525   :  { %4203 = vmatpush.msrb.mxu2 %v10856_v60  ;;  %4249 = vmatpush.msrb.mxu3 %v10824_v53  ;;  %v4441_v14 = vsub.f32 %v10957_v35, %v13541_v45 }
 0x526   :  { %4034 = vmatpush.msrb.mxu0 %v10811_v47  ;;  %4143 = vmatpush.msrb.mxu1 %v4142_v9  ;;  %v13727_v9 = vld [vmem:[#allocation13_spill] sm:$0xff]  ;;  %v4051_v46 = vand.u32 4294901760, %v4050_v21  ;;  %v11011_v45 = vsub.f32 %v3268_v43, %v10987_v20  ;;  %v11025_v43 = vand.u32 4294901760, %v3265_v33 }
 0x527   :  { %4206 = vmatpush.msrb.mxu2 %v10868_v56  ;;  %4251 = vmatpush.msrb.mxu3 %v10834_v0  ;;  %v3207_v1 = vmax.f32 %v13727_v9, %v3191_v3  ;;  %v10996_v3 = vsub.f32 %v3269_v38, %v10976_v61  ;;  %v4442_v17 = vand.u32 4294901760, %v4441_v14 }
 0x528   :  { %4036 = vmatpush.msrb.mxu0 %v10824_v53  ;;  %4149 = vmatpush.msrb.mxu1 %v4148_v22  ;;  %v10985_v22 = vsub.f32 %v3270_v5, %v10967_v59  ;;  %v3266_v5 = vld [vmem:[#allocation2 + $0x1c8] sm:$0xff]  ;;  %13731 = vst [vmem:[#allocation12_spill] sm:$0xff] %v11011_v45  ;;  %v4052_v16 = vsub.f32 %v4050_v21, %v4051_v46 }
 0x529   :  { %4209 = vmatpush.msrb.mxu2 %v10882_v42  ;;  %4253 = vmatpush.msrb.mxu3 %v10846_v31  ;;  %13729 = vst [vmem:[#allocation19_spill] sm:$0xff] %v10996_v3  ;;  %v11000_v9 = vand.u32 4294901760, %v3207_v1  ;;  %v11015_v44 = vand.u32 4294901760, %v3266_v5 }
 0x52a   :  { %4038 = vmatpush.msrb.mxu0 %v10834_v0  ;;  %4155 = vmatpush.msrb.mxu1 %v4154_v34  ;;  %13728 = vst [vmem:[#allocation11_spill] sm:$0xff] %v10985_v22  ;;  %v10998_v34 = vand.u32 4294901760, %v3267_v7  ;;  %v13550_v38 = vand.u32 4294901760, %v10985_v22 }
 0x52b   :  { %4212 = vmatpush.msrb.mxu2 %v10894_v55  ;;  %4255 = vmatpush.msrb.mxu3 %v10858_v27  ;;  %13730 = vst [vmem:[#allocation20_spill] sm:$0xff] %v11000_v9 }
 0x52c   :  { %4040 = vmatpush.msrb.mxu0 %v10846_v31  ;;  %4161 = vmatpush.msrb.mxu1 %v4160_v51  ;;  %v4447_v51 = vsub.f32 %v10970_v29, %v13546_v48  ;;  %v11020_v48 = vsub.f32 %v3267_v7, %v10998_v34  ;;  %v4453_v7 = vsub.f32 %v10985_v22, %v13550_v38  ;;  %v3176_v22 = vpop.permute.xlu0 %3175 }
 0x52d   :  { %4215 = vmatpush.msrb.mxu2 %v10906_v52  ;;  %4257 = vmatpush.msrb.mxu3 %v10870_v13  ;;  %v13737_v52 = vand.u32 4294901760, %v10719_v25  ;;  %v13738_v25 = vand.u32 4294901760, %v10735_v19  ;;  %v13740_v19 = vand.u32 4294901760, %v10748_v39  ;;  %v13743_v39 = vand.u32 4294901760, %v10762_v2 }
 0x52e   :  { %4163 = vmatmul.f32.vlgmr.msrb.gmra.mxu1 %v10964_v6  ;;  %4042 = vmatpush.msrb.mxu0 %v10858_v27  ;;  %13732 = vst [vmem:[#allocation14_spill] sm:$0xff] %v11020_v48  ;;  %v4448_v14 = vand.u32 4294901760, %v4447_v51 }
 0x52f   :  { %4349 = vmatpush.msra.mxu1 %v10705_v30  ;;  %4218 = vmatpush.msrb.mxu2 %v10918_v18  ;;  %v4058_v30 = vsub.f32 %v3207_v1, %v11000_v9  ;;  %v11037_v1 = vand.u32 4294901760, %v3264_v8  ;;  %v3262_v18 = vld [vmem:[#allocation2 + $0x1a8] sm:$0xff] }
 0x530   :  { %4259 = vmatpush.msrb.mxu3 %v10884_v10  ;;  %4221 = vmatmul.f32.vlgmr.msrb.gmra.mxu2 %v4050_v21  ;;  %v13734_v21 = vand.u32 4294901760, %v10996_v3 }
 0x531   :  { %4351 = vmatpush.msra.mxu1 %v10714_v57  ;;  %4390 = vmatpush.msra.mxu2 %v10937_v32  ;;  %v11035_v57 = vsub.f32 %v3266_v5, %v11015_v44  ;;  %v4053_v5 = vand.u32 4294901760, %v4052_v16  ;;  %v4059_v36 = vand.u32 4294901760, %v4058_v30  ;;  %v11061_v16 = vand.u32 4294901760, %v3262_v18 }
 0x532   :  { %4044 = vmatpush.msrb.mxu0 %v10870_v13  ;;  %4261 = vmatpush.msrb.mxu3 %v10896_v15  ;;  %v4459_v51 = vsub.f32 %v10996_v3, %v13734_v21  ;;  %v13735_v21 = vand.u32 4294901760, %v11011_v45  ;;  %v3261_v3 = vld [vmem:[#allocation2 + $0x1a0] sm:$0xff] }
 0x533   :  { %4265 = vmatmul.f32.vlgmr.msrb.gmra.mxu3 %v4051_v46  ;;  %4353 = vmatpush.msra.mxu1 %v10726_v23  ;;  %13733 = vst [vmem:[#allocation13_spill] sm:$0xff] %v11035_v57  ;;  %v11047_v23 = vsub.f32 %v3265_v33, %v11025_v43  ;;  %v11049_v46 = vand.u32 4294901760, %v3263_v50  ;;  %v11059_v33 = vsub.f32 %v3264_v8, %v11037_v1  ;;  %v13742_v8 = vld [vmem:[#allocation15_spill] sm:$0xff] }
 0x534   :  { %4392 = vmatpush.msra.mxu2 %v10948_v58  ;;  %4443 = vmatpush.msra.mxu3 %v4442_v17  ;;  %v4454_v17 = vand.u32 4294901760, %v4453_v7  ;;  %v4465_v38 = vsub.f32 %v11011_v45, %v13735_v21  ;;  %v13736_v7 = vand.u32 4294901760, %v11020_v48  ;;  %v3260_v45 = vld [vmem:[#allocation2 + $0x198] sm:$0xff] }
 0x535   :  { %4046 = vmatpush.msrb.mxu0 %v10884_v10  ;;  %4355 = vmatpush.msra.mxu1 %v10740_v26  ;;  %v11072_v26 = vsub.f32 %v3263_v50, %v11049_v46 }
 0x536   :  { %4394 = vmatpush.msra.mxu2 %v10967_v59  ;;  %4449 = vmatpush.msra.mxu3 %v4448_v14  ;;  %v4460_v14 = vand.u32 4294901760, %v4459_v51  ;;  %v4471_v21 = vsub.f32 %v11020_v48, %v13736_v7  ;;  %v4466_v51 = vand.u32 4294901760, %v4465_v38  ;;  %v4060_v7 = vsub.f32 %v4058_v30, %v4059_v36  ;;  %v3259_v48 = vld [vmem:[#allocation2 + $0x190] sm:$0xff] }
 0x537   :  { %4048 = vmatpush.msrb.mxu0 %v10896_v15  ;;  %4167 = vmatmul.f32.gmra.mxu1 %v11000_v9  ;;  %v11086_v9 = vsub.f32 %v3262_v18, %v11061_v16  ;;  %v11100_v18 = vand.u32 4294901760, %v3259_v48 }
 0x538   :  { %4054 = vmatmul.f32.vlgmr.msrb.gmra.mxu0 %v4053_v5  ;;  %4357 = vmatpush.msra.mxu1 %v10750_v12  ;;  %v11074_v5 = vand.u32 4294901760, %v3261_v3  ;;  %v3188_v12 = vsel %vm390_vm12, %v10910_v37, %v3176_v22  ;;  %v11088_v37 = vand.u32 4294901760, %v3260_v45  ;;  %v4472_v38 = vand.u32 4294901760, %v4471_v21 }
 0x539   :  { %4278 = vmatpush.msra.mxu0 %v13737_v52  ;;  %4396 = vmatpush.msra.mxu2 %v10976_v61  ;;  %v13739_v52 = vand.u32 4294901760, %v11035_v57  ;;  %v13744_v21 = vand.u32 4294901760, %v11059_v33 }
 0x53a   :  { %4455 = vmatpush.msra.mxu3 %v4454_v17  ;;  %4226 = vmatmul.f32.gmra.mxu2 %v4058_v30  ;;  %v4494_v17 = vand.u32 4294901760, %v11072_v26 }
 0x53b   :  { %4282 = vmatpush.msra.mxu0 %v13738_v25  ;;  %4359 = vmatpush.msra.mxu1 %v10771_v24  ;;  %v4477_v50 = vsub.f32 %v11035_v57, %v13739_v52  ;;  %v13741_v24 = vand.u32 4294901760, %v11047_v23  ;;  %v11098_v25 = vsub.f32 %v3261_v3, %v11074_v5  ;;  %v3258_v52 = vld [vmem:[#allocation2 + $0x188] sm:$0xff]  ;;  %v3204_v57 = vmax.f32 %v13742_v8, %v3188_v12  ;;  %v3257_v8 = vld [vmem:[#allocation2 + $0x180] sm:$0xff] }
 0x53c   :  { %4398 = vmatpush.msra.mxu2 %v10987_v20  ;;  %4461 = vmatpush.msra.mxu3 %v4460_v14  ;;  %v4489_v3 = vsub.f32 %v11059_v33, %v13744_v21  ;;  %v4495_v12 = vsub.f32 %v11072_v26, %v4494_v17 }
 0x53d   :  { %4271 = vmatmul.f32.gmra.mxu3 %v4059_v36  ;;  %4286 = vmatpush.msra.mxu0 %v13740_v19  ;;  %v4483_v30 = vsub.f32 %v11047_v23, %v13741_v24  ;;  %v4061_v36 = vand.u32 4294901760, %v4060_v7  ;;  %v4478_v14 = vand.u32 4294901760, %v4477_v50  ;;  %v4500_v19 = vand.u32 4294901760, %v11086_v9 }
 0x53e   :  { %4361 = vmatpush.msra.mxu1 %v10782_v54  ;;  %4400 = vmatpush.msra.mxu2 %v10998_v34  ;;  %v11112_v24 = vsub.f32 %v3260_v45, %v11088_v37  ;;  %v11116_v54 = vand.u32 4294901760, %v3258_v52  ;;  %v11123_v7 = vsub.f32 %v3259_v48, %v11100_v18  ;;  %v11125_v45 = vand.u32 4294901760, %v3204_v57 }
 0x53f   :  { %4467 = vmatpush.msra.mxu3 %v4466_v51  ;;  %4290 = vmatpush.msra.mxu0 %v13743_v39  ;;  %v4484_v2 = vand.u32 4294901760, %v4483_v30  ;;  %v4506_v51 = vand.u32 4294901760, %v11098_v25  ;;  %v11130_v50 = vand.u32 4294901760, %v3257_v8  ;;  %v4501_v30 = vsub.f32 %v11086_v9, %v4500_v19 }
 0x540   :  { %4363 = vmatpush.msra.mxu1 %v10796_v62  ;;  %4402 = vmatpush.msra.mxu2 %v11015_v44  ;;  %v13745_v62 = vand.u32 4294901760, %v10769_v41  ;;  %v4512_v48 = vand.u32 4294901760, %v11112_v24  ;;  %v11141_v41 = vsub.f32 %v3258_v52, %v11116_v54  ;;  %v4496_v39 = vand.u32 4294901760, %v4495_v12 }
 0x541   :  { %4473 = vmatpush.msra.mxu3 %v4472_v38  ;;  %4062 = vmatmul.f32.gmra.mxu0 %v4061_v36  ;;  %v4490_v38 = vand.u32 4294901760, %v4489_v3  ;;  %v13746_v36 = vand.u32 4294901760, %v10794_v11  ;;  %v4518_v21 = vand.u32 4294901760, %v11123_v7  ;;  %v11151_v11 = vsub.f32 %v3204_v57, %v11125_v45  ;;  %v13748_v3 = vld [vmem:[#allocation18_spill] sm:$0xff] }
 0x542   :  { %4294 = vmatpush.msra.mxu0 %v13745_v62  ;;  %4365 = vmatpush.msra.mxu1 %v10811_v47  ;;  %v3192_v47 = vsel %vm390_vm12, %v10941_v4, %v3176_v22  ;;  %v11157_v4 = vsub.f32 %v3257_v8, %v11130_v50  ;;  %v4502_v22 = vand.u32 4294901760, %v4501_v30  ;;  %v4513_v52 = vsub.f32 %v11112_v24, %v4512_v48 }
 0x543   :  { %4404 = vmatpush.msra.mxu2 %v11025_v43  ;;  %4479 = vmatpush.msra.mxu3 %v4478_v14  ;;  %v4507_v14 = vsub.f32 %v11098_v25, %v4506_v51  ;;  %v13749_v57 = vand.u32 4294901760, %v10821_v28  ;;  %v4519_v8 = vsub.f32 %v11123_v7, %v4518_v21  ;;  %v4423_v12 = vand.u32 4294901760, %v11151_v11 }
 0x544   :  { %4298 = vmatpush.msra.mxu0 %v13746_v36  ;;  %4367 = vmatpush.msra.mxu1 %v10824_v53  ;;  %v13747_v53 = vand.u32 4294901760, %v10806_v49  ;;  %v4524_v49 = vand.u32 4294901760, %v11141_v41  ;;  %v13750_v62 = vand.u32 4294901760, %v10832_v40  ;;  %v4530_v28 = vand.u32 4294901760, %v11157_v4 }
 0x545   :  { %4406 = vmatpush.msra.mxu2 %v11037_v1  ;;  %4485 = vmatpush.msra.mxu3 %v4484_v2  ;;  %v3208_v2 = vmax.f32 %v13748_v3, %v3192_v47  ;;  %v13751_v30 = vand.u32 4294901760, %v10844_v63  ;;  %v4424_v36 = vsub.f32 %v11151_v11, %v4423_v12  ;;  %v13752_v47 = vand.u32 4294901760, %v10856_v60  ;;  %v13758_v3 = vld [vmem:[#allocation16_spill] sm:$0xff] }
 0x546   :  { %4302 = vmatpush.msra.mxu0 %v13747_v53  ;;  %4369 = vmatpush.msra.mxu1 %v10834_v0  ;;  %v4508_v0 = vand.u32 4294901760, %v4507_v14  ;;  %v4525_v40 = vsub.f32 %v11141_v41, %v4524_v49  ;;  %v4531_v63 = vsub.f32 %v11157_v4, %v4530_v28  ;;  %vm4807_vm12 = vcmask 523264  }
 0x547   :  { %4408 = vmatpush.msra.mxu2 %v11049_v46  ;;  %4491 = vmatpush.msra.mxu3 %v4490_v38  ;;  %v11178_v38 = vand.u32 4294901760, %v3208_v2  ;;  %v4425_v60 = vand.u32 4294901760, %v4424_v36 }
 0x548   :  { %4306 = vmatpush.msra.mxu0 %v13749_v57  ;;  %4371 = vmatpush.msra.mxu1 %v10846_v31  ;;  %v4514_v31 = vand.u32 4294901760, %v4513_v52  ;;  %v4526_v14 = vand.u32 4294901760, %v4525_v40  ;;  %v4532_v53 = vand.u32 4294901760, %v4531_v63 }
 0x549   :  { %4410 = vmatpush.msra.mxu2 %v11061_v16  ;;  %4497 = vmatpush.msra.mxu3 %v4496_v39  ;;  %v13753_v39 = vand.u32 4294901760, %v10868_v56 }
 0x54a   :  { %4310 = vmatpush.msra.mxu0 %v13750_v62  ;;  %4373 = vmatpush.msra.mxu1 %v10858_v27  ;;  %v4520_v27 = vand.u32 4294901760, %v4519_v8  ;;  %v13764_v62 = vld [vmem:[#allocation20_spill] sm:$0xff] }
 0x54b   :  { %4412 = vmatpush.msra.mxu2 %v11074_v5  ;;  %4503 = vmatpush.msra.mxu3 %v4502_v22  ;;  %v13756_v22 = vand.u32 4294901760, %v10894_v55  ;;  %v13760_v55 = vld [vmem:[#allocation11_spill] sm:$0xff] }
 0x54c   :  { %4314 = vmatpush.msra.mxu0 %v13751_v30  ;;  %4375 = vmatpush.msra.mxu1 %v10870_v13  ;;  %v11198_v13 = vsub.f32 %v3208_v2, %v11178_v38  ;;  %v13759_v2 = vand.u32 4294901760, %v13758_v3  ;;  %v13761_v57 = vand.u32 4294901760, %v13760_v55 }
 0x54d   :  { %4414 = vmatpush.msra.mxu2 %v11088_v37  ;;  %4509 = vmatpush.msra.mxu3 %v4508_v0  ;;  %v13762_v0 = vld [vmem:[#allocation17_spill] sm:$0xff] }
 0x54e   :  { %4318 = vmatpush.msra.mxu0 %v13752_v47  ;;  %4377 = vmatpush.msra.mxu1 %v10884_v10  ;;  %v13754_v10 = vand.u32 4294901760, %v10882_v42  ;;  %v4431_v56 = vand.u32 4294901760, %v11198_v13  ;;  %v13757_v42 = vand.u32 4294901760, %v10970_v29  ;;  %v13763_v8 = vand.u32 4294901760, %v13762_v0 }
 0x54f   :  { %4416 = vmatpush.msra.mxu2 %v11100_v18  ;;  %4515 = vmatpush.msra.mxu3 %v4514_v31  ;;  %v13765_v31 = vld [vmem:[#allocation19_spill] sm:$0xff] }
 0x550   :  { %4322 = vmatpush.msra.mxu0 %v13753_v39  ;;  %4379 = vmatpush.msra.mxu1 %v10896_v15  ;;  %v13755_v15 = vand.u32 4294901760, %v10957_v35  ;;  %v4432_v52 = vsub.f32 %v11198_v13, %v4431_v56  ;;  %v13766_v30 = vand.u32 4294901760, %v13765_v31 }
 0x551   :  { %4418 = vmatpush.msra.mxu2 %v11116_v54  ;;  %4521 = vmatpush.msra.mxu3 %v4520_v27 }
 0x552   :  { %4381 = vmatmul.f32.vlgmr.msra.gmra.mxu1 %v10964_v6  ;;  %4326 = vmatpush.msra.mxu0 %v13754_v10 }
 0x553   :  { %4603 = vmatpush.msrb.mxu1 %v10937_v32  ;;  %4420 = vmatpush.msra.mxu2 %v11130_v50 }
 0x554   :  { %4527 = vmatpush.msra.mxu3 %v4526_v14  ;;  %4426 = vmatmul.f32.vlgmr.msra.gmra.mxu2 %v4425_v60 }
 0x555   :  { %4605 = vmatpush.msrb.mxu1 %v10948_v58  ;;  %4650 = vmatpush.msrb.mxu2 %v13755_v15 }
 0x556   :  { %4330 = vmatpush.msra.mxu0 %v13756_v22  ;;  %4533 = vmatpush.msra.mxu3 %v4532_v53 }
 0x557   :  { %4535 = vmatmul.f32.vlgmr.msra.gmra.mxu3 %v11125_v45  ;;  %4607 = vmatpush.msrb.mxu1 %v10967_v59 }
 0x558   :  { %4654 = vmatpush.msrb.mxu2 %v13757_v42  ;;  %4721 = vmatpush.msrb.mxu3 %v10937_v32  ;;  %v4433_v32 = vand.u32 4294901760, %v4432_v52 }
 0x559   :  { %4334 = vmatpush.msra.mxu0 %v13759_v2  ;;  %4609 = vmatpush.msrb.mxu1 %v10976_v61 }
 0x55a   :  { %4658 = vmatpush.msrb.mxu2 %v13761_v57  ;;  %4723 = vmatpush.msrb.mxu3 %v10948_v58  ;;  %v13767_v58 = vld [vmem:[#allocation12_spill] sm:$0xff] }
 0x55b   :  { %4338 = vmatpush.msra.mxu0 %v13763_v8  ;;  %4385 = vmatmul.f32.gmra.mxu1 %v13764_v62  ;;  %v13768_v40 = vand.u32 4294901760, %v13767_v58 }
 0x55c   :  { %4340 = vmatmul.f32.vlgmr.msra.gmra.mxu0 %v10964_v6  ;;  %4611 = vmatpush.msrb.mxu1 %v10987_v20  ;;  %v13769_v6 = vld [vmem:[#allocation14_spill] sm:$0xff] }
 0x55d   :  { %4545 = vmatpush.msrb.mxu0 %v10957_v35  ;;  %4662 = vmatpush.msrb.mxu2 %v13766_v30  ;;  %v13770_v35 = vand.u32 4294901760, %v13769_v6 }
 0x55e   :  { %4725 = vmatpush.msrb.mxu3 %v10967_v59  ;;  %4434 = vmatmul.f32.gmra.mxu2 %v4433_v32  ;;  %v13771_v59 = vld [vmem:[#allocation13_spill] sm:$0xff] }
 0x55f   :  { %4548 = vmatpush.msrb.mxu0 %v10970_v29  ;;  %4613 = vmatpush.msrb.mxu1 %v10998_v34  ;;  %v13772_v29 = vand.u32 4294901760, %v13771_v59 }
 0x560   :  { %4666 = vmatpush.msrb.mxu2 %v13768_v40  ;;  %4727 = vmatpush.msrb.mxu3 %v10976_v61  ;;  %v13773_v61 = vand.u32 4294901760, %v11047_v23 }
 0x561   :  { %4539 = vmatmul.f32.gmra.mxu3 %v11178_v38  ;;  %4551 = vmatpush.msrb.mxu0 %v13760_v55 }
 0x562   :  { %4615 = vmatpush.msrb.mxu1 %v11015_v44  ;;  %4670 = vmatpush.msrb.mxu2 %v13770_v35 }
 0x563   :  { %4729 = vmatpush.msrb.mxu3 %v10987_v20  ;;  %4554 = vmatpush.msrb.mxu0 %v13765_v31  ;;  %v13774_v20 = vand.u32 4294901760, %v11059_v33 }
 0x564   :  { %4617 = vmatpush.msrb.mxu1 %v11025_v43  ;;  %4674 = vmatpush.msrb.mxu2 %v13772_v29 }
 0x565   :  { %4731 = vmatpush.msrb.mxu3 %v10998_v34  ;;  %4344 = vmatmul.f32.gmra.mxu0 %v13764_v62  ;;  %v3420_v34 = vpop.f32.mrf.mxu1 }
 0x566   :  { %4557 = vmatpush.msrb.mxu0 %v13767_v58  ;;  %4619 = vmatpush.msrb.mxu1 %v11037_v1 }
 0x567   :  { %4678 = vmatpush.msrb.mxu2 %v13773_v61  ;;  %4733 = vmatpush.msrb.mxu3 %v11015_v44 }
 0x568   :  { %4560 = vmatpush.msrb.mxu0 %v13769_v6  ;;  %4621 = vmatpush.msrb.mxu1 %v11049_v46  ;;  %v3311_v44 = vpop.f32.mrf.mxu0 }
 0x569   :  { %4682 = vmatpush.msrb.mxu2 %v13774_v20  ;;  %4735 = vmatpush.msrb.mxu3 %v11025_v43 }
 0x56a   :  { %4563 = vmatpush.msrb.mxu0 %v13771_v59  ;;  %4623 = vmatpush.msrb.mxu1 %v11061_v16  ;;  %v3522_v43 = vpop.f32.mrf.mxu3 }
 0x56b   :  { %4686 = vmatpush.msrb.mxu2 %v4494_v17  ;;  %4737 = vmatpush.msrb.mxu3 %v11037_v1  ;;  %v3421_v17 = vadd.f32 %v3420_v34, %v3311_v44 }
 0x56c   :  { %4566 = vmatpush.msrb.mxu0 %v11047_v23  ;;  %4625 = vmatpush.msrb.mxu1 %v11074_v5 }
 0x56d   :  { %4690 = vmatpush.msrb.mxu2 %v4500_v19  ;;  %4739 = vmatpush.msrb.mxu3 %v11049_v46  ;;  %v3424_v23 = vpop.f32.mrf.mxu1 }
 0x56e   :  { %4569 = vmatpush.msrb.mxu0 %v11059_v33  ;;  %4627 = vmatpush.msrb.mxu1 %v11088_v37 }
 0x56f   :  { %4694 = vmatpush.msrb.mxu2 %v4506_v51  ;;  %4741 = vmatpush.msrb.mxu3 %v11061_v16 }
 0x570   :  { %4572 = vmatpush.msrb.mxu0 %v11072_v26  ;;  %4629 = vmatpush.msrb.mxu1 %v11100_v18 }
 0x571   :  { %4698 = vmatpush.msrb.mxu2 %v4512_v48  ;;  %4743 = vmatpush.msrb.mxu3 %v11074_v5 }
 0x572   :  { %4575 = vmatpush.msrb.mxu0 %v11086_v9  ;;  %4631 = vmatpush.msrb.mxu1 %v11116_v54  ;;  %v3478_v9 = vpop.f32.mrf.mxu2  ;;  %v3319_v1 = vpop.f32.mrf.mxu0 }
 0x573   :  { %4702 = vmatpush.msrb.mxu2 %v4518_v21  ;;  %4745 = vmatpush.msrb.mxu3 %v11088_v37  ;;  %v3479_v19 = vadd.f32 %v3478_v9, %v3421_v17 }
 0x574   :  { %4578 = vmatpush.msrb.mxu0 %v11098_v25  ;;  %4633 = vmatpush.msrb.mxu1 %v11130_v50  ;;  %v3528_v26 = vpop.f32.mrf.mxu3 }
 0x575   :  { %4706 = vmatpush.msrb.mxu2 %v4524_v49  ;;  %4747 = vmatpush.msrb.mxu3 %v11100_v18  ;;  %v3638_v16 = vpop.f32.mrf.mxu1  ;;  %v3523_v51 = vadd.f32 %v3522_v43, %v3479_v19 }
 0x576   :  { %4637 = vmatmul.f32.vlgmr.msrb.gmra.mxu1 %v4423_v12  ;;  %4581 = vmatpush.msrb.mxu0 %v11112_v24 }
 0x577   :  { %4710 = vmatpush.msrb.mxu2 %v4530_v28  ;;  %4749 = vmatpush.msrb.mxu3 %v11116_v54 }
 0x578   :  { %4712 = vmatmul.f32.vlgmr.msrb.gmra.mxu2 %v11125_v45  ;;  %4584 = vmatpush.msrb.mxu0 %v11123_v7  ;;  %v3425_v7 = vadd.f32 %v3424_v23, %v3319_v1 }
 0x579   :  { %4751 = vmatpush.msrb.mxu3 %v11130_v50 }
 0x57a   :  { %4753 = vmatmul.f32.vlgmr.msrb.gmra.mxu3 %v11125_v45  ;;  %4587 = vmatpush.msrb.mxu0 %v11141_v41  ;;  %v3483_v46 = vpop.f32.mrf.mxu2 }
 0x57b   :  { %v3484_v41 = vadd.f32 %v3483_v46, %v3425_v7 }
 0x57c   :  { %4590 = vmatpush.msrb.mxu0 %v11157_v4  ;;  %v3597_v33 = vpop.f32.mrf.mxu0 }
 0x57d   :  { %4593 = vmatmul.f32.vlgmr.msrb.gmra.mxu0 %v11151_v11  ;;  %v3642_v18 = vpop.f32.mrf.mxu1  ;;  %v3598_v45 = vadd.f32 %v3597_v33, %v3523_v51  ;;  %v3529_v49 = vadd.f32 %v3528_v26, %v3484_v41 }
 0x57e   :  { %4643 = vmatmul.f32.gmra.mxu1 %v4431_v56  ;;  %v3792_v37 = vpop.f32.mrf.mxu3 }
 0x57f   :  { %v3639_v21 = vadd.f32 %v3638_v16, %v3598_v45 }
 0x580   :  { %4716 = vmatmul.f32.gmra.mxu2 %v11178_v38 }
 0x582   :  { %4757 = vmatmul.f32.gmra.mxu3 %v11178_v38  ;;  %v3683_v5 = vpop.f32.mrf.mxu2 }
 0x583   :  { %v3684_v12 = vadd.f32 %v3683_v5, %v3639_v21 }
 0x585   :  { %4598 = vmatmul.f32.gmra.mxu0 %v11198_v13  ;;  %v3793_v27 = vadd.f32 %v3792_v37, %v3684_v12 }
 0x586   :  { %v3601_v25 = vpop.f32.mrf.mxu0 }
 0x587   :  { %v3602_v28 = vadd.f32 %v3601_v25, %v3529_v49 }
 0x588   :  { %v3796_v54 = vpop.f32.mrf.mxu3  ;;  %v3894_v48 = vpop.f32.mrf.mxu1 }
 0x589   :  { %v3643_v47 = vadd.f32 %v3642_v18, %v3602_v28 }
 0x58a   :  { %v3691_v24 = vpop.f32.mrf.mxu2 }
 0x58b   :  { %v3692_v14 = vadd.f32 %v3691_v24, %v3643_v47 }
 0x58d   :  { %v3797_v56 = vadd.f32 %v3796_v54, %v3692_v14 }
 0x592   :  { %v3969_v11 = vpop.f32.mrf.mxu2  ;;  %v3900_v36 = vpop.f32.mrf.mxu1 }
 0x593   :  { %v3850_v50 = vpop.f32.mrf.mxu0 }
 0x594   :  { %v4010_v4 = vpop.f32.mrf.mxu3  ;;  %v3851_v63 = vadd.f32 %v3850_v50, %v3793_v27  ;;  %v4904_v27 = vld [vmem:[#allocation5 + $0x78] sm:$0xff] }
 0x596   :  { %v3895_v60 = vadd.f32 %v3894_v48, %v3851_v63  ;;  %v11331_v63 = vand.u32 4294901760, %v4904_v27 }
 0x598   :  { %v3970_v15 = vadd.f32 %v3969_v11, %v3895_v60  ;;  %5218 = vmatpush.msra.mxu3 %v11331_v63  ;;  %5022 = vmatpush.msra.mxu0 %v11331_v63 }
 0x59a   :  { %v4011_v3 = vadd.f32 %v4010_v4, %v3970_v15  ;;  %v4899_v15 = vld [vmem:[#allocation5 + $0x50] sm:$0xff] }
 0x59b   :  { %v3973_v13 = vpop.f32.mrf.mxu2 }
 0x59c   :  { %v3855_v38 = vpop.f32.mrf.mxu0 }
 0x59d   :  { %v3856_v42 = vadd.f32 %v3855_v38, %v3797_v56  ;;  %v4900_v56 = vld [vmem:[#allocation5 + $0x58] sm:$0xff] }
 0x59e   :  { %v4014_v39 = vpop.f32.mrf.mxu3 }
 0x59f   :  { %v3901_v2 = vadd.f32 %v3900_v36, %v3856_v42  ;;  %v4903_v36 = vld [vmem:[#allocation5 + $0x70] sm:$0xff]  ;;  %v11346_v42 = vsub.f32 %v4904_v27, %v11331_v63 }
 0x5a0   :  { %v11339_v60 = vand.u32 4294901760, %v4903_v36 }
 0x5a1   :  { %v3974_v8 = vadd.f32 %v3973_v13, %v3901_v2  ;;  %v4902_v13 = vld [vmem:[#allocation5 + $0x68] sm:$0xff]  ;;  %5165 = vmatpush.msra.mxu2 %v11346_v42 }
 0x5a2   :  { %5220 = vmatpush.msra.mxu3 %v11339_v60  ;;  %5024 = vmatpush.msra.mxu0 %v11339_v60 }
 0x5a3   :  { %v4015_v30 = vadd.f32 %v4014_v39, %v3974_v8  ;;  %v4901_v39 = vld [vmem:[#allocation5 + $0x60] sm:$0xff] }
 0x5ab   :  { %v4164_v53 = vpop.f32.mrf.mxu1 }
 0x5b3   :  { %v4222_v22 = vpop.f32.mrf.mxu2 }
 0x5b4   :  { %v4168_v0 = vpop.f32.mrf.mxu1 }
 0x5b5   :  { %v4055_v10 = vpop.f32.mrf.mxu0 }
 0x5b6   :  { %v4266_v52 = vpop.f32.mrf.mxu3  ;;  %v4056_v55 = vadd.f32 %v4055_v10, %v4011_v3  ;;  %v11341_v10 = vand.u32 4294901760, %v4902_v13  ;;  %v11352_v3 = vand.u32 4294901760, %v4899_v15 }
 0x5b8   :  { %v4165_v62 = vadd.f32 %v4164_v53, %v4056_v55  ;;  %v11343_v53 = vand.u32 4294901760, %v4901_v39  ;;  %v4897_v55 = vld [vmem:[#allocation5 + $0x40] sm:$0xff]  ;;  %5222 = vmatpush.msra.mxu3 %v11341_v10  ;;  %5026 = vmatpush.msra.mxu0 %v11341_v10 }
 0x5ba   :  { %v4223_v58 = vadd.f32 %v4222_v22, %v4165_v62  ;;  %v4898_v22 = vld [vmem:[#allocation5 + $0x48] sm:$0xff]  ;;  %v11363_v8 = vsub.f32 %v4901_v39, %v11343_v53  ;;  %v11365_v62 = vand.u32 4294901760, %v4897_v55  ;;  %5224 = vmatpush.msra.mxu3 %v11343_v53  ;;  %5028 = vmatpush.msra.mxu0 %v11343_v53 }
 0x5bb   :  { %v11354_v2 = vand.u32 4294901760, %v4898_v22 }
 0x5bc   :  { %v4267_v59 = vadd.f32 %v4266_v52, %v4223_v58  ;;  %v11350_v52 = vand.u32 4294901760, %v4900_v56  ;;  %v11375_v58 = vsub.f32 %v4899_v15, %v11352_v3 }
 0x5bd   :  { %v4227_v32 = vpop.f32.mrf.mxu2 }
 0x5be   :  { %v4063_v57 = vpop.f32.mrf.mxu0  ;;  %5226 = vmatpush.msra.mxu3 %v11350_v52  ;;  %5030 = vmatpush.msra.mxu0 %v11350_v52 }
 0x5bf   :  { %v4064_v6 = vadd.f32 %v4063_v57, %v4015_v30  ;;  %v11357_v57 = vsub.f32 %v4903_v36, %v11339_v60  ;;  %v11372_v30 = vsub.f32 %v4900_v56, %v11350_v52 }
 0x5c0   :  { %v4272_v31 = vpop.f32.mrf.mxu3  ;;  %5228 = vmatpush.msra.mxu3 %v11352_v3  ;;  %5032 = vmatpush.msra.mxu0 %v11352_v3 }
 0x5c1   :  { %v4169_v61 = vadd.f32 %v4168_v0, %v4064_v6  ;;  %v11360_v0 = vsub.f32 %v4902_v13, %v11341_v10  ;;  %v5070_v6 = vand.u32 4294901760, %v11357_v57  ;;  %5168 = vmatpush.msra.mxu2 %v11357_v57  ;;  %v4891_v13 = vld [vmem:[#allocation5 + $0x10] sm:$0xff] }
 0x5c2   :  { %5230 = vmatpush.msra.mxu3 %v11354_v2  ;;  %5034 = vmatpush.msra.mxu0 %v11354_v2 }
 0x5c3   :  { %v4228_v34 = vadd.f32 %v4227_v32, %v4169_v61  ;;  %5171 = vmatpush.msra.mxu2 %v11360_v0 }
 0x5c4   :  { %5232 = vmatpush.msra.mxu3 %v11365_v62  ;;  %5036 = vmatpush.msra.mxu0 %v11365_v62 }
 0x5c5   :  { %v4273_v23 = vadd.f32 %v4272_v31, %v4228_v34  ;;  %v5064_v31 = vand.u32 4294901760, %v11346_v42  ;;  %5174 = vmatpush.msra.mxu2 %v11363_v8 }
 0x5c7   :  { %5177 = vmatpush.msra.mxu2 %v11372_v30 }
 0x5c9   :  { %5180 = vmatpush.msra.mxu2 %v11375_v58 }
 0x5cf   :  { %v4382_v35 = vpop.f32.mrf.mxu1 }
 0x5d7   :  { %v4427_v29 = vpop.f32.mrf.mxu2 }
 0x5d8   :  { %v4386_v1 = vpop.f32.mrf.mxu1 }
 0x5d9   :  { %v4341_v40 = vpop.f32.mrf.mxu0 }
 0x5da   :  { %v4342_v20 = vadd.f32 %v4341_v40, %v4267_v59  ;;  %v4536_v44 = vpop.f32.mrf.mxu3  ;;  %v5082_v59 = vand.u32 4294901760, %v11363_v8 }
 0x5dc   :  { %v4383_v9 = vadd.f32 %v4382_v35, %v4342_v20  ;;  %v5076_v35 = vand.u32 4294901760, %v11360_v0  ;;  %v5065_v20 = vsub.f32 %v11346_v42, %v5064_v31 }
 0x5de   :  { %v4428_v46 = vadd.f32 %v4427_v29, %v4383_v9  ;;  %v11382_v29 = vsub.f32 %v4898_v22, %v11354_v2  ;;  %v5071_v9 = vsub.f32 %v11357_v57, %v5070_v6  ;;  %v4917_v57 = vld [vmem:[#allocation5 + $0xe0] sm:$0xff] }
 0x5e0   :  { %v4537_v5 = vadd.f32 %v4536_v44, %v4428_v46  ;;  %v5088_v44 = vand.u32 4294901760, %v11372_v30  ;;  %v5066_v46 = vand.u32 4294901760, %v5065_v20  ;;  %v4890_v20 = vld [vmem:[#allocation5 + $0x8] sm:$0xff]  ;;  %5183 = vmatpush.msra.mxu2 %v11382_v29 }
 0x5e1   :  { %v4435_v26 = vpop.f32.mrf.mxu2 }
 0x5e2   :  { %v4345_v43 = vpop.f32.mrf.mxu0  ;;  %5067 = vmatpush.msra.mxu1 %v5066_v46  ;;  %v11470_v46 = vand.u32 4294901760, %v4891_v13 }
 0x5e3   :  { %v4346_v33 = vadd.f32 %v4345_v43, %v4273_v23  ;;  %v5077_v43 = vsub.f32 %v11360_v0, %v5076_v35  ;;  %v4896_v23 = vld [vmem:[#allocation5 + $0x38] sm:$0xff] }
 0x5e4   :  { %v4540_v16 = vpop.f32.mrf.mxu3 }
 0x5e5   :  { %v4387_v17 = vadd.f32 %v4386_v1, %v4346_v33  ;;  %v11404_v1 = vsub.f32 %v4897_v55, %v11365_v62  ;;  %v5094_v33 = vand.u32 4294901760, %v11375_v58 }
 0x5e7   :  { %v4436_v54 = vadd.f32 %v4435_v26, %v4387_v17  ;;  %v5083_v26 = vsub.f32 %v11363_v8, %v5082_v59  ;;  %v5100_v17 = vand.u32 4294901760, %v11382_v29  ;;  %5186 = vmatpush.msra.mxu2 %v11404_v1 }
 0x5e9   :  { %v4541_v48 = vadd.f32 %v4540_v16, %v4436_v54  ;;  %v4895_v16 = vld [vmem:[#allocation5 + $0x30] sm:$0xff]  ;;  %v5106_v54 = vand.u32 4294901760, %v11404_v1  ;;  %v5101_v36 = vsub.f32 %v11382_v29, %v5100_v17 }
 0x5f3   :  { %v4638_v18 = vpop.f32.mrf.mxu1 }
 0x5fa   :  { %v4594_v37 = vpop.f32.mrf.mxu0 }
 0x5fb   :  { %v4595_v25 = vadd.f32 %v4594_v37, %v4537_v5  ;;  %v4713_v24 = vpop.f32.mrf.mxu2  ;;  %v4644_v4 = vpop.f32.mrf.mxu1  ;;  %v4894_v5 = vld [vmem:[#allocation5 + $0x28] sm:$0xff]  ;;  %v5072_v37 = vand.u32 4294901760, %v5071_v9 }
 0x5fd   :  { %v4639_v19 = vadd.f32 %v4638_v18, %v4595_v25  ;;  %v4754_v7 = vpop.f32.mrf.mxu3  ;;  %v4893_v25 = vld [vmem:[#allocation5 + $0x20] sm:$0xff]  ;;  %v5078_v18 = vand.u32 4294901760, %v5077_v43  ;;  %5073 = vmatpush.msra.mxu1 %v5072_v37 }
 0x5ff   :  { %v4714_v51 = vadd.f32 %v4713_v24, %v4639_v19  ;;  %v5089_v19 = vsub.f32 %v11372_v30, %v5088_v44  ;;  %v11422_v24 = vand.u32 4294901760, %v4896_v23  ;;  %5079 = vmatpush.msra.mxu1 %v5078_v18  ;;  %v11486_v18 = vand.u32 4294901760, %v4890_v20 }
 0x601   :  { %v11313_v45 = vadd.f32 %v4754_v7, %v4714_v51  ;;  %v11427_v51 = vand.u32 4294901760, %v4895_v16  ;;  %v11429_v7 = vand.u32 4294901760, %v4894_v5  ;;  %v5090_v39 = vand.u32 4294901760, %v5089_v19  ;;  %5234 = vmatpush.msra.mxu3 %v11422_v24  ;;  %5038 = vmatpush.msra.mxu0 %v11422_v24 }
 0x602   :  { %v4599_v50 = vpop.f32.mrf.mxu0 }
 0x603   :  { %4816 = vrot.lane.b32.xlu1 %v11313_v45, %s8105_s6  ;;  %v4766_v41 = vrot.slane %v11313_v45, 2  ;;  %v4762_v21 = vrot.slane %v11313_v45, 1  ;;  %v4600_v11 = vadd.f32 %v4599_v50, %v4541_v48  ;;  %v4768_v12 = vrot.slane %v11313_v45, 3  ;;  %v4717_v47 = vpop.f32.mrf.mxu2  ;;  %v4892_v50 = vld [vmem:[#allocation5 + $0x18] sm:$0xff]  ;;  %5236 = vmatpush.msra.mxu3 %v11427_v51 }
 0x604   :  { %v4774_v28 = vrot.slane %v11313_v45, 5  ;;  %v4772_v38 = vrot.slane %v11313_v45, 4  ;;  %v13568_v32 = vrot.slane %v11313_v45, 6  ;;  %v13572_v34 = vrot.slane %v11313_v45, 7  ;;  %5040 = vmatpush.msra.mxu0 %v11427_v51 }
 0x605   :  { %4820 = vrot.lane.b32.xlu0 %v4766_v41, %s8105_s6  ;;  %4763 = vrot.lane.b32.xlu2 %v4762_v21, %s8105_s6  ;;  %v4645_v49 = vadd.f32 %v4644_v4, %v4600_v11  ;;  %v4758_v40 = vpop.f32.mrf.mxu3  ;;  %v5084_v48 = vand.u32 4294901760, %v5083_v26  ;;  %v5095_v11 = vsub.f32 %v11375_v58, %v5094_v33  ;;  %v11436_v4 = vsub.f32 %v4896_v23, %v11422_v24 }
 0x606   :  { %v11452_v56 = vsub.f32 %v4894_v5, %v11429_v7  ;;  %v11454_v15 = vand.u32 4294901760, %v4892_v50  ;;  %v5102_v26 = vand.u32 4294901760, %v5101_v36  ;;  %v11496_v36 = vsub.f32 %v4891_v13, %v11470_v46  ;;  %5238 = vmatpush.msra.mxu3 %v11429_v7  ;;  %5042 = vmatpush.msra.mxu0 %v11429_v7 }
 0x607   :  { %v4718_v14 = vadd.f32 %v4717_v47, %v4645_v49  ;;  %v11438_v49 = vand.u32 4294901760, %v4893_v25  ;;  %v11447_v47 = vsub.f32 %v4895_v16, %v11427_v51  ;;  %5085 = vmatpush.msra.mxu1 %v5084_v48  ;;  %v5096_v9 = vand.u32 4294901760, %v5095_v11  ;;  %v4889_v16 = vld [vmem:[#allocation5] sm:$0xff]  ;;  %5189 = vmatpush.msra.mxu2 %v11436_v4 }
 0x608   :  { %v5124_v37 = vand.u32 4294901760, %v11452_v56  ;;  %v11509_v13 = vsub.f32 %v4890_v20, %v11486_v18  ;;  %v5142_v20 = vand.u32 4294901760, %v11496_v36 }
 0x609   :  { %v11384_v61 = vadd.f32 %v4758_v40, %v4718_v14  ;;  %v5112_v14 = vand.u32 4294901760, %v11436_v4  ;;  %v5107_v40 = vsub.f32 %v11404_v1, %v5106_v54  ;;  %v5118_v43 = vand.u32 4294901760, %v11447_v47  ;;  %5091 = vmatpush.msra.mxu1 %v5090_v39  ;;  %5192 = vmatpush.msra.mxu2 %v11447_v47 }
 0x60a   :  { %v11468_v23 = vsub.f32 %v4893_v25, %v11438_v49  ;;  %v11484_v25 = vsub.f32 %v4892_v50, %v11454_v15  ;;  %v11498_v50 = vand.u32 4294901760, %v4889_v16  ;;  %5240 = vmatpush.msra.mxu3 %v11438_v49  ;;  %5044 = vmatpush.msra.mxu0 %v11438_v49 }
 0x60b   :  { %4769 = vrot.lane.b32.xlu1 %v4768_v12, %s8105_s6  ;;  %v13567_v27 = vrot.slane %v11384_v61, 1  ;;  %v13566_v22 = vrot.slane %v11384_v61, 3  ;;  %v13565_v55 = vrot.slane %v11384_v61, 2  ;;  %v5113_v5 = vsub.f32 %v11436_v4, %v5112_v14  ;;  %5097 = vmatpush.msra.mxu1 %v5096_v9 }
 0x60c   :  { %v5108_v19 = vand.u32 4294901760, %v5107_v40  ;;  %v5119_v48 = vsub.f32 %v11447_v47, %v5118_v43  ;;  %v5130_v11 = vand.u32 4294901760, %v11468_v23  ;;  %v13569_v39 = vrot.slane %v11384_v61, 4  ;;  %5195 = vmatpush.msra.mxu2 %v11452_v56  ;;  %5242 = vmatpush.msra.mxu3 %v11454_v15 }
 0x60d   :  { %4775 = vrot.lane.b32.xlu0 %v4774_v28, %s8105_s6  ;;  %4824 = vrot.lane.b32.xlu2 %v4772_v38, %s8105_s6  ;;  %v5114_v40 = vand.u32 4294901760, %v5113_v5  ;;  %v5125_v9 = vsub.f32 %v11452_v56, %v5124_v37 }
 0x60e   :  { %5103 = vmatpush.msra.mxu1 %v5102_v26  ;;  %v13571_v26 = vrot.slane %v11384_v61, 5  ;;  %v5120_v5 = vand.u32 4294901760, %v5119_v48  ;;  %5198 = vmatpush.msra.mxu2 %v11468_v23 }
 0x60f   :  { %5244 = vmatpush.msra.mxu3 %v11470_v46  ;;  %5046 = vmatpush.msra.mxu0 %v11454_v15 }
 0x610   :  { %5109 = vmatpush.msra.mxu1 %v5108_v19  ;;  %v5126_v19 = vand.u32 4294901760, %v5125_v9  ;;  %5201 = vmatpush.msra.mxu2 %v11484_v25 }
 0x611   :  { %5246 = vmatpush.msra.mxu3 %v11486_v18  ;;  %5048 = vmatpush.msra.mxu0 %v11470_v46 }
 0x612   :  { %5115 = vmatpush.msra.mxu1 %v5114_v40  ;;  %v5143_v40 = vsub.f32 %v11496_v36, %v5142_v20  ;;  %5204 = vmatpush.msra.mxu2 %v11496_v36 }
 0x613   :  { %4828 = vrot.lane.b32.xlu1 %v13568_v32, %s8105_s6  ;;  %v11523_v32 = vsub.f32 %v4889_v16, %v11498_v50  ;;  %5248 = vmatpush.msra.mxu3 %v11498_v50 }
 0x614   :  { %5121 = vmatpush.msra.mxu1 %v5120_v5  ;;  %v5144_v5 = vand.u32 4294901760, %v5143_v40  ;;  %5207 = vmatpush.msra.mxu2 %v11509_v13 }
 0x615   :  { %4832 = vrot.lane.b32.xlu0 %v11384_v61, %s8105_s6  ;;  %4781 = vrot.lane.b32.xlu2 %v13572_v34, %s8105_s6  ;;  %v5154_v9 = vand.u32 4294901760, %v11523_v32 }
 0x616   :  { %5127 = vmatpush.msra.mxu1 %v5126_v19  ;;  %5210 = vmatpush.msra.mxu2 %v11523_v32 }
 0x617   :  { %v5155_v19 = vsub.f32 %v11523_v32, %v5154_v9  ;;  %5050 = vmatpush.msra.mxu0 %v11486_v18 }
 0x619   :  { %v5156_v40 = vand.u32 4294901760, %v5155_v19  ;;  %5052 = vmatpush.msra.mxu0 %v11498_v50 }
 0x61b   :  { %4786 = vrot.lane.b32.xlu1 %v13567_v27, %s8105_s6  ;;  %v5131_v27 = vsub.f32 %v11468_v23, %v5130_v11  ;;  %5259 = vmatpush.msrb.mxu0 %v5064_v31  ;;  %v11602_v31 = vand.u32 4294901760, %v4917_v57 }
 0x61d   :  { %4792 = vrot.lane.b32.xlu0 %v13566_v22, %s8105_s6  ;;  %4836 = vrot.lane.b32.xlu2 %v13565_v55, %s8105_s6  ;;  %v5136_v55 = vand.u32 4294901760, %v11484_v25  ;;  %v13570_v22 = vrot.slane %v11384_v61, 6  ;;  %v5132_v16 = vand.u32 4294901760, %v5131_v27  ;;  %v11618_v19 = vsub.f32 %v4917_v57, %v11602_v31 }
 0x61e   :  { %5263 = vmatpush.msrb.mxu0 %v5070_v6 }
 0x61f   :  { %v5137_v48 = vsub.f32 %v11484_v25, %v5136_v55  ;;  %5133 = vmatpush.msra.mxu1 %v5132_v16 }
 0x620   :  { %5267 = vmatpush.msrb.mxu0 %v5076_v35 }
 0x622   :  { %5271 = vmatpush.msrb.mxu0 %v5082_v59 }
 0x623   :  { %4840 = vrot.lane.b32.xlu1 %v13569_v39, %s8105_s6  ;;  %v5148_v39 = vand.u32 4294901760, %v11509_v13 }
 0x624   :  { %5275 = vmatpush.msrb.mxu0 %v5088_v44 }
 0x625   :  { %4844 = vrot.lane.b32.xlu0 %v13570_v22, %s8105_s6  ;;  %4798 = vrot.lane.b32.xlu2 %v13571_v26, %s8105_s6  ;;  %v13575_v22 = vrot.slane %v11384_v61, 7  ;;  %v5138_v26 = vand.u32 4294901760, %v5137_v48  ;;  %v5149_v27 = vsub.f32 %v11509_v13, %v5148_v39  ;;  %v4920_v48 = vld [vmem:[#allocation5 + $0xf8] sm:$0xff] }
 0x626   :  { %v11563_v16 = vand.u32 4294901760, %v4920_v48  ;;  %5279 = vmatpush.msrb.mxu0 %v5094_v33 }
 0x627   :  { %5139 = vmatpush.msra.mxu1 %v5138_v26  ;;  %v5150_v34 = vand.u32 4294901760, %v5149_v27 }
 0x628   :  { %5363 = vmatpush.msrb.mxu2 %v11563_v16  ;;  %v11577_v26 = vsub.f32 %v4920_v48, %v11563_v16  ;;  %5283 = vmatpush.msrb.mxu0 %v5100_v17 }
 0x629   :  { %5145 = vmatpush.msra.mxu1 %v5144_v5 }
 0x62a   :  { %5287 = vmatpush.msrb.mxu0 %v5106_v54 }
 0x62b   :  { %4804 = vrot.lane.b32.xlu1 %v13575_v22, %s8105_s6  ;;  %5151 = vmatpush.msra.mxu1 %v5150_v34  ;;  %v4919_v34 = vld [vmem:[#allocation5 + $0xf0] sm:$0xff] }
 0x62c   :  { %v11582_v27 = vand.u32 4294901760, %v4919_v34  ;;  %5291 = vmatpush.msrb.mxu0 %v5112_v14 }
 0x62d   :  { %5157 = vmatpush.msra.mxu1 %v5156_v40 }
 0x62e   :  { %5365 = vmatpush.msrb.mxu2 %v11582_v27  ;;  %5295 = vmatpush.msrb.mxu0 %v5118_v43 }
 0x62f   :  { %5326 = vmatpush.msrb.mxu1 %v11331_v63  ;;  %v4918_v63 = vld [vmem:[#allocation5 + $0xe8] sm:$0xff] }
 0x630   :  { %v11589_v42 = vand.u32 4294901760, %v4918_v63  ;;  %5299 = vmatpush.msrb.mxu0 %v5124_v37 }
 0x631   :  { %5328 = vmatpush.msrb.mxu1 %v11339_v60  ;;  %v5405_v60 = vand.u32 4294901760, %v11577_v26 }
 0x632   :  { %5367 = vmatpush.msrb.mxu2 %v11589_v42  ;;  %v11605_v6 = vsub.f32 %v4918_v63, %v11589_v42  ;;  %5303 = vmatpush.msrb.mxu0 %v5130_v11 }
 0x633   :  { %5330 = vmatpush.msrb.mxu1 %v11341_v10  ;;  %v11592_v10 = vsub.f32 %v4919_v34, %v11582_v27  ;;  %v5423_v34 = vand.u32 4294901760, %v11618_v19 }
 0x634   :  { %5369 = vmatpush.msrb.mxu2 %v11602_v31  ;;  %v5417_v59 = vand.u32 4294901760, %v11605_v6  ;;  %5307 = vmatpush.msrb.mxu0 %v5136_v55 }
 0x635   :  { %5332 = vmatpush.msrb.mxu1 %v11343_v53  ;;  %v5406_v53 = vsub.f32 %v11577_v26, %v5405_v60  ;;  %v5411_v0 = vand.u32 4294901760, %v11592_v10 }
 0x636   :  { %v5418_v44 = vsub.f32 %v11605_v6, %v5417_v59  ;;  %5311 = vmatpush.msrb.mxu0 %v5142_v20 }
 0x637   :  { %5334 = vmatpush.msrb.mxu1 %v11350_v52  ;;  %v4916_v52 = vld [vmem:[#allocation5 + $0xd8] sm:$0xff]  ;;  %v5407_v8 = vand.u32 4294901760, %v5406_v53  ;;  %v5412_v35 = vsub.f32 %v11592_v10, %v5411_v0  ;;  %v5424_v53 = vsub.f32 %v11618_v19, %v5423_v34 }
 0x638   :  { %v11615_v5 = vand.u32 4294901760, %v4916_v52  ;;  %v5419_v58 = vand.u32 4294901760, %v5418_v44  ;;  %5315 = vmatpush.msrb.mxu0 %v5148_v39 }
 0x639   :  { %5336 = vmatpush.msrb.mxu1 %v11352_v3  ;;  %v4915_v3 = vld [vmem:[#allocation5 + $0xd0] sm:$0xff]  ;;  %5408 = vmatpush.msrb.mxu3 %v5407_v8  ;;  %v5413_v30 = vand.u32 4294901760, %v5412_v35  ;;  %v5425_v35 = vand.u32 4294901760, %v5424_v53 }
 0x63a   :  { %5371 = vmatpush.msrb.mxu2 %v11615_v5  ;;  %v11627_v48 = vand.u32 4294901760, %v4915_v3  ;;  %v11630_v40 = vsub.f32 %v4916_v52, %v11615_v5  ;;  %5319 = vmatpush.msrb.mxu0 %v5154_v9 }
 0x63b   :  { %5338 = vmatpush.msrb.mxu1 %v11354_v2  ;;  %v4914_v2 = vld [vmem:[#allocation5 + $0xc8] sm:$0xff]  ;;  %5414 = vmatpush.msrb.mxu3 %v5413_v30 }
 0x63c   :  { %5373 = vmatpush.msrb.mxu2 %v11627_v48  ;;  %v5429_v33 = vand.u32 4294901760, %v11630_v40  ;;  %v11638_v63 = vand.u32 4294901760, %v4914_v2  ;;  %v11641_v57 = vsub.f32 %v4915_v3, %v11627_v48 }
 0x63d   :  { %5340 = vmatpush.msrb.mxu1 %v11365_v62  ;;  %v4913_v62 = vld [vmem:[#allocation5 + $0xc0] sm:$0xff]  ;;  %5420 = vmatpush.msrb.mxu3 %v5419_v58 }
 0x63e   :  { %v5430_v29 = vsub.f32 %v11630_v40, %v5429_v33  ;;  %5375 = vmatpush.msrb.mxu2 %v11638_v63  ;;  %v5435_v17 = vand.u32 4294901760, %v11641_v57  ;;  %v11654_v52 = vand.u32 4294901760, %v4913_v62  ;;  %v11657_v8 = vsub.f32 %v4914_v2, %v11638_v63 }
 0x63f   :  { %5342 = vmatpush.msrb.mxu1 %v11422_v24  ;;  %v4912_v24 = vld [vmem:[#allocation5 + $0xb8] sm:$0xff]  ;;  %5426 = vmatpush.msrb.mxu3 %v5425_v35 }
 0x640   :  { %v5431_v1 = vand.u32 4294901760, %v5430_v29  ;;  %v5436_v54 = vsub.f32 %v11641_v57, %v5435_v17  ;;  %5377 = vmatpush.msrb.mxu2 %v11654_v52  ;;  %v5441_v3 = vand.u32 4294901760, %v11657_v8  ;;  %v11667_v30 = vand.u32 4294901760, %v4912_v24 }
 0x641   :  { %5344 = vmatpush.msrb.mxu1 %v11427_v51  ;;  %v11670_v44 = vsub.f32 %v4913_v62, %v11654_v52  ;;  %v4911_v51 = vld [vmem:[#allocation5 + $0xb0] sm:$0xff] }
 0x642   :  { %v5437_v4 = vand.u32 4294901760, %v5436_v54  ;;  %v5442_v14 = vsub.f32 %v11657_v8, %v5441_v3  ;;  %5379 = vmatpush.msrb.mxu2 %v11667_v30  ;;  %v11677_v2 = vand.u32 4294901760, %v4911_v51  ;;  %v11680_v58 = vsub.f32 %v4912_v24, %v11667_v30  ;;  %5432 = vmatpush.msrb.mxu3 %v5431_v1 }
 0x643   :  { %5346 = vmatpush.msrb.mxu1 %v11429_v7  ;;  %v5447_v53 = vand.u32 4294901760, %v11670_v44  ;;  %v4910_v7 = vld [vmem:[#allocation5 + $0xa8] sm:$0xff] }
 0x644   :  { %v5443_v62 = vand.u32 4294901760, %v5442_v14  ;;  %5381 = vmatpush.msrb.mxu2 %v11677_v2  ;;  %v5453_v29 = vand.u32 4294901760, %v11680_v58  ;;  %v11688_v35 = vand.u32 4294901760, %v4910_v7  ;;  %v11691_v54 = vsub.f32 %v4911_v51, %v11677_v2  ;;  %5438 = vmatpush.msrb.mxu3 %v5437_v4 }
 0x645   :  { %5348 = vmatpush.msrb.mxu1 %v11438_v49  ;;  %v5448_v47 = vsub.f32 %v11670_v44, %v5447_v53  ;;  %v4909_v49 = vld [vmem:[#allocation5 + $0xa0] sm:$0xff] }
 0x646   :  { %v5454_v43 = vsub.f32 %v11680_v58, %v5453_v29  ;;  %5383 = vmatpush.msrb.mxu2 %v11688_v35  ;;  %v5459_v24 = vand.u32 4294901760, %v11691_v54  ;;  %v11704_v1 = vand.u32 4294901760, %v4909_v49  ;;  %v11707_v56 = vsub.f32 %v4910_v7, %v11688_v35  ;;  %5444 = vmatpush.msrb.mxu3 %v5443_v62 }
 0x647   :  { %5350 = vmatpush.msrb.mxu1 %v11454_v15  ;;  %v5449_v37 = vand.u32 4294901760, %v5448_v47  ;;  %v4908_v15 = vld [vmem:[#allocation5 + $0x98] sm:$0xff] }
 0x648   :  { %v5455_v51 = vand.u32 4294901760, %v5454_v43  ;;  %v5460_v4 = vsub.f32 %v11691_v54, %v5459_v24  ;;  %5385 = vmatpush.msrb.mxu2 %v11704_v1  ;;  %v5465_v14 = vand.u32 4294901760, %v11707_v56  ;;  %v11719_v23 = vand.u32 4294901760, %v4908_v15 }
 0x649   :  { %5352 = vmatpush.msrb.mxu1 %v11470_v46  ;;  %5450 = vmatpush.msrb.mxu3 %v5449_v37  ;;  %v11722_v11 = vsub.f32 %v4909_v49, %v11704_v1  ;;  %v4907_v46 = vld [vmem:[#allocation5 + $0x90] sm:$0xff] }
 0x64a   :  { %v5461_v7 = vand.u32 4294901760, %v5460_v4  ;;  %v5466_v62 = vsub.f32 %v11707_v56, %v5465_v14  ;;  %v11728_v47 = vand.u32 4294901760, %v4907_v46  ;;  %5387 = vmatpush.msrb.mxu2 %v11719_v23  ;;  %v11735_v25 = vsub.f32 %v4908_v15, %v11719_v23  ;;  %v4905_v15 = vld [vmem:[#allocation5 + $0x80] sm:$0xff] }
 0x64b   :  { %5354 = vmatpush.msrb.mxu1 %v11486_v18  ;;  %5456 = vmatpush.msrb.mxu3 %v5455_v51  ;;  %v5471_v55 = vand.u32 4294901760, %v11722_v11  ;;  %v4906_v18 = vld [vmem:[#allocation5 + $0x88] sm:$0xff]  ;;  %v11751_v51 = vand.u32 4294901760, %v4905_v15 }
 0x64c   :  { %v5467_v49 = vand.u32 4294901760, %v5466_v62  ;;  %v11738_v43 = vand.u32 4294901760, %v4906_v18  ;;  %v11741_v37 = vsub.f32 %v4907_v46, %v11728_v47  ;;  %5389 = vmatpush.msrb.mxu2 %v11728_v47  ;;  %v5477_v20 = vand.u32 4294901760, %v11735_v25 }
 0x64d   :  { %5356 = vmatpush.msrb.mxu1 %v11498_v50  ;;  %5462 = vmatpush.msrb.mxu3 %v5461_v7  ;;  %v5472_v36 = vsub.f32 %v11722_v11, %v5471_v55  ;;  %v11767_v62 = vsub.f32 %v4905_v15, %v11751_v51 }
 0x64e   :  { %v13573_v50 = vand.u32 4294901760, %v11741_v37  ;;  %v11754_v4 = vsub.f32 %v4906_v18, %v11738_v43  ;;  %v5478_v13 = vsub.f32 %v11735_v25, %v5477_v20  ;;  %5391 = vmatpush.msrb.mxu2 %v11738_v43 }
 0x64f   :  { %5468 = vmatpush.msrb.mxu3 %v5467_v49  ;;  %v5473_v39 = vand.u32 4294901760, %v5472_v36  ;;  %v13576_v49 = vand.u32 4294901760, %v11767_v62 }
 0x650   :  { %v5484_v46 = vsub.f32 %v11741_v37, %v13573_v50  ;;  %v13574_v7 = vand.u32 4294901760, %v11754_v4  ;;  %v5479_v32 = vand.u32 4294901760, %v5478_v13  ;;  %5393 = vmatpush.msrb.mxu2 %v11751_v51 }
 0x651   :  { %5474 = vmatpush.msrb.mxu3 %v5473_v39  ;;  %v5496_v50 = vsub.f32 %v11767_v62, %v13576_v49 }
 0x652   :  { %v5485_v9 = vand.u32 4294901760, %v5484_v46  ;;  %v5490_v18 = vsub.f32 %v11754_v4, %v13574_v7 }
 0x653   :  { %5480 = vmatpush.msrb.mxu3 %v5479_v32  ;;  %v5497_v15 = vand.u32 4294901760, %v5496_v50 }
 0x654   :  { %v5491_v36 = vand.u32 4294901760, %v5490_v18 }
 0x655   :  { %5486 = vmatpush.msrb.mxu3 %v5485_v9 }
 0x657   :  { %5492 = vmatpush.msrb.mxu3 %v5491_v36 }
 0x659   :  { %5498 = vmatpush.msrb.mxu3 %v5497_v15 }
 0x65f   :  { %v4764_v39 = vpop.permute.xlu2 %4763 }
 0x660   :  { %v4808_v18 = vsel %vm4807_vm12, %v11313_v45, %v4764_v39 }
 0x667   :  { %v4825_v13 = vpop.permute.xlu2 %4824 }
 0x668   :  { %v4850_v36 = vsel %vm4807_vm12, %v4825_v13, %v4774_v28 }
 0x675   :  { %v4817_v46 = vpop.permute.xlu1 %4816 }
 0x676   :  { %v4848_v7 = vsel %vm4807_vm12, %v4817_v46, %v4762_v21  ;;  %v4866_v46 = vrot.slane %v4850_v36, 7 }
 0x677   :  { %v4864_v22 = vrot.slane %v4848_v7, 7  ;;  %v4821_v32 = vpop.permute.xlu0 %4820 }
 0x678   :  { %v4849_v50 = vsel %vm4807_vm12, %v4821_v32, %v4768_v12  ;;  %v4782_v12 = vpop.permute.xlu2 %4781 }
 0x679   :  { %v4881_v49 = vsel %vm4880_vm7, %v4808_v18, %v4864_v22  ;;  %v4865_v21 = vrot.slane %v4849_v50, 7 }
 0x67a   :  { %v11783_v9 = vand.u32 4294901760, %v4881_v49 }
 0x67c   :  { %v5054_v15 = vsub.f32 %v4881_v49, %v11783_v9  ;;  %5159 = vmatmul.f32.vlgmr.msra.gmra.mxu1 %v11783_v9 }
 0x67d   :  { %5559 = vmatpush.msra.mxu1 %v11563_v16  ;;  %v4770_v7 = vpop.permute.xlu1 %4769 }
 0x67e   :  { %v5055_v39 = vand.u32 4294901760, %v5054_v15  ;;  %v4809_v22 = vsel %vm4807_vm12, %v4766_v41, %v4770_v7  ;;  %5213 = vmatmul.f32.vlgmr.msra.gmra.mxu2 %v5054_v15 }
 0x67f   :  { %v4882_v32 = vsel %vm4880_vm7, %v4809_v22, %v4865_v21  ;;  %5561 = vmatpush.msra.mxu1 %v11582_v27  ;;  %5600 = vmatpush.msra.mxu2 %v5405_v60  ;;  %v4776_v28 = vpop.permute.xlu0 %4775 }
 0x680   :  { %v5056_v49 = vsub.f32 %v5054_v15, %v5055_v39  ;;  %v11801_v13 = vand.u32 4294901760, %v4882_v32  ;;  %v4810_v18 = vsel %vm4807_vm12, %v4772_v38, %v4776_v28  ;;  %5252 = vmatmul.f32.vlgmr.msra.gmra.mxu3 %v5055_v39  ;;  %v13776_v15 = vrot.slane %v11313_v45, 6  ;;  %v4837_v39 = vpop.permute.xlu2 %4836 }
 0x681   :  { %v11807_v41 = vsel %vm4880_vm7, %v4810_v18, %v4866_v46  ;;  %5563 = vmatpush.msra.mxu1 %v11589_v42  ;;  %5604 = vmatpush.msra.mxu2 %v5411_v0 }
 0x682   :  { %v11813_v50 = vsub.f32 %v4882_v32, %v11801_v13  ;;  %5667 = vmatpush.msra.mxu3 %v11563_v16  ;;  %v5057_v60 = vand.u32 4294901760, %v5056_v49  ;;  %v4811_v21 = vsel %vm4807_vm12, %v13776_v15, %v4782_v12 }
 0x683   :  { %5565 = vmatpush.msra.mxu1 %v11602_v31  ;;  %5608 = vmatpush.msra.mxu2 %v5417_v59  ;;  %v13775_v59 = vrot.slane %v11313_v45, 7 }
 0x684   :  { %v5396_v38 = vand.u32 4294901760, %v11813_v50  ;;  %5669 = vmatpush.msra.mxu3 %v11582_v27  ;;  %5058 = vmatmul.f32.vlgmr.msra.gmra.mxu0 %v5057_v60 }
 0x685   :  { %5358 = vmatmul.f32.vlgmr.msrb.gmra.mxu1 %v11783_v9  ;;  %5506 = vmatpush.msra.mxu0 %v11577_v26  ;;  %v4829_v0 = vpop.permute.xlu1 %4828 }
 0x686   :  { %v5397_v16 = vsub.f32 %v11813_v50, %v5396_v38  ;;  %5567 = vmatpush.msra.mxu1 %v11615_v5  ;;  %5612 = vmatpush.msra.mxu2 %v5423_v34  ;;  %v4851_v36 = vsel %vm4807_vm12, %v4829_v0, %v13775_v59  ;;  %v4936_v34 = vld [vmem:[#allocation5 + $0x178] sm:$0xff] }
 0x687   :  { %5671 = vmatpush.msra.mxu3 %v11589_v42  ;;  %v4867_v27 = vrot.slane %v4851_v36, 7  ;;  %5509 = vmatpush.msra.mxu0 %v11592_v10  ;;  %v4833_v26 = vpop.permute.xlu0 %4832  ;;  %v13777_v42 = vrot.slane %v11384_v61, 1  ;;  %v11853_v10 = vand.u32 4294901760, %v4936_v34  ;;  %v4932_v0 = vld [vmem:[#allocation5 + $0x158] sm:$0xff]  ;;  %v4930_v36 = vld [vmem:[#allocation5 + $0x148] sm:$0xff] }
 0x688   :  { %v5398_v7 = vand.u32 4294901760, %v5397_v16  ;;  %5569 = vmatpush.msra.mxu1 %v11627_v48  ;;  %5616 = vmatpush.msra.mxu2 %v5429_v33  ;;  %v4935_v33 = vld [vmem:[#allocation5 + $0x170] sm:$0xff]  ;;  %v4799_v59 = vpop.permute.xlu2 %4798 }
 0x689   :  { %v11841_v22 = vsel %vm4880_vm7, %v4811_v21, %v4867_v27  ;;  %5673 = vmatpush.msra.mxu3 %v11602_v31  ;;  %5512 = vmatpush.msra.mxu0 %v11605_v6  ;;  %v4852_v45 = vsel %vm4807_vm12, %v4833_v26, %v13777_v42  ;;  %v13778_v31 = vrot.slane %v11384_v61, 3  ;;  %v11866_v32 = vand.u32 4294901760, %v4935_v33  ;;  %v4931_v16 = vld [vmem:[#allocation5 + $0x150] sm:$0xff]  ;;  %v4929_v21 = vld [vmem:[#allocation5 + $0x140] sm:$0xff] }
 0x68a   :  { %5500 = vmatmul.f32.vlgmr.msrb.gmra.mxu3 %v11801_v13  ;;  %5571 = vmatpush.msra.mxu1 %v11638_v63  ;;  %v4868_v46 = vrot.slane %v4852_v45, 7  ;;  %v11874_v49 = vsub.f32 %v4936_v34, %v11853_v10  ;;  %v11937_v42 = vand.u32 4294901760, %v4930_v36 }
 0x68b   :  { %5620 = vmatpush.msra.mxu2 %v5435_v17  ;;  %5675 = vmatpush.msra.mxu3 %v11615_v5  ;;  %v4853_v6 = vsel %vm4807_vm12, %v4837_v39, %v13778_v31  ;;  %v4934_v17 = vld [vmem:[#allocation5 + $0x168] sm:$0xff] }
 0x68c   :  { %5399 = vmatmul.f32.vlgmr.msrb.gmra.mxu2 %v5398_v7  ;;  %5515 = vmatpush.msra.mxu0 %v11618_v19  ;;  %v4869_v28 = vrot.slane %v4853_v6, 7  ;;  %v13783_v7 = vrot.slane %v11384_v61, 4  ;;  %v11954_v6 = vand.u32 4294901760, %v4929_v21 }
 0x68d   :  { %5573 = vmatpush.msra.mxu1 %v11654_v52  ;;  %5624 = vmatpush.msra.mxu2 %v5441_v3  ;;  %v4787_v12 = vpop.permute.xlu1 %4786 }
 0x68e   :  { %5677 = vmatpush.msra.mxu3 %v11627_v48  ;;  %5321 = vmatmul.f32.vlgmr.msrb.gmra.mxu0 %v11783_v9  ;;  %v4812_v5 = vsel %vm4807_vm12, %v11384_v61, %v4787_v12  ;;  %v4933_v48 = vld [vmem:[#allocation5 + $0x160] sm:$0xff]  ;;  %v13780_v9 = vrot.slane %v11384_v61, 2  ;;  %v4814_v34 = vsel %vm4807_vm12, %v13783_v7, %v4799_v59  ;;  %v4926_v59 = vld [vmem:[#allocation5 + $0x128] sm:$0xff]  ;;  %v4924_v7 = vld [vmem:[#allocation5 + $0x118] sm:$0xff] }
 0x68f   :  { %5518 = vmatpush.msra.mxu0 %v11630_v40  ;;  %5575 = vmatpush.msra.mxu1 %v11667_v30  ;;  %v11871_v19 = vsel %vm4880_vm7, %v4812_v5, %v4868_v46  ;;  %v4793_v3 = vpop.permute.xlu0 %4792  ;;  %v11882_v40 = vand.u32 4294901760, %v4934_v17  ;;  %v11969_v5 = vsub.f32 %v4930_v36, %v11937_v42  ;;  %v13790_v36 = vand.u32 4294901760, %v11767_v62 }
 0x690   :  { %13779 = vst [vmem:[#allocation15_spill] sm:$0xff] %v11871_v19  ;;  %5628 = vmatpush.msra.mxu2 %v5447_v53  ;;  %5679 = vmatpush.msra.mxu3 %v11638_v63  ;;  %v4813_v18 = vsel %vm4807_vm12, %v13780_v9, %v4793_v3  ;;  %v11893_v63 = vsub.f32 %v4935_v33, %v11866_v32  ;;  %v11895_v53 = vand.u32 4294901760, %v4933_v48  ;;  %v13788_v9 = vrot.slane %v11384_v61, 6 }
 0x691   :  { %5521 = vmatpush.msra.mxu0 %v11641_v57  ;;  %5577 = vmatpush.msra.mxu1 %v11677_v2  ;;  %v11887_v60 = vsel %vm4880_vm7, %v4813_v18, %v4869_v28  ;;  %v13593_v57 = vand.u32 4294901760, %v11874_v49 }
 0x692   :  { %13781 = vst [vmem:[#allocation18_spill] sm:$0xff] %v11887_v60  ;;  %5632 = vmatpush.msra.mxu2 %v5453_v29  ;;  %5681 = vmatpush.msra.mxu3 %v11654_v52  ;;  %v11904_v29 = vsub.f32 %v4934_v17, %v11882_v40  ;;  %v11906_v52 = vand.u32 4294901760, %v4932_v0  ;;  %v13592_v27 = vand.u32 4294901760, %v11893_v63  ;;  %v11918_v26 = vsub.f32 %v4933_v48, %v11895_v53 }
 0x693   :  { %5524 = vmatpush.msra.mxu0 %v11657_v8  ;;  %5579 = vmatpush.msra.mxu1 %v11688_v35 }
 0x694   :  { %5636 = vmatpush.msra.mxu2 %v5459_v24  ;;  %5683 = vmatpush.msra.mxu3 %v11667_v30  ;;  %v13782_v30 = vrot.slane %v11384_v61, 5  ;;  %v11935_v39 = vsub.f32 %v4932_v0, %v11906_v52  ;;  %v5753_v33 = vsub.f32 %v11893_v63, %v13592_v27  ;;  %v13589_v31 = vand.u32 4294901760, %v11918_v26 }
 0x695   :  { %5527 = vmatpush.msra.mxu0 %v11670_v44  ;;  %5581 = vmatpush.msra.mxu1 %v11704_v1  ;;  %v4841_v8 = vpop.permute.xlu1 %4840 }
 0x696   :  { %5640 = vmatpush.msra.mxu2 %v5465_v14  ;;  %5685 = vmatpush.msra.mxu3 %v11677_v2  ;;  %v4854_v24 = vsel %vm4807_vm12, %v4841_v8, %v13782_v30  ;;  %v5747_v14 = vsub.f32 %v11874_v49, %v13593_v57  ;;  %v11925_v2 = vand.u32 4294901760, %v4931_v16  ;;  %v13588_v17 = vand.u32 4294901760, %v11935_v39 }
 0x697   :  { %5530 = vmatpush.msra.mxu0 %v11680_v58  ;;  %5583 = vmatpush.msra.mxu1 %v11719_v23  ;;  %v4870_v44 = vrot.slane %v4854_v24, 7  ;;  %v4845_v15 = vpop.permute.xlu0 %4844  ;;  %v13591_v58 = vand.u32 4294901760, %v11904_v29  ;;  %v5754_v0 = vand.u32 4294901760, %v5753_v33 }
 0x698   :  { %5644 = vmatpush.msra.mxu2 %v5471_v55  ;;  %5687 = vmatpush.msra.mxu3 %v11688_v35  ;;  %v13785_v35 = vrot.slane %v11384_v61, 7  ;;  %v5748_v46 = vand.u32 4294901760, %v5747_v14  ;;  %v5771_v24 = vsub.f32 %v11935_v39, %v13588_v17  ;;  %v4941_v17 = vld [vmem:[#allocation5 + $0x1a0] sm:$0xff] }
 0x699   :  { %v11940_v45 = vsel %vm4880_vm7, %v4814_v34, %v4870_v44  ;;  %5533 = vmatpush.msra.mxu0 %v11691_v54  ;;  %5585 = vmatpush.msra.mxu1 %v11728_v47  ;;  %v4928_v54 = vld [vmem:[#allocation5 + $0x138] sm:$0xff]  ;;  %v5759_v12 = vsub.f32 %v11904_v29, %v13591_v58  ;;  %v4925_v44 = vld [vmem:[#allocation5 + $0x120] sm:$0xff] }
 0x69a   :  { %13784 = vst [vmem:[#allocation16_spill] sm:$0xff] %v11940_v45  ;;  %5648 = vmatpush.msra.mxu2 %v5477_v20  ;;  %5689 = vmatpush.msra.mxu3 %v11704_v1  ;;  %v4855_v55 = vsel %vm4807_vm12, %v4845_v15, %v13785_v35  ;;  %v11959_v20 = vsub.f32 %v4931_v16, %v11925_v2  ;;  %v13786_v1 = vand.u32 4294901760, %v11741_v37  ;;  %v11973_v48 = vand.u32 4294901760, %v4928_v54 }
 0x69b   :  { %5536 = vmatpush.msra.mxu0 %v11707_v56  ;;  %5587 = vmatpush.msra.mxu1 %v11738_v43  ;;  %v4927_v56 = vld [vmem:[#allocation5 + $0x130] sm:$0xff]  ;;  %v4871_v28 = vrot.slane %v4855_v55, 7  ;;  %v5765_v16 = vsub.f32 %v11918_v26, %v13589_v31  ;;  %v5760_v30 = vand.u32 4294901760, %v5759_v12  ;;  %v12007_v15 = vand.u32 4294901760, %v4926_v59 }
 0x69c   :  { %5652 = vmatpush.msra.mxu2 %v13786_v1  ;;  %5691 = vmatpush.msra.mxu3 %v11719_v23  ;;  %v13787_v23 = vand.u32 4294901760, %v11754_v4  ;;  %v13587_v61 = vand.u32 4294901760, %v11959_v20  ;;  %v11994_v8 = vand.u32 4294901760, %v4927_v56  ;;  %v12019_v35 = vand.u32 4294901760, %v4925_v44 }
 0x69d   :  { %5539 = vmatpush.msra.mxu0 %v11722_v11  ;;  %5589 = vmatpush.msra.mxu1 %v11751_v51  ;;  %v4805_v3 = vpop.permute.xlu1 %4804  ;;  %v11985_v11 = vsub.f32 %v4929_v21, %v11954_v6  ;;  %v5766_v14 = vand.u32 4294901760, %v5765_v16  ;;  %v5772_v55 = vand.u32 4294901760, %v5771_v24  ;;  %v12031_v1 = vand.u32 4294901760, %v4924_v7 }
 0x69e   :  { %5656 = vmatpush.msra.mxu2 %v13787_v23  ;;  %5693 = vmatpush.msra.mxu3 %v11728_v47  ;;  %v4815_v18 = vsel %vm4807_vm12, %v13788_v9, %v4805_v3  ;;  %v12017_v34 = vsub.f32 %v4927_v56, %v11994_v8  ;;  %v4921_v23 = vld [vmem:[#allocation5 + $0x100] sm:$0xff] }
 0x69f   :  { %5593 = vmatmul.f32.vlgmr.msra.gmra.mxu1 %v5396_v38  ;;  %5542 = vmatpush.msra.mxu0 %v11735_v25  ;;  %v11991_v47 = vsel %vm4880_vm7, %v4815_v18, %v4871_v28  ;;  %v13586_v38 = vand.u32 4294901760, %v11969_v5  ;;  %v12005_v25 = vsub.f32 %v4928_v54, %v11973_v48  ;;  %v13585_v21 = vand.u32 4294901760, %v11985_v11 }
 0x6a0   :  { %13789 = vst [vmem:[#allocation11_spill] sm:$0xff] %v11991_v47  ;;  %5749 = vmatpush.msrb.mxu1 %v5748_v46  ;;  %5660 = vmatpush.msra.mxu2 %v13790_v36  ;;  %v12029_v54 = vsub.f32 %v4926_v59, %v12007_v15  ;;  %v4922_v46 = vld [vmem:[#allocation5 + $0x108] sm:$0xff]  ;;  %v13583_v56 = vand.u32 4294901760, %v12017_v34  ;;  %v12041_v28 = vsub.f32 %v4925_v44, %v12019_v35  ;;  %v4943_v47 = vld [vmem:[#allocation5 + $0x1b0] sm:$0xff] }
 0x6a1   :  { %5695 = vmatpush.msra.mxu3 %v11738_v43  ;;  %5662 = vmatmul.f32.vlgmr.msra.gmra.mxu2 %v11801_v13  ;;  %v5777_v43 = vsub.f32 %v11959_v20, %v13587_v61  ;;  %v5783_v33 = vsub.f32 %v11969_v5, %v13586_v38  ;;  %v12055_v16 = vand.u32 4294901760, %v4922_v46  ;;  %v4946_v38 = vld [vmem:[#allocation5 + $0x1c8] sm:$0xff]  ;;  %v12204_v19 = vand.u32 4294901760, %v4943_v47 }
 0x6a2   :  { %5755 = vmatpush.msrb.mxu1 %v5754_v0  ;;  %5847 = vmatpush.msrb.mxu2 %v11874_v49  ;;  %v13581_v18 = vand.u32 4294901760, %v12029_v54  ;;  %v12053_v0 = vsub.f32 %v4924_v7, %v12031_v1  ;;  %v13579_v59 = vand.u32 4294901760, %v12041_v28  ;;  %v12167_v31 = vand.u32 4294901760, %v4946_v38 }
 0x6a3   :  { %5545 = vmatpush.msra.mxu0 %v11741_v37  ;;  %5697 = vmatpush.msra.mxu3 %v11751_v51  ;;  %v4923_v37 = vld [vmem:[#allocation5 + $0x110] sm:$0xff]  ;;  %v13584_v51 = vand.u32 4294901760, %v12005_v25  ;;  %v5778_v12 = vand.u32 4294901760, %v5777_v43  ;;  %v12077_v7 = vsub.f32 %v4922_v46, %v12055_v16 }
 0x6a4   :  { %5699 = vmatmul.f32.vlgmr.msra.gmra.mxu3 %v11801_v13  ;;  %5761 = vmatpush.msrb.mxu1 %v5760_v30  ;;  %v5789_v13 = vsub.f32 %v11985_v11, %v13585_v21  ;;  %v12043_v3 = vand.u32 4294901760, %v4923_v37  ;;  %v12067_v30 = vand.u32 4294901760, %v4921_v23  ;;  %v5807_v44 = vsub.f32 %v12029_v54, %v13581_v18  ;;  %v4948_v18 = vld [vmem:[#allocation5 + $0x1d8] sm:$0xff] }
 0x6a5   :  { %5850 = vmatpush.msrb.mxu2 %v11893_v63  ;;  %5900 = vmatpush.msrb.mxu3 %v11853_v10  ;;  %v5795_v9 = vsub.f32 %v12005_v25, %v13584_v51 }
 0x6a6   :  { %5548 = vmatpush.msra.mxu0 %v11754_v4  ;;  %5767 = vmatpush.msrb.mxu1 %v5766_v14  ;;  %v5784_v4 = vand.u32 4294901760, %v5783_v33  ;;  %v12065_v36 = vsub.f32 %v4923_v37, %v12043_v3  ;;  %v13577_v14 = vand.u32 4294901760, %v12053_v0  ;;  %v12087_v37 = vsub.f32 %v4921_v23, %v12067_v30  ;;  %v4951_v23 = vld [vmem:[#allocation5 + $0x1f0] sm:$0xff] }
 0x6a7   :  { %5853 = vmatpush.msrb.mxu2 %v11904_v29  ;;  %5902 = vmatpush.msrb.mxu3 %v11866_v32  ;;  %v5796_v24 = vand.u32 4294901760, %v5795_v9  ;;  %v5808_v46 = vand.u32 4294901760, %v5807_v44 }
 0x6a8   :  { %5551 = vmatpush.msra.mxu0 %v11767_v62  ;;  %5773 = vmatpush.msrb.mxu1 %v5772_v55  ;;  %v5790_v62 = vand.u32 4294901760, %v5789_v13  ;;  %v5813_v55 = vsub.f32 %v12041_v28, %v13579_v59  ;;  %v13578_v33 = vand.u32 4294901760, %v12065_v36  ;;  %v4952_v13 = vld [vmem:[#allocation5 + $0x1f8] sm:$0xff]  ;;  %v4949_v59 = vld [vmem:[#allocation5 + $0x1e0] sm:$0xff] }
 0x6a9   :  { %5554 = vmatmul.f32.vlgmr.msra.gmra.mxu0 %v11813_v50  ;;  %5856 = vmatpush.msrb.mxu2 %v11918_v26  ;;  %v5801_v50 = vsub.f32 %v12017_v34, %v13583_v56  ;;  %v4947_v56 = vld [vmem:[#allocation5 + $0x1d0] sm:$0xff] }
 0x6aa   :  { %5704 = vmatpush.msrb.mxu0 %v11853_v10  ;;  %5904 = vmatpush.msrb.mxu3 %v11882_v40  ;;  %v5814_v9 = vand.u32 4294901760, %v5813_v55  ;;  %v12111_v55 = vand.u32 4294901760, %v4951_v23 }
 0x6ab   :  { %5779 = vmatpush.msrb.mxu1 %v5778_v12  ;;  %5859 = vmatpush.msrb.mxu2 %v11935_v39  ;;  %v5802_v43 = vand.u32 4294901760, %v5801_v50  ;;  %v5819_v12 = vsub.f32 %v12053_v0, %v13577_v14  ;;  %v13582_v50 = vand.u32 4294901760, %v12087_v37  ;;  %v4950_v14 = vld [vmem:[#allocation5 + $0x1e8] sm:$0xff] }
 0x6ac   :  { %5706 = vmatpush.msrb.mxu0 %v11866_v32  ;;  %5906 = vmatpush.msrb.mxu3 %v11895_v53 }
 0x6ad   :  { %5785 = vmatpush.msrb.mxu1 %v5784_v4  ;;  %5862 = vmatpush.msrb.mxu2 %v11959_v20  ;;  %v13580_v4 = vand.u32 4294901760, %v12077_v7  ;;  %v5820_v44 = vand.u32 4294901760, %v5819_v12 }
 0x6ae   :  { %5708 = vmatpush.msrb.mxu0 %v11882_v40  ;;  %5908 = vmatpush.msrb.mxu3 %v11906_v52 }
 0x6af   :  { %5791 = vmatpush.msrb.mxu1 %v5790_v62  ;;  %5865 = vmatpush.msrb.mxu2 %v11969_v5  ;;  %v5825_v62 = vsub.f32 %v12065_v36, %v13578_v33 }
 0x6b0   :  { %5710 = vmatpush.msrb.mxu0 %v11895_v53  ;;  %5910 = vmatpush.msrb.mxu3 %v11925_v2 }
 0x6b1   :  { %5797 = vmatpush.msrb.mxu1 %v5796_v24  ;;  %5868 = vmatpush.msrb.mxu2 %v11985_v11  ;;  %v12103_v24 = vand.u32 4294901760, %v4952_v13  ;;  %v5826_v33 = vand.u32 4294901760, %v5825_v62 }
 0x6b2   :  { %5712 = vmatpush.msrb.mxu0 %v11906_v52  ;;  %5912 = vmatpush.msrb.mxu3 %v11937_v42 }
 0x6b3   :  { %5803 = vmatpush.msrb.mxu1 %v5802_v43  ;;  %5871 = vmatpush.msrb.mxu2 %v12005_v25  ;;  %v5831_v43 = vsub.f32 %v12077_v7, %v13580_v4  ;;  %v12120_v12 = vsub.f32 %v4952_v13, %v12103_v24  ;;  %v12124_v4 = vand.u32 4294901760, %v4950_v14  ;;  %v12135_v13 = vand.u32 4294901760, %v4949_v59 }
 0x6b4   :  { %5714 = vmatpush.msrb.mxu0 %v11925_v2  ;;  %5914 = vmatpush.msrb.mxu3 %v11954_v6 }
 0x6b5   :  { %5809 = vmatpush.msrb.mxu1 %v5808_v46  ;;  %5874 = vmatpush.msrb.mxu2 %v12017_v34  ;;  %v5837_v46 = vsub.f32 %v12087_v37, %v13582_v50  ;;  %v5832_v62 = vand.u32 4294901760, %v5831_v43  ;;  %v12131_v50 = vsub.f32 %v4951_v23, %v12111_v55  ;;  %v13590_v21 = vand.u32 4294901760, %v12120_v12 }
 0x6b6   :  { %5716 = vmatpush.msrb.mxu0 %v11937_v42  ;;  %5916 = vmatpush.msrb.mxu3 %v11973_v48  ;;  %v12144_v23 = vsub.f32 %v4950_v14, %v12124_v4  ;;  %v12155_v61 = vsub.f32 %v4949_v59, %v12135_v13 }
 0x6b7   :  { %5815 = vmatpush.msrb.mxu1 %v5814_v9  ;;  %5877 = vmatpush.msrb.mxu2 %v12029_v54  ;;  %v12127_v9 = vand.u32 4294901760, %v11807_v41  ;;  %v5838_v51 = vand.u32 4294901760, %v5837_v46  ;;  %v12150_v46 = vand.u32 4294901760, %v4947_v56 }
 0x6b8   :  { %5718 = vmatpush.msrb.mxu0 %v11954_v6  ;;  %5918 = vmatpush.msrb.mxu3 %v11994_v8  ;;  %13791 = vst [vmem:[#allocation17_spill] sm:$0xff] %v12155_v61  ;;  %v13795_v60 = vand.u32 4294901760, %v12155_v61 }
 0x6b9   :  { %5821 = vmatpush.msrb.mxu1 %v5820_v44  ;;  %5880 = vmatpush.msrb.mxu2 %v12041_v28  ;;  %v12139_v44 = vand.u32 4294901760, %v4948_v18  ;;  %v5736_v43 = vsub.f32 %v11807_v41, %v12127_v9  ;;  %v6088_v41 = vsub.f32 %v12120_v12, %v13590_v21  ;;  %v4944_v21 = vld [vmem:[#allocation5 + $0x1b8] sm:$0xff] }
 0x6ba   :  { %5720 = vmatpush.msrb.mxu0 %v11973_v48  ;;  %5920 = vmatpush.msrb.mxu3 %v12007_v15  ;;  %v12192_v58 = vand.u32 4294901760, %v4944_v21 }
 0x6bb   :  { %5827 = vmatpush.msrb.mxu1 %v5826_v33  ;;  %5883 = vmatpush.msrb.mxu2 %v12053_v0  ;;  %v13595_v33 = vand.u32 4294901760, %v12131_v50  ;;  %v12162_v14 = vsub.f32 %v4948_v18, %v12139_v44  ;;  %v5737_v59 = vand.u32 4294901760, %v5736_v43  ;;  %v12175_v18 = vsub.f32 %v4947_v56, %v12150_v46 }
 0x6bc   :  { %5722 = vmatpush.msrb.mxu0 %v11994_v8  ;;  %5922 = vmatpush.msrb.mxu3 %v12019_v35  ;;  %v6089_v57 = vand.u32 4294901760, %v6088_v41  ;;  %v13794_v56 = vand.u32 4294901760, %v12144_v23 }
 0x6bd   :  { %5833 = vmatpush.msrb.mxu1 %v5832_v62  ;;  %5886 = vmatpush.msrb.mxu2 %v12065_v36  ;;  %13792 = vst [vmem:[#allocation20_spill] sm:$0xff] %v12162_v14  ;;  %v4945_v62 = vld [vmem:[#allocation5 + $0x1c0] sm:$0xff]  ;;  %v5738_v45 = vsub.f32 %v5736_v43, %v5737_v59 }
 0x6be   :  { %5724 = vmatpush.msrb.mxu0 %v12007_v15  ;;  %5924 = vmatpush.msrb.mxu3 %v12031_v1  ;;  %13793 = vst [vmem:[#allocation19_spill] sm:$0xff] %v12175_v18  ;;  %v12180_v27 = vand.u32 4294901760, %v4945_v62 }
 0x6bf   :  { %5839 = vmatpush.msrb.mxu1 %v5838_v51  ;;  %5889 = vmatpush.msrb.mxu2 %v12077_v7  ;;  %v6094_v51 = vsub.f32 %v12131_v50, %v13595_v33  ;;  %v12190_v33 = vsub.f32 %v4946_v38, %v12167_v31 }
 0x6c0   :  { %5726 = vmatpush.msrb.mxu0 %v12019_v35  ;;  %5926 = vmatpush.msrb.mxu3 %v12043_v3  ;;  %v12202_v38 = vsub.f32 %v4945_v62, %v12180_v27  ;;  %v12214_v62 = vsub.f32 %v4944_v21, %v12192_v58  ;;  %v12226_v21 = vsub.f32 %v4943_v47, %v12204_v19 }
 0x6c1   :  { %5841 = vmatmul.f32.vlgmr.msrb.gmra.mxu1 %v12127_v9  ;;  %5892 = vmatpush.msrb.mxu2 %v12087_v37  ;;  %v6095_v41 = vand.u32 4294901760, %v6094_v51 }
 0x6c2   :  { %6008 = vmatpush.msra.mxu1 %v11853_v10  ;;  %5728 = vmatpush.msrb.mxu0 %v12031_v1  ;;  %v6100_v10 = vsub.f32 %v12144_v23, %v13794_v56  ;;  %v6106_v56 = vsub.f32 %v12155_v61, %v13795_v60  ;;  %v5739_v61 = vand.u32 4294901760, %v5738_v45  ;;  %v12228_v60 = vand.u32 4294901760, %v4941_v17 }
 0x6c3   :  { %5928 = vmatpush.msrb.mxu3 %v12055_v16  ;;  %5895 = vmatmul.f32.vlgmr.msrb.gmra.mxu2 %v5736_v43  ;;  %v13796_v43 = vand.u32 4294901760, %v12162_v14 }
 0x6c4   :  { %6010 = vmatpush.msra.mxu1 %v11866_v32  ;;  %6045 = vmatpush.msra.mxu2 %v12103_v24  ;;  %v4942_v32 = vld [vmem:[#allocation5 + $0x1a8] sm:$0xff] }
 0x6c5   :  { %5730 = vmatpush.msrb.mxu0 %v12043_v3  ;;  %5930 = vmatpush.msrb.mxu3 %v12067_v30  ;;  %v6112_v51 = vsub.f32 %v12162_v14, %v13796_v43  ;;  %v4940_v14 = vld [vmem:[#allocation5 + $0x198] sm:$0xff] }
 0x6c6   :  { %5934 = vmatmul.f32.vlgmr.msrb.gmra.mxu3 %v5737_v59  ;;  %6012 = vmatpush.msra.mxu1 %v11882_v40  ;;  %v6101_v40 = vand.u32 4294901760, %v6100_v10  ;;  %v12216_v59 = vand.u32 4294901760, %v4942_v32  ;;  %v12240_v10 = vand.u32 4294901760, %v4940_v14 }
 0x6c7   :  { %6047 = vmatpush.msra.mxu2 %v12111_v55  ;;  %6090 = vmatpush.msra.mxu3 %v6089_v57  ;;  %v13797_v57 = vand.u32 4294901760, %v12175_v18  ;;  %v6113_v45 = vand.u32 4294901760, %v6112_v51  ;;  %v13801_v51 = vand.u32 4294901760, %v12202_v38 }
 0x6c8   :  { %5732 = vmatpush.msrb.mxu0 %v12055_v16  ;;  %6014 = vmatpush.msra.mxu1 %v11895_v53  ;;  %v6107_v53 = vand.u32 4294901760, %v6106_v56  ;;  %v12238_v47 = vsub.f32 %v4942_v32, %v12216_v59  ;;  %v12251_v32 = vsub.f32 %v4941_v17, %v12228_v60  ;;  %v4938_v56 = vld [vmem:[#allocation5 + $0x188] sm:$0xff]  ;;  %v12264_v17 = vsub.f32 %v4940_v14, %v12240_v10 }
 0x6c9   :  { %6049 = vmatpush.msra.mxu2 %v12124_v4  ;;  %6096 = vmatpush.msra.mxu3 %v6095_v41  ;;  %v6118_v43 = vsub.f32 %v12175_v18, %v13797_v57  ;;  %v4939_v41 = vld [vmem:[#allocation5 + $0x190] sm:$0xff]  ;;  %v13798_v57 = vand.u32 4294901760, %v11874_v49  ;;  %v13799_v18 = vand.u32 4294901760, %v12190_v33  ;;  %v13800_v49 = vand.u32 4294901760, %v11893_v63 }
 0x6ca   :  { %5734 = vmatpush.msrb.mxu0 %v12067_v30  ;;  %6016 = vmatpush.msra.mxu1 %v11906_v52  ;;  %v13802_v63 = vand.u32 4294901760, %v11904_v29  ;;  %v13804_v29 = vand.u32 4294901760, %v11918_v26 }
 0x6cb   :  { %5740 = vmatmul.f32.vlgmr.msrb.gmra.mxu0 %v5739_v61  ;;  %6051 = vmatpush.msra.mxu2 %v12135_v13  ;;  %v6124_v52 = vsub.f32 %v12190_v33, %v13799_v18  ;;  %v6119_v61 = vand.u32 4294901760, %v6118_v43  ;;  %v6130_v18 = vsub.f32 %v12202_v38, %v13801_v51  ;;  %v13803_v43 = vand.u32 4294901760, %v12214_v62  ;;  %v4937_v51 = vld [vmem:[#allocation5 + $0x180] sm:$0xff] }
 0x6cc   :  { %5941 = vmatpush.msra.mxu0 %v13798_v57  ;;  %6102 = vmatpush.msra.mxu3 %v6101_v40  ;;  %v6141_v40 = vand.u32 4294901760, %v12226_v21  ;;  %v12253_v57 = vand.u32 4294901760, %v4939_v41  ;;  %v12284_v26 = vand.u32 4294901760, %v4937_v51 }
 0x6cd   :  { %6018 = vmatpush.msra.mxu1 %v11925_v2  ;;  %6053 = vmatpush.msra.mxu2 %v12139_v44  ;;  %v6125_v2 = vand.u32 4294901760, %v6124_v52 }
 0x6ce   :  { %5945 = vmatpush.msra.mxu0 %v13800_v49  ;;  %6108 = vmatpush.msra.mxu3 %v6107_v53  ;;  %v6136_v53 = vsub.f32 %v12214_v62, %v13803_v43  ;;  %v6147_v49 = vand.u32 4294901760, %v12238_v47  ;;  %v6142_v52 = vsub.f32 %v12226_v21, %v6141_v40  ;;  %v12277_v14 = vsub.f32 %v4939_v41, %v12253_v57 }
 0x6cf   :  { %6020 = vmatpush.msra.mxu1 %v11937_v42  ;;  %6055 = vmatpush.msra.mxu2 %v12150_v46  ;;  %v12268_v42 = vand.u32 4294901760, %v4938_v56  ;;  %v6159_v41 = vand.u32 4294901760, %v12264_v17 }
 0x6d0   :  { %5949 = vmatpush.msra.mxu0 %v13802_v63  ;;  %6114 = vmatpush.msra.mxu3 %v6113_v45  ;;  %v6131_v45 = vand.u32 4294901760, %v6130_v18  ;;  %v6153_v63 = vand.u32 4294901760, %v12251_v32  ;;  %v6137_v18 = vand.u32 4294901760, %v6136_v53  ;;  %v6148_v43 = vsub.f32 %v12238_v47, %v6147_v49 }
 0x6d1   :  { %6022 = vmatpush.msra.mxu1 %v11954_v6  ;;  %6057 = vmatpush.msra.mxu2 %v12167_v31  ;;  %v12280_v6 = vand.u32 4294901760, %v11841_v22  ;;  %v6165_v53 = vand.u32 4294901760, %v12277_v14 }
 0x6d2   :  { %5953 = vmatpush.msra.mxu0 %v13804_v29  ;;  %6120 = vmatpush.msra.mxu3 %v6119_v61  ;;  %v13805_v61 = vand.u32 4294901760, %v11935_v39  ;;  %v13806_v29 = vand.u32 4294901760, %v11959_v20  ;;  %v6143_v39 = vand.u32 4294901760, %v6142_v52  ;;  %v13807_v20 = vand.u32 4294901760, %v11969_v5 }
 0x6d3   :  { %6024 = vmatpush.msra.mxu1 %v11973_v48  ;;  %6059 = vmatpush.msra.mxu2 %v12180_v27  ;;  %v12295_v48 = vsub.f32 %v4938_v56, %v12268_v42  ;;  %v6149_v56 = vand.u32 4294901760, %v6148_v43  ;;  %v6166_v5 = vsub.f32 %v12277_v14, %v6165_v53 }
 0x6d4   :  { %5957 = vmatpush.msra.mxu0 %v13805_v61  ;;  %6126 = vmatpush.msra.mxu3 %v6125_v2  ;;  %v6154_v2 = vsub.f32 %v12251_v32, %v6153_v63  ;;  %v12305_v61 = vsub.f32 %v11841_v22, %v12280_v6 }
 0x6d5   :  { %6026 = vmatpush.msra.mxu1 %v11994_v8  ;;  %6061 = vmatpush.msra.mxu2 %v12192_v58  ;;  %v12310_v8 = vsub.f32 %v4937_v51, %v12284_v26  ;;  %v6171_v22 = vand.u32 4294901760, %v12295_v48 }
 0x6d6   :  { %5961 = vmatpush.msra.mxu0 %v13806_v29  ;;  %6132 = vmatpush.msra.mxu3 %v6131_v45  ;;  %v6160_v45 = vsub.f32 %v12264_v17, %v6159_v41  ;;  %v6155_v51 = vand.u32 4294901760, %v6154_v2  ;;  %v6078_v52 = vand.u32 4294901760, %v12305_v61  ;;  %v13810_v29 = vand.u32 4294901760, %v12017_v34 }
 0x6d7   :  { %6028 = vmatpush.msra.mxu1 %v12007_v15  ;;  %6063 = vmatpush.msra.mxu2 %v12204_v19  ;;  %v13808_v15 = vand.u32 4294901760, %v11985_v11  ;;  %v6172_v43 = vsub.f32 %v12295_v48, %v6171_v22  ;;  %v13812_v2 = vand.u32 4294901760, %v12041_v28  ;;  %v13815_v28 = vand.u32 4294901760, %v12065_v36 }
 0x6d8   :  { %5965 = vmatpush.msra.mxu0 %v13807_v20  ;;  %6138 = vmatpush.msra.mxu3 %v6137_v18  ;;  %v13809_v18 = vand.u32 4294901760, %v12005_v25  ;;  %v6161_v11 = vand.u32 4294901760, %v6160_v45  ;;  %v6079_v25 = vsub.f32 %v12305_v61, %v6078_v52  ;;  %v13818_v45 = vand.u32 4294901760, %v12144_v23 }
 0x6d9   :  { %6030 = vmatpush.msra.mxu1 %v12019_v35  ;;  %6065 = vmatpush.msra.mxu2 %v12216_v59  ;;  %v6177_v35 = vand.u32 4294901760, %v12310_v8  ;;  %v6173_v34 = vand.u32 4294901760, %v6172_v43  ;;  %v13819_v36 = vand.u32 4294901760, %v12087_v37  ;;  %v13824_v37 = vld [vmem:[#allocation19_spill] sm:$0xff]  ;;  %v4964_v43 = vld [vmem:[#allocation5 + $0x258] sm:$0xff] }
 0x6da   :  { %5969 = vmatpush.msra.mxu0 %v13808_v15  ;;  %6144 = vmatpush.msra.mxu3 %v6143_v39  ;;  %v13811_v39 = vand.u32 4294901760, %v12029_v54  ;;  %v13813_v54 = vand.u32 4294901760, %v12053_v0  ;;  %v13817_v0 = vand.u32 4294901760, %v12077_v7  ;;  %v13820_v15 = vld [vmem:[#allocation17_spill] sm:$0xff]  ;;  %v13822_v7 = vld [vmem:[#allocation20_spill] sm:$0xff] }
 0x6db   :  { %6032 = vmatpush.msra.mxu1 %v12031_v1  ;;  %6067 = vmatpush.msra.mxu2 %v12228_v60  ;;  %v6167_v1 = vand.u32 4294901760, %v6166_v5  ;;  %v4967_v5 = vld [vmem:[#allocation5 + $0x270] sm:$0xff] }
 0x6dc   :  { %5973 = vmatpush.msra.mxu0 %v13809_v18  ;;  %6150 = vmatpush.msra.mxu3 %v6149_v56  ;;  %v13816_v56 = vand.u32 4294901760, %v12131_v50 }
 0x6dd   :  { %6034 = vmatpush.msra.mxu1 %v12043_v3  ;;  %6069 = vmatpush.msra.mxu2 %v12240_v10  ;;  %v6178_v3 = vsub.f32 %v12310_v8, %v6177_v35 }
 0x6de   :  { %5977 = vmatpush.msra.mxu0 %v13810_v29  ;;  %6156 = vmatpush.msra.mxu3 %v6155_v51  ;;  %v13821_v51 = vand.u32 4294901760, %v13820_v15 }
 0x6df   :  { %6036 = vmatpush.msra.mxu1 %v12055_v16  ;;  %6071 = vmatpush.msra.mxu2 %v12253_v57  ;;  %v6080_v16 = vand.u32 4294901760, %v6079_v25  ;;  %v6179_v20 = vand.u32 4294901760, %v6178_v3  ;;  %v4963_v3 = vld [vmem:[#allocation5 + $0x250] sm:$0xff] }
 0x6e0   :  { %5981 = vmatpush.msra.mxu0 %v13811_v39  ;;  %6162 = vmatpush.msra.mxu3 %v6161_v11  ;;  %v4962_v39 = vld [vmem:[#allocation5 + $0x248] sm:$0xff] }
 0x6e1   :  { %6038 = vmatpush.msra.mxu1 %v12067_v30  ;;  %6073 = vmatpush.msra.mxu2 %v12268_v42  ;;  %v13814_v30 = vand.u32 4294901760, %v12120_v12 }
 0x6e2   :  { %5985 = vmatpush.msra.mxu0 %v13812_v2  ;;  %6168 = vmatpush.msra.mxu3 %v6167_v1  ;;  %v12454_v2 = vand.u32 4294901760, %v4962_v39 }
 0x6e3   :  { %6040 = vmatmul.f32.vlgmr.msra.gmra.mxu1 %v12127_v9  ;;  %6075 = vmatpush.msra.mxu2 %v12284_v26 }
 0x6e4   :  { %6241 = vmatpush.msrb.mxu1 %v12103_v24  ;;  %5989 = vmatpush.msra.mxu0 %v13813_v54  ;;  %v12480_v54 = vsub.f32 %v4962_v39, %v12454_v2 }
 0x6e5   :  { %6174 = vmatpush.msra.mxu3 %v6173_v34  ;;  %6081 = vmatmul.f32.vlgmr.msra.gmra.mxu2 %v6080_v16  ;;  %v4961_v34 = vld [vmem:[#allocation5 + $0x240] sm:$0xff]  ;;  %v4960_v16 = vld [vmem:[#allocation5 + $0x238] sm:$0xff] }
 0x6e6   :  { %6243 = vmatpush.msrb.mxu1 %v12111_v55  ;;  %6282 = vmatpush.msrb.mxu2 %v13814_v30  ;;  %v4959_v30 = vld [vmem:[#allocation5 + $0x230] sm:$0xff] }
 0x6e7   :  { %5993 = vmatpush.msra.mxu0 %v13815_v28  ;;  %6180 = vmatpush.msra.mxu3 %v6179_v20 }
 0x6e8   :  { %6182 = vmatmul.f32.vlgmr.msra.gmra.mxu3 %v12280_v6  ;;  %6245 = vmatpush.msrb.mxu1 %v12124_v4 }
 0x6e9   :  { %6286 = vmatpush.msrb.mxu2 %v13816_v56  ;;  %6349 = vmatpush.msrb.mxu3 %v12103_v24  ;;  %v13823_v24 = vand.u32 4294901760, %v13822_v7  ;;  %v4958_v56 = vld [vmem:[#allocation5 + $0x228] sm:$0xff] }
 0x6ea   :  { %5997 = vmatpush.msra.mxu0 %v13817_v0  ;;  %6247 = vmatpush.msrb.mxu1 %v12135_v13 }
 0x6eb   :  { %6290 = vmatpush.msrb.mxu2 %v13818_v45  ;;  %6351 = vmatpush.msrb.mxu3 %v12111_v55  ;;  %v4968_v55 = vld [vmem:[#allocation5 + $0x278] sm:$0xff]  ;;  %v13615_v45 = vand.u32 4294901760, %v12480_v54 }
 0x6ec   :  { %6001 = vmatpush.msra.mxu0 %v13819_v36  ;;  %6249 = vmatpush.msrb.mxu1 %v12139_v44  ;;  %v4957_v36 = vld [vmem:[#allocation5 + $0x220] sm:$0xff] }
 0x6ed   :  { %6003 = vmatmul.f32.vlgmr.msra.gmra.mxu0 %v12127_v9  ;;  %6294 = vmatpush.msrb.mxu2 %v13821_v51  ;;  %v13825_v9 = vand.u32 4294901760, %v13824_v37  ;;  %v4956_v51 = vld [vmem:[#allocation5 + $0x218] sm:$0xff] }
 0x6ee   :  { %6188 = vmatpush.msrb.mxu0 %v12120_v12  ;;  %6353 = vmatpush.msrb.mxu3 %v12124_v4  ;;  %v12391_v4 = vand.u32 4294901760, %v4968_v55  ;;  %v13826_v12 = vand.u32 4294901760, %v12190_v33 }
 0x6ef   :  { %6251 = vmatpush.msrb.mxu1 %v12150_v46  ;;  %6298 = vmatpush.msrb.mxu2 %v13823_v24  ;;  %v12524_v24 = vand.u32 4294901760, %v4957_v36 }
 0x6f0   :  { %6191 = vmatpush.msrb.mxu0 %v12131_v50  ;;  %6355 = vmatpush.msrb.mxu3 %v12135_v13  ;;  %v4966_v50 = vld [vmem:[#allocation5 + $0x268] sm:$0xff]  ;;  %v12398_v13 = vand.u32 4294901760, %v4967_v5  ;;  %v12406_v18 = vsub.f32 %v4968_v55, %v12391_v4 }
 0x6f1   :  { %6253 = vmatpush.msrb.mxu1 %v12167_v31  ;;  %6302 = vmatpush.msrb.mxu2 %v13825_v9  ;;  %v12408_v11 = vand.u32 4294901760, %v4966_v50 }
 0x6f2   :  { %6194 = vmatpush.msrb.mxu0 %v12144_v23  ;;  %6357 = vmatpush.msrb.mxu3 %v12139_v44  ;;  %v13827_v23 = vand.u32 4294901760, %v12202_v38  ;;  %v4965_v44 = vld [vmem:[#allocation5 + $0x260] sm:$0xff]  ;;  %v12416_v29 = vsub.f32 %v4967_v5, %v12398_v13  ;;  %v12536_v5 = vand.u32 4294901760, %v4956_v51 }
 0x6f3   :  { %6255 = vmatpush.msrb.mxu1 %v12180_v27  ;;  %6306 = vmatpush.msrb.mxu2 %v13826_v12  ;;  %v12418_v1 = vand.u32 4294901760, %v4965_v44  ;;  %v12427_v25 = vsub.f32 %v4966_v50, %v12408_v11  ;;  %v4954_v12 = vld [vmem:[#allocation5 + $0x208] sm:$0xff] }
 0x6f4   :  { %6197 = vmatpush.msrb.mxu0 %v13820_v15  ;;  %6359 = vmatpush.msrb.mxu3 %v12150_v46  ;;  %v13828_v46 = vand.u32 4294901760, %v12214_v62 }
 0x6f5   :  { %6257 = vmatpush.msrb.mxu1 %v12192_v58  ;;  %6310 = vmatpush.msrb.mxu2 %v13827_v23 }
 0x6f6   :  { %6200 = vmatpush.msrb.mxu0 %v13822_v7  ;;  %6361 = vmatpush.msrb.mxu3 %v12167_v31  ;;  %v13623_v31 = vand.u32 4294901760, %v12406_v18 }
 0x6f7   :  { %6259 = vmatpush.msrb.mxu1 %v12204_v19  ;;  %6314 = vmatpush.msrb.mxu2 %v13828_v46 }
 0x6f8   :  { %6203 = vmatpush.msrb.mxu0 %v13824_v37  ;;  %6363 = vmatpush.msrb.mxu3 %v12180_v27  ;;  %v12429_v27 = vand.u32 4294901760, %v4964_v43  ;;  %v6465_v37 = vsub.f32 %v12480_v54, %v13615_v45 }
 0x6f9   :  { %6261 = vmatpush.msrb.mxu1 %v12216_v59  ;;  %6318 = vmatpush.msrb.mxu2 %v6141_v40  ;;  %v12443_v40 = vand.u32 4294901760, %v4963_v3 }
 0x6fa   :  { %6206 = vmatpush.msrb.mxu0 %v12190_v33  ;;  %6365 = vmatpush.msrb.mxu3 %v12192_v58  ;;  %v13621_v58 = vand.u32 4294901760, %v12416_v29  ;;  %v12438_v33 = vsub.f32 %v4965_v44, %v12418_v1  ;;  %v12546_v44 = vsub.f32 %v4957_v36, %v12524_v24 }
 0x6fb   :  { %6263 = vmatpush.msrb.mxu1 %v12228_v60  ;;  %6322 = vmatpush.msrb.mxu2 %v6147_v49  ;;  %v12452_v49 = vsub.f32 %v4964_v43, %v12429_v27  ;;  %v4953_v43 = vld [vmem:[#allocation5 + $0x200] sm:$0xff] }
 0x6fc   :  { %6209 = vmatpush.msrb.mxu0 %v12202_v38  ;;  %6367 = vmatpush.msrb.mxu3 %v12204_v19  ;;  %v6429_v19 = vsub.f32 %v12406_v18, %v13623_v31  ;;  %v13620_v38 = vand.u32 4294901760, %v12427_v25 }
 0x6fd   :  { %6265 = vmatpush.msrb.mxu1 %v12240_v10  ;;  %6326 = vmatpush.msrb.mxu2 %v6153_v63  ;;  %v12465_v63 = vand.u32 4294901760, %v4961_v34  ;;  %v13617_v20 = vand.u32 4294901760, %v12452_v49 }
 0x6fe   :  { %6212 = vmatpush.msrb.mxu0 %v12214_v62  ;;  %6369 = vmatpush.msrb.mxu3 %v12216_v59  ;;  %v6435_v62 = vsub.f32 %v12416_v29, %v13621_v58  ;;  %v13618_v59 = vand.u32 4294901760, %v12438_v33 }
 0x6ff   :  { %6267 = vmatpush.msrb.mxu1 %v12253_v57  ;;  %6330 = vmatpush.msrb.mxu2 %v6159_v41  ;;  %v12471_v41 = vsub.f32 %v4963_v3, %v12443_v40  ;;  %v12493_v28 = vsub.f32 %v4961_v34, %v12465_v63  ;;  %v6453_v0 = vsub.f32 %v12452_v49, %v13617_v20 }
 0x700   :  { %6215 = vmatpush.msrb.mxu0 %v12226_v21  ;;  %6371 = vmatpush.msrb.mxu3 %v12228_v60  ;;  %v6430_v60 = vand.u32 4294901760, %v6429_v19  ;;  %v6441_v21 = vsub.f32 %v12427_v25, %v13620_v38  ;;  %v12558_v34 = vsub.f32 %v4956_v51, %v12536_v5  ;;  %v12560_v19 = vand.u32 4294901760, %v4954_v12 }
 0x701   :  { %6269 = vmatpush.msrb.mxu1 %v12268_v42  ;;  %6334 = vmatpush.msrb.mxu2 %v6165_v53  ;;  %v12485_v53 = vand.u32 4294901760, %v4960_v16  ;;  %v13614_v15 = vand.u32 4294901760, %v12493_v28  ;;  %v6454_v55 = vand.u32 4294901760, %v6453_v0 }
 0x702   :  { %6218 = vmatpush.msrb.mxu0 %v12238_v47  ;;  %6373 = vmatpush.msrb.mxu3 %v12240_v10  ;;  %v6436_v10 = vand.u32 4294901760, %v6435_v62  ;;  %v6447_v47 = vsub.f32 %v12438_v33, %v13618_v59  ;;  %v13609_v62 = vand.u32 4294901760, %v12546_v44  ;;  %v4975_v59 = vld [vmem:[#allocation5 + $0x2b0] sm:$0xff] }
 0x703   :  { %6271 = vmatpush.msrb.mxu1 %v12284_v26  ;;  %6338 = vmatpush.msrb.mxu2 %v6171_v22  ;;  %v13616_v22 = vand.u32 4294901760, %v12471_v41  ;;  %v12709_v31 = vand.u32 4294901760, %v4975_v59 }
 0x704   :  { %6221 = vmatpush.msrb.mxu0 %v12251_v32  ;;  %6375 = vmatpush.msrb.mxu3 %v12253_v57  ;;  %v12500_v32 = vand.u32 4294901760, %v4959_v30  ;;  %v6442_v57 = vand.u32 4294901760, %v6441_v21 }
 0x705   :  { %6275 = vmatmul.f32.vlgmr.msrb.gmra.mxu1 %v6078_v52  ;;  %6342 = vmatpush.msrb.mxu2 %v6177_v35  ;;  %v12510_v52 = vsub.f32 %v4960_v16, %v12485_v53  ;;  %v12512_v35 = vand.u32 4294901760, %v4958_v56 }
 0x706   :  { %6431 = vmatpush.msra.mxu1 %v6430_v60  ;;  %6224 = vmatpush.msrb.mxu0 %v12264_v17  ;;  %v6448_v17 = vand.u32 4294901760, %v6447_v47  ;;  %v12522_v7 = vsub.f32 %v4959_v30, %v12500_v32  ;;  %v12572_v60 = vand.u32 4294901760, %v4953_v43  ;;  %v12582_v47 = vsub.f32 %v4954_v12, %v12560_v19 }
 0x707   :  { %6377 = vmatpush.msrb.mxu3 %v12268_v42  ;;  %6344 = vmatmul.f32.vlgmr.msrb.gmra.mxu2 %v12280_v6  ;;  %v6459_v42 = vsub.f32 %v12471_v41, %v13616_v22  ;;  %v12534_v9 = vsub.f32 %v4958_v56, %v12512_v35 }
 0x708   :  { %6437 = vmatpush.msra.mxu1 %v6436_v10  ;;  %6529 = vmatpush.msra.mxu2 %v12406_v18  ;;  %v13611_v23 = vand.u32 4294901760, %v12522_v7  ;;  %v13608_v10 = vand.u32 4294901760, %v12558_v34  ;;  %v12592_v36 = vsub.f32 %v4953_v43, %v12572_v60 }
 0x709   :  { %6227 = vmatpush.msrb.mxu0 %v12277_v14  ;;  %6379 = vmatpush.msrb.mxu3 %v12284_v26  ;;  %v4955_v14 = vld [vmem:[#allocation5 + $0x210] sm:$0xff]  ;;  %v13612_v26 = vand.u32 4294901760, %v12510_v52  ;;  %v6460_v50 = vand.u32 4294901760, %v6459_v42  ;;  %v13610_v39 = vand.u32 4294901760, %v12534_v9 }
 0x70a   :  { %6381 = vmatmul.f32.vlgmr.msrb.gmra.mxu3 %v12280_v6  ;;  %6443 = vmatpush.msra.mxu1 %v6442_v57  ;;  %v6471_v6 = vsub.f32 %v12493_v28, %v13614_v15  ;;  %v12548_v46 = vand.u32 4294901760, %v4955_v14  ;;  %v6495_v57 = vsub.f32 %v12546_v44, %v13609_v62  ;;  %v6501_v42 = vsub.f32 %v12558_v34, %v13608_v10  ;;  %v4978_v62 = vld [vmem:[#allocation5 + $0x2c8] sm:$0xff] }
 0x70b   :  { %6532 = vmatpush.msra.mxu2 %v12416_v29  ;;  %6582 = vmatpush.msra.mxu3 %v12391_v4  ;;  %v6477_v3 = vsub.f32 %v12510_v52, %v13612_v26  ;;  %v6489_v30 = vsub.f32 %v12534_v9, %v13610_v39  ;;  %v13605_v12 = vand.u32 4294901760, %v12592_v36  ;;  %v12672_v26 = vand.u32 4294901760, %v4978_v62 }
 0x70c   :  { %6230 = vmatpush.msrb.mxu0 %v12295_v48  ;;  %6449 = vmatpush.msra.mxu1 %v6448_v17  ;;  %v6466_v48 = vand.u32 4294901760, %v6465_v37  ;;  %v12570_v16 = vsub.f32 %v4955_v14, %v12548_v46  ;;  %v4984_v17 = vld [vmem:[#allocation5 + $0x2f8] sm:$0xff]  ;;  %v4983_v37 = vld [vmem:[#allocation5 + $0x2f0] sm:$0xff]  ;;  %v6496_v14 = vand.u32 4294901760, %v6495_v57 }
 0x70d   :  { %6535 = vmatpush.msra.mxu2 %v12427_v25  ;;  %6584 = vmatpush.msra.mxu3 %v12398_v13  ;;  %v6478_v21 = vand.u32 4294901760, %v6477_v3  ;;  %v6490_v51 = vand.u32 4294901760, %v6489_v30  ;;  %v12616_v3 = vand.u32 4294901760, %v4983_v37 }
 0x70e   :  { %6233 = vmatpush.msrb.mxu0 %v12310_v8  ;;  %6455 = vmatpush.msra.mxu1 %v6454_v55  ;;  %v6472_v8 = vand.u32 4294901760, %v6471_v6  ;;  %v13607_v0 = vand.u32 4294901760, %v12570_v16  ;;  %v13606_v55 = vand.u32 4294901760, %v12582_v47 }
 0x70f   :  { %6236 = vmatmul.f32.vlgmr.msrb.gmra.mxu0 %v12305_v61  ;;  %6538 = vmatpush.msra.mxu2 %v12438_v33  ;;  %v6483_v61 = vsub.f32 %v12522_v7, %v13611_v23 }
 0x710   :  { %6386 = vmatpush.msra.mxu0 %v12391_v4  ;;  %6586 = vmatpush.msra.mxu3 %v12408_v11  ;;  %v6507_v6 = vsub.f32 %v12570_v16, %v13607_v0  ;;  %v6513_v43 = vsub.f32 %v12582_v47, %v13606_v55  ;;  %v4979_v55 = vld [vmem:[#allocation5 + $0x2d0] sm:$0xff] }
 0x711   :  { %6461 = vmatpush.msra.mxu1 %v6460_v50  ;;  %6541 = vmatpush.msra.mxu2 %v12452_v49  ;;  %v6484_v56 = vand.u32 4294901760, %v6483_v61  ;;  %v12608_v50 = vand.u32 4294901760, %v4984_v17 }
 0x712   :  { %6388 = vmatpush.msra.mxu0 %v12398_v13  ;;  %6588 = vmatpush.msra.mxu3 %v12418_v1  ;;  %v6508_v61 = vand.u32 4294901760, %v6507_v6  ;;  %v6514_v6 = vand.u32 4294901760, %v6513_v43 }
 0x713   :  { %6467 = vmatpush.msra.mxu1 %v6466_v48  ;;  %6544 = vmatpush.msra.mxu2 %v12471_v41  ;;  %v6502_v48 = vand.u32 4294901760, %v6501_v42  ;;  %v12625_v30 = vsub.f32 %v4984_v17, %v12608_v50  ;;  %v13829_v42 = vld [vmem:[#allocation15_spill] sm:$0xff] }
 0x714   :  { %6390 = vmatpush.msra.mxu0 %v12408_v11  ;;  %6590 = vmatpush.msra.mxu3 %v12429_v27 }
 0x715   :  { %6473 = vmatpush.msra.mxu1 %v6472_v8  ;;  %6547 = vmatpush.msra.mxu2 %v12480_v54  ;;  %v4982_v8 = vld [vmem:[#allocation5 + $0x2e8] sm:$0xff]  ;;  %v13613_v10 = vand.u32 4294901760, %v12625_v30 }
 0x716   :  { %6392 = vmatpush.msra.mxu0 %v12418_v1  ;;  %6592 = vmatpush.msra.mxu3 %v12443_v40  ;;  %v12629_v57 = vand.u32 4294901760, %v4982_v8 }
 0x717   :  { %6479 = vmatpush.msra.mxu1 %v6478_v21  ;;  %6550 = vmatpush.msra.mxu2 %v12493_v28  ;;  %v6519_v21 = vsub.f32 %v12592_v36, %v13605_v12  ;;  %v12636_v12 = vsub.f32 %v4983_v37, %v12616_v3 }
 0x718   :  { %6394 = vmatpush.msra.mxu0 %v12429_v27  ;;  %6594 = vmatpush.msra.mxu3 %v12454_v2  ;;  %v12649_v37 = vsub.f32 %v4982_v8, %v12629_v57  ;;  %v6770_v8 = vsub.f32 %v12625_v30, %v13613_v10  ;;  %v4976_v10 = vld [vmem:[#allocation5 + $0x2b8] sm:$0xff] }
 0x719   :  { %6485 = vmatpush.msra.mxu1 %v6484_v56  ;;  %6553 = vmatpush.msra.mxu2 %v12510_v52  ;;  %v4981_v56 = vld [vmem:[#allocation5 + $0x2e0] sm:$0xff]  ;;  %v6520_v0 = vand.u32 4294901760, %v6519_v21  ;;  %v12655_v21 = vand.u32 4294901760, %v4979_v55 }
 0x71a   :  { %6396 = vmatpush.msra.mxu0 %v12443_v40  ;;  %6596 = vmatpush.msra.mxu3 %v12465_v63  ;;  %v12640_v17 = vand.u32 4294901760, %v4981_v56  ;;  %v13622_v23 = vand.u32 4294901760, %v12649_v37  ;;  %v6771_v22 = vand.u32 4294901760, %v6770_v8 }
 0x71b   :  { %6491 = vmatpush.msra.mxu1 %v6490_v51  ;;  %6556 = vmatpush.msra.mxu2 %v12522_v7  ;;  %v4980_v51 = vld [vmem:[#allocation5 + $0x2d8] sm:$0xff] }
 0x71c   :  { %6398 = vmatpush.msra.mxu0 %v12454_v2  ;;  %6598 = vmatpush.msra.mxu3 %v12485_v53  ;;  %v12660_v39 = vsub.f32 %v4981_v56, %v12640_v17 }
 0x71d   :  { %6497 = vmatpush.msra.mxu1 %v6496_v14  ;;  %6559 = vmatpush.msra.mxu2 %v12534_v9  ;;  %v12632_v14 = vand.u32 4294901760, %v13829_v42 }
 0x71e   :  { %6400 = vmatpush.msra.mxu0 %v12465_v63  ;;  %6600 = vmatpush.msra.mxu3 %v12500_v32  ;;  %v13624_v15 = vand.u32 4294901760, %v12660_v39 }
 0x71f   :  { %6503 = vmatpush.msra.mxu1 %v6502_v48  ;;  %6562 = vmatpush.msra.mxu2 %v12546_v44  ;;  %v12644_v48 = vand.u32 4294901760, %v4980_v51  ;;  %v6418_v43 = vsub.f32 %v13829_v42, %v12632_v14 }
 0x720   :  { %6402 = vmatpush.msra.mxu0 %v12485_v53  ;;  %6602 = vmatpush.msra.mxu3 %v12512_v35 }
 0x721   :  { %6509 = vmatpush.msra.mxu1 %v6508_v61  ;;  %6565 = vmatpush.msra.mxu2 %v12558_v34  ;;  %v13619_v61 = vand.u32 4294901760, %v12636_v12  ;;  %v12667_v42 = vsub.f32 %v4980_v51, %v12644_v48  ;;  %v6419_v56 = vand.u32 4294901760, %v6418_v43  ;;  %v12680_v51 = vsub.f32 %v4979_v55, %v12655_v21 }
 0x722   :  { %6404 = vmatpush.msra.mxu0 %v12500_v32  ;;  %6604 = vmatpush.msra.mxu3 %v12524_v24  ;;  %v12695_v55 = vsub.f32 %v4978_v62, %v12672_v26 }
 0x723   :  { %6515 = vmatpush.msra.mxu1 %v6514_v6  ;;  %6568 = vmatpush.msra.mxu2 %v12570_v16  ;;  %13830 = vst [vmem:[#allocation12_spill] sm:$0xff] %v12667_v42  ;;  %v4977_v6 = vld [vmem:[#allocation5 + $0x2c0] sm:$0xff]  ;;  %v13625_v20 = vand.u32 4294901760, %v12667_v42  ;;  %v6420_v38 = vsub.f32 %v6418_v43, %v6419_v56 }
 0x724   :  { %6406 = vmatpush.msra.mxu0 %v12512_v35  ;;  %6606 = vmatpush.msra.mxu3 %v12536_v5  ;;  %13831 = vst [vmem:[#allocation14_spill] sm:$0xff] %v12680_v51  ;;  %v12685_v45 = vand.u32 4294901760, %v4977_v6 }
 0x725   :  { %6521 = vmatpush.msra.mxu1 %v6520_v0  ;;  %6571 = vmatpush.msra.mxu2 %v12582_v47  ;;  %v6776_v0 = vsub.f32 %v12636_v12, %v13619_v61  ;;  %v12697_v61 = vand.u32 4294901760, %v4976_v10  ;;  %v6421_v58 = vand.u32 4294901760, %v6420_v38 }
 0x726   :  { %6408 = vmatpush.msra.mxu0 %v12524_v24  ;;  %6608 = vmatpush.msra.mxu3 %v12548_v46  ;;  %v12707_v62 = vsub.f32 %v4977_v6, %v12685_v45 }
 0x727   :  { %6523 = vmatmul.f32.vlgmr.msra.gmra.mxu1 %v12632_v14  ;;  %6574 = vmatpush.msra.mxu2 %v12592_v36  ;;  %v6777_v8 = vand.u32 4294901760, %v6776_v0  ;;  %v4973_v0 = vld [vmem:[#allocation5 + $0x2a0] sm:$0xff]  ;;  %v12719_v6 = vsub.f32 %v4976_v10, %v12697_v61  ;;  %v12731_v10 = vsub.f32 %v4975_v59, %v12709_v31 }
 0x728   :  { %6690 = vmatpush.msrb.mxu1 %v12391_v4  ;;  %6410 = vmatpush.msra.mxu0 %v12536_v5  ;;  %v6782_v4 = vsub.f32 %v12649_v37, %v13622_v23  ;;  %v6788_v23 = vsub.f32 %v12660_v39, %v13624_v15 }
 0x729   :  { %6610 = vmatpush.msra.mxu3 %v12560_v19  ;;  %6577 = vmatmul.f32.vlgmr.msra.gmra.mxu2 %v6418_v43  ;;  %v6794_v43 = vsub.f32 %v12667_v42, %v13625_v20  ;;  %v4972_v42 = vld [vmem:[#allocation5 + $0x298] sm:$0xff] }
 0x72a   :  { %6692 = vmatpush.msrb.mxu1 %v12398_v13  ;;  %6727 = vmatpush.msrb.mxu2 %v12608_v50  ;;  %v4974_v13 = vld [vmem:[#allocation5 + $0x2a8] sm:$0xff] }
 0x72b   :  { %6412 = vmatpush.msra.mxu0 %v12548_v46  ;;  %6612 = vmatpush.msra.mxu3 %v12572_v60  ;;  %v12721_v15 = vand.u32 4294901760, %v4974_v13  ;;  %v6795_v38 = vand.u32 4294901760, %v6794_v43  ;;  %v13836_v43 = vand.u32 4294901760, %v12707_v62 }
 0x72c   :  { %6616 = vmatmul.f32.vlgmr.msra.gmra.mxu3 %v6419_v56  ;;  %6694 = vmatpush.msrb.mxu1 %v12408_v11  ;;  %v6783_v11 = vand.u32 4294901760, %v6782_v4  ;;  %v12733_v56 = vand.u32 4294901760, %v4973_v0  ;;  %v12745_v4 = vand.u32 4294901760, %v4972_v42 }
 0x72d   :  { %6729 = vmatpush.msrb.mxu2 %v12616_v3  ;;  %6772 = vmatpush.msrb.mxu3 %v6771_v22  ;;  %v13832_v22 = vand.u32 4294901760, %v12680_v51  ;;  %v12743_v59 = vsub.f32 %v4974_v13, %v12721_v15 }
 0x72e   :  { %6414 = vmatpush.msra.mxu0 %v12560_v19  ;;  %6696 = vmatpush.msrb.mxu1 %v12418_v1  ;;  %v6789_v1 = vand.u32 4294901760, %v6788_v23  ;;  %v12756_v13 = vsub.f32 %v4973_v0, %v12733_v56  ;;  %v4970_v23 = vld [vmem:[#allocation5 + $0x288] sm:$0xff]  ;;  %v12769_v0 = vsub.f32 %v4972_v42, %v12745_v4 }
 0x72f   :  { %6731 = vmatpush.msrb.mxu2 %v12629_v57  ;;  %6778 = vmatpush.msrb.mxu3 %v6777_v8  ;;  %v6800_v20 = vsub.f32 %v12680_v51, %v13832_v22  ;;  %v4971_v8 = vld [vmem:[#allocation5 + $0x290] sm:$0xff]  ;;  %v13833_v22 = vand.u32 4294901760, %v12406_v18  ;;  %v13834_v51 = vand.u32 4294901760, %v12695_v55  ;;  %v13835_v18 = vand.u32 4294901760, %v12416_v29 }
 0x730   :  { %6416 = vmatpush.msra.mxu0 %v12572_v60  ;;  %6698 = vmatpush.msrb.mxu1 %v12429_v27  ;;  %v13837_v29 = vand.u32 4294901760, %v12427_v25  ;;  %v13839_v25 = vand.u32 4294901760, %v12438_v33 }
 0x731   :  { %6422 = vmatmul.f32.vlgmr.msra.gmra.mxu0 %v6421_v58  ;;  %6733 = vmatpush.msrb.mxu2 %v12640_v17  ;;  %v6806_v27 = vsub.f32 %v12695_v55, %v13834_v51  ;;  %v6801_v58 = vand.u32 4294901760, %v6800_v20  ;;  %v6812_v51 = vsub.f32 %v12707_v62, %v13836_v43  ;;  %v13838_v20 = vand.u32 4294901760, %v12719_v6  ;;  %v4969_v43 = vld [vmem:[#allocation5 + $0x280] sm:$0xff] }
 0x732   :  { %6623 = vmatpush.msrb.mxu0 %v13833_v22  ;;  %6784 = vmatpush.msrb.mxu3 %v6783_v11  ;;  %v13630_v11 = vand.u32 4294901760, %v12731_v10  ;;  %v12758_v22 = vand.u32 4294901760, %v4971_v8  ;;  %v12789_v33 = vand.u32 4294901760, %v4969_v43 }
 0x733   :  { %6700 = vmatpush.msrb.mxu1 %v12443_v40  ;;  %6735 = vmatpush.msrb.mxu2 %v12644_v48  ;;  %v6807_v40 = vand.u32 4294901760, %v6806_v27 }
 0x734   :  { %6627 = vmatpush.msrb.mxu0 %v13835_v18  ;;  %6790 = vmatpush.msrb.mxu3 %v6789_v1  ;;  %v6818_v1 = vsub.f32 %v12719_v6, %v13838_v20  ;;  %v6829_v18 = vand.u32 4294901760, %v12743_v59  ;;  %v6824_v27 = vsub.f32 %v12731_v10, %v13630_v11  ;;  %v12782_v42 = vsub.f32 %v4971_v8, %v12758_v22  ;;  %v13840_v20 = vld [vmem:[#allocation18_spill] sm:$0xff] }
 0x735   :  { %6702 = vmatpush.msrb.mxu1 %v12454_v2  ;;  %6737 = vmatpush.msrb.mxu2 %v12655_v21  ;;  %v12773_v2 = vand.u32 4294901760, %v4970_v23  ;;  %v6841_v8 = vand.u32 4294901760, %v12769_v0  ;;  %v13842_v11 = vand.u32 4294901760, %v12471_v41  ;;  %v13843_v41 = vand.u32 4294901760, %v12480_v54 }
 0x736   :  { %6631 = vmatpush.msrb.mxu0 %v13837_v29  ;;  %6796 = vmatpush.msrb.mxu3 %v6795_v38  ;;  %v6813_v38 = vand.u32 4294901760, %v6812_v51  ;;  %v6835_v29 = vand.u32 4294901760, %v12756_v13  ;;  %v6819_v51 = vand.u32 4294901760, %v6818_v1  ;;  %v6847_v1 = vand.u32 4294901760, %v12782_v42 }
 0x737   :  { %6704 = vmatpush.msrb.mxu1 %v12465_v63  ;;  %6739 = vmatpush.msrb.mxu2 %v12672_v26  ;;  %v12785_v63 = vand.u32 4294901760, %v13840_v20 }
 0x738   :  { %6635 = vmatpush.msrb.mxu0 %v13839_v25  ;;  %6802 = vmatpush.msrb.mxu3 %v6801_v58  ;;  %v13841_v58 = vand.u32 4294901760, %v12452_v49  ;;  %v6830_v25 = vsub.f32 %v12743_v59, %v6829_v18  ;;  %v6825_v49 = vand.u32 4294901760, %v6824_v27  ;;  %v6848_v54 = vsub.f32 %v12782_v42, %v6847_v1 }
 0x739   :  { %6706 = vmatpush.msrb.mxu1 %v12485_v53  ;;  %6741 = vmatpush.msrb.mxu2 %v12685_v45  ;;  %v12800_v53 = vsub.f32 %v4970_v23, %v12773_v2 }
 0x73a   :  { %6639 = vmatpush.msrb.mxu0 %v13841_v58  ;;  %6808 = vmatpush.msrb.mxu3 %v6807_v40  ;;  %v6836_v40 = vsub.f32 %v12756_v13, %v6835_v29  ;;  %v12810_v58 = vsub.f32 %v13840_v20, %v12785_v63  ;;  %v6831_v23 = vand.u32 4294901760, %v6830_v25  ;;  %v13845_v20 = vand.u32 4294901760, %v12510_v52 }
 0x73b   :  { %6708 = vmatpush.msrb.mxu1 %v12500_v32  ;;  %6743 = vmatpush.msrb.mxu2 %v12697_v61  ;;  %v12815_v32 = vsub.f32 %v4969_v43, %v12789_v33  ;;  %v13846_v25 = vand.u32 4294901760, %v12522_v7 }
 0x73c   :  { %6643 = vmatpush.msrb.mxu0 %v13842_v11  ;;  %6814 = vmatpush.msrb.mxu3 %v6813_v38  ;;  %v6842_v11 = vsub.f32 %v12769_v0, %v6841_v8  ;;  %v13844_v38 = vand.u32 4294901760, %v12493_v28  ;;  %v6837_v43 = vand.u32 4294901760, %v6836_v40  ;;  %v6760_v27 = vand.u32 4294901760, %v12810_v58 }
 0x73d   :  { %6710 = vmatpush.msrb.mxu1 %v12512_v35  ;;  %6745 = vmatpush.msrb.mxu2 %v12709_v31  ;;  %v6853_v35 = vand.u32 4294901760, %v12800_v53  ;;  %v13848_v40 = vand.u32 4294901760, %v12546_v44  ;;  %v13851_v44 = vand.u32 4294901760, %v12570_v16  ;;  %v13855_v16 = vand.u32 4294901760, %v12592_v36  ;;  %v13859_v36 = vld [vmem:[#allocation14_spill] sm:$0xff] }
 0x73e   :  { %6647 = vmatpush.msrb.mxu0 %v13843_v41  ;;  %6820 = vmatpush.msrb.mxu3 %v6819_v51  ;;  %v6843_v28 = vand.u32 4294901760, %v6842_v11  ;;  %v6761_v52 = vsub.f32 %v12810_v58, %v6760_v27  ;;  %v13854_v11 = vand.u32 4294901760, %v12649_v37 }
 0x73f   :  { %6712 = vmatpush.msrb.mxu1 %v12524_v24  ;;  %6747 = vmatpush.msrb.mxu2 %v12721_v15  ;;  %v6859_v24 = vand.u32 4294901760, %v12815_v32  ;;  %v6854_v51 = vsub.f32 %v12800_v53, %v6853_v35 }
 0x740   :  { %6651 = vmatpush.msrb.mxu0 %v13844_v38  ;;  %6826 = vmatpush.msrb.mxu3 %v6825_v49  ;;  %v13847_v49 = vand.u32 4294901760, %v12534_v9  ;;  %v13849_v9 = vand.u32 4294901760, %v12558_v34  ;;  %v13853_v34 = vand.u32 4294901760, %v12582_v47  ;;  %v13856_v38 = vand.u32 4294901760, %v12660_v39  ;;  %v13857_v47 = vld [vmem:[#allocation12_spill] sm:$0xff] }
 0x741   :  { %6714 = vmatpush.msrb.mxu1 %v12536_v5  ;;  %6749 = vmatpush.msrb.mxu2 %v12733_v56  ;;  %v6849_v5 = vand.u32 4294901760, %v6848_v54  ;;  %v6855_v7 = vand.u32 4294901760, %v6854_v51 }
 0x742   :  { %6655 = vmatpush.msrb.mxu0 %v13845_v20  ;;  %6832 = vmatpush.msrb.mxu3 %v6831_v23  ;;  %v13852_v23 = vand.u32 4294901760, %v12636_v12 }
 0x743   :  { %6716 = vmatpush.msrb.mxu1 %v12548_v46  ;;  %6751 = vmatpush.msrb.mxu2 %v12745_v4  ;;  %v6860_v46 = vsub.f32 %v12815_v32, %v6859_v24 }
 0x744   :  { %6659 = vmatpush.msrb.mxu0 %v13846_v25  ;;  %6838 = vmatpush.msrb.mxu3 %v6837_v43  ;;  %v4999_v43 = vld [vmem:[#allocation5 + $0x370] sm:$0xff] }
 0x745   :  { %6718 = vmatpush.msrb.mxu1 %v12560_v19  ;;  %6753 = vmatpush.msrb.mxu2 %v12758_v22  ;;  %v6762_v19 = vand.u32 4294901760, %v6761_v52  ;;  %v6861_v41 = vand.u32 4294901760, %v6860_v46  ;;  %v4995_v52 = vld [vmem:[#allocation5 + $0x350] sm:$0xff]  ;;  %v4994_v46 = vld [vmem:[#allocation5 + $0x348] sm:$0xff] }
 0x746   :  { %6663 = vmatpush.msrb.mxu0 %v13847_v49  ;;  %6844 = vmatpush.msrb.mxu3 %v6843_v28  ;;  %v12948_v49 = vand.u32 4294901760, %v4995_v52 }
 0x747   :  { %6720 = vmatpush.msrb.mxu1 %v12572_v60  ;;  %6755 = vmatpush.msrb.mxu2 %v12773_v2  ;;  %v13850_v60 = vand.u32 4294901760, %v12625_v30 }
 0x748   :  { %6667 = vmatpush.msrb.mxu0 %v13848_v40  ;;  %6850 = vmatpush.msrb.mxu3 %v6849_v5  ;;  %v12959_v40 = vand.u32 4294901760, %v4994_v46 }
 0x749   :  { %6722 = vmatmul.f32.vlgmr.msrb.gmra.mxu1 %v12632_v14  ;;  %6757 = vmatpush.msrb.mxu2 %v12789_v33 }
 0x74a   :  { %6923 = vmatpush.msra.mxu1 %v12608_v50  ;;  %6671 = vmatpush.msrb.mxu0 %v13849_v9  ;;  %v12985_v9 = vsub.f32 %v4994_v46, %v12959_v40 }
 0x74b   :  { %6856 = vmatpush.msrb.mxu3 %v6855_v7  ;;  %6763 = vmatmul.f32.vlgmr.msrb.gmra.mxu2 %v6762_v19  ;;  %v4993_v7 = vld [vmem:[#allocation5 + $0x340] sm:$0xff]  ;;  %v4992_v19 = vld [vmem:[#allocation5 + $0x338] sm:$0xff] }
 0x74c   :  { %6925 = vmatpush.msra.mxu1 %v12616_v3  ;;  %6964 = vmatpush.msra.mxu2 %v13850_v60  ;;  %v4991_v60 = vld [vmem:[#allocation5 + $0x330] sm:$0xff] }
 0x74d   :  { %6675 = vmatpush.msrb.mxu0 %v13851_v44  ;;  %6862 = vmatpush.msrb.mxu3 %v6861_v41 }
 0x74e   :  { %6864 = vmatmul.f32.vlgmr.msrb.gmra.mxu3 %v12785_v63  ;;  %6927 = vmatpush.msra.mxu1 %v12629_v57 }
 0x74f   :  { %6968 = vmatpush.msra.mxu2 %v13852_v23  ;;  %7031 = vmatpush.msra.mxu3 %v12608_v50  ;;  %v13858_v50 = vand.u32 4294901760, %v13857_v47  ;;  %v4990_v23 = vld [vmem:[#allocation5 + $0x328] sm:$0xff] }
 0x750   :  { %6679 = vmatpush.msrb.mxu0 %v13853_v34  ;;  %6929 = vmatpush.msra.mxu1 %v12640_v17 }
 0x751   :  { %6972 = vmatpush.msra.mxu2 %v13854_v11  ;;  %7033 = vmatpush.msra.mxu3 %v12616_v3  ;;  %v5000_v3 = vld [vmem:[#allocation5 + $0x378] sm:$0xff]  ;;  %v13641_v11 = vand.u32 4294901760, %v12985_v9 }
 0x752   :  { %6683 = vmatpush.msrb.mxu0 %v13855_v16  ;;  %6931 = vmatpush.msra.mxu1 %v12644_v48  ;;  %v4989_v16 = vld [vmem:[#allocation5 + $0x320] sm:$0xff] }
 0x753   :  { %6685 = vmatmul.f32.vlgmr.msrb.gmra.mxu0 %v12632_v14  ;;  %6976 = vmatpush.msra.mxu2 %v13856_v38  ;;  %v13860_v14 = vand.u32 4294901760, %v13859_v36 }
 0x754   :  { %6870 = vmatpush.msra.mxu0 %v12625_v30  ;;  %7035 = vmatpush.msra.mxu3 %v12629_v57  ;;  %v12896_v30 = vand.u32 4294901760, %v5000_v3  ;;  %v13861_v57 = vand.u32 4294901760, %v12695_v55 }
 0x755   :  { %6933 = vmatpush.msra.mxu1 %v12655_v21  ;;  %6980 = vmatpush.msra.mxu2 %v13858_v50 }
 0x756   :  { %6873 = vmatpush.msra.mxu0 %v12636_v12  ;;  %7037 = vmatpush.msra.mxu3 %v12640_v17  ;;  %v4998_v12 = vld [vmem:[#allocation5 + $0x368] sm:$0xff]  ;;  %v12903_v17 = vand.u32 4294901760, %v4999_v43  ;;  %v12911_v54 = vsub.f32 %v5000_v3, %v12896_v30  ;;  %v13029_v3 = vand.u32 4294901760, %v4989_v16 }
 0x757   :  { %6935 = vmatpush.msra.mxu1 %v12672_v26  ;;  %6984 = vmatpush.msra.mxu2 %v13860_v14  ;;  %v12913_v20 = vand.u32 4294901760, %v4998_v12  ;;  %v7147_v14 = vsub.f32 %v12985_v9, %v13641_v11 }
 0x758   :  { %6876 = vmatpush.msra.mxu0 %v12649_v37  ;;  %7039 = vmatpush.msra.mxu3 %v12644_v48  ;;  %v13862_v37 = vand.u32 4294901760, %v12707_v62  ;;  %v4997_v48 = vld [vmem:[#allocation5 + $0x360] sm:$0xff]  ;;  %v12921_v28 = vsub.f32 %v4999_v43, %v12903_v17  ;;  %v13649_v25 = vand.u32 4294901760, %v12911_v54 }
 0x759   :  { %6937 = vmatpush.msra.mxu1 %v12685_v45  ;;  %6988 = vmatpush.msra.mxu2 %v13861_v57  ;;  %v12923_v51 = vand.u32 4294901760, %v4997_v48  ;;  %v12932_v5 = vsub.f32 %v4998_v12, %v12913_v20  ;;  %v4986_v12 = vld [vmem:[#allocation5 + $0x308] sm:$0xff] }
 0x75a   :  { %6879 = vmatpush.msra.mxu0 %v12660_v39  ;;  %7041 = vmatpush.msra.mxu3 %v12655_v21  ;;  %v13863_v39 = vand.u32 4294901760, %v12719_v6  ;;  %v4996_v21 = vld [vmem:[#allocation5 + $0x358] sm:$0xff] }
 0x75b   :  { %6939 = vmatpush.msra.mxu1 %v12697_v61  ;;  %6992 = vmatpush.msra.mxu2 %v13862_v37 }
 0x75c   :  { %6882 = vmatpush.msra.mxu0 %v13857_v47  ;;  %7043 = vmatpush.msra.mxu3 %v12672_v26  ;;  %v13864_v26 = vand.u32 4294901760, %v12731_v10  ;;  %v4988_v47 = vld [vmem:[#allocation5 + $0x318] sm:$0xff] }
 0x75d   :  { %6941 = vmatpush.msra.mxu1 %v12709_v31  ;;  %6996 = vmatpush.msra.mxu2 %v13863_v39  ;;  %v13041_v57 = vand.u32 4294901760, %v4988_v47  ;;  %v13051_v39 = vsub.f32 %v4989_v16, %v13029_v3 }
 0x75e   :  { %6885 = vmatpush.msra.mxu0 %v13859_v36  ;;  %7045 = vmatpush.msra.mxu3 %v12685_v45  ;;  %v12934_v45 = vand.u32 4294901760, %v4996_v21 }
 0x75f   :  { %6943 = vmatpush.msra.mxu1 %v12721_v15  ;;  %7000 = vmatpush.msra.mxu2 %v13864_v26  ;;  %v4985_v26 = vld [vmem:[#allocation5 + $0x300] sm:$0xff] }
 0x760   :  { %6888 = vmatpush.msra.mxu0 %v12695_v55  ;;  %7047 = vmatpush.msra.mxu3 %v12697_v61  ;;  %v13647_v61 = vand.u32 4294901760, %v12921_v28  ;;  %v12943_v55 = vsub.f32 %v4997_v48, %v12923_v51 }
 0x761   :  { %6945 = vmatpush.msra.mxu1 %v12733_v56  ;;  %7004 = vmatpush.msra.mxu2 %v6829_v18  ;;  %v12957_v18 = vsub.f32 %v4996_v21, %v12934_v45 }
 0x762   :  { %6891 = vmatpush.msra.mxu0 %v12707_v62  ;;  %7049 = vmatpush.msra.mxu3 %v12709_v31  ;;  %v7111_v31 = vsub.f32 %v12911_v54, %v13649_v25  ;;  %v13646_v62 = vand.u32 4294901760, %v12932_v5 }
 0x763   :  { %6947 = vmatpush.msra.mxu1 %v12745_v4  ;;  %7008 = vmatpush.msra.mxu2 %v6835_v29  ;;  %v12970_v29 = vand.u32 4294901760, %v4993_v7  ;;  %v13643_v41 = vand.u32 4294901760, %v12957_v18 }
 0x764   :  { %6894 = vmatpush.msra.mxu0 %v12719_v6  ;;  %7051 = vmatpush.msra.mxu3 %v12721_v15  ;;  %v7117_v15 = vsub.f32 %v12921_v28, %v13647_v61  ;;  %v13644_v6 = vand.u32 4294901760, %v12943_v55 }
 0x765   :  { %6949 = vmatpush.msra.mxu1 %v12758_v22  ;;  %7012 = vmatpush.msra.mxu2 %v6841_v8  ;;  %v12976_v8 = vsub.f32 %v4995_v52, %v12948_v49  ;;  %v12998_v44 = vsub.f32 %v4993_v7, %v12970_v29  ;;  %v7135_v34 = vsub.f32 %v12957_v18, %v13643_v41 }
 0x766   :  { %6897 = vmatpush.msra.mxu0 %v12731_v10  ;;  %7053 = vmatpush.msra.mxu3 %v12733_v56  ;;  %v7112_v56 = vand.u32 4294901760, %v7111_v31  ;;  %v7123_v10 = vsub.f32 %v12932_v5, %v13646_v62  ;;  %v13063_v7 = vsub.f32 %v4988_v47, %v13041_v57  ;;  %v13065_v31 = vand.u32 4294901760, %v4986_v12 }
 0x767   :  { %6951 = vmatpush.msra.mxu1 %v12773_v2  ;;  %7016 = vmatpush.msra.mxu2 %v6847_v1  ;;  %v12990_v1 = vand.u32 4294901760, %v4992_v19  ;;  %v13640_v38 = vand.u32 4294901760, %v12998_v44  ;;  %v7136_v36 = vand.u32 4294901760, %v7135_v34 }
 0x768   :  { %6900 = vmatpush.msra.mxu0 %v12743_v59  ;;  %7055 = vmatpush.msra.mxu3 %v12745_v4  ;;  %v7118_v4 = vand.u32 4294901760, %v7117_v15  ;;  %v7129_v59 = vsub.f32 %v12943_v55, %v13644_v6  ;;  %v13635_v15 = vand.u32 4294901760, %v13051_v39  ;;  %v5007_v6 = vld [vmem:[#allocation5 + $0x3b0] sm:$0xff] }
 0x769   :  { %6953 = vmatpush.msra.mxu1 %v12789_v33  ;;  %7020 = vmatpush.msra.mxu2 %v6853_v35  ;;  %v13642_v35 = vand.u32 4294901760, %v12976_v8  ;;  %v13214_v25 = vand.u32 4294901760, %v5007_v6 }
 0x76a   :  { %6903 = vmatpush.msra.mxu0 %v12756_v13  ;;  %7057 = vmatpush.msra.mxu3 %v12758_v22  ;;  %v13005_v13 = vand.u32 4294901760, %v4991_v60  ;;  %v7124_v22 = vand.u32 4294901760, %v7123_v10 }
 0x76b   :  { %6957 = vmatmul.f32.vlgmr.msra.gmra.mxu1 %v6760_v27  ;;  %7024 = vmatpush.msra.mxu2 %v6859_v24  ;;  %v13015_v27 = vsub.f32 %v4992_v19, %v12990_v1  ;;  %v13017_v24 = vand.u32 4294901760, %v4990_v23 }
 0x76c   :  { %7113 = vmatpush.msrb.mxu1 %v7112_v56  ;;  %6906 = vmatpush.msra.mxu0 %v12769_v0  ;;  %v7130_v0 = vand.u32 4294901760, %v7129_v59  ;;  %v13027_v50 = vsub.f32 %v4991_v60, %v13005_v13  ;;  %v13077_v56 = vand.u32 4294901760, %v4985_v26  ;;  %v13087_v59 = vsub.f32 %v4986_v12, %v13065_v31 }
 0x76d   :  { %7059 = vmatpush.msra.mxu3 %v12773_v2  ;;  %7026 = vmatmul.f32.vlgmr.msra.gmra.mxu2 %v12785_v63  ;;  %v7141_v2 = vsub.f32 %v12976_v8, %v13642_v35  ;;  %v13039_v43 = vsub.f32 %v4990_v23, %v13017_v24 }
 0x76e   :  { %7119 = vmatpush.msrb.mxu1 %v7118_v4  ;;  %7211 = vmatpush.msrb.mxu2 %v12911_v54  ;;  %v13637_v48 = vand.u32 4294901760, %v13027_v50  ;;  %v13634_v4 = vand.u32 4294901760, %v13063_v7  ;;  %v13097_v16 = vsub.f32 %v4985_v26, %v13077_v56 }
 0x76f   :  { %6909 = vmatpush.msra.mxu0 %v12782_v42  ;;  %7061 = vmatpush.msra.mxu3 %v12789_v33  ;;  %v4987_v42 = vld [vmem:[#allocation5 + $0x310] sm:$0xff]  ;;  %v13638_v33 = vand.u32 4294901760, %v13015_v27  ;;  %v7142_v37 = vand.u32 4294901760, %v7141_v2  ;;  %v13636_v46 = vand.u32 4294901760, %v13039_v43 }
 0x770   :  { %7063 = vmatmul.f32.vlgmr.msra.gmra.mxu3 %v12785_v63  ;;  %7125 = vmatpush.msrb.mxu1 %v7124_v22  ;;  %v7153_v63 = vsub.f32 %v12998_v44, %v13640_v38  ;;  %v13053_v21 = vand.u32 4294901760, %v4987_v42  ;;  %v7177_v22 = vsub.f32 %v13051_v39, %v13635_v15  ;;  %v7183_v2 = vsub.f32 %v13063_v7, %v13634_v4  ;;  %v5010_v15 = vld [vmem:[#allocation5 + $0x3c8] sm:$0xff] }
 0x771   :  { %7214 = vmatpush.msrb.mxu2 %v12921_v28  ;;  %7264 = vmatpush.msrb.mxu3 %v12896_v30  ;;  %v7159_v52 = vsub.f32 %v13015_v27, %v13638_v33  ;;  %v7171_v60 = vsub.f32 %v13039_v43, %v13636_v46  ;;  %v13631_v12 = vand.u32 4294901760, %v13097_v16  ;;  %v13177_v33 = vand.u32 4294901760, %v5010_v15 }
 0x772   :  { %6912 = vmatpush.msra.mxu0 %v12800_v53  ;;  %7131 = vmatpush.msrb.mxu1 %v7130_v0  ;;  %v7148_v53 = vand.u32 4294901760, %v7147_v14  ;;  %v13075_v19 = vsub.f32 %v4987_v42, %v13053_v21  ;;  %v5016_v0 = vld [vmem:[#allocation5 + $0x3f8] sm:$0xff]  ;;  %v5015_v14 = vld [vmem:[#allocation5 + $0x3f0] sm:$0xff]  ;;  %v7178_v42 = vand.u32 4294901760, %v7177_v22 }
 0x773   :  { %7217 = vmatpush.msrb.mxu2 %v12932_v5  ;;  %7266 = vmatpush.msrb.mxu3 %v12903_v17  ;;  %v7160_v10 = vand.u32 4294901760, %v7159_v52  ;;  %v7172_v47 = vand.u32 4294901760, %v7171_v60  ;;  %v13121_v52 = vand.u32 4294901760, %v5015_v14 }
 0x774   :  { %6915 = vmatpush.msra.mxu0 %v12815_v32  ;;  %7137 = vmatpush.msrb.mxu1 %v7136_v36  ;;  %v7154_v32 = vand.u32 4294901760, %v7153_v63  ;;  %v13633_v34 = vand.u32 4294901760, %v13075_v19  ;;  %v13632_v36 = vand.u32 4294901760, %v13087_v59 }
 0x775   :  { %6918 = vmatmul.f32.vlgmr.msra.gmra.mxu0 %v12810_v58  ;;  %7220 = vmatpush.msrb.mxu2 %v12943_v55  ;;  %v7165_v58 = vsub.f32 %v13027_v50, %v13637_v48 }
 0x776   :  { %7068 = vmatpush.msrb.mxu0 %v12896_v30  ;;  %7268 = vmatpush.msrb.mxu3 %v12913_v20  ;;  %v7189_v63 = vsub.f32 %v13075_v19, %v13633_v34  ;;  %v7195_v26 = vsub.f32 %v13087_v59, %v13632_v36  ;;  %v5011_v36 = vld [vmem:[#allocation5 + $0x3d0] sm:$0xff] }
 0x777   :  { %7143 = vmatpush.msrb.mxu1 %v7142_v37  ;;  %7223 = vmatpush.msrb.mxu2 %v12957_v18  ;;  %v7166_v23 = vand.u32 4294901760, %v7165_v58  ;;  %v13113_v37 = vand.u32 4294901760, %v5016_v0 }
 0x778   :  { %7070 = vmatpush.msrb.mxu0 %v12903_v17  ;;  %7270 = vmatpush.msrb.mxu3 %v12923_v51  ;;  %v7190_v58 = vand.u32 4294901760, %v7189_v63  ;;  %v7196_v63 = vand.u32 4294901760, %v7195_v26 }
 0x779   :  { %7149 = vmatpush.msrb.mxu1 %v7148_v53  ;;  %7226 = vmatpush.msrb.mxu2 %v12976_v8  ;;  %v7184_v53 = vand.u32 4294901760, %v7183_v2  ;;  %v13130_v60 = vsub.f32 %v5016_v0, %v13113_v37  ;;  %v13865_v2 = vld [vmem:[#allocation16_spill] sm:$0xff] }
 0x77a   :  { %7072 = vmatpush.msrb.mxu0 %v12913_v20  ;;  %7272 = vmatpush.msrb.mxu3 %v12934_v45 }
 0x77b   :  { %7155 = vmatpush.msrb.mxu1 %v7154_v32  ;;  %7229 = vmatpush.msrb.mxu2 %v12985_v9  ;;  %v5014_v32 = vld [vmem:[#allocation5 + $0x3e8] sm:$0xff]  ;;  %v13639_v4 = vand.u32 4294901760, %v13130_v60 }
 0x77c   :  { %7074 = vmatpush.msrb.mxu0 %v12923_v51  ;;  %7274 = vmatpush.msrb.mxu3 %v12948_v49  ;;  %v13134_v22 = vand.u32 4294901760, %v5014_v32 }
 0x77d   :  { %7161 = vmatpush.msrb.mxu1 %v7160_v10  ;;  %7232 = vmatpush.msrb.mxu2 %v12998_v44  ;;  %v7201_v10 = vsub.f32 %v13097_v16, %v13631_v12  ;;  %v13141_v12 = vsub.f32 %v5015_v14, %v13121_v52 }
 0x77e   :  { %7076 = vmatpush.msrb.mxu0 %v12934_v45  ;;  %7276 = vmatpush.msrb.mxu3 %v12959_v40  ;;  %v13154_v14 = vsub.f32 %v5014_v32, %v13134_v22  ;;  %v7452_v32 = vsub.f32 %v13130_v60, %v13639_v4  ;;  %v5008_v4 = vld [vmem:[#allocation5 + $0x3b8] sm:$0xff] }
 0x77f   :  { %7167 = vmatpush.msrb.mxu1 %v7166_v23  ;;  %7235 = vmatpush.msrb.mxu2 %v13015_v27  ;;  %v5013_v23 = vld [vmem:[#allocation5 + $0x3e0] sm:$0xff]  ;;  %v7202_v34 = vand.u32 4294901760, %v7201_v10  ;;  %v13160_v10 = vand.u32 4294901760, %v5011_v36 }
 0x780   :  { %7078 = vmatpush.msrb.mxu0 %v12948_v49  ;;  %7278 = vmatpush.msrb.mxu3 %v12970_v29  ;;  %v13145_v0 = vand.u32 4294901760, %v5013_v23  ;;  %v13648_v48 = vand.u32 4294901760, %v13154_v14  ;;  %v7453_v35 = vand.u32 4294901760, %v7452_v32 }
 0x781   :  { %7173 = vmatpush.msrb.mxu1 %v7172_v47  ;;  %7238 = vmatpush.msrb.mxu2 %v13027_v50  ;;  %v5012_v47 = vld [vmem:[#allocation5 + $0x3d8] sm:$0xff] }
 0x782   :  { %7080 = vmatpush.msrb.mxu0 %v12959_v40  ;;  %7280 = vmatpush.msrb.mxu3 %v12990_v1  ;;  %v13165_v46 = vsub.f32 %v5013_v23, %v13145_v0 }
 0x783   :  { %7179 = vmatpush.msrb.mxu1 %v7178_v42  ;;  %7241 = vmatpush.msrb.mxu2 %v13039_v43  ;;  %v13137_v42 = vand.u32 4294901760, %v13865_v2 }
 0x784   :  { %7082 = vmatpush.msrb.mxu0 %v12970_v29  ;;  %7282 = vmatpush.msrb.mxu3 %v13005_v13  ;;  %v13650_v38 = vand.u32 4294901760, %v13165_v46 }
 0x785   :  { %7185 = vmatpush.msrb.mxu1 %v7184_v53  ;;  %7244 = vmatpush.msrb.mxu2 %v13051_v39  ;;  %v13149_v53 = vand.u32 4294901760, %v5012_v47  ;;  %v7100_v26 = vsub.f32 %v13865_v2, %v13137_v42 }
 0x786   :  { %7084 = vmatpush.msrb.mxu0 %v12990_v1  ;;  %7284 = vmatpush.msrb.mxu3 %v13017_v24 }
 0x787   :  { %7191 = vmatpush.msrb.mxu1 %v7190_v58  ;;  %7247 = vmatpush.msrb.mxu2 %v13063_v7  ;;  %v13645_v58 = vand.u32 4294901760, %v13141_v12  ;;  %v13172_v2 = vsub.f32 %v5012_v47, %v13149_v53  ;;  %v7101_v23 = vand.u32 4294901760, %v7100_v26  ;;  %v13185_v47 = vsub.f32 %v5011_v36, %v13160_v10 }
 0x788   :  { %7086 = vmatpush.msrb.mxu0 %v13005_v13  ;;  %7286 = vmatpush.msrb.mxu3 %v13029_v3  ;;  %v13200_v36 = vsub.f32 %v5010_v15, %v13177_v33 }
 0x789   :  { %7197 = vmatpush.msrb.mxu1 %v7196_v63  ;;  %7250 = vmatpush.msrb.mxu2 %v13075_v19  ;;  %13866 = vst [vmem:[#allocation13_spill] sm:$0xff] %v13172_v2  ;;  %v5009_v63 = vld [vmem:[#allocation5 + $0x3c0] sm:$0xff]  ;;  %v13651_v41 = vand.u32 4294901760, %v13172_v2  ;;  %v7102_v62 = vsub.f32 %v7100_v26, %v7101_v23  ;;  %v13654_v61 = vand.u32 4294901760, %v13185_v47 }
 0x78a   :  { %7088 = vmatpush.msrb.mxu0 %v13017_v24  ;;  %7288 = vmatpush.msrb.mxu3 %v13041_v57  ;;  %13867 = vst [vmem:[#allocation17_spill] sm:$0xff] %v13185_v47  ;;  %v13190_v11 = vand.u32 4294901760, %v5009_v63 }
 0x78b   :  { %7203 = vmatpush.msrb.mxu1 %v7202_v34  ;;  %7253 = vmatpush.msrb.mxu2 %v13087_v59  ;;  %v7458_v34 = vsub.f32 %v13141_v12, %v13645_v58  ;;  %v13202_v58 = vand.u32 4294901760, %v5008_v4 }
 0x78c   :  { %7090 = vmatpush.msrb.mxu0 %v13029_v3  ;;  %7290 = vmatpush.msrb.mxu3 %v13053_v21  ;;  %v13212_v15 = vsub.f32 %v5009_v63, %v13190_v11 }
 0x78d   :  { %7205 = vmatmul.f32.vlgmr.msrb.gmra.mxu1 %v13137_v42  ;;  %7256 = vmatpush.msrb.mxu2 %v13097_v16  ;;  %v7459_v32 = vand.u32 4294901760, %v7458_v34  ;;  %v5005_v34 = vld [vmem:[#allocation5 + $0x3a0] sm:$0xff]  ;;  %v13224_v63 = vsub.f32 %v5008_v4, %v13202_v58  ;;  %v13236_v4 = vsub.f32 %v5007_v6, %v13214_v25 }
 0x78e   :  { %7372 = vmatpush.msra.mxu1 %v12896_v30  ;;  %7092 = vmatpush.msrb.mxu0 %v13041_v57  ;;  %v7464_v30 = vsub.f32 %v13154_v14, %v13648_v48  ;;  %v7470_v48 = vsub.f32 %v13165_v46, %v13650_v38 }
 0x78f   :  { %7292 = vmatpush.msrb.mxu3 %v13065_v31  ;;  %7259 = vmatmul.f32.vlgmr.msrb.gmra.mxu2 %v7100_v26  ;;  %v7476_v26 = vsub.f32 %v13172_v2, %v13651_v41  ;;  %v7482_v41 = vsub.f32 %v13185_v47, %v13654_v61  ;;  %v5004_v2 = vld [vmem:[#allocation5 + $0x398] sm:$0xff]  ;;  %v13868_v61 = vand.u32 4294901760, %v12911_v54  ;;  %v13869_v47 = vand.u32 4294901760, %v13200_v36 }
 0x790   :  { %7374 = vmatpush.msra.mxu1 %v12903_v17  ;;  %7409 = vmatpush.msra.mxu2 %v13113_v37  ;;  %v5006_v17 = vld [vmem:[#allocation5 + $0x3a8] sm:$0xff]  ;;  %v13870_v54 = vand.u32 4294901760, %v12921_v28  ;;  %v13872_v28 = vand.u32 4294901760, %v12932_v5  ;;  %v13874_v5 = vand.u32 4294901760, %v12943_v55 }
 0x791   :  { %7094 = vmatpush.msrb.mxu0 %v13053_v21  ;;  %7294 = vmatpush.msrb.mxu3 %v13077_v56  ;;  %v13226_v38 = vand.u32 4294901760, %v5006_v17 }
 0x792   :  { %7298 = vmatmul.f32.vlgmr.msrb.gmra.mxu3 %v7101_v23  ;;  %7376 = vmatpush.msra.mxu1 %v12913_v20  ;;  %v7465_v20 = vand.u32 4294901760, %v7464_v30  ;;  %v13238_v23 = vand.u32 4294901760, %v5005_v34  ;;  %v13250_v30 = vand.u32 4294901760, %v5004_v2 }
 0x793   :  { %7411 = vmatpush.msra.mxu2 %v13121_v52  ;;  %7454 = vmatpush.msra.mxu3 %v7453_v35  ;;  %v7103_v35 = vand.u32 4294901760, %v7102_v62  ;;  %v7477_v62 = vand.u32 4294901760, %v7476_v26  ;;  %v13248_v6 = vsub.f32 %v5006_v17, %v13226_v38  ;;  %v7483_v26 = vand.u32 4294901760, %v7482_v41 }
 0x794   :  { %7096 = vmatpush.msrb.mxu0 %v13065_v31  ;;  %7378 = vmatpush.msra.mxu1 %v12923_v51  ;;  %v7471_v51 = vand.u32 4294901760, %v7470_v48  ;;  %v13261_v17 = vsub.f32 %v5005_v34, %v13238_v23  ;;  %v5002_v48 = vld [vmem:[#allocation5 + $0x388] sm:$0xff]  ;;  %v13873_v41 = vand.u32 4294901760, %v13224_v63  ;;  %v13274_v34 = vsub.f32 %v5004_v2, %v13250_v30 }
 0x795   :  { %7413 = vmatpush.msra.mxu2 %v13134_v22  ;;  %7460 = vmatpush.msra.mxu3 %v7459_v32  ;;  %v5003_v32 = vld [vmem:[#allocation5 + $0x390] sm:$0xff] }
 0x796   :  { %7098 = vmatpush.msrb.mxu0 %v13077_v56  ;;  %7380 = vmatpush.msra.mxu1 %v12934_v45  ;;  %v7488_v45 = vsub.f32 %v13200_v36, %v13869_v47 }
 0x797   :  { %7104 = vmatmul.f32.vlgmr.msrb.gmra.mxu0 %v7103_v35  ;;  %7415 = vmatpush.msra.mxu2 %v13145_v0  ;;  %v13263_v35 = vand.u32 4294901760, %v5003_v32 }
 0x798   :  { %7305 = vmatpush.msra.mxu0 %v13868_v61  ;;  %7466 = vmatpush.msra.mxu3 %v7465_v20  ;;  %v13871_v61 = vand.u32 4294901760, %v13212_v15  ;;  %v13657_v20 = vand.u32 4294901760, %v13236_v4 }
 0x799   :  { %7382 = vmatpush.msra.mxu1 %v12948_v49  ;;  %7417 = vmatpush.msra.mxu2 %v13149_v53  ;;  %v7489_v49 = vand.u32 4294901760, %v7488_v45  ;;  %v13287_v2 = vsub.f32 %v5003_v32, %v13263_v35  ;;  %v7523_v32 = vand.u32 4294901760, %v13274_v34 }
 0x79a   :  { %7309 = vmatpush.msra.mxu0 %v13870_v54  ;;  %7472 = vmatpush.msra.mxu3 %v7471_v51  ;;  %v7494_v47 = vsub.f32 %v13212_v15, %v13871_v61  ;;  %v7500_v51 = vsub.f32 %v13224_v63, %v13873_v41  ;;  %v7511_v54 = vand.u32 4294901760, %v13248_v6  ;;  %v5001_v61 = vld [vmem:[#allocation5 + $0x380] sm:$0xff]  ;;  %v7506_v45 = vsub.f32 %v13236_v4, %v13657_v20 }
 0x79b   :  { %7384 = vmatpush.msra.mxu1 %v12959_v40  ;;  %7419 = vmatpush.msra.mxu2 %v13160_v10  ;;  %v13278_v40 = vand.u32 4294901760, %v5002_v48  ;;  %v13875_v41 = vld [vmem:[#allocation11_spill] sm:$0xff]  ;;  %v13294_v55 = vand.u32 4294901760, %v5001_v61  ;;  %v13877_v20 = vand.u32 4294901760, %v12976_v8  ;;  %v13878_v8 = vand.u32 4294901760, %v12985_v9 }
 0x79c   :  { %7313 = vmatpush.msra.mxu0 %v13872_v28  ;;  %7478 = vmatpush.msra.mxu3 %v7477_v62  ;;  %v7495_v62 = vand.u32 4294901760, %v7494_v47  ;;  %v7517_v28 = vand.u32 4294901760, %v13261_v17  ;;  %v7501_v47 = vand.u32 4294901760, %v7500_v51  ;;  %v7529_v51 = vand.u32 4294901760, %v13287_v2 }
 0x79d   :  { %7386 = vmatpush.msra.mxu1 %v12970_v29  ;;  %7421 = vmatpush.msra.mxu2 %v13177_v33  ;;  %v13290_v29 = vand.u32 4294901760, %v13875_v41 }
 0x79e   :  { %7317 = vmatpush.msra.mxu0 %v13874_v5  ;;  %7484 = vmatpush.msra.mxu3 %v7483_v26  ;;  %v13876_v26 = vand.u32 4294901760, %v12957_v18  ;;  %v7512_v5 = vsub.f32 %v13248_v6, %v7511_v54  ;;  %v7507_v18 = vand.u32 4294901760, %v7506_v45  ;;  %v7530_v9 = vsub.f32 %v13287_v2, %v7529_v51 }
 0x79f   :  { %7388 = vmatpush.msra.mxu1 %v12990_v1  ;;  %7423 = vmatpush.msra.mxu2 %v13190_v11  ;;  %v13305_v1 = vsub.f32 %v5002_v48, %v13278_v40 }
 0x7a0   :  { %7321 = vmatpush.msra.mxu0 %v13876_v26  ;;  %7490 = vmatpush.msra.mxu3 %v7489_v49  ;;  %v7518_v49 = vsub.f32 %v13261_v17, %v7517_v28  ;;  %v13315_v26 = vsub.f32 %v13875_v41, %v13290_v29  ;;  %v7513_v48 = vand.u32 4294901760, %v7512_v5  ;;  %v13880_v41 = vand.u32 4294901760, %v13015_v27 }
 0x7a1   :  { %7390 = vmatpush.msra.mxu1 %v13005_v13  ;;  %7425 = vmatpush.msra.mxu2 %v13202_v58  ;;  %v13320_v13 = vsub.f32 %v5001_v61, %v13294_v55  ;;  %v13881_v5 = vand.u32 4294901760, %v13027_v50 }
 0x7a2   :  { %7325 = vmatpush.msra.mxu0 %v13877_v20  ;;  %7496 = vmatpush.msra.mxu3 %v7495_v62  ;;  %v7524_v20 = vsub.f32 %v13274_v34, %v7523_v32  ;;  %v13879_v62 = vand.u32 4294901760, %v12998_v44  ;;  %v7519_v61 = vand.u32 4294901760, %v7518_v49  ;;  %v7442_v45 = vand.u32 4294901760, %v13315_v26 }
 0x7a3   :  { %7392 = vmatpush.msra.mxu1 %v13017_v24  ;;  %7427 = vmatpush.msra.mxu2 %v13214_v25  ;;  %v7535_v24 = vand.u32 4294901760, %v13305_v1  ;;  %v13883_v49 = vand.u32 4294901760, %v13051_v39  ;;  %v13886_v39 = vand.u32 4294901760, %v13075_v19  ;;  %v8000_v19 = vld [vmem:[%s13490_s9] ss:$0 sm:$0xff] }
 0x7a4   :  { %7329 = vmatpush.msra.mxu0 %v13878_v8  ;;  %7502 = vmatpush.msra.mxu3 %v7501_v47  ;;  %v7525_v44 = vand.u32 4294901760, %v7524_v20  ;;  %v7443_v27 = vsub.f32 %v13315_v26, %v7442_v45  ;;  %v13889_v20 = vand.u32 4294901760, %v13154_v14 }
 0x7a5   :  { %7394 = vmatpush.msra.mxu1 %v13029_v3  ;;  %7429 = vmatpush.msra.mxu2 %v13226_v38  ;;  %v7541_v3 = vand.u32 4294901760, %v13320_v13  ;;  %v7536_v47 = vsub.f32 %v13305_v1, %v7535_v24 }
 0x7a6   :  { %7333 = vmatpush.msra.mxu0 %v13879_v62  ;;  %7508 = vmatpush.msra.mxu3 %v7507_v18  ;;  %v13882_v18 = vand.u32 4294901760, %v13039_v43  ;;  %v13884_v43 = vand.u32 4294901760, %v13063_v7  ;;  %v13888_v7 = vand.u32 4294901760, %v13087_v59  ;;  %v5059_v62 = vpop.f32.mrf.mxu0  ;;  %v13891_v59 = vand.u32 4294901760, %v13165_v46 }
 0x7a7   :  { %7396 = vmatpush.msra.mxu1 %v13041_v57  ;;  %7431 = vmatpush.msra.mxu2 %v13238_v23  ;;  %v7531_v57 = vand.u32 4294901760, %v7530_v9  ;;  %v7537_v50 = vand.u32 4294901760, %v7536_v47  ;;  %v13892_v9 = vld [vmem:[#allocation13_spill] sm:$0xff] }
 0x7a8   :  { %7337 = vmatpush.msra.mxu0 %v13880_v41  ;;  %7514 = vmatpush.msra.mxu3 %v7513_v48  ;;  %v13887_v48 = vand.u32 4294901760, %v13141_v12  ;;  %v5160_v41 = vpop.f32.mrf.mxu1 }
 0x7a9   :  { %7398 = vmatpush.msra.mxu1 %v13053_v21  ;;  %7433 = vmatpush.msra.mxu2 %v13250_v30  ;;  %v7542_v21 = vsub.f32 %v13320_v13, %v7541_v3 }
 0x7aa   :  { %7341 = vmatpush.msra.mxu0 %v13881_v5  ;;  %7520 = vmatpush.msra.mxu3 %v7519_v61  ;;  %v13890_v61 = vand.u32 4294901760, %v13097_v16  ;;  %v13894_v16 = vld [vmem:[#allocation17_spill] sm:$0xff] }
 0x7ab   :  { %7400 = vmatpush.msra.mxu1 %v13065_v31  ;;  %7435 = vmatpush.msra.mxu2 %v13263_v35  ;;  %v7444_v31 = vand.u32 4294901760, %v7443_v27  ;;  %v7543_v8 = vand.u32 4294901760, %v7542_v21 }
 0x7ac   :  { %7345 = vmatpush.msra.mxu0 %v13882_v18  ;;  %7526 = vmatpush.msra.mxu3 %v7525_v44 }
 0x7ad   :  { %7402 = vmatpush.msra.mxu1 %v13077_v56  ;;  %7437 = vmatpush.msra.mxu2 %v13278_v40  ;;  %v13885_v56 = vand.u32 4294901760, %v13130_v60 }
 0x7ae   :  { %7349 = vmatpush.msra.mxu0 %v13883_v49  ;;  %7532 = vmatpush.msra.mxu3 %v7531_v57  ;;  %v5322_v44 = vpop.f32.mrf.mxu0 }
 0x7af   :  { %7404 = vmatmul.f32.vlgmr.msra.gmra.mxu1 %v13137_v42  ;;  %7439 = vmatpush.msra.mxu2 %v13294_v55 }
 0x7b0   :  { %7605 = vmatpush.msrb.mxu1 %v13113_v37  ;;  %7353 = vmatpush.msra.mxu0 %v13884_v43 }
 0x7b1   :  { %7538 = vmatpush.msra.mxu3 %v7537_v50  ;;  %7445 = vmatmul.f32.vlgmr.msra.gmra.mxu2 %v7444_v31 }
 0x7b2   :  { %7607 = vmatpush.msrb.mxu1 %v13121_v52  ;;  %7646 = vmatpush.msrb.mxu2 %v13885_v56 }
 0x7b3   :  { %7357 = vmatpush.msra.mxu0 %v13886_v39  ;;  %7544 = vmatpush.msra.mxu3 %v7543_v8 }
 0x7b4   :  { %7546 = vmatmul.f32.vlgmr.msra.gmra.mxu3 %v13290_v29  ;;  %7609 = vmatpush.msrb.mxu1 %v13134_v22 }
 0x7b5   :  { %7650 = vmatpush.msrb.mxu2 %v13887_v48  ;;  %7713 = vmatpush.msrb.mxu3 %v13113_v37  ;;  %v5060_v37 = vadd.f32 %v8000_v19, %v5059_v62 }
 0x7b6   :  { %7361 = vmatpush.msra.mxu0 %v13888_v7  ;;  %7611 = vmatpush.msrb.mxu1 %v13145_v0 }
 0x7b7   :  { %7654 = vmatpush.msrb.mxu2 %v13889_v20  ;;  %7715 = vmatpush.msrb.mxu3 %v13121_v52  ;;  %v13893_v52 = vand.u32 4294901760, %v13892_v9 }
 0x7b8   :  { %7365 = vmatpush.msra.mxu0 %v13890_v61  ;;  %7613 = vmatpush.msrb.mxu1 %v13149_v53 }
 0x7b9   :  { %7367 = vmatmul.f32.vlgmr.msra.gmra.mxu0 %v13137_v42  ;;  %7658 = vmatpush.msrb.mxu2 %v13891_v59  ;;  %v13895_v42 = vand.u32 4294901760, %v13894_v16 }
 0x7ba   :  { %7552 = vmatpush.msrb.mxu0 %v13130_v60  ;;  %7717 = vmatpush.msrb.mxu3 %v13134_v22  ;;  %v5161_v60 = vadd.f32 %v5160_v41, %v5060_v37  ;;  %v13896_v22 = vand.u32 4294901760, %v13200_v36 }
 0x7bb   :  { %7615 = vmatpush.msrb.mxu1 %v13160_v10  ;;  %7662 = vmatpush.msrb.mxu2 %v13893_v52 }
 0x7bc   :  { %7555 = vmatpush.msrb.mxu0 %v13141_v12  ;;  %7719 = vmatpush.msrb.mxu3 %v13145_v0  ;;  %v13897_v12 = vand.u32 4294901760, %v13212_v15  ;;  %v5214_v0 = vpop.f32.mrf.mxu2 }
 0x7bd   :  { %7617 = vmatpush.msrb.mxu1 %v13177_v33  ;;  %7666 = vmatpush.msrb.mxu2 %v13895_v42 }
 0x7be   :  { %7558 = vmatpush.msrb.mxu0 %v13154_v14  ;;  %7721 = vmatpush.msrb.mxu3 %v13149_v53  ;;  %v5215_v53 = vadd.f32 %v5214_v0, %v5161_v60  ;;  %v13898_v14 = vand.u32 4294901760, %v13224_v63 }
 0x7bf   :  { %7619 = vmatpush.msrb.mxu1 %v13190_v11  ;;  %7670 = vmatpush.msrb.mxu2 %v13896_v22 }
 0x7c0   :  { %7561 = vmatpush.msrb.mxu0 %v13165_v46  ;;  %7723 = vmatpush.msrb.mxu3 %v13160_v10  ;;  %v13899_v46 = vand.u32 4294901760, %v13236_v4  ;;  %v5253_v10 = vpop.f32.mrf.mxu3 }
 0x7c1   :  { %7621 = vmatpush.msrb.mxu1 %v13202_v58  ;;  %7674 = vmatpush.msrb.mxu2 %v13897_v12 }
 0x7c2   :  { %7564 = vmatpush.msrb.mxu0 %v13892_v9  ;;  %7725 = vmatpush.msrb.mxu3 %v13177_v33  ;;  %v5254_v33 = vadd.f32 %v5253_v10, %v5215_v53 }
 0x7c3   :  { %7623 = vmatpush.msrb.mxu1 %v13214_v25  ;;  %7678 = vmatpush.msrb.mxu2 %v13898_v14  ;;  %v7753_v14 = vld [vmem:[%s13491_s10 + $0x18] sm:$0xff] }
 0x7c4   :  { %7567 = vmatpush.msrb.mxu0 %v13894_v16  ;;  %7727 = vmatpush.msrb.mxu3 %v13190_v11  ;;  %v5323_v11 = vadd.f32 %v5322_v44, %v5254_v33  ;;  %v7752_v33 = vld [vmem:[%s13491_s10 + $0x10] sm:$0xff] }
 0x7c5   :  { %7625 = vmatpush.msrb.mxu1 %v13226_v38  ;;  %7682 = vmatpush.msrb.mxu2 %v13899_v46  ;;  %v7773_v46 = vand.u32 4294901760, %v7753_v14 }
 0x7c6   :  { %7570 = vmatpush.msrb.mxu0 %v13200_v36  ;;  %7729 = vmatpush.msrb.mxu3 %v13202_v58  ;;  %v5400_v58 = vpop.f32.mrf.mxu2 }
 0x7c7   :  { %7627 = vmatpush.msrb.mxu1 %v13238_v23  ;;  %7686 = vmatpush.msrb.mxu2 %v7511_v54 }
 0x7c8   :  { %7573 = vmatpush.msrb.mxu0 %v13212_v15  ;;  %7731 = vmatpush.msrb.mxu3 %v13214_v25  ;;  %v5359_v25 = vpop.f32.mrf.mxu1  ;;  %v5501_v15 = vpop.f32.mrf.mxu3 }
 0x7c9   :  { %7629 = vmatpush.msrb.mxu1 %v13250_v30  ;;  %7690 = vmatpush.msrb.mxu2 %v7517_v28 }
 0x7ca   :  { %7576 = vmatpush.msrb.mxu0 %v13224_v63  ;;  %7733 = vmatpush.msrb.mxu3 %v13226_v38  ;;  %v5360_v38 = vadd.f32 %v5359_v25, %v5323_v11  ;;  %v7803_v11 = vsub.f32 %v7753_v14, %v7773_v46  ;;  %v7775_v25 = vand.u32 4294901760, %v7752_v33 }
 0x7cb   :  { %7631 = vmatpush.msrb.mxu1 %v13263_v35  ;;  %7694 = vmatpush.msrb.mxu2 %v7523_v32 }
 0x7cc   :  { %7579 = vmatpush.msrb.mxu0 %v13236_v4  ;;  %7735 = vmatpush.msrb.mxu3 %v13238_v23  ;;  %v5401_v36 = vadd.f32 %v5400_v58, %v5360_v38  ;;  %v5555_v23 = vpop.f32.mrf.mxu0  ;;  %v7751_v38 = vld [vmem:[%s13491_s10 + $0x8] sm:$0xff]  ;;  %v7804_v58 = vand.u32 4294901760, %v7803_v11 }
 0x7cd   :  { %7633 = vmatpush.msrb.mxu1 %v13278_v40  ;;  %7698 = vmatpush.msrb.mxu2 %v7529_v51 }
 0x7ce   :  { %7582 = vmatpush.msrb.mxu0 %v13248_v6  ;;  %7737 = vmatpush.msrb.mxu3 %v13250_v30  ;;  %v5502_v63 = vadd.f32 %v5501_v15, %v5401_v36  ;;  %v7809_v36 = vsub.f32 %v7752_v33, %v7775_v25  ;;  %v7777_v15 = vand.u32 4294901760, %v7751_v38 }
 0x7cf   :  { %7635 = vmatpush.msrb.mxu1 %v13294_v55  ;;  %7702 = vmatpush.msrb.mxu2 %v7535_v24 }
 0x7d0   :  { %7585 = vmatpush.msrb.mxu0 %v13261_v17  ;;  %7739 = vmatpush.msrb.mxu3 %v13263_v35  ;;  %v5556_v30 = vadd.f32 %v5555_v23, %v5502_v63  ;;  %v5594_v4 = vpop.f32.mrf.mxu1  ;;  %v5663_v17 = vpop.f32.mrf.mxu2 }
 0x7d1   :  { %7639 = vmatmul.f32.vlgmr.msrb.gmra.mxu1 %v7442_v45  ;;  %7706 = vmatpush.msrb.mxu2 %v7541_v3  ;;  %v5700_v54 = vpop.f32.mrf.mxu3 }
 0x7d2   :  { %7588 = vmatpush.msrb.mxu0 %v13274_v34  ;;  %7741 = vmatpush.msrb.mxu3 %v13278_v40  ;;  %v5595_v6 = vadd.f32 %v5594_v4, %v5556_v30  ;;  %v7750_v30 = vld [vmem:[%s13491_s10] sm:$0xff] }
 0x7d3   :  { %7708 = vmatmul.f32.vlgmr.msrb.gmra.mxu2 %v13290_v29 }
 0x7d4   :  { %7591 = vmatpush.msrb.mxu0 %v13287_v2  ;;  %7743 = vmatpush.msrb.mxu3 %v13294_v55  ;;  %v5664_v35 = vadd.f32 %v5663_v17, %v5595_v6  ;;  %v5741_v34 = vpop.f32.mrf.mxu0  ;;  %v7805_v6 = vsub.f32 %v7803_v11, %v7804_v58  ;;  %v7810_v17 = vand.u32 4294901760, %v7809_v36 }
 0x7d5   :  { %7745 = vmatmul.f32.vlgmr.msrb.gmra.mxu3 %v13290_v29  ;;  %7845 = vmatpush.msra.mxu2 %v7803_v11 }
 0x7d6   :  { %7594 = vmatpush.msrb.mxu0 %v13305_v1  ;;  %v5701_v40 = vadd.f32 %v5700_v54, %v5664_v35  ;;  %7874 = vmatpush.msra.mxu3 %v7773_v46  ;;  %v7815_v35 = vsub.f32 %v7751_v38, %v7777_v15  ;;  %v7779_v54 = vand.u32 4294901760, %v7750_v30 }
 0x7d7   :  { %7848 = vmatpush.msra.mxu2 %v7809_v36 }
 0x7d8   :  { %7597 = vmatpush.msrb.mxu0 %v13320_v13  ;;  %v5742_v28 = vadd.f32 %v5741_v34, %v5701_v40  ;;  %v5842_v2 = vpop.f32.mrf.mxu1  ;;  %v5896_v55 = vpop.f32.mrf.mxu2  ;;  %7876 = vmatpush.msra.mxu3 %v7775_v25  ;;  %v7806_v40 = vand.u32 4294901760, %v7805_v6 }
 0x7d9   :  { %7600 = vmatmul.f32.vlgmr.msrb.gmra.mxu0 %v13315_v26  ;;  %v5935_v51 = vpop.f32.mrf.mxu3  ;;  %7851 = vmatpush.msra.mxu2 %v7815_v35 }
 0x7da   :  { %v5843_v29 = vadd.f32 %v5842_v2, %v5742_v28  ;;  %7774 = vmatpush.msra.mxu0 %v7773_v46  ;;  %7878 = vmatpush.msra.mxu3 %v7777_v15  ;;  %v7811_v28 = vsub.f32 %v7809_v36, %v7810_v17  ;;  %v7816_v2 = vand.u32 4294901760, %v7815_v35 }
 0x7db   :  { %7807 = vmatpush.msra.mxu1 %v7806_v40 }
 0x7dc   :  { %v5897_v32 = vadd.f32 %v5896_v55, %v5843_v29  ;;  %v6004_v1 = vpop.f32.mrf.mxu0  ;;  %7776 = vmatpush.msra.mxu0 %v7775_v25  ;;  %v7821_v29 = vsub.f32 %v7750_v30, %v7779_v54  ;;  %7880 = vmatpush.msra.mxu3 %v7779_v54  ;;  %v7812_v55 = vand.u32 4294901760, %v7811_v28 }
 0x7de   :  { %v5936_v24 = vadd.f32 %v5935_v51, %v5897_v32  ;;  %7778 = vmatpush.msra.mxu0 %v7777_v15  ;;  %v7817_v32 = vsub.f32 %v7815_v35, %v7816_v2  ;;  %7854 = vmatpush.msra.mxu2 %v7821_v29 }
 0x7df   :  { %7813 = vmatpush.msra.mxu1 %v7812_v55 }
 0x7e0   :  { %v6005_v45 = vadd.f32 %v6004_v1, %v5936_v24  ;;  %v6041_v13 = vpop.f32.mrf.mxu1  ;;  %v6082_v47 = vpop.f32.mrf.mxu2  ;;  %7780 = vmatpush.msra.mxu0 %v7779_v54  ;;  %v7822_v1 = vand.u32 4294901760, %v7821_v29 }
 0x7e1   :  { %v6183_v5 = vpop.f32.mrf.mxu3 }
 0x7e2   :  { %v6042_v3 = vadd.f32 %v6041_v13, %v6005_v45  ;;  %7903 = vmatpush.msrb.mxu0 %v7804_v58  ;;  %v7818_v45 = vand.u32 4294901760, %v7817_v32  ;;  %v7823_v13 = vsub.f32 %v7821_v29, %v7822_v1 }
 0x7e4   :  { %v6083_v26 = vadd.f32 %v6082_v47, %v6042_v3  ;;  %v6237_v57 = vpop.f32.mrf.mxu0  ;;  %7907 = vmatpush.msrb.mxu0 %v7810_v17  ;;  %7819 = vmatpush.msra.mxu1 %v7818_v45  ;;  %v7824_v47 = vand.u32 4294901760, %v7823_v13 }
 0x7e6   :  { %v6184_v27 = vadd.f32 %v6183_v5, %v6083_v26  ;;  %7911 = vmatpush.msrb.mxu0 %v7816_v2  ;;  %7825 = vmatpush.msra.mxu1 %v7824_v47 }
 0x7e8   :  { %v6238_v21 = vadd.f32 %v6237_v57, %v6184_v27  ;;  %v6276_v18 = vpop.f32.mrf.mxu1  ;;  %v6345_v49 = vpop.f32.mrf.mxu2  ;;  %7915 = vmatpush.msrb.mxu0 %v7822_v1  ;;  %7934 = vmatpush.msrb.mxu1 %v7773_v46 }
 0x7e9   :  { %v6382_v8 = vpop.f32.mrf.mxu3 }
 0x7ea   :  { %v6277_v50 = vadd.f32 %v6276_v18, %v6238_v21  ;;  %7936 = vmatpush.msrb.mxu1 %v7775_v25 }
 0x7ec   :  { %v6346_v31 = vadd.f32 %v6345_v49, %v6277_v50  ;;  %v6423_v43 = vpop.f32.mrf.mxu0  ;;  %7938 = vmatpush.msrb.mxu1 %v7777_v15 }
 0x7ee   :  { %v6383_v56 = vadd.f32 %v6382_v8, %v6346_v31  ;;  %7940 = vmatpush.msrb.mxu1 %v7779_v54 }
 0x7f0   :  { %v6424_v39 = vadd.f32 %v6423_v43, %v6383_v56  ;;  %v6524_v48 = vpop.f32.mrf.mxu1  ;;  %v6578_v19 = vpop.f32.mrf.mxu2 }
 0x7f1   :  { %v6617_v62 = vpop.f32.mrf.mxu3 }
 0x7f2   :  { %v6525_v7 = vadd.f32 %v6524_v48, %v6424_v39 }
 0x7f4   :  { %v6579_v20 = vadd.f32 %v6578_v19, %v6525_v7  ;;  %v6686_v61 = vpop.f32.mrf.mxu0 }
 0x7f6   :  { %v6618_v59 = vadd.f32 %v6617_v62, %v6579_v20 }
 0x7f8   :  { %v6687_v37 = vadd.f32 %v6686_v61, %v6618_v59  ;;  %v6723_v9 = vpop.f32.mrf.mxu1  ;;  %v6764_v16 = vpop.f32.mrf.mxu2 }
 0x7f9   :  { %v6865_v41 = vpop.f32.mrf.mxu3 }
 0x7fa   :  { %v6724_v52 = vadd.f32 %v6723_v9, %v6687_v37 }
 0x7fc   :  { %v6765_v42 = vadd.f32 %v6764_v16, %v6724_v52  ;;  %v6919_v60 = vpop.f32.mrf.mxu0 }
 0x7fe   :  { %v6866_v22 = vadd.f32 %v6865_v41, %v6765_v42 }
 0x800   :  { %v6920_v12 = vadd.f32 %v6919_v60, %v6866_v22  ;;  %v6958_v0 = vpop.f32.mrf.mxu1  ;;  %v7027_v10 = vpop.f32.mrf.mxu2  ;;  %v8001_v60 = vld [vmem:[%s13492_s11] ss:$0 sm:$0xff] }
 0x801   :  { %v7064_v23 = vpop.f32.mrf.mxu3 }
 0x802   :  { %v6959_v53 = vadd.f32 %v6958_v0, %v6920_v12 }
 0x804   :  { %v7028_v44 = vadd.f32 %v7027_v10, %v6959_v53 }
 0x806   :  { %v7065_v4 = vadd.f32 %v7064_v23, %v7028_v44 }
 0x80a   :  { %v7206_v51 = vpop.f32.mrf.mxu1 }
 0x812   :  { %v7260_v3 = vpop.f32.mrf.mxu2 }
 0x814   :  { %v7105_v63 = vpop.f32.mrf.mxu0 }
 0x815   :  { %v7106_v34 = vadd.f32 %v7105_v63, %v7065_v4  ;;  %v7299_v5 = vpop.f32.mrf.mxu3 }
 0x817   :  { %v7207_v24 = vadd.f32 %v7206_v51, %v7106_v34 }
 0x819   :  { %v7261_v26 = vadd.f32 %v7260_v3, %v7207_v24 }
 0x81b   :  { %v7300_v27 = vadd.f32 %v7299_v5, %v7261_v26 }
 0x82c   :  { %v7405_v18 = vpop.f32.mrf.mxu1 }
 0x834   :  { %v7446_v49 = vpop.f32.mrf.mxu2 }
 0x836   :  { %v7368_v57 = vpop.f32.mrf.mxu0 }
 0x837   :  { %v7369_v21 = vadd.f32 %v7368_v57, %v7300_v27  ;;  %v7547_v8 = vpop.f32.mrf.mxu3 }
 0x839   :  { %v7406_v50 = vadd.f32 %v7405_v18, %v7369_v21 }
 0x83b   :  { %v7447_v31 = vadd.f32 %v7446_v49, %v7406_v50 }
 0x83d   :  { %v7548_v43 = vadd.f32 %v7547_v8, %v7447_v31 }
 0x84e   :  { %v7640_v48 = vpop.f32.mrf.mxu1 }
 0x856   :  { %v7601_v56 = vpop.f32.mrf.mxu0  ;;  %v7709_v19 = vpop.f32.mrf.mxu2 }
 0x857   :  { %v7602_v39 = vadd.f32 %v7601_v56, %v7548_v43 }
 0x858   :  { %v7746_v62 = vpop.f32.mrf.mxu3 }
 0x859   :  { %v7641_v7 = vadd.f32 %v7640_v48, %v7602_v39 }
 0x85b   :  { %v7710_v20 = vadd.f32 %v7709_v19, %v7641_v7 }
 0x85d   :  { %v7747_v61 = vadd.f32 %v7746_v62, %v7710_v20 }
 0x85f   :  { %v7749_v59 = vmax.f32 %v7747_v61, 0.0 }
 0x861   :  { %v7759_v37 = vsel %vm253_vm6, %v7749_v59, 0  ;;  %vm7946_vm6 = vcmask 74752  }
 0x862   :  { %v7781_v9 = vand.u32 4294901760, %v7759_v37 }
 0x864   :  { %v7782_v52 = vsub.f32 %v7759_v37, %v7781_v9  ;;  %7827 = vmatmul.f32.vlgmr.msra.gmra.mxu1 %v7781_v9 }
 0x866   :  { %v7783_v16 = vand.u32 4294901760, %v7782_v52  ;;  %7857 = vmatmul.f32.vlgmr.msra.gmra.mxu2 %v7782_v52 }
 0x868   :  { %v7784_v42 = vsub.f32 %v7782_v52, %v7783_v16  ;;  %7884 = vmatmul.f32.vlgmr.msra.gmra.mxu3 %v7783_v16 }
 0x86a   :  { %v7785_v41 = vand.u32 4294901760, %v7784_v42 }
 0x86c   :  { %7786 = vmatmul.f32.vlgmr.msra.gmra.mxu0 %v7785_v41  ;;  %7942 = vmatmul.f32.vlgmr.msrb.gmra.mxu1 %v7781_v9 }
 0x874   :  { %7917 = vmatmul.f32.vlgmr.msrb.gmra.mxu0 %v7781_v9 }
 0x8e1   :  { %v7828_v22 = vpop.f32.mrf.mxu1 }
 0x8e9   :  { %v7787_v12 = vpop.f32.mrf.mxu0  ;;  %v7858_v14 = vpop.f32.mrf.mxu2 }
 0x8ea   :  { %v7788_v0 = vadd.f32 %v8001_v60, %v7787_v12  ;;  %v7943_v25 = vpop.f32.mrf.mxu1 }
 0x8eb   :  { %v7885_v10 = vpop.f32.mrf.mxu3 }
 0x8ec   :  { %v7829_v53 = vadd.f32 %v7828_v22, %v7788_v0 }
 0x8ee   :  { %v7859_v46 = vadd.f32 %v7858_v14, %v7829_v53 }
 0x8f0   :  { %v7886_v33 = vadd.f32 %v7885_v10, %v7859_v46 }
 0x8f1   :  { %v7918_v44 = vpop.f32.mrf.mxu0 }
 0x8f2   :  { %v7919_v11 = vadd.f32 %v7918_v44, %v7886_v33 }
 0x8f4   :  { %v7944_v38 = vadd.f32 %v7943_v25, %v7919_v11 }
 0x8f6   :  { %7947 = vst.msk [vmem:[#allocation7] sm:$0x3] %vm7946_vm6, %v7944_v38 }
 0x8f7   :  { %7958 = dma.vmem_to_hbm [thread:$0]  %s7954_s25, 32, %s7956_s8, [#allocation4]  }
 0x8f8   :  { %8081 = dma.done.wait [#allocation4], 32  }
 0x8f9   :  { %8082 = vsyncadd [#allocation4], 4294967264 }
 0x8fa   :  { %7963 = vsyncpa [#allocation3], 1 }
 0x8fb   :  { %7964 = vsyncpa [#allocation6], 1 }
 0x8fc   :  { %7965 = vsyncpa [#allocation4], 1 }

</bundles_post_ra>
